<compile_context>
chip_gen: v5e
topology: v5e:2x2
jax: 0.10.0
libtpu: 0.0.40
codegen_flags: <defaults>
</compile_context>

<pallas_src>
import numpy as np
import jax
import jax.numpy as jnp
from jax import lax
from jax.experimental import pallas as pl
from jax.experimental.pallas import tpu as pltpu


# ---------------------------------------------------------------------------
# Pallas kernel: entire forward pass for one batch element, fully in VMEM.
# ---------------------------------------------------------------------------
def _encoder_kernel(xp_ref,                      # (H+2, W+2, 3) reflect-padded input
                    w11_ref, b11_ref,            # (9, 3, 16), (1, 16)   [conv0 folded in]
                    w12_ref, b12_ref,            # (9, 16, 16), (1, 16)
                    w21_ref, b21_ref,            # (9, 16, 32), (1, 32)
                    o_ref,                       # (Ho*Wo, 32)
                    pad12_ref,                   # VMEM scratch (H+2, W+2, 16)
                    pad21_ref):                  # VMEM scratch (Ho+2, Wo+2, 16)
    Hp, Wp, _ = xp_ref.shape
    H, W = Hp - 2, Wp - 2
    Ho, Wo = H // 2, W // 2

    def conv3x3_relu(pad_ref, w_ref, b_ref, h, w):
        # pad_ref: (h+2, w+2, cin) ref; w_ref: (9, cin, cout); b_ref: (1, cout)
        cin = pad_ref.shape[-1]
        cout = w_ref.shape[-1]
        acc = jnp.zeros((h * w, cout), jnp.float32)
        for dy in range(3):
            for dx in range(3):
                tap = pad_ref[dy:dy + h, dx:dx + w, :]          # (h, w, cin)
                acc = acc + jnp.dot(tap.reshape(h * w, cin),
                                    w_ref[3 * dy + dx],
                                    preferred_element_type=jnp.float32)
        return jnp.maximum(acc + b_ref[...], 0.0)               # (h*w, cout)

    def fill_reflect(pad_ref, t):
        # ReflectionPad2d((1,1,1,1)) of t (h, w, c) into pad_ref (h+2, w+2, c),
        # written as interior + 4 edge strips (no concatenates).
        h, w, _ = t.shape
        pad_ref[1:h + 1, 1:w + 1, :] = t
        pad_ref[1:h + 1, 0:1, :] = t[:, 1:2, :]                 # left  = col 1
        pad_ref[1:h + 1, w + 1:w + 2, :] = t[:, w - 2:w - 1, :] # right = col w-2
        pad_ref[0:1, :, :] = pad_ref[2:3, :, :]                 # top   = row 1 (padded)
        pad_ref[h + 1:h + 2, :, :] = pad_ref[h - 1:h, :, :]     # bot   = row h-2 (padded)

    # conv11 (+ folded conv0) + relu : 3 -> 16
    y11 = conv3x3_relu(xp_ref, w11_ref, b11_ref, H, W)
    fill_reflect(pad12_ref, y11.reshape(H, W, y11.shape[-1]))

    # conv12 + relu : 16 -> 16
    y12 = conv3x3_relu(pad12_ref, w12_ref, b12_ref, H, W)
    c = y12.shape[-1]
    y12 = y12.reshape(H, W, c)

    # maxpool 2x2, stride 2
    yp = y12.reshape(H, W // 2, 2, c).max(axis=2)
    yp = yp.reshape(H // 2, 2, W // 2, c).max(axis=1)           # (Ho, Wo, c)
    fill_reflect(pad21_ref, yp)

    # conv21 + relu : 16 -> 32, stored flat (row-major pixels x channels)
    o_ref[...] = conv3x3_relu(pad21_ref, w21_ref, b21_ref, Ho, Wo)


# ---------------------------------------------------------------------------
# Wrapper: fold conv0 into conv11, build per-tap weight mats, call pallas_call.
# ---------------------------------------------------------------------------
def _tap_weights(w_oihw):
    # (Cout, Cin, 3, 3) -> (9, Cin, Cout), tap order k = 3*dy + dx
    o, i, kh, kw = w_oihw.shape
    return jnp.transpose(w_oihw, (2, 3, 1, 0)).reshape(kh * kw, i, o)


def small_encoder_forward(x_nchw, params):
    B, C, H, W = x_nchw.shape
    assert C == 3 and H % 2 == 0 and W % 2 == 0 and H >= 4 and W >= 4
    Ho, Wo = H // 2, W // 2
    f32 = jnp.float32

    # --- fold conv0 (1x1, 3->3, linear) into conv11 -------------------------
    w0 = params["w0"][:, :, 0, 0].astype(f32)                   # (3, 3): [c_out0, c_in]
    b0 = params["b0"].astype(f32)
    w11 = params["w11"].astype(f32)                              # (16, 3, 3, 3) OIHW
    w11_eff = jnp.einsum("ochw,ci->oihw", w11, w0)               # (16, 3, 3, 3)
    b11_eff = params["b11"].astype(f32) + jnp.einsum("ochw,c->o", w11, b0)

    w11m, b11r = _tap_weights(w11_eff), b11_eff.reshape(1, -1)
    w12m, b12r = _tap_weights(params["w12"].astype(f32)), params["b12"].astype(f32).reshape(1, -1)
    w21m, b21r = _tap_weights(params["w21"].astype(f32)), params["b21"].astype(f32).reshape(1, -1)

    # --- NCHW -> NHWC, reflect-pad once in XLA (conv0 is pointwise, so
    #     padding the raw input == padding conv0's output under the fold) ----
    x_nhwc = jnp.transpose(x_nchw.astype(f32), (0, 2, 3, 1))
    xp = jnp.pad(x_nhwc, ((0, 0), (1, 1), (1, 1), (0, 0)), mode="reflect")

    resident = lambda a: pl.BlockSpec(a.shape, lambda b: (0,) * a.ndim)

    out = pl.pallas_call(
        _encoder_kernel,
        out_shape=jax.ShapeDtypeStruct((B, Ho * Wo, 32), f32),
        grid_spec=pltpu.PrefetchScalarGridSpec(
            num_scalar_prefetch=0,
            grid=(B,),
            in_specs=[
                pl.BlockSpec((None, H + 2, W + 2, 3), lambda b: (b, 0, 0, 0)),
                resident(w11m), resident(b11r),
                resident(w12m), resident(b12r),
                resident(w21m), resident(b21r),
            ],
            out_specs=pl.BlockSpec((None, Ho * Wo, 32), lambda b: (b, 0, 0)),
            scratch_shapes=[
                pltpu.VMEM((H + 2, W + 2, 16), f32),   # pad buffer for conv12 input
                pltpu.VMEM((Ho + 2, Wo + 2, 16), f32), # pad buffer for conv21 input
            ],
        ),
        compiler_params=pltpu.CompilerParams(
            dimension_semantics=("parallel",)),
    )(xp, w11m, b11r, w12m, b12r, w21m, b21r)

    # (B, Ho*Wo, 32) -> (B, Ho, Wo, 32) -> NCHW  (same HBM bytes; free reshape)
    return jnp.transpose(out.reshape(B, Ho, Wo, 32), (0, 3, 1, 2))


# ---------------------------------------------------------------------------
# Pure-JAX reference (NCHW, mirrors the PyTorch module exactly).
# ---------------------------------------------------------------------------
def reference_forward(x, params):
    def conv(t, w, b):
        o = lax.conv_general_dilated(
            t, w, window_strides=(1, 1), padding="VALID",
            dimension_numbers=("NCHW", "OIHW", "NCHW"))
        return o + b.reshape(1, -1, 1, 1)

    def rpad(t):
        return jnp.pad(t, ((0, 0), (0, 0), (1, 1), (1, 1)), mode="reflect")

    y = conv(x, params["w0"], params["b0"])
    y = jax.nn.relu(conv(rpad(y), params["w11"], params["b11"]))
    y = jax.nn.relu(conv(rpad(y), params["w12"], params["b12"]))
    y = lax.reduce_window(y, -jnp.inf, lax.max,
                          (1, 1, 2, 2), (1, 1, 2, 2), "VALID")
    y = jax.nn.relu(conv(rpad(y), params["w21"], params["b21"]))
    return y


def init_params(key):
    ks = jax.random.split(key, 8)
    mk = lambda k, shape, scale: (scale * jax.random.normal(k, shape)).astype(jnp.float32)
    # Shapes follow the nn.Conv2d definitions in __init__.
    return {
        "w0":  mk(ks[0], (3, 3, 1, 1), 0.3),   "b0":  mk(ks[1], (3,), 0.1),
        "w11": mk(ks[2], (16, 3, 3, 3), 0.2),  "b11": mk(ks[3], (16,), 0.1),
        "w12": mk(ks[4], (16, 16, 3, 3), 0.1), "b12": mk(ks[5], (16,), 0.1),
        "w21": mk(ks[6], (32, 16, 3, 3), 0.1), "b21": mk(ks[7], (32,), 0.1),
    }
    # NOTE: conv11_aux / conv21_aux are unused in forward(); not instantiated.


if __name__ == "__main__":
    key = jax.random.PRNGKey(0)
    kx, kp = jax.random.split(key)

    x = jax.random.normal(kx, (2, 3, 16, 16), dtype=jnp.float32)  # NCHW input
    params = init_params(kp)

    out = jax.block_until_ready(small_encoder_forward(x, params))
    ref = jax.block_until_ready(reference_forward(x, params))

    assert out.shape == (2, 32, 8, 8), out.shape
    np.testing.assert_allclose(np.asarray(out), np.asarray(ref),
                               rtol=1e-3, atol=1e-4)
    print("KERNEL_OK")
</pallas_src>

<mosaic_0001>
module attributes {stable_mosaic.version = 11 : i64} {
  func.func @_encoder_kernel(%arg0: i32, %arg1: memref<1x18x18x3xf32, #tpu.memory_space<vmem>>, %arg2: memref<9x3x16xf32, #tpu.memory_space<vmem>>, %arg3: memref<1x16xf32, #tpu.memory_space<vmem>>, %arg4: memref<9x16x16xf32, #tpu.memory_space<vmem>>, %arg5: memref<1x16xf32, #tpu.memory_space<vmem>>, %arg6: memref<9x16x32xf32, #tpu.memory_space<vmem>>, %arg7: memref<1x32xf32, #tpu.memory_space<vmem>>, %arg8: memref<1x64x32xf32, #tpu.memory_space<vmem>>, %arg9: memref<18x18x16xf32, #tpu.memory_space<vmem>>, %arg10: memref<10x10x16xf32, #tpu.memory_space<vmem>>) attributes {dimension_semantics = [#tpu.dimension_semantics<parallel>], iteration_bounds = array<i64: 2>, scalar_prefetch = 0 : i64, scratch_operands = 2 : i64, tpu.core_type = #tpu.core_type<tc>, window_params = [{transform_indices = @transform_0, window_bounds = array<i64: 1, 18, 18, 3>}, {pipeline_mode = #tpu.pipeline_mode<synchronous>, transform_indices = @transform_1, window_bounds = array<i64: 9, 3, 16>}, {pipeline_mode = #tpu.pipeline_mode<synchronous>, transform_indices = @transform_2, window_bounds = array<i64: 1, 16>}, {pipeline_mode = #tpu.pipeline_mode<synchronous>, transform_indices = @transform_3, window_bounds = array<i64: 9, 16, 16>}, {pipeline_mode = #tpu.pipeline_mode<synchronous>, transform_indices = @transform_4, window_bounds = array<i64: 1, 16>}, {pipeline_mode = #tpu.pipeline_mode<synchronous>, transform_indices = @transform_5, window_bounds = array<i64: 9, 16, 32>}, {pipeline_mode = #tpu.pipeline_mode<synchronous>, transform_indices = @transform_6, window_bounds = array<i64: 1, 32>}, {transform_indices = @transform_7, window_bounds = array<i64: 1, 64, 32>}]} {
    %cst = arith.constant 0.000000e+00 : f32
    %0 = vector.broadcast %cst : f32 to vector<256x16xf32>
    %c0 = arith.constant 0 : index
    %c0_0 = arith.constant 0 : index
    %c0_1 = arith.constant 0 : index
    %c0_2 = arith.constant 0 : index
    %1 = vector.load %arg1[%c0, %c0_0, %c0_1, %c0_2] : memref<1x18x18x3xf32, #tpu.memory_space<vmem>>, vector<1x16x16x3xf32>
    %2 = vector.shape_cast %1 : vector<1x16x16x3xf32> to vector<16x16x3xf32>
    %3 = vector.shape_cast %2 : vector<16x16x3xf32> to vector<256x3xf32>
    %c0_3 = arith.constant 0 : index
    %c0_4 = arith.constant 0 : index
    %c0_5 = arith.constant 0 : index
    %4 = vector.load %arg2[%c0_3, %c0_4, %c0_5] : memref<9x3x16xf32, #tpu.memory_space<vmem>>, vector<1x3x16xf32>
    %5 = vector.shape_cast %4 : vector<1x3x16xf32> to vector<3x16xf32>
    %cst_6 = arith.constant dense<0.000000e+00> : vector<256x16xf32>
    %6 = tpu.matmul %3, %5, %cst_6 {dimension_numbers = #tpu.dot_dimension_numbers<[1], [0], [0], [1], [0, 0, 1, 1], [], []>} : vector<256x3xf32>, vector<3x16xf32>, vector<256x16xf32> -> vector<256x16xf32>
    %7 = arith.addf %0, %6 : vector<256x16xf32>
    %c0_7 = arith.constant 0 : index
    %c0_8 = arith.constant 0 : index
    %c1 = arith.constant 1 : index
    %c0_9 = arith.constant 0 : index
    %8 = vector.load %arg1[%c0_7, %c0_8, %c1, %c0_9] : memref<1x18x18x3xf32, #tpu.memory_space<vmem>>, vector<1x16x16x3xf32>
    %9 = vector.shape_cast %8 : vector<1x16x16x3xf32> to vector<16x16x3xf32>
    %10 = vector.shape_cast %9 : vector<16x16x3xf32> to vector<256x3xf32>
    %c1_10 = arith.constant 1 : index
    %c0_11 = arith.constant 0 : index
    %c0_12 = arith.constant 0 : index
    %11 = vector.load %arg2[%c1_10, %c0_11, %c0_12] : memref<9x3x16xf32, #tpu.memory_space<vmem>>, vector<1x3x16xf32>
    %12 = vector.shape_cast %11 : vector<1x3x16xf32> to vector<3x16xf32>
    %cst_13 = arith.constant dense<0.000000e+00> : vector<256x16xf32>
    %13 = tpu.matmul %10, %12, %cst_13 {dimension_numbers = #tpu.dot_dimension_numbers<[1], [0], [0], [1], [0, 0, 1, 1], [], []>} : vector<256x3xf32>, vector<3x16xf32>, vector<256x16xf32> -> vector<256x16xf32>
    %14 = arith.addf %7, %13 : vector<256x16xf32>
    %c0_14 = arith.constant 0 : index
    %c0_15 = arith.constant 0 : index
    %c2 = arith.constant 2 : index
    %c0_16 = arith.constant 0 : index
    %15 = vector.load %arg1[%c0_14, %c0_15, %c2, %c0_16] : memref<1x18x18x3xf32, #tpu.memory_space<vmem>>, vector<1x16x16x3xf32>
    %16 = vector.shape_cast %15 : vector<1x16x16x3xf32> to vector<16x16x3xf32>
    %17 = vector.shape_cast %16 : vector<16x16x3xf32> to vector<256x3xf32>
    %c2_17 = arith.constant 2 : index
    %c0_18 = arith.constant 0 : index
    %c0_19 = arith.constant 0 : index
    %18 = vector.load %arg2[%c2_17, %c0_18, %c0_19] : memref<9x3x16xf32, #tpu.memory_space<vmem>>, vector<1x3x16xf32>
    %19 = vector.shape_cast %18 : vector<1x3x16xf32> to vector<3x16xf32>
    %cst_20 = arith.constant dense<0.000000e+00> : vector<256x16xf32>
    %20 = tpu.matmul %17, %19, %cst_20 {dimension_numbers = #tpu.dot_dimension_numbers<[1], [0], [0], [1], [0, 0, 1, 1], [], []>} : vector<256x3xf32>, vector<3x16xf32>, vector<256x16xf32> -> vector<256x16xf32>
    %21 = arith.addf %14, %20 : vector<256x16xf32>
    %c0_21 = arith.constant 0 : index
    %c1_22 = arith.constant 1 : index
    %c0_23 = arith.constant 0 : index
    %c0_24 = arith.constant 0 : index
    %22 = vector.load %arg1[%c0_21, %c1_22, %c0_23, %c0_24] : memref<1x18x18x3xf32, #tpu.memory_space<vmem>>, vector<1x16x16x3xf32>
    %23 = vector.shape_cast %22 : vector<1x16x16x3xf32> to vector<16x16x3xf32>
    %24 = vector.shape_cast %23 : vector<16x16x3xf32> to vector<256x3xf32>
    %c3 = arith.constant 3 : index
    %c0_25 = arith.constant 0 : index
    %c0_26 = arith.constant 0 : index
    %25 = vector.load %arg2[%c3, %c0_25, %c0_26] : memref<9x3x16xf32, #tpu.memory_space<vmem>>, vector<1x3x16xf32>
    %26 = vector.shape_cast %25 : vector<1x3x16xf32> to vector<3x16xf32>
    %cst_27 = arith.constant dense<0.000000e+00> : vector<256x16xf32>
    %27 = tpu.matmul %24, %26, %cst_27 {dimension_numbers = #tpu.dot_dimension_numbers<[1], [0], [0], [1], [0, 0, 1, 1], [], []>} : vector<256x3xf32>, vector<3x16xf32>, vector<256x16xf32> -> vector<256x16xf32>
    %28 = arith.addf %21, %27 : vector<256x16xf32>
    %c0_28 = arith.constant 0 : index
    %c1_29 = arith.constant 1 : index
    %c1_30 = arith.constant 1 : index
    %c0_31 = arith.constant 0 : index
    %29 = vector.load %arg1[%c0_28, %c1_29, %c1_30, %c0_31] : memref<1x18x18x3xf32, #tpu.memory_space<vmem>>, vector<1x16x16x3xf32>
    %30 = vector.shape_cast %29 : vector<1x16x16x3xf32> to vector<16x16x3xf32>
    %31 = vector.shape_cast %30 : vector<16x16x3xf32> to vector<256x3xf32>
    %c4 = arith.constant 4 : index
    %c0_32 = arith.constant 0 : index
    %c0_33 = arith.constant 0 : index
    %32 = vector.load %arg2[%c4, %c0_32, %c0_33] : memref<9x3x16xf32, #tpu.memory_space<vmem>>, vector<1x3x16xf32>
    %33 = vector.shape_cast %32 : vector<1x3x16xf32> to vector<3x16xf32>
    %cst_34 = arith.constant dense<0.000000e+00> : vector<256x16xf32>
    %34 = tpu.matmul %31, %33, %cst_34 {dimension_numbers = #tpu.dot_dimension_numbers<[1], [0], [0], [1], [0, 0, 1, 1], [], []>} : vector<256x3xf32>, vector<3x16xf32>, vector<256x16xf32> -> vector<256x16xf32>
    %35 = arith.addf %28, %34 : vector<256x16xf32>
    %c0_35 = arith.constant 0 : index
    %c1_36 = arith.constant 1 : index
    %c2_37 = arith.constant 2 : index
    %c0_38 = arith.constant 0 : index
    %36 = vector.load %arg1[%c0_35, %c1_36, %c2_37, %c0_38] : memref<1x18x18x3xf32, #tpu.memory_space<vmem>>, vector<1x16x16x3xf32>
    %37 = vector.shape_cast %36 : vector<1x16x16x3xf32> to vector<16x16x3xf32>
    %38 = vector.shape_cast %37 : vector<16x16x3xf32> to vector<256x3xf32>
    %c5 = arith.constant 5 : index
    %c0_39 = arith.constant 0 : index
    %c0_40 = arith.constant 0 : index
    %39 = vector.load %arg2[%c5, %c0_39, %c0_40] : memref<9x3x16xf32, #tpu.memory_space<vmem>>, vector<1x3x16xf32>
    %40 = vector.shape_cast %39 : vector<1x3x16xf32> to vector<3x16xf32>
    %cst_41 = arith.constant dense<0.000000e+00> : vector<256x16xf32>
    %41 = tpu.matmul %38, %40, %cst_41 {dimension_numbers = #tpu.dot_dimension_numbers<[1], [0], [0], [1], [0, 0, 1, 1], [], []>} : vector<256x3xf32>, vector<3x16xf32>, vector<256x16xf32> -> vector<256x16xf32>
    %42 = arith.addf %35, %41 : vector<256x16xf32>
    %c0_42 = arith.constant 0 : index
    %c2_43 = arith.constant 2 : index
    %c0_44 = arith.constant 0 : index
    %c0_45 = arith.constant 0 : index
    %43 = vector.load %arg1[%c0_42, %c2_43, %c0_44, %c0_45] : memref<1x18x18x3xf32, #tpu.memory_space<vmem>>, vector<1x16x16x3xf32>
    %44 = vector.shape_cast %43 : vector<1x16x16x3xf32> to vector<16x16x3xf32>
    %45 = vector.shape_cast %44 : vector<16x16x3xf32> to vector<256x3xf32>
    %c6 = arith.constant 6 : index
    %c0_46 = arith.constant 0 : index
    %c0_47 = arith.constant 0 : index
    %46 = vector.load %arg2[%c6, %c0_46, %c0_47] : memref<9x3x16xf32, #tpu.memory_space<vmem>>, vector<1x3x16xf32>
    %47 = vector.shape_cast %46 : vector<1x3x16xf32> to vector<3x16xf32>
    %cst_48 = arith.constant dense<0.000000e+00> : vector<256x16xf32>
    %48 = tpu.matmul %45, %47, %cst_48 {dimension_numbers = #tpu.dot_dimension_numbers<[1], [0], [0], [1], [0, 0, 1, 1], [], []>} : vector<256x3xf32>, vector<3x16xf32>, vector<256x16xf32> -> vector<256x16xf32>
    %49 = arith.addf %42, %48 : vector<256x16xf32>
    %c0_49 = arith.constant 0 : index
    %c2_50 = arith.constant 2 : index
    %c1_51 = arith.constant 1 : index
    %c0_52 = arith.constant 0 : index
    %50 = vector.load %arg1[%c0_49, %c2_50, %c1_51, %c0_52] : memref<1x18x18x3xf32, #tpu.memory_space<vmem>>, vector<1x16x16x3xf32>
    %51 = vector.shape_cast %50 : vector<1x16x16x3xf32> to vector<16x16x3xf32>
    %52 = vector.shape_cast %51 : vector<16x16x3xf32> to vector<256x3xf32>
    %c7 = arith.constant 7 : index
    %c0_53 = arith.constant 0 : index
    %c0_54 = arith.constant 0 : index
    %53 = vector.load %arg2[%c7, %c0_53, %c0_54] : memref<9x3x16xf32, #tpu.memory_space<vmem>>, vector<1x3x16xf32>
    %54 = vector.shape_cast %53 : vector<1x3x16xf32> to vector<3x16xf32>
    %cst_55 = arith.constant dense<0.000000e+00> : vector<256x16xf32>
    %55 = tpu.matmul %52, %54, %cst_55 {dimension_numbers = #tpu.dot_dimension_numbers<[1], [0], [0], [1], [0, 0, 1, 1], [], []>} : vector<256x3xf32>, vector<3x16xf32>, vector<256x16xf32> -> vector<256x16xf32>
    %56 = arith.addf %49, %55 : vector<256x16xf32>
    %c0_56 = arith.constant 0 : index
    %c2_57 = arith.constant 2 : index
    %c2_58 = arith.constant 2 : index
    %c0_59 = arith.constant 0 : index
    %57 = vector.load %arg1[%c0_56, %c2_57, %c2_58, %c0_59] : memref<1x18x18x3xf32, #tpu.memory_space<vmem>>, vector<1x16x16x3xf32>
    %58 = vector.shape_cast %57 : vector<1x16x16x3xf32> to vector<16x16x3xf32>
    %59 = vector.shape_cast %58 : vector<16x16x3xf32> to vector<256x3xf32>
    %c8 = arith.constant 8 : index
    %c0_60 = arith.constant 0 : index
    %c0_61 = arith.constant 0 : index
    %60 = vector.load %arg2[%c8, %c0_60, %c0_61] : memref<9x3x16xf32, #tpu.memory_space<vmem>>, vector<1x3x16xf32>
    %61 = vector.shape_cast %60 : vector<1x3x16xf32> to vector<3x16xf32>
    %cst_62 = arith.constant dense<0.000000e+00> : vector<256x16xf32>
    %62 = tpu.matmul %59, %61, %cst_62 {dimension_numbers = #tpu.dot_dimension_numbers<[1], [0], [0], [1], [0, 0, 1, 1], [], []>} : vector<256x3xf32>, vector<3x16xf32>, vector<256x16xf32> -> vector<256x16xf32>
    %63 = arith.addf %56, %62 : vector<256x16xf32>
    %c0_63 = arith.constant 0 : index
    %c0_64 = arith.constant 0 : index
    %64 = vector.load %arg3[%c0_63, %c0_64] : memref<1x16xf32, #tpu.memory_space<vmem>>, vector<1x16xf32>
    %65 = vector.broadcast %64 : vector<1x16xf32> to vector<256x16xf32>
    %66 = arith.addf %63, %65 : vector<256x16xf32>
    %cst_65 = arith.constant 0.000000e+00 : f32
    %67 = vector.broadcast %cst_65 : f32 to vector<256x16xf32>
    %68 = arith.maximumf %66, %67 : vector<256x16xf32>
    %69 = vector.shape_cast %68 : vector<256x16xf32> to vector<16x16x16xf32>
    %c1_66 = arith.constant 1 : index
    %c1_67 = arith.constant 1 : index
    %c0_68 = arith.constant 0 : index
    %70 = vector.load %arg9[%c1_66, %c1_67, %c0_68] : memref<18x18x16xf32, #tpu.memory_space<vmem>>, vector<16x16x16xf32>
    tpu.vector_store %arg9[%c1_66, %c1_67, %c0_68], %69 {strides = array<i32>} : memref<18x18x16xf32, #tpu.memory_space<vmem>>, vector<16x16x16xf32>,
    %71 = vector.extract_strided_slice %69 {offsets = [0, 1, 0], sizes = [16, 1, 16], strides = [1, 1, 1]} : vector<16x16x16xf32> to vector<16x1x16xf32>
    %c1_69 = arith.constant 1 : index
    %c0_70 = arith.constant 0 : index
    %c0_71 = arith.constant 0 : index
    %72 = vector.load %arg9[%c1_69, %c0_70, %c0_71] : memref<18x18x16xf32, #tpu.memory_space<vmem>>, vector<16x1x16xf32>
    tpu.vector_store %arg9[%c1_69, %c0_70, %c0_71], %71 {strides = array<i32>} : memref<18x18x16xf32, #tpu.memory_space<vmem>>, vector<16x1x16xf32>,
    %73 = vector.extract_strided_slice %69 {offsets = [0, 14, 0], sizes = [16, 1, 16], strides = [1, 1, 1]} : vector<16x16x16xf32> to vector<16x1x16xf32>
    %c1_72 = arith.constant 1 : index
    %c17 = arith.constant 17 : index
    %c0_73 = arith.constant 0 : index
    %74 = vector.load %arg9[%c1_72, %c17, %c0_73] : memref<18x18x16xf32, #tpu.memory_space<vmem>>, vector<16x1x16xf32>
    tpu.vector_store %arg9[%c1_72, %c17, %c0_73], %73 {strides = array<i32>} : memref<18x18x16xf32, #tpu.memory_space<vmem>>, vector<16x1x16xf32>,
    %c2_74 = arith.constant 2 : index
    %c0_75 = arith.constant 0 : index
    %c0_76 = arith.constant 0 : index
    %75 = vector.load %arg9[%c2_74, %c0_75, %c0_76] : memref<18x18x16xf32, #tpu.memory_space<vmem>>, vector<1x18x16xf32>
    %c0_77 = arith.constant 0 : index
    %c0_78 = arith.constant 0 : index
    %c0_79 = arith.constant 0 : index
    %76 = vector.load %arg9[%c0_77, %c0_78, %c0_79] : memref<18x18x16xf32, #tpu.memory_space<vmem>>, vector<1x18x16xf32>
    tpu.vector_store %arg9[%c0_77, %c0_78, %c0_79], %75 {strides = array<i32>} : memref<18x18x16xf32, #tpu.memory_space<vmem>>, vector<1x18x16xf32>,
    %c15 = arith.constant 15 : index
    %c0_80 = arith.constant 0 : index
    %c0_81 = arith.constant 0 : index
    %77 = vector.load %arg9[%c15, %c0_80, %c0_81] : memref<18x18x16xf32, #tpu.memory_space<vmem>>, vector<1x18x16xf32>
    %c17_82 = arith.constant 17 : index
    %c0_83 = arith.constant 0 : index
    %c0_84 = arith.constant 0 : index
    %78 = vector.load %arg9[%c17_82, %c0_83, %c0_84] : memref<18x18x16xf32, #tpu.memory_space<vmem>>, vector<1x18x16xf32>
    tpu.vector_store %arg9[%c17_82, %c0_83, %c0_84], %77 {strides = array<i32>} : memref<18x18x16xf32, #tpu.memory_space<vmem>>, vector<1x18x16xf32>,
    %cst_85 = arith.constant 0.000000e+00 : f32
    %79 = vector.broadcast %cst_85 : f32 to vector<256x16xf32>
    %c0_86 = arith.constant 0 : index
    %c0_87 = arith.constant 0 : index
    %c0_88 = arith.constant 0 : index
    %80 = vector.load %arg9[%c0_86, %c0_87, %c0_88] : memref<18x18x16xf32, #tpu.memory_space<vmem>>, vector<16x16x16xf32>
    %81 = vector.shape_cast %80 : vector<16x16x16xf32> to vector<256x16xf32>
    %c0_89 = arith.constant 0 : index
    %c0_90 = arith.constant 0 : index
    %c0_91 = arith.constant 0 : index
    %82 = vector.load %arg4[%c0_89, %c0_90, %c0_91] : memref<9x16x16xf32, #tpu.memory_space<vmem>>, vector<1x16x16xf32>
    %83 = vector.shape_cast %82 : vector<1x16x16xf32> to vector<16x16xf32>
    %cst_92 = arith.constant dense<0.000000e+00> : vector<256x16xf32>
    %84 = tpu.matmul %81, %83, %cst_92 {dimension_numbers = #tpu.dot_dimension_numbers<[1], [0], [0], [1], [0, 0, 1, 1], [], []>} : vector<256x16xf32>, vector<16x16xf32>, vector<256x16xf32> -> vector<256x16xf32>
    %85 = arith.addf %79, %84 : vector<256x16xf32>
    %c0_93 = arith.constant 0 : index
    %c1_94 = arith.constant 1 : index
    %c0_95 = arith.constant 0 : index
    %86 = vector.load %arg9[%c0_93, %c1_94, %c0_95] : memref<18x18x16xf32, #tpu.memory_space<vmem>>, vector<16x16x16xf32>
    %87 = vector.shape_cast %86 : vector<16x16x16xf32> to vector<256x16xf32>
    %c1_96 = arith.constant 1 : index
    %c0_97 = arith.constant 0 : index
    %c0_98 = arith.constant 0 : index
    %88 = vector.load %arg4[%c1_96, %c0_97, %c0_98] : memref<9x16x16xf32, #tpu.memory_space<vmem>>, vector<1x16x16xf32>
    %89 = vector.shape_cast %88 : vector<1x16x16xf32> to vector<16x16xf32>
    %cst_99 = arith.constant dense<0.000000e+00> : vector<256x16xf32>
    %90 = tpu.matmul %87, %89, %cst_99 {dimension_numbers = #tpu.dot_dimension_numbers<[1], [0], [0], [1], [0, 0, 1, 1], [], []>} : vector<256x16xf32>, vector<16x16xf32>, vector<256x16xf32> -> vector<256x16xf32>
    %91 = arith.addf %85, %90 : vector<256x16xf32>
    %c0_100 = arith.constant 0 : index
    %c2_101 = arith.constant 2 : index
    %c0_102 = arith.constant 0 : index
    %92 = vector.load %arg9[%c0_100, %c2_101, %c0_102] : memref<18x18x16xf32, #tpu.memory_space<vmem>>, vector<16x16x16xf32>
    %93 = vector.shape_cast %92 : vector<16x16x16xf32> to vector<256x16xf32>
    %c2_103 = arith.constant 2 : index
    %c0_104 = arith.constant 0 : index
    %c0_105 = arith.constant 0 : index
    %94 = vector.load %arg4[%c2_103, %c0_104, %c0_105] : memref<9x16x16xf32, #tpu.memory_space<vmem>>, vector<1x16x16xf32>
    %95 = vector.shape_cast %94 : vector<1x16x16xf32> to vector<16x16xf32>
    %cst_106 = arith.constant dense<0.000000e+00> : vector<256x16xf32>
    %96 = tpu.matmul %93, %95, %cst_106 {dimension_numbers = #tpu.dot_dimension_numbers<[1], [0], [0], [1], [0, 0, 1, 1], [], []>} : vector<256x16xf32>, vector<16x16xf32>, vector<256x16xf32> -> vector<256x16xf32>
    %97 = arith.addf %91, %96 : vector<256x16xf32>
    %c1_107 = arith.constant 1 : index
    %c0_108 = arith.constant 0 : index
    %c0_109 = arith.constant 0 : index
    %98 = vector.load %arg9[%c1_107, %c0_108, %c0_109] : memref<18x18x16xf32, #tpu.memory_space<vmem>>, vector<16x16x16xf32>
    %99 = vector.shape_cast %98 : vector<16x16x16xf32> to vector<256x16xf32>
    %c3_110 = arith.constant 3 : index
    %c0_111 = arith.constant 0 : index
    %c0_112 = arith.constant 0 : index
    %100 = vector.load %arg4[%c3_110, %c0_111, %c0_112] : memref<9x16x16xf32, #tpu.memory_space<vmem>>, vector<1x16x16xf32>
    %101 = vector.shape_cast %100 : vector<1x16x16xf32> to vector<16x16xf32>
    %cst_113 = arith.constant dense<0.000000e+00> : vector<256x16xf32>
    %102 = tpu.matmul %99, %101, %cst_113 {dimension_numbers = #tpu.dot_dimension_numbers<[1], [0], [0], [1], [0, 0, 1, 1], [], []>} : vector<256x16xf32>, vector<16x16xf32>, vector<256x16xf32> -> vector<256x16xf32>
    %103 = arith.addf %97, %102 : vector<256x16xf32>
    %c1_114 = arith.constant 1 : index
    %c1_115 = arith.constant 1 : index
    %c0_116 = arith.constant 0 : index
    %104 = vector.load %arg9[%c1_114, %c1_115, %c0_116] : memref<18x18x16xf32, #tpu.memory_space<vmem>>, vector<16x16x16xf32>
    %105 = vector.shape_cast %104 : vector<16x16x16xf32> to vector<256x16xf32>
    %c4_117 = arith.constant 4 : index
    %c0_118 = arith.constant 0 : index
    %c0_119 = arith.constant 0 : index
    %106 = vector.load %arg4[%c4_117, %c0_118, %c0_119] : memref<9x16x16xf32, #tpu.memory_space<vmem>>, vector<1x16x16xf32>
    %107 = vector.shape_cast %106 : vector<1x16x16xf32> to vector<16x16xf32>
    %cst_120 = arith.constant dense<0.000000e+00> : vector<256x16xf32>
    %108 = tpu.matmul %105, %107, %cst_120 {dimension_numbers = #tpu.dot_dimension_numbers<[1], [0], [0], [1], [0, 0, 1, 1], [], []>} : vector<256x16xf32>, vector<16x16xf32>, vector<256x16xf32> -> vector<256x16xf32>
    %109 = arith.addf %103, %108 : vector<256x16xf32>
    %c1_121 = arith.constant 1 : index
    %c2_122 = arith.constant 2 : index
    %c0_123 = arith.constant 0 : index
    %110 = vector.load %arg9[%c1_121, %c2_122, %c0_123] : memref<18x18x16xf32, #tpu.memory_space<vmem>>, vector<16x16x16xf32>
    %111 = vector.shape_cast %110 : vector<16x16x16xf32> to vector<256x16xf32>
    %c5_124 = arith.constant 5 : index
    %c0_125 = arith.constant 0 : index
    %c0_126 = arith.constant 0 : index
    %112 = vector.load %arg4[%c5_124, %c0_125, %c0_126] : memref<9x16x16xf32, #tpu.memory_space<vmem>>, vector<1x16x16xf32>
    %113 = vector.shape_cast %112 : vector<1x16x16xf32> to vector<16x16xf32>
    %cst_127 = arith.constant dense<0.000000e+00> : vector<256x16xf32>
    %114 = tpu.matmul %111, %113, %cst_127 {dimension_numbers = #tpu.dot_dimension_numbers<[1], [0], [0], [1], [0, 0, 1, 1], [], []>} : vector<256x16xf32>, vector<16x16xf32>, vector<256x16xf32> -> vector<256x16xf32>
    %115 = arith.addf %109, %114 : vector<256x16xf32>
    %c2_128 = arith.constant 2 : index
    %c0_129 = arith.constant 0 : index
    %c0_130 = arith.constant 0 : index
    %116 = vector.load %arg9[%c2_128, %c0_129, %c0_130] : memref<18x18x16xf32, #tpu.memory_space<vmem>>, vector<16x16x16xf32>
    %117 = vector.shape_cast %116 : vector<16x16x16xf32> to vector<256x16xf32>
    %c6_131 = arith.constant 6 : index
    %c0_132 = arith.constant 0 : index
    %c0_133 = arith.constant 0 : index
    %118 = vector.load %arg4[%c6_131, %c0_132, %c0_133] : memref<9x16x16xf32, #tpu.memory_space<vmem>>, vector<1x16x16xf32>
    %119 = vector.shape_cast %118 : vector<1x16x16xf32> to vector<16x16xf32>
    %cst_134 = arith.constant dense<0.000000e+00> : vector<256x16xf32>
    %120 = tpu.matmul %117, %119, %cst_134 {dimension_numbers = #tpu.dot_dimension_numbers<[1], [0], [0], [1], [0, 0, 1, 1], [], []>} : vector<256x16xf32>, vector<16x16xf32>, vector<256x16xf32> -> vector<256x16xf32>
    %121 = arith.addf %115, %120 : vector<256x16xf32>
    %c2_135 = arith.constant 2 : index
    %c1_136 = arith.constant 1 : index
    %c0_137 = arith.constant 0 : index
    %122 = vector.load %arg9[%c2_135, %c1_136, %c0_137] : memref<18x18x16xf32, #tpu.memory_space<vmem>>, vector<16x16x16xf32>
    %123 = vector.shape_cast %122 : vector<16x16x16xf32> to vector<256x16xf32>
    %c7_138 = arith.constant 7 : index
    %c0_139 = arith.constant 0 : index
    %c0_140 = arith.constant 0 : index
    %124 = vector.load %arg4[%c7_138, %c0_139, %c0_140] : memref<9x16x16xf32, #tpu.memory_space<vmem>>, vector<1x16x16xf32>
    %125 = vector.shape_cast %124 : vector<1x16x16xf32> to vector<16x16xf32>
    %cst_141 = arith.constant dense<0.000000e+00> : vector<256x16xf32>
    %126 = tpu.matmul %123, %125, %cst_141 {dimension_numbers = #tpu.dot_dimension_numbers<[1], [0], [0], [1], [0, 0, 1, 1], [], []>} : vector<256x16xf32>, vector<16x16xf32>, vector<256x16xf32> -> vector<256x16xf32>
    %127 = arith.addf %121, %126 : vector<256x16xf32>
    %c2_142 = arith.constant 2 : index
    %c2_143 = arith.constant 2 : index
    %c0_144 = arith.constant 0 : index
    %128 = vector.load %arg9[%c2_142, %c2_143, %c0_144] : memref<18x18x16xf32, #tpu.memory_space<vmem>>, vector<16x16x16xf32>
    %129 = vector.shape_cast %128 : vector<16x16x16xf32> to vector<256x16xf32>
    %c8_145 = arith.constant 8 : index
    %c0_146 = arith.constant 0 : index
    %c0_147 = arith.constant 0 : index
    %130 = vector.load %arg4[%c8_145, %c0_146, %c0_147] : memref<9x16x16xf32, #tpu.memory_space<vmem>>, vector<1x16x16xf32>
    %131 = vector.shape_cast %130 : vector<1x16x16xf32> to vector<16x16xf32>
    %cst_148 = arith.constant dense<0.000000e+00> : vector<256x16xf32>
    %132 = tpu.matmul %129, %131, %cst_148 {dimension_numbers = #tpu.dot_dimension_numbers<[1], [0], [0], [1], [0, 0, 1, 1], [], []>} : vector<256x16xf32>, vector<16x16xf32>, vector<256x16xf32> -> vector<256x16xf32>
    %133 = arith.addf %127, %132 : vector<256x16xf32>
    %c0_149 = arith.constant 0 : index
    %c0_150 = arith.constant 0 : index
    %134 = vector.load %arg5[%c0_149, %c0_150] : memref<1x16xf32, #tpu.memory_space<vmem>>, vector<1x16xf32>
    %135 = vector.broadcast %134 : vector<1x16xf32> to vector<256x16xf32>
    %136 = arith.addf %133, %135 : vector<256x16xf32>
    %cst_151 = arith.constant 0.000000e+00 : f32
    %137 = vector.broadcast %cst_151 : f32 to vector<256x16xf32>
    %138 = arith.maximumf %136, %137 : vector<256x16xf32>
    %139 = vector.shape_cast %138 : vector<256x16xf32> to vector<16x16x16xf32>
    %140 = vector.shape_cast %139 : vector<16x16x16xf32> to vector<16x8x2x16xf32>
    %cst_152 = arith.constant dense<0xFF800000> : vector<16x8x16xf32>
    %141 = vector.multi_reduction <maximumf>, %140, %cst_152 [2] : vector<16x8x2x16xf32> to vector<16x8x16xf32>
    %142 = vector.shape_cast %141 : vector<16x8x16xf32> to vector<8x2x8x16xf32>
    %cst_153 = arith.constant dense<0xFF800000> : vector<8x8x16xf32>
    %143 = vector.multi_reduction <maximumf>, %142, %cst_153 [1] : vector<8x2x8x16xf32> to vector<8x8x16xf32>
    %c1_154 = arith.constant 1 : index
    %c1_155 = arith.constant 1 : index
    %c0_156 = arith.constant 0 : index
    %144 = vector.load %arg10[%c1_154, %c1_155, %c0_156] : memref<10x10x16xf32, #tpu.memory_space<vmem>>, vector<8x8x16xf32>
    tpu.vector_store %arg10[%c1_154, %c1_155, %c0_156], %143 {strides = array<i32>} : memref<10x10x16xf32, #tpu.memory_space<vmem>>, vector<8x8x16xf32>,
    %145 = vector.extract_strided_slice %143 {offsets = [0, 1, 0], sizes = [8, 1, 16], strides = [1, 1, 1]} : vector<8x8x16xf32> to vector<8x1x16xf32>
    %c1_157 = arith.constant 1 : index
    %c0_158 = arith.constant 0 : index
    %c0_159 = arith.constant 0 : index
    %146 = vector.load %arg10[%c1_157, %c0_158, %c0_159] : memref<10x10x16xf32, #tpu.memory_space<vmem>>, vector<8x1x16xf32>
    tpu.vector_store %arg10[%c1_157, %c0_158, %c0_159], %145 {strides = array<i32>} : memref<10x10x16xf32, #tpu.memory_space<vmem>>, vector<8x1x16xf32>,
    %147 = vector.extract_strided_slice %143 {offsets = [0, 6, 0], sizes = [8, 1, 16], strides = [1, 1, 1]} : vector<8x8x16xf32> to vector<8x1x16xf32>
    %c1_160 = arith.constant 1 : index
    %c9 = arith.constant 9 : index
    %c0_161 = arith.constant 0 : index
    %148 = vector.load %arg10[%c1_160, %c9, %c0_161] : memref<10x10x16xf32, #tpu.memory_space<vmem>>, vector<8x1x16xf32>
    tpu.vector_store %arg10[%c1_160, %c9, %c0_161], %147 {strides = array<i32>} : memref<10x10x16xf32, #tpu.memory_space<vmem>>, vector<8x1x16xf32>,
    %c2_162 = arith.constant 2 : index
    %c0_163 = arith.constant 0 : index
    %c0_164 = arith.constant 0 : index
    %149 = vector.load %arg10[%c2_162, %c0_163, %c0_164] : memref<10x10x16xf32, #tpu.memory_space<vmem>>, vector<1x10x16xf32>
    %c0_165 = arith.constant 0 : index
    %c0_166 = arith.constant 0 : index
    %c0_167 = arith.constant 0 : index
    %150 = vector.load %arg10[%c0_165, %c0_166, %c0_167] : memref<10x10x16xf32, #tpu.memory_space<vmem>>, vector<1x10x16xf32>
    tpu.vector_store %arg10[%c0_165, %c0_166, %c0_167], %149 {strides = array<i32>} : memref<10x10x16xf32, #tpu.memory_space<vmem>>, vector<1x10x16xf32>,
    %c7_168 = arith.constant 7 : index
    %c0_169 = arith.constant 0 : index
    %c0_170 = arith.constant 0 : index
    %151 = vector.load %arg10[%c7_168, %c0_169, %c0_170] : memref<10x10x16xf32, #tpu.memory_space<vmem>>, vector<1x10x16xf32>
    %c9_171 = arith.constant 9 : index
    %c0_172 = arith.constant 0 : index
    %c0_173 = arith.constant 0 : index
    %152 = vector.load %arg10[%c9_171, %c0_172, %c0_173] : memref<10x10x16xf32, #tpu.memory_space<vmem>>, vector<1x10x16xf32>
    tpu.vector_store %arg10[%c9_171, %c0_172, %c0_173], %151 {strides = array<i32>} : memref<10x10x16xf32, #tpu.memory_space<vmem>>, vector<1x10x16xf32>,
    %cst_174 = arith.constant 0.000000e+00 : f32
    %153 = vector.broadcast %cst_174 : f32 to vector<64x32xf32>
    %c0_175 = arith.constant 0 : index
    %c0_176 = arith.constant 0 : index
    %c0_177 = arith.constant 0 : index
    %154 = vector.load %arg10[%c0_175, %c0_176, %c0_177] : memref<10x10x16xf32, #tpu.memory_space<vmem>>, vector<8x8x16xf32>
    %155 = vector.shape_cast %154 : vector<8x8x16xf32> to vector<64x16xf32>
    %c0_178 = arith.constant 0 : index
    %c0_179 = arith.constant 0 : index
    %c0_180 = arith.constant 0 : index
    %156 = vector.load %arg6[%c0_178, %c0_179, %c0_180] : memref<9x16x32xf32, #tpu.memory_space<vmem>>, vector<1x16x32xf32>
    %157 = vector.shape_cast %156 : vector<1x16x32xf32> to vector<16x32xf32>
    %cst_181 = arith.constant dense<0.000000e+00> : vector<64x32xf32>
    %158 = tpu.matmul %155, %157, %cst_181 {dimension_numbers = #tpu.dot_dimension_numbers<[1], [0], [0], [1], [0, 0, 1, 1], [], []>} : vector<64x16xf32>, vector<16x32xf32>, vector<64x32xf32> -> vector<64x32xf32>
    %159 = arith.addf %153, %158 : vector<64x32xf32>
    %c0_182 = arith.constant 0 : index
    %c1_183 = arith.constant 1 : index
    %c0_184 = arith.constant 0 : index
    %160 = vector.load %arg10[%c0_182, %c1_183, %c0_184] : memref<10x10x16xf32, #tpu.memory_space<vmem>>, vector<8x8x16xf32>
    %161 = vector.shape_cast %160 : vector<8x8x16xf32> to vector<64x16xf32>
    %c1_185 = arith.constant 1 : index
    %c0_186 = arith.constant 0 : index
    %c0_187 = arith.constant 0 : index
    %162 = vector.load %arg6[%c1_185, %c0_186, %c0_187] : memref<9x16x32xf32, #tpu.memory_space<vmem>>, vector<1x16x32xf32>
    %163 = vector.shape_cast %162 : vector<1x16x32xf32> to vector<16x32xf32>
    %cst_188 = arith.constant dense<0.000000e+00> : vector<64x32xf32>
    %164 = tpu.matmul %161, %163, %cst_188 {dimension_numbers = #tpu.dot_dimension_numbers<[1], [0], [0], [1], [0, 0, 1, 1], [], []>} : vector<64x16xf32>, vector<16x32xf32>, vector<64x32xf32> -> vector<64x32xf32>
    %165 = arith.addf %159, %164 : vector<64x32xf32>
    %c0_189 = arith.constant 0 : index
    %c2_190 = arith.constant 2 : index
    %c0_191 = arith.constant 0 : index
    %166 = vector.load %arg10[%c0_189, %c2_190, %c0_191] : memref<10x10x16xf32, #tpu.memory_space<vmem>>, vector<8x8x16xf32>
    %167 = vector.shape_cast %166 : vector<8x8x16xf32> to vector<64x16xf32>
    %c2_192 = arith.constant 2 : index
    %c0_193 = arith.constant 0 : index
    %c0_194 = arith.constant 0 : index
    %168 = vector.load %arg6[%c2_192, %c0_193, %c0_194] : memref<9x16x32xf32, #tpu.memory_space<vmem>>, vector<1x16x32xf32>
    %169 = vector.shape_cast %168 : vector<1x16x32xf32> to vector<16x32xf32>
    %cst_195 = arith.constant dense<0.000000e+00> : vector<64x32xf32>
    %170 = tpu.matmul %167, %169, %cst_195 {dimension_numbers = #tpu.dot_dimension_numbers<[1], [0], [0], [1], [0, 0, 1, 1], [], []>} : vector<64x16xf32>, vector<16x32xf32>, vector<64x32xf32> -> vector<64x32xf32>
    %171 = arith.addf %165, %170 : vector<64x32xf32>
    %c1_196 = arith.constant 1 : index
    %c0_197 = arith.constant 0 : index
    %c0_198 = arith.constant 0 : index
    %172 = vector.load %arg10[%c1_196, %c0_197, %c0_198] : memref<10x10x16xf32, #tpu.memory_space<vmem>>, vector<8x8x16xf32>
    %173 = vector.shape_cast %172 : vector<8x8x16xf32> to vector<64x16xf32>
    %c3_199 = arith.constant 3 : index
    %c0_200 = arith.constant 0 : index
    %c0_201 = arith.constant 0 : index
    %174 = vector.load %arg6[%c3_199, %c0_200, %c0_201] : memref<9x16x32xf32, #tpu.memory_space<vmem>>, vector<1x16x32xf32>
    %175 = vector.shape_cast %174 : vector<1x16x32xf32> to vector<16x32xf32>
    %cst_202 = arith.constant dense<0.000000e+00> : vector<64x32xf32>
    %176 = tpu.matmul %173, %175, %cst_202 {dimension_numbers = #tpu.dot_dimension_numbers<[1], [0], [0], [1], [0, 0, 1, 1], [], []>} : vector<64x16xf32>, vector<16x32xf32>, vector<64x32xf32> -> vector<64x32xf32>
    %177 = arith.addf %171, %176 : vector<64x32xf32>
    %c1_203 = arith.constant 1 : index
    %c1_204 = arith.constant 1 : index
    %c0_205 = arith.constant 0 : index
    %178 = vector.load %arg10[%c1_203, %c1_204, %c0_205] : memref<10x10x16xf32, #tpu.memory_space<vmem>>, vector<8x8x16xf32>
    %179 = vector.shape_cast %178 : vector<8x8x16xf32> to vector<64x16xf32>
    %c4_206 = arith.constant 4 : index
    %c0_207 = arith.constant 0 : index
    %c0_208 = arith.constant 0 : index
    %180 = vector.load %arg6[%c4_206, %c0_207, %c0_208] : memref<9x16x32xf32, #tpu.memory_space<vmem>>, vector<1x16x32xf32>
    %181 = vector.shape_cast %180 : vector<1x16x32xf32> to vector<16x32xf32>
    %cst_209 = arith.constant dense<0.000000e+00> : vector<64x32xf32>
    %182 = tpu.matmul %179, %181, %cst_209 {dimension_numbers = #tpu.dot_dimension_numbers<[1], [0], [0], [1], [0, 0, 1, 1], [], []>} : vector<64x16xf32>, vector<16x32xf32>, vector<64x32xf32> -> vector<64x32xf32>
    %183 = arith.addf %177, %182 : vector<64x32xf32>
    %c1_210 = arith.constant 1 : index
    %c2_211 = arith.constant 2 : index
    %c0_212 = arith.constant 0 : index
    %184 = vector.load %arg10[%c1_210, %c2_211, %c0_212] : memref<10x10x16xf32, #tpu.memory_space<vmem>>, vector<8x8x16xf32>
    %185 = vector.shape_cast %184 : vector<8x8x16xf32> to vector<64x16xf32>
    %c5_213 = arith.constant 5 : index
    %c0_214 = arith.constant 0 : index
    %c0_215 = arith.constant 0 : index
    %186 = vector.load %arg6[%c5_213, %c0_214, %c0_215] : memref<9x16x32xf32, #tpu.memory_space<vmem>>, vector<1x16x32xf32>
    %187 = vector.shape_cast %186 : vector<1x16x32xf32> to vector<16x32xf32>
    %cst_216 = arith.constant dense<0.000000e+00> : vector<64x32xf32>
    %188 = tpu.matmul %185, %187, %cst_216 {dimension_numbers = #tpu.dot_dimension_numbers<[1], [0], [0], [1], [0, 0, 1, 1], [], []>} : vector<64x16xf32>, vector<16x32xf32>, vector<64x32xf32> -> vector<64x32xf32>
    %189 = arith.addf %183, %188 : vector<64x32xf32>
    %c2_217 = arith.constant 2 : index
    %c0_218 = arith.constant 0 : index
    %c0_219 = arith.constant 0 : index
    %190 = vector.load %arg10[%c2_217, %c0_218, %c0_219] : memref<10x10x16xf32, #tpu.memory_space<vmem>>, vector<8x8x16xf32>
    %191 = vector.shape_cast %190 : vector<8x8x16xf32> to vector<64x16xf32>
    %c6_220 = arith.constant 6 : index
    %c0_221 = arith.constant 0 : index
    %c0_222 = arith.constant 0 : index
    %192 = vector.load %arg6[%c6_220, %c0_221, %c0_222] : memref<9x16x32xf32, #tpu.memory_space<vmem>>, vector<1x16x32xf32>
    %193 = vector.shape_cast %192 : vector<1x16x32xf32> to vector<16x32xf32>
    %cst_223 = arith.constant dense<0.000000e+00> : vector<64x32xf32>
    %194 = tpu.matmul %191, %193, %cst_223 {dimension_numbers = #tpu.dot_dimension_numbers<[1], [0], [0], [1], [0, 0, 1, 1], [], []>} : vector<64x16xf32>, vector<16x32xf32>, vector<64x32xf32> -> vector<64x32xf32>
    %195 = arith.addf %189, %194 : vector<64x32xf32>
    %c2_224 = arith.constant 2 : index
    %c1_225 = arith.constant 1 : index
    %c0_226 = arith.constant 0 : index
    %196 = vector.load %arg10[%c2_224, %c1_225, %c0_226] : memref<10x10x16xf32, #tpu.memory_space<vmem>>, vector<8x8x16xf32>
    %197 = vector.shape_cast %196 : vector<8x8x16xf32> to vector<64x16xf32>
    %c7_227 = arith.constant 7 : index
    %c0_228 = arith.constant 0 : index
    %c0_229 = arith.constant 0 : index
    %198 = vector.load %arg6[%c7_227, %c0_228, %c0_229] : memref<9x16x32xf32, #tpu.memory_space<vmem>>, vector<1x16x32xf32>
    %199 = vector.shape_cast %198 : vector<1x16x32xf32> to vector<16x32xf32>
    %cst_230 = arith.constant dense<0.000000e+00> : vector<64x32xf32>
    %200 = tpu.matmul %197, %199, %cst_230 {dimension_numbers = #tpu.dot_dimension_numbers<[1], [0], [0], [1], [0, 0, 1, 1], [], []>} : vector<64x16xf32>, vector<16x32xf32>, vector<64x32xf32> -> vector<64x32xf32>
    %201 = arith.addf %195, %200 : vector<64x32xf32>
    %c2_231 = arith.constant 2 : index
    %c2_232 = arith.constant 2 : index
    %c0_233 = arith.constant 0 : index
    %202 = vector.load %arg10[%c2_231, %c2_232, %c0_233] : memref<10x10x16xf32, #tpu.memory_space<vmem>>, vector<8x8x16xf32>
    %203 = vector.shape_cast %202 : vector<8x8x16xf32> to vector<64x16xf32>
    %c8_234 = arith.constant 8 : index
    %c0_235 = arith.constant 0 : index
    %c0_236 = arith.constant 0 : index
    %204 = vector.load %arg6[%c8_234, %c0_235, %c0_236] : memref<9x16x32xf32, #tpu.memory_space<vmem>>, vector<1x16x32xf32>
    %205 = vector.shape_cast %204 : vector<1x16x32xf32> to vector<16x32xf32>
    %cst_237 = arith.constant dense<0.000000e+00> : vector<64x32xf32>
    %206 = tpu.matmul %203, %205, %cst_237 {dimension_numbers = #tpu.dot_dimension_numbers<[1], [0], [0], [1], [0, 0, 1, 1], [], []>} : vector<64x16xf32>, vector<16x32xf32>, vector<64x32xf32> -> vector<64x32xf32>
    %207 = arith.addf %201, %206 : vector<64x32xf32>
    %c0_238 = arith.constant 0 : index
    %c0_239 = arith.constant 0 : index
    %208 = vector.load %arg7[%c0_238, %c0_239] : memref<1x32xf32, #tpu.memory_space<vmem>>, vector<1x32xf32>
    %209 = vector.broadcast %208 : vector<1x32xf32> to vector<64x32xf32>
    %210 = arith.addf %207, %209 : vector<64x32xf32>
    %cst_240 = arith.constant 0.000000e+00 : f32
    %211 = vector.broadcast %cst_240 : f32 to vector<64x32xf32>
    %212 = arith.maximumf %210, %211 : vector<64x32xf32>
    %c0_241 = arith.constant 0 : index
    %c0_242 = arith.constant 0 : index
    %c0_243 = arith.constant 0 : index
    %213 = vector.load %arg8[%c0_241, %c0_242, %c0_243] : memref<1x64x32xf32, #tpu.memory_space<vmem>>, vector<1x64x32xf32>
    %214 = vector.shape_cast %213 : vector<1x64x32xf32> to vector<64x32xf32>
    %215 = vector.shape_cast %212 : vector<64x32xf32> to vector<1x64x32xf32>
    tpu.vector_store %arg8[%c0_241, %c0_242, %c0_243], %215 {strides = array<i32>} : memref<1x64x32xf32, #tpu.memory_space<vmem>>, vector<1x64x32xf32>,
    return
  }
  func.func @transform_0(%arg0: i32) -> (i32, i32, i32, i32) {
    %c0_i32 = arith.constant 0 : i32
    %c0_i32_0 = arith.constant 0 : i32
    %c0_i32_1 = arith.constant 0 : i32
    %c0_i32_2 = arith.constant 0 : i32
    return %arg0, %c0_i32, %c0_i32_0, %c0_i32_1 : i32, i32, i32, i32
  }
  func.func @transform_1(%arg0: i32) -> (i32, i32, i32) {
    %c0_i32 = arith.constant 0 : i32
    %c0_i32_0 = arith.constant 0 : i32
    %c0_i32_1 = arith.constant 0 : i32
    %c0_i32_2 = arith.constant 0 : i32
    return %c0_i32, %c0_i32_0, %c0_i32_1 : i32, i32, i32
  }
  func.func @transform_2(%arg0: i32) -> (i32, i32) {
    %c0_i32 = arith.constant 0 : i32
    %c0_i32_0 = arith.constant 0 : i32
    %c0_i32_1 = arith.constant 0 : i32
    return %c0_i32, %c0_i32_0 : i32, i32
  }
  func.func @transform_3(%arg0: i32) -> (i32, i32, i32) {
    %c0_i32 = arith.constant 0 : i32
    %c0_i32_0 = arith.constant 0 : i32
    %c0_i32_1 = arith.constant 0 : i32
    %c0_i32_2 = arith.constant 0 : i32
    return %c0_i32, %c0_i32_0, %c0_i32_1 : i32, i32, i32
  }
  func.func @transform_4(%arg0: i32) -> (i32, i32) {
    %c0_i32 = arith.constant 0 : i32
    %c0_i32_0 = arith.constant 0 : i32
    %c0_i32_1 = arith.constant 0 : i32
    return %c0_i32, %c0_i32_0 : i32, i32
  }
  func.func @transform_5(%arg0: i32) -> (i32, i32, i32) {
    %c0_i32 = arith.constant 0 : i32
    %c0_i32_0 = arith.constant 0 : i32
    %c0_i32_1 = arith.constant 0 : i32
    %c0_i32_2 = arith.constant 0 : i32
    return %c0_i32, %c0_i32_0, %c0_i32_1 : i32, i32, i32
  }
  func.func @transform_6(%arg0: i32) -> (i32, i32) {
    %c0_i32 = arith.constant 0 : i32
    %c0_i32_0 = arith.constant 0 : i32
    %c0_i32_1 = arith.constant 0 : i32
    return %c0_i32, %c0_i32_0 : i32, i32
  }
  func.func @transform_7(%arg0: i32) -> (i32, i32, i32) {
    %c0_i32 = arith.constant 0 : i32
    %c0_i32_0 = arith.constant 0 : i32
    %c0_i32_1 = arith.constant 0 : i32
    return %arg0, %c0_i32, %c0_i32_0 : i32, i32, i32
  }
}

</mosaic_0001>

<bundles_post_ra>
// kernel: tpu_custom_call.1
= control target key start
LH: loop header
LB: loop body
LE: loop exit
PB: predicated region body
PF: predicated region fallthrough
CT: control target
= control target key end

     0   :  { %s8656_s24 = smov 0   ;;  %s12260_s0 = inlined_call_operand.vmem [shape: f32[2,18,18,3], index: 0, kind: input, shape index: {}]   ;;  %s12261_s1 = inlined_call_operand.vmem [shape: f32[9,3,16], index: 1, kind: input, shape index: {}]   ;;  %s12262_s2 = inlined_call_operand.vmem [shape: f32[1,16], index: 2, kind: input, shape index: {}]   ;;  %s12263_s3 = inlined_call_operand.vmem [shape: f32[9,16,16], index: 3, kind: input, shape index: {}]   ;;  %s12264_s4 = inlined_call_operand.vmem [shape: f32[1,16], index: 4, kind: input, shape index: {}]   ;;  %s12265_s5 = inlined_call_operand.vmem [shape: f32[9,16,32], index: 5, kind: input, shape index: {}]   ;;  %s12266_s6 = inlined_call_operand.vmem [shape: f32[1,32], index: 6, kind: input, shape index: {}]   ;;  %s12267_s7 = inlined_call_operand.vmem [shape: f32[2,64,32], index: 7, kind: output, shape index: {}]  }
   0x1 LB: > { %s7666_s25 = sadd.s32 4294967295, %s8614_s24   ;;  %p7670_p0 = scmp.ge.s32.totalorder %s8614_s24, 1  ;;  %s8614_s24 = sphi %s8656_s24, %s17_s24  }
   0x2   : > { %p237_p1 = scmp.lt.s32.totalorder %s8614_s24, 3 }
   0x4   : > { %p238_p2 = pnand %p7670_p0, %p237_p1 }
   0x6   : > { %241 = sbr.rel (%p238_p2) target bundleno = 1947 (0x79b), region = 48 }
   0xb   : > { %v7674_v0 = vld [vmem:[%s12261_s1 + $0x4] sm:$0x7]  ;;  %vm443_vm0 = vcmask 1042432   ;;  %p269_p3 = scmp.lt.s32.totalorder %s7666_s25, 1  ;;  %v7873_v1 = vld [vmem:[%s12261_s1 + $0x10] sm:$0x7] }
   0xc   : > { %7675 = vmatpush.msk.msra.mxu0 %vm443_vm0, %v7674_v0  ;;  %8566 = vmatpush.msk.msra.mxu1 %vm443_vm0, %v7674_v0  ;;  %v311_v2 = vld [vmem:[%s12261_s1] sm:$0x7]  ;;  %v7741_v3 = vld [vmem:[%s12261_s1 + $0x8] sm:$0x7]  ;;  %v7807_v4 = vld [vmem:[%s12261_s1 + $0xc] sm:$0x7] }
   0xd   : > { %8567 = vmatpush.msk.msra.mxu2 %vm443_vm0, %v7674_v0  ;;  %s12731_s25 = smov (!%p269_p3, %s7666_s25), 1  ;;  %8568 = vmatpush.msk.msra.mxu3 %vm443_vm0, %v7674_v0  ;;  %vm346_vm1 = vcmask 23552   ;;  %v7939_v45 = vld [vmem:[%s12261_s1 + $0x14] sm:$0x7]  ;;  %vm2789_vm2 = vcmask 130048   ;;  %vm2822_vm3 = vcmask 123905  }
   0xe   : > { %7874 = vmatpush.msk.msrb.mxu0 %vm443_vm0, %v7873_v1  ;;  %7708 = vmatpush.msk.msrb.mxu1 %vm443_vm0, %v311_v2  ;;  %s8569_s13 = smul.u32 432, %s12731_s25  ;;  %vm2839_vm4 = vcmask 129030   ;;  %vm2862_vm5 = vcmask 123904   ;;  %vm6735_vm6 = vcmask 1041409   ;;  %vm6815_vm7 = vcmask 122880   ;;  %s8565_s27 = sshll.u32 %s12731_s25, 6 }
   0xf   : > { %7742 = vmatpush.msk.msrb.mxu2 %vm443_vm0, %v7741_v3  ;;  %7808 = vmatpush.msk.msrb.mxu3 %vm443_vm0, %v7807_v4  ;;  %vm6737_vm8 = vcmask 1042434   ;;  %vm6739_vm9 = vcmask 1043459   ;;  %vm6741_vm10 = vcmask 1044484   ;;  %vm6743_vm11 = vcmask 1045509   ;;  %s12222_s30 = scalar_lea.vmem %s12267_s7, %s8565_s27 }
  0x10   : > { %s8693_s16 = scalar_lea.vmem %s12260_s0, %s8569_s13  ;;  %vm6745_vm12 = vcmask 1046534   ;;  %vm6747_vm13 = vcmask 1047559   ;;  %vm7602_vm14 = vcmask 261120  }
  0x11   : > { %v312_v5 = vld [vmem:[%s8693_s16 + $0x1] sm:$0xff]  ;;  %v338_v6 = vld [vmem:[%s8693_s16 + $0x139] sm:$0xff]  ;;  %v340_v7 = vld [vmem:[%s8693_s16 + $0x151] sm:$0xff] }
  0x12   : > { %7676 = vmatmul.msk.f32.vlgmr.msra.gmra.mxu0 %vm346_vm1, %v312_v5  ;;  %7702 = vmatmul.msk.f32.vlgmr.msra.gmra.mxu1 %vm346_vm1, %v338_v6  ;;  %v342_v8 = vld [vmem:[%s8693_s16 + $0x169] sm:$0xff]  ;;  %v339_v10 = vld [vmem:[%s8693_s16 + $0x141] sm:$0xff]  ;;  %v341_v11 = vld [vmem:[%s8693_s16 + $0x159] sm:$0xff] }
  0x13   : > { %7704 = vmatmul.msk.f32.vlgmr.msra.gmra.mxu2 %vm346_vm1, %v340_v7  ;;  %7706 = vmatmul.msk.f32.vlgmr.msra.gmra.mxu3 %vm346_vm1, %v342_v8  ;;  %v313_v9 = vld [vmem:[%s8693_s16 + $0x9] sm:$0xff]  ;;  %v343_v12 = vld [vmem:[%s8693_s16 + $0x171] sm:$0xff]  ;;  %v8712_v13 = vld [vmem:[%s8693_s16 + $0x19] sm:$0xff] }
  0x14   : > { %v279_v14 = vld [vmem:[%s8693_s16] sm:$0xff]  ;;  %v7775_v16 = vld [vmem:[%s8693_s16 + $0x18] sm:$0xff]  ;;  %v280_v18 = vld [vmem:[%s8693_s16 + $0x8] sm:$0xff]  ;;  %7940 = vmatpush.msk.msra.mxu1 %vm443_vm0, %v7939_v45 }
  0x15   : > { %v772_v15 = vld [vmem:[%s8693_s16 + $0x2] sm:$0xff]  ;;  %v773_v19 = vld [vmem:[%s8693_s16 + $0xa] sm:$0xff]  ;;  %v8737_v22 = vld [vmem:[%s8693_s16 + $0x1a] sm:$0xff] }
  0x16   : > { %v8723_v17 = vld [vmem:[%s8693_s16 + $0x21] sm:$0xff]  ;;  %v8734_v21 = vld [vmem:[%s8693_s16 + $0x31] sm:$0xff]  ;;  %v8750_v24 = vld [vmem:[%s8693_s16 + $0x39] sm:$0xff] }
  0x17   : > { %v7776_v20 = vld [vmem:[%s8693_s16 + $0x20] sm:$0xff]  ;;  %v8740_v23 = vld [vmem:[%s8693_s16 + $0x30] sm:$0xff]  ;;  %v8756_v26 = vld [vmem:[%s8693_s16 + $0x38] sm:$0xff] }
  0x18   : > { %v8753_v25 = vld [vmem:[%s8693_s16 + $0x22] sm:$0xff]  ;;  %v8769_v28 = vld [vmem:[%s8693_s16 + $0x32] sm:$0xff]  ;;  %v8786_v31 = vld [vmem:[%s8693_s16 + $0x3a] sm:$0xff] }
  0x19   : > { %v8766_v27 = vld [vmem:[%s8693_s16 + $0x49] sm:$0xff]  ;;  %v8783_v30 = vld [vmem:[%s8693_s16 + $0x51] sm:$0xff]  ;;  %v8800_v33 = vld [vmem:[%s8693_s16 + $0x61] sm:$0xff] }
  0x1a   : > { %7677 = vmatmul.msk.f32.gmra.mxu0 %vm346_vm1, %v313_v9  ;;  %7703 = vmatmul.msk.f32.gmra.mxu1 %vm346_vm1, %v339_v10  ;;  %v8772_v29 = vld [vmem:[%s8693_s16 + $0x48] sm:$0xff]  ;;  %v8789_v32 = vld [vmem:[%s8693_s16 + $0x50] sm:$0xff]  ;;  %v8806_v35 = vld [vmem:[%s8693_s16 + $0x60] sm:$0xff] }
  0x1b   : > { %7705 = vmatmul.msk.f32.gmra.mxu2 %vm346_vm1, %v341_v11  ;;  %7707 = vmatmul.msk.f32.gmra.mxu3 %vm346_vm1, %v343_v12  ;;  %v8803_v34 = vld [vmem:[%s8693_s16 + $0x4a] sm:$0xff]  ;;  %v8820_v37 = vld [vmem:[%s8693_s16 + $0x52] sm:$0xff]  ;;  %v8837_v40 = vld [vmem:[%s8693_s16 + $0x62] sm:$0xff] }
  0x1c   : > { %v8817_v36 = vld [vmem:[%s8693_s16 + $0x69] sm:$0xff]  ;;  %v8834_v39 = vld [vmem:[%s8693_s16 + $0x79] sm:$0xff]  ;;  %v8851_v42 = vld [vmem:[%s8693_s16 + $0x81] sm:$0xff] }
  0x1d   : > { %v8823_v38 = vld [vmem:[%s8693_s16 + $0x68] sm:$0xff]  ;;  %v8840_v41 = vld [vmem:[%s8693_s16 + $0x78] sm:$0xff]  ;;  %v8857_v44 = vld [vmem:[%s8693_s16 + $0x80] sm:$0xff] }
  0x1e   : > { %v8854_v43 = vld [vmem:[%s8693_s16 + $0x6a] sm:$0xff]  ;;  %v8875_v47 = vld [vmem:[%s8693_s16 + $0x7a] sm:$0xff]  ;;  %v8892_v50 = vld [vmem:[%s8693_s16 + $0x82] sm:$0xff] }
  0x1f   : > { %v8872_v46 = vld [vmem:[%s8693_s16 + $0x91] sm:$0xff]  ;;  %v8889_v49 = vld [vmem:[%s8693_s16 + $0x99] sm:$0xff]  ;;  %v8906_v52 = vld [vmem:[%s8693_s16 + $0xa9] sm:$0xff] }
  0x20   : > { %v8878_v48 = vld [vmem:[%s8693_s16 + $0x90] sm:$0xff]  ;;  %v8895_v51 = vld [vmem:[%s8693_s16 + $0x98] sm:$0xff]  ;;  %v8912_v54 = vld [vmem:[%s8693_s16 + $0xa8] sm:$0xff] }
  0x21   : > { %v8909_v53 = vld [vmem:[%s8693_s16 + $0x92] sm:$0xff]  ;;  %v8926_v56 = vld [vmem:[%s8693_s16 + $0x9a] sm:$0xff]  ;;  %v8945_v61 = vld [vmem:[%s8693_s16 + $0xaa] sm:$0xff] }
  0x22   : > { %7678 = vmatmul.msk.f32.gmra.mxu0 %vm346_vm1, %v8712_v13  ;;  %7709 = vmatmul.msk.f32.vlgmr.msrb.gmra.mxu1 %vm346_vm1, %v279_v14  ;;  %v8923_v55 = vld [vmem:[%s8693_s16 + $0xb1] sm:$0xff]  ;;  %v8942_v60 = vld [vmem:[%s8693_s16 + $0xc1] sm:$0xff]  ;;  %12326 = vst [vmem:[#allocation4_spill] sm:$0xff] %v8945_v61  ;;  %v8965_v3 = vld [vmem:[%s8693_s16 + $0xc9] sm:$0xff] }
  0x23   : > { %7743 = vmatmul.msk.f32.vlgmr.msrb.gmra.mxu2 %vm346_vm1, %v772_v15  ;;  %7809 = vmatmul.msk.f32.vlgmr.msrb.gmra.mxu3 %vm346_vm1, %v7775_v16  ;;  %v8929_v57 = vld [vmem:[%s8693_s16 + $0xb0] sm:$0xff]  ;;  %v8948_v62 = vld [vmem:[%s8693_s16 + $0xc0] sm:$0xff]  ;;  %v8971_v5 = vld [vmem:[%s8693_s16 + $0xc8] sm:$0xff] }
  0x24   : > { %12327 = vst [vmem:[#allocation5_spill] sm:$0xff] %v8948_v62  ;;  %v8968_v4 = vld [vmem:[%s8693_s16 + $0xb2] sm:$0xff]  ;;  %v8989_v11 = vld [vmem:[%s8693_s16 + $0xc2] sm:$0xff] }
  0x25   : > { %12330 = vst [vmem:[#allocation8_spill] sm:$0xff] %v8968_v4  ;;  %v8986_v10 = vld [vmem:[%s8693_s16 + $0xd9] sm:$0xff]  ;;  %v9003_v45 = vld [vmem:[%s8693_s16 + $0xe1] sm:$0xff] }
  0x26   : > { %12331 = vst [vmem:[#allocation9_spill] sm:$0xff] %v8971_v5  ;;  %v8992_v12 = vld [vmem:[%s8693_s16 + $0xd8] sm:$0xff] }
  0x27   : > { %12334 = vst [vmem:[#allocation12_spill] sm:$0xff] %v8989_v11 }
  0x28   : > { %12335 = vst [vmem:[#allocation13_spill] sm:$0xff] %v8992_v12 }
  0x2a   : > { %7679 = vmatmul.msk.f32.gmra.mxu0 %vm346_vm1, %v8723_v17  ;;  %7710 = vmatmul.msk.f32.gmra.mxu1 %vm346_vm1, %v280_v18 }
  0x2b   : > { %7744 = vmatmul.msk.f32.gmra.mxu2 %vm346_vm1, %v773_v19  ;;  %7810 = vmatmul.msk.f32.gmra.mxu3 %vm346_vm1, %v7776_v20 }
  0x32   : > { %7680 = vmatmul.msk.f32.gmra.mxu0 %vm346_vm1, %v8734_v21  ;;  %7711 = vmatmul.msk.f32.gmra.mxu1 %vm346_vm1, %v7775_v16 }
  0x33   : > { %7745 = vmatmul.msk.f32.gmra.mxu2 %vm346_vm1, %v8737_v22  ;;  %7811 = vmatmul.msk.f32.gmra.mxu3 %vm346_vm1, %v8740_v23 }
  0x3a   : > { %7681 = vmatmul.msk.f32.gmra.mxu0 %vm346_vm1, %v8750_v24  ;;  %7712 = vmatmul.msk.f32.gmra.mxu1 %vm346_vm1, %v7776_v20 }
  0x3b   : > { %7746 = vmatmul.msk.f32.gmra.mxu2 %vm346_vm1, %v8753_v25  ;;  %7812 = vmatmul.msk.f32.gmra.mxu3 %vm346_vm1, %v8756_v26 }
  0x42   : > { %7682 = vmatmul.msk.f32.gmra.mxu0 %vm346_vm1, %v8766_v27  ;;  %7713 = vmatmul.msk.f32.gmra.mxu1 %vm346_vm1, %v8740_v23 }
  0x43   : > { %7747 = vmatmul.msk.f32.gmra.mxu2 %vm346_vm1, %v8769_v28  ;;  %7813 = vmatmul.msk.f32.gmra.mxu3 %vm346_vm1, %v8772_v29 }
  0x4a   : > { %7683 = vmatmul.msk.f32.gmra.mxu0 %vm346_vm1, %v8783_v30  ;;  %7714 = vmatmul.msk.f32.gmra.mxu1 %vm346_vm1, %v8756_v26 }
  0x4b   : > { %7748 = vmatmul.msk.f32.gmra.mxu2 %vm346_vm1, %v8786_v31  ;;  %7814 = vmatmul.msk.f32.gmra.mxu3 %vm346_vm1, %v8789_v32 }
  0x52   : > { %7684 = vmatmul.msk.f32.gmra.mxu0 %vm346_vm1, %v8800_v33  ;;  %7715 = vmatmul.msk.f32.gmra.mxu1 %vm346_vm1, %v8772_v29 }
  0x53   : > { %7749 = vmatmul.msk.f32.gmra.mxu2 %vm346_vm1, %v8803_v34  ;;  %7815 = vmatmul.msk.f32.gmra.mxu3 %vm346_vm1, %v8806_v35 }
  0x5a   : > { %7685 = vmatmul.msk.f32.gmra.mxu0 %vm346_vm1, %v8817_v36  ;;  %7716 = vmatmul.msk.f32.gmra.mxu1 %vm346_vm1, %v8789_v32 }
  0x5b   : > { %7750 = vmatmul.msk.f32.gmra.mxu2 %vm346_vm1, %v8820_v37  ;;  %7816 = vmatmul.msk.f32.gmra.mxu3 %vm346_vm1, %v8823_v38 }
  0x62   : > { %7686 = vmatmul.msk.f32.gmra.mxu0 %vm346_vm1, %v8834_v39  ;;  %7717 = vmatmul.msk.f32.gmra.mxu1 %vm346_vm1, %v8806_v35 }
  0x63   : > { %7751 = vmatmul.msk.f32.gmra.mxu2 %vm346_vm1, %v8837_v40  ;;  %7817 = vmatmul.msk.f32.gmra.mxu3 %vm346_vm1, %v8840_v41 }
  0x6a   : > { %7687 = vmatmul.msk.f32.gmra.mxu0 %vm346_vm1, %v8851_v42  ;;  %7718 = vmatmul.msk.f32.gmra.mxu1 %vm346_vm1, %v8823_v38 }
  0x6b   : > { %7752 = vmatmul.msk.f32.gmra.mxu2 %vm346_vm1, %v8854_v43  ;;  %7818 = vmatmul.msk.f32.gmra.mxu3 %vm346_vm1, %v8857_v44 }
  0x72   : > { %7688 = vmatmul.msk.f32.gmra.mxu0 %vm346_vm1, %v8872_v46  ;;  %7719 = vmatmul.msk.f32.gmra.mxu1 %vm346_vm1, %v8840_v41 }
  0x73   : > { %7753 = vmatmul.msk.f32.gmra.mxu2 %vm346_vm1, %v8875_v47  ;;  %7819 = vmatmul.msk.f32.gmra.mxu3 %vm346_vm1, %v8878_v48 }
  0x7a   : > { %7689 = vmatmul.msk.f32.gmra.mxu0 %vm346_vm1, %v8889_v49  ;;  %7720 = vmatmul.msk.f32.gmra.mxu1 %vm346_vm1, %v8857_v44 }
  0x7b   : > { %7754 = vmatmul.msk.f32.gmra.mxu2 %vm346_vm1, %v8892_v50  ;;  %7820 = vmatmul.msk.f32.gmra.mxu3 %vm346_vm1, %v8895_v51 }
  0x82   : > { %7690 = vmatmul.msk.f32.gmra.mxu0 %vm346_vm1, %v8906_v52  ;;  %7721 = vmatmul.msk.f32.gmra.mxu1 %vm346_vm1, %v8878_v48 }
  0x83   : > { %7755 = vmatmul.msk.f32.gmra.mxu2 %vm346_vm1, %v8909_v53  ;;  %7821 = vmatmul.msk.f32.gmra.mxu3 %vm346_vm1, %v8912_v54 }
  0x8a   : > { %7691 = vmatmul.msk.f32.gmra.mxu0 %vm346_vm1, %v8923_v55  ;;  %7722 = vmatmul.msk.f32.gmra.mxu1 %vm346_vm1, %v8895_v51 }
  0x8b   : > { %7756 = vmatmul.msk.f32.gmra.mxu2 %vm346_vm1, %v8926_v56  ;;  %7822 = vmatmul.msk.f32.gmra.mxu3 %vm346_vm1, %v8929_v57 }
  0x8f   : > { %v464_v58 = vpop.f32.mrf.mxu0  ;;  %v8939_v59 = vpop.f32.mrf.mxu1 }
  0x92   : > { %7692 = vmatmul.msk.f32.gmra.mxu0 %vm346_vm1, %v8942_v60  ;;  %7723 = vmatmul.msk.f32.gmra.mxu1 %vm346_vm1, %v8912_v54 }
  0x93   : > { %7757 = vmatmul.msk.f32.gmra.mxu2 %vm346_vm1, %v8945_v61  ;;  %7823 = vmatmul.msk.f32.gmra.mxu3 %vm346_vm1, %v8948_v62 }
  0x96   : > { %v8958_v63 = vpop.f32.mrf.mxu2  ;;  %v8960_v0 = vpop.f32.mrf.mxu3 }
  0x97   : > { %12328 = vst [vmem:[#allocation6_spill] sm:$0xff] %v8958_v63  ;;  %v467_v1 = vpop.f32.mrf.mxu0  ;;  %v8962_v2 = vpop.f32.mrf.mxu1 }
  0x98   : > { %12329 = vst [vmem:[#allocation7_spill] sm:$0xff] %v8960_v0  ;;  %v9009_v0 = vld [vmem:[%s8693_s16 + $0xe0] sm:$0xff] }
  0x99   : > { %12337 = vst [vmem:[#allocation15_spill] sm:$0xff] %v9009_v0 }
  0x9a   : > { %7693 = vmatmul.msk.f32.gmra.mxu0 %vm346_vm1, %v8965_v3  ;;  %7724 = vmatmul.msk.f32.gmra.mxu1 %vm346_vm1, %v8929_v57 }
  0x9b   : > { %7758 = vmatmul.msk.f32.gmra.mxu2 %vm346_vm1, %v8968_v4  ;;  %7824 = vmatmul.msk.f32.gmra.mxu3 %vm346_vm1, %v8971_v5 }
  0x9e   : > { %v8981_v6 = vpop.f32.mrf.mxu2  ;;  %v8983_v7 = vpop.f32.mrf.mxu3 }
  0x9f   : > { %12332 = vst [vmem:[#allocation10_spill] sm:$0xff] %v8981_v6  ;;  %v470_v8 = vpop.f32.mrf.mxu0  ;;  %v676_v9 = vpop.f32.mrf.mxu1 }
  0xa0   : > { %12333 = vst [vmem:[#allocation11_spill] sm:$0xff] %v8983_v7  ;;  %v677_v14 = vadd.f32 %v676_v9, %v464_v58  ;;  %v9006_v7 = vld [vmem:[%s8693_s16 + $0xca] sm:$0xff] }
  0xa1   : > { %12336 = vst [vmem:[#allocation14_spill] sm:$0xff] %v9006_v7 }
  0xa2   : > { %7694 = vmatmul.msk.f32.gmra.mxu0 %vm346_vm1, %v8986_v10  ;;  %7725 = vmatmul.msk.f32.gmra.mxu1 %vm346_vm1, %v8948_v62  ;;  %v9074_v62 = vld [vmem:[%s8693_s16 + $0x108] sm:$0xff] }
  0xa3   : > { %7759 = vmatmul.msk.f32.gmra.mxu2 %vm346_vm1, %v8989_v11  ;;  %7825 = vmatmul.msk.f32.gmra.mxu3 %vm346_vm1, %v8992_v12  ;;  %12346 = vst [vmem:[#allocation24_spill] sm:$0xff] %v9074_v62 }
  0xa6   : > { %v922_v15 = vpop.f32.mrf.mxu2  ;;  %v1201_v16 = vpop.f32.mrf.mxu3 }
  0xa7   : > { %v1018_v18 = vadd.f32 %v922_v15, %v677_v14  ;;  %v473_v19 = vpop.f32.mrf.mxu0  ;;  %v679_v20 = vpop.f32.mrf.mxu1 }
  0xa8   : > { %v680_v58 = vadd.f32 %v679_v20, %v467_v1 }
  0xa9   : > { %v9011_v6 = vadd.f32 %v1201_v16, %v1018_v18  ;;  %v9022_v18 = vld [vmem:[%s8693_s16 + $0xf1] sm:$0xff] }
  0xaa   : > { %7695 = vmatmul.msk.f32.gmra.mxu0 %vm346_vm1, %v9003_v45  ;;  %7726 = vmatmul.msk.f32.gmra.mxu1 %vm346_vm1, %v8971_v5  ;;  %v9028_v5 = vld [vmem:[%s8693_s16 + $0xf0] sm:$0xff] }
  0xab   : > { %12338 = vst [vmem:[#allocation16_spill] sm:$0xff] %v9011_v6  ;;  %7760 = vmatmul.msk.f32.gmra.mxu2 %vm346_vm1, %v9006_v7  ;;  %7826 = vmatmul.msk.f32.gmra.mxu3 %vm346_vm1, %v9009_v0  ;;  %v9025_v6 = vld [vmem:[%s8693_s16 + $0xda] sm:$0xff] }
  0xac   : > { %12339 = vst [vmem:[#allocation17_spill] sm:$0xff] %v9025_v6 }
  0xad   : > { %12340 = vst [vmem:[#allocation18_spill] sm:$0xff] %v9028_v5 }
  0xae   : > { %v925_v9 = vpop.f32.mrf.mxu2  ;;  %v1204_v14 = vpop.f32.mrf.mxu3 }
  0xaf   : > { %v1019_v15 = vadd.f32 %v925_v9, %v680_v58  ;;  %v476_v11 = vpop.f32.mrf.mxu0  ;;  %v682_v16 = vpop.f32.mrf.mxu1 }
  0xb0   : > { %v683_v1 = vadd.f32 %v682_v16, %v470_v8  ;;  %v8071_v8 = vld [vmem:[%s12261_s1 + $0x1c] sm:$0x7] }
  0xb1   : > { %v9030_v4 = vadd.f32 %v1204_v14, %v1019_v15  ;;  %v9041_v14 = vld [vmem:[%s8693_s16 + $0xf9] sm:$0xff]  ;;  %v9044_v15 = vld [vmem:[%s8693_s16 + $0xe2] sm:$0xff]  ;;  %8072 = vmatpush.msk.msra.mxu3 %vm443_vm0, %v8071_v8 }
  0xb2   : > { %7696 = vmatmul.msk.f32.gmra.mxu0 %vm346_vm1, %v9022_v18  ;;  %7727 = vmatmul.msk.f32.gmra.mxu1 %vm346_vm1, %v8992_v12  ;;  %12342 = vst [vmem:[#allocation20_spill] sm:$0xff] %v9044_v15 }
  0xb3   : > { %12341 = vst [vmem:[#allocation19_spill] sm:$0xff] %v9030_v4  ;;  %7761 = vmatmul.msk.f32.gmra.mxu2 %vm346_vm1, %v9025_v6  ;;  %7827 = vmatmul.msk.f32.gmra.mxu3 %vm346_vm1, %v9028_v5  ;;  %v9047_v4 = vld [vmem:[%s8693_s16 + $0xf8] sm:$0xff] }
  0xb4   : > { %12343 = vst [vmem:[#allocation21_spill] sm:$0xff] %v9047_v4  ;;  %v8005_v6 = vld [vmem:[%s12261_s1 + $0x18] sm:$0x7] }
  0xb5   : > { %8006 = vmatpush.msk.msra.mxu2 %vm443_vm0, %v8005_v6 }
  0xb6   : > { %v928_v20 = vpop.f32.mrf.mxu2  ;;  %v1207_v58 = vpop.f32.mrf.mxu3 }
  0xb7   : > { %v1020_v9 = vadd.f32 %v928_v20, %v683_v1  ;;  %v479_v7 = vpop.f32.mrf.mxu0  ;;  %v685_v63 = vpop.f32.mrf.mxu1 }
  0xb8   : > { %v686_v16 = vadd.f32 %v685_v63, %v473_v19  ;;  %v8137_v63 = vld [vmem:[%s12261_s1 + $0x20] sm:$0x7] }
  0xb9   : > { %v9049_v12 = vadd.f32 %v1207_v58, %v1020_v9  ;;  %8138 = vmatpush.msk.msra.mxu0 %vm443_vm0, %v8137_v63 }
  0xba   : > { %7697 = vmatmul.msk.f32.gmra.mxu0 %vm346_vm1, %v9041_v14  ;;  %7728 = vmatmul.msk.f32.gmra.mxu1 %vm346_vm1, %v9009_v0  ;;  %v9068_v0 = vld [vmem:[%s8693_s16 + $0x109] sm:$0xff] }
  0xbb   : > { %12344 = vst [vmem:[#allocation22_spill] sm:$0xff] %v9049_v12  ;;  %7762 = vmatmul.msk.f32.gmra.mxu2 %vm346_vm1, %v9044_v15  ;;  %7828 = vmatmul.msk.f32.gmra.mxu3 %vm346_vm1, %v9047_v4  ;;  %v9071_v15 = vld [vmem:[%s8693_s16 + $0xf2] sm:$0xff] }
  0xbc   : > { %12345 = vst [vmem:[#allocation23_spill] sm:$0xff] %v9071_v15 }
  0xbe   : > { %v931_v1 = vpop.f32.mrf.mxu2  ;;  %v1210_v20 = vpop.f32.mrf.mxu3 }
  0xbf   : > { %v1021_v58 = vadd.f32 %v931_v1, %v686_v16  ;;  %v482_v9 = vpop.f32.mrf.mxu0  ;;  %v688_v12 = vpop.f32.mrf.mxu1 }
  0xc0   : > { %v689_v6 = vadd.f32 %v688_v12, %v476_v11 }
  0xc1   : > { %v9076_v61 = vadd.f32 %v1210_v20, %v1021_v58  ;;  %v9091_v58 = vld [vmem:[%s8693_s16 + $0x111] sm:$0xff] }
  0xc2   : > { %7698 = vmatmul.msk.f32.gmra.mxu0 %vm346_vm1, %v9068_v0  ;;  %7729 = vmatmul.msk.f32.gmra.mxu1 %vm346_vm1, %v9028_v5  ;;  %12348 = vst [vmem:[#allocation26_spill] sm:$0xff] %v9091_v58 }
  0xc3   : > { %12347 = vst [vmem:[#allocation25_spill] sm:$0xff] %v9076_v61  ;;  %7763 = vmatmul.msk.f32.gmra.mxu2 %vm346_vm1, %v9071_v15  ;;  %7829 = vmatmul.msk.f32.gmra.mxu3 %vm346_vm1, %v9074_v62  ;;  %v9094_v61 = vld [vmem:[%s8693_s16 + $0xfa] sm:$0xff]  ;;  %v9097_v15 = vld [vmem:[%s8693_s16 + $0x110] sm:$0xff] }
  0xc4   : > { %12349 = vst [vmem:[#allocation27_spill] sm:$0xff] %v9094_v61 }
  0xc6   : > { %v934_v19 = vpop.f32.mrf.mxu2  ;;  %v1213_v8 = vpop.f32.mrf.mxu3 }
  0xc7   : > { %v1022_v16 = vadd.f32 %v934_v19, %v689_v6  ;;  %v485_v1 = vpop.f32.mrf.mxu0  ;;  %v691_v20 = vpop.f32.mrf.mxu1 }
  0xc8   : > { %v692_v11 = vadd.f32 %v691_v20, %v479_v7 }
  0xc9   : > { %v9099_v5 = vadd.f32 %v1213_v8, %v1022_v16  ;;  %v9110_v16 = vld [vmem:[%s8693_s16 + $0x121] sm:$0xff] }
  0xca   : > { %7699 = vmatmul.msk.f32.gmra.mxu0 %vm346_vm1, %v9091_v58  ;;  %7730 = vmatmul.msk.f32.gmra.mxu1 %vm346_vm1, %v9047_v4  ;;  %12351 = vst [vmem:[#allocation29_spill] sm:$0xff] %v9110_v16  ;;  %v9116_v4 = vld [vmem:[%s8693_s16 + $0x120] sm:$0xff] }
  0xcb   : > { %12350 = vst [vmem:[#allocation28_spill] sm:$0xff] %v9099_v5  ;;  %7764 = vmatmul.msk.f32.gmra.mxu2 %vm346_vm1, %v9094_v61  ;;  %7830 = vmatmul.msk.f32.gmra.mxu3 %vm346_vm1, %v9097_v15  ;;  %v9113_v5 = vld [vmem:[%s8693_s16 + $0x10a] sm:$0xff] }
  0xcc   : > { %12352 = vst [vmem:[#allocation30_spill] sm:$0xff] %v9113_v5 }
  0xcd   : > { %12353 = vst [vmem:[#allocation31_spill] sm:$0xff] %v9116_v4 }
  0xce   : > { %v937_v12 = vpop.f32.mrf.mxu2  ;;  %v1216_v63 = vpop.f32.mrf.mxu3 }
  0xcf   : > { %v1023_v6 = vadd.f32 %v937_v12, %v692_v11  ;;  %v488_v19 = vpop.f32.mrf.mxu0  ;;  %v694_v8 = vpop.f32.mrf.mxu1 }
  0xd0   : > { %v695_v7 = vadd.f32 %v694_v8, %v482_v9 }
  0xd1   : > { %v9118_v58 = vadd.f32 %v1216_v63, %v1023_v6  ;;  %v9129_v6 = vld [vmem:[%s8693_s16 + $0x129] sm:$0xff] }
  0xd2   : > { %7700 = vmatmul.msk.f32.gmra.mxu0 %vm346_vm1, %v9110_v16  ;;  %7731 = vmatmul.msk.f32.gmra.mxu1 %vm346_vm1, %v9074_v62  ;;  %12355 = vst [vmem:[#allocation33_spill] sm:$0xff] %v9129_v6  ;;  %v9135_v16 = vld [vmem:[%s8693_s16 + $0x128] sm:$0xff] }
  0xd3   : > { %12354 = vst [vmem:[#allocation32_spill] sm:$0xff] %v9118_v58  ;;  %7765 = vmatmul.msk.f32.gmra.mxu2 %vm346_vm1, %v9113_v5  ;;  %7831 = vmatmul.msk.f32.gmra.mxu3 %vm346_vm1, %v9116_v4  ;;  %v9132_v58 = vld [vmem:[%s8693_s16 + $0x112] sm:$0xff] }
  0xd4   : > { %12356 = vst [vmem:[#allocation34_spill] sm:$0xff] %v9132_v58 }
  0xd6   : > { %v940_v20 = vpop.f32.mrf.mxu2  ;;  %v1219_v11 = vpop.f32.mrf.mxu3 }
  0xd7   : > { %v1024_v12 = vadd.f32 %v940_v20, %v695_v7  ;;  %v491_v61 = vpop.f32.mrf.mxu0  ;;  %v697_v63 = vpop.f32.mrf.mxu1 }
  0xd8   : > { %v698_v9 = vadd.f32 %v697_v63, %v485_v1 }
  0xd9   : > { %v9137_v62 = vadd.f32 %v1219_v11, %v1024_v12  ;;  %v9148_v12 = vld [vmem:[%s8693_s16 + $0x122] sm:$0xff] }
  0xda   : > { %7701 = vmatmul.msk.f32.gmra.mxu0 %vm346_vm1, %v9129_v6  ;;  %7732 = vmatmul.msk.f32.gmra.mxu1 %vm346_vm1, %v9097_v15  ;;  %12358 = vst [vmem:[#allocation36_spill] sm:$0xff] %v9148_v12 }
  0xdb   : > { %12357 = vst [vmem:[#allocation35_spill] sm:$0xff] %v9137_v62  ;;  %7766 = vmatmul.msk.f32.gmra.mxu2 %vm346_vm1, %v9132_v58  ;;  %7832 = vmatmul.msk.f32.gmra.mxu3 %vm346_vm1, %v9135_v16  ;;  %v9151_v62 = vld [vmem:[%s8693_s16 + $0x138] sm:$0xff] }
  0xdc   : > { %12359 = vst [vmem:[#allocation37_spill] sm:$0xff] %v9151_v62 }
  0xde   : > { %v943_v8 = vpop.f32.mrf.mxu2  ;;  %v1222_v7 = vpop.f32.mrf.mxu3 }
  0xdf   : > { %v1025_v20 = vadd.f32 %v943_v8, %v698_v9  ;;  %v494_v5 = vpop.f32.mrf.mxu0  ;;  %v700_v11 = vpop.f32.mrf.mxu1 }
  0xe0   : > { %v701_v1 = vadd.f32 %v700_v11, %v488_v19 }
  0xe1   : > { %v9153_v6 = vadd.f32 %v1222_v7, %v1025_v20  ;;  %v9164_v20 = vld [vmem:[%s8693_s16 + $0x12a] sm:$0xff] }
  0xe2   : > { %7733 = vmatmul.msk.f32.gmra.mxu1 %vm346_vm1, %v9116_v4  ;;  %7875 = vmatmul.msk.f32.vlgmr.msrb.gmra.mxu0 %vm346_vm1, %v8712_v13  ;;  %12361 = vst [vmem:[#allocation39_spill] sm:$0xff] %v9164_v20 }
  0xe3   : > { %12360 = vst [vmem:[#allocation38_spill] sm:$0xff] %v9153_v6  ;;  %7767 = vmatmul.msk.f32.gmra.mxu2 %vm346_vm1, %v9148_v12  ;;  %7833 = vmatmul.msk.f32.gmra.mxu3 %vm346_vm1, %v9151_v62  ;;  %v9167_v6 = vld [vmem:[%s8693_s16 + $0x140] sm:$0xff] }
  0xe4   : > { %12362 = vst [vmem:[#allocation40_spill] sm:$0xff] %v9167_v6 }
  0xe6   : > { %v946_v63 = vpop.f32.mrf.mxu2  ;;  %v1225_v9 = vpop.f32.mrf.mxu3 }
  0xe7   : > { %v1026_v8 = vadd.f32 %v946_v63, %v701_v1  ;;  %v497_v58 = vpop.f32.mrf.mxu0  ;;  %v703_v7 = vpop.f32.mrf.mxu1 }
  0xe8   : > { %v704_v13 = vadd.f32 %v703_v7, %v491_v61 }
  0xe9   : > { %v9169_v4 = vadd.f32 %v1225_v9, %v1026_v8  ;;  %v9180_v8 = vld [vmem:[%s8693_s16 + $0x13a] sm:$0xff] }
  0xea   : > { %7734 = vmatmul.msk.f32.gmra.mxu1 %vm346_vm1, %v9135_v16  ;;  %7876 = vmatmul.msk.f32.gmra.mxu0 %vm346_vm1, %v8723_v17  ;;  %12364 = vst [vmem:[#allocation42_spill] sm:$0xff] %v9180_v8 }
  0xeb   : > { %12363 = vst [vmem:[#allocation41_spill] sm:$0xff] %v9169_v4  ;;  %7768 = vmatmul.msk.f32.gmra.mxu2 %vm346_vm1, %v9164_v20  ;;  %7834 = vmatmul.msk.f32.gmra.mxu3 %vm346_vm1, %v9167_v6  ;;  %v9183_v4 = vld [vmem:[%s8693_s16 + $0x150] sm:$0xff] }
  0xec   : > { %12365 = vst [vmem:[#allocation43_spill] sm:$0xff] %v9183_v4 }
  0xee   : > { %v949_v19 = vpop.f32.mrf.mxu2  ;;  %v1228_v11 = vpop.f32.mrf.mxu3 }
  0xef   : > { %v1027_v1 = vadd.f32 %v949_v19, %v704_v13  ;;  %v500_v63 = vpop.f32.mrf.mxu0  ;;  %v706_v9 = vpop.f32.mrf.mxu1 }
  0xf0   : > { %v707_v17 = vadd.f32 %v706_v9, %v494_v5 }
  0xf1   : > { %v9185_v12 = vadd.f32 %v1228_v11, %v1027_v1  ;;  %v9196_v1 = vld [vmem:[%s8693_s16 + $0x142] sm:$0xff] }
  0xf2   : > { %7735 = vmatmul.msk.f32.gmra.mxu1 %vm346_vm1, %v9151_v62  ;;  %7877 = vmatmul.msk.f32.gmra.mxu0 %vm346_vm1, %v8734_v21  ;;  %12367 = vst [vmem:[#allocation45_spill] sm:$0xff] %v9196_v1 }
  0xf3   : > { %12366 = vst [vmem:[#allocation44_spill] sm:$0xff] %v9185_v12  ;;  %7769 = vmatmul.msk.f32.gmra.mxu2 %vm346_vm1, %v9180_v8  ;;  %7835 = vmatmul.msk.f32.gmra.mxu3 %vm346_vm1, %v9183_v4  ;;  %v9199_v12 = vld [vmem:[%s8693_s16 + $0x158] sm:$0xff] }
  0xf4   : > { %12368 = vst [vmem:[#allocation46_spill] sm:$0xff] %v9199_v12 }
  0xf6   : > { %v952_v61 = vpop.f32.mrf.mxu2  ;;  %v1231_v7 = vpop.f32.mrf.mxu3 }
  0xf7   : > { %v1028_v13 = vadd.f32 %v952_v61, %v707_v17  ;;  %v503_v19 = vpop.f32.mrf.mxu0  ;;  %v709_v11 = vpop.f32.mrf.mxu1 }
  0xf8   : > { %v710_v5 = vadd.f32 %v709_v11, %v497_v58 }
  0xf9   : > { %v9201_v20 = vadd.f32 %v1231_v7, %v1028_v13  ;;  %v9212_v13 = vld [vmem:[%s8693_s16 + $0x152] sm:$0xff] }
  0xfa   : > { %7736 = vmatmul.msk.f32.gmra.mxu1 %vm346_vm1, %v9167_v6  ;;  %7878 = vmatmul.msk.f32.gmra.mxu0 %vm346_vm1, %v8750_v24  ;;  %12370 = vst [vmem:[#allocation48_spill] sm:$0xff] %v9212_v13 }
  0xfb   : > { %12369 = vst [vmem:[#allocation47_spill] sm:$0xff] %v9201_v20  ;;  %7770 = vmatmul.msk.f32.gmra.mxu2 %vm346_vm1, %v9196_v1  ;;  %7836 = vmatmul.msk.f32.gmra.mxu3 %vm346_vm1, %v9199_v12  ;;  %v9215_v20 = vld [vmem:[%s8693_s16 + $0x168] sm:$0xff] }
  0xfe   : > { %v955_v9 = vpop.f32.mrf.mxu2  ;;  %v1234_v17 = vpop.f32.mrf.mxu3 }
  0xff   : > { %v1029_v61 = vadd.f32 %v955_v9, %v710_v5  ;;  %v506_v8 = vpop.f32.mrf.mxu0  ;;  %v712_v7 = vpop.f32.mrf.mxu1 }
 0x100   : > { %v713_v58 = vadd.f32 %v712_v7, %v500_v63 }
 0x101   : > { %v9217_v6 = vadd.f32 %v1234_v17, %v1029_v61  ;;  %v9228_v61 = vld [vmem:[%s8693_s16 + $0x15a] sm:$0xff] }
 0x102   : > { %7737 = vmatmul.msk.f32.gmra.mxu1 %vm346_vm1, %v9183_v4  ;;  %7879 = vmatmul.msk.f32.gmra.mxu0 %vm346_vm1, %v8766_v27  ;;  %12372 = vst [vmem:[#allocation50_spill] sm:$0xff] %v9228_v61 }
 0x103   : > { %12371 = vst [vmem:[#allocation49_spill] sm:$0xff] %v9217_v6  ;;  %7771 = vmatmul.msk.f32.gmra.mxu2 %vm346_vm1, %v9212_v13  ;;  %7837 = vmatmul.msk.f32.gmra.mxu3 %vm346_vm1, %v9215_v20  ;;  %v9231_v6 = vld [vmem:[%s8693_s16 + $0x170] sm:$0xff] }
 0x106   : > { %v958_v11 = vpop.f32.mrf.mxu2  ;;  %v1237_v5 = vpop.f32.mrf.mxu3 }
 0x107   : > { %v1030_v9 = vadd.f32 %v958_v11, %v713_v58  ;;  %v509_v1 = vpop.f32.mrf.mxu0  ;;  %v715_v17 = vpop.f32.mrf.mxu1 }
 0x108   : > { %v716_v63 = vadd.f32 %v715_v17, %v503_v19 }
 0x109   : > { %v9233_v4 = vadd.f32 %v1237_v5, %v1030_v9  ;;  %v9244_v9 = vld [vmem:[%s8693_s16 + $0x16a] sm:$0xff] }
 0x10a   : > { %7738 = vmatmul.msk.f32.gmra.mxu1 %vm346_vm1, %v9199_v12  ;;  %7880 = vmatmul.msk.f32.gmra.mxu0 %vm346_vm1, %v8783_v30  ;;  %12374 = vst [vmem:[#allocation52_spill] sm:$0xff] %v9244_v9 }
 0x10b   : > { %12373 = vst [vmem:[#allocation51_spill] sm:$0xff] %v9233_v4  ;;  %7772 = vmatmul.msk.f32.gmra.mxu2 %vm346_vm1, %v9228_v61  ;;  %7838 = vmatmul.msk.f32.gmra.mxu3 %vm346_vm1, %v9231_v6  ;;  %v9247_v4 = vld [vmem:[%s8693_s16 + $0x180] sm:$0xff] }
 0x10c   : > { %12375 = vst [vmem:[#allocation53_spill] sm:$0xff] %v9247_v4 }
 0x10e   : > { %v961_v7 = vpop.f32.mrf.mxu2  ;;  %v1240_v58 = vpop.f32.mrf.mxu3 }
 0x10f   : > { %v1031_v11 = vadd.f32 %v961_v7, %v716_v63  ;;  %v512_v13 = vpop.f32.mrf.mxu0  ;;  %v718_v5 = vpop.f32.mrf.mxu1 }
 0x110   : > { %v719_v19 = vadd.f32 %v718_v5, %v506_v8 }
 0x111   : > { %v9249_v12 = vadd.f32 %v1240_v58, %v1031_v11  ;;  %v9260_v58 = vld [vmem:[%s8693_s16 + $0x172] sm:$0xff]  ;;  %v9263_v11 = vld [vmem:[%s8693_s16 + $0x188] sm:$0xff] }
 0x112   : > { %7739 = vmatmul.msk.f32.gmra.mxu1 %vm346_vm1, %v9215_v20  ;;  %7881 = vmatmul.msk.f32.gmra.mxu0 %vm346_vm1, %v8800_v33 }
 0x113   : > { %12376 = vst [vmem:[#allocation54_spill] sm:$0xff] %v9249_v12  ;;  %7773 = vmatmul.msk.f32.gmra.mxu2 %vm346_vm1, %v9244_v9  ;;  %7839 = vmatmul.msk.f32.gmra.mxu3 %vm346_vm1, %v9247_v4 }
 0x116   : > { %v964_v17 = vpop.f32.mrf.mxu2  ;;  %v1243_v63 = vpop.f32.mrf.mxu3 }
 0x117   : > { %v1032_v7 = vadd.f32 %v964_v17, %v719_v19  ;;  %v515_v61 = vpop.f32.mrf.mxu0  ;;  %v721_v62 = vpop.f32.mrf.mxu1 }
 0x118   : > { %v722_v8 = vadd.f32 %v721_v62, %v509_v1 }
 0x119   : > { %v9265_v12 = vadd.f32 %v1243_v63, %v1032_v7 }
 0x11a   : > { %7740 = vmatmul.msk.f32.gmra.mxu1 %vm346_vm1, %v9231_v6  ;;  %7882 = vmatmul.msk.f32.gmra.mxu0 %vm346_vm1, %v8817_v36 }
 0x11b   : > { %12377 = vst [vmem:[#allocation55_spill] sm:$0xff] %v9265_v12  ;;  %7774 = vmatmul.msk.f32.gmra.mxu2 %vm346_vm1, %v9260_v58  ;;  %7840 = vmatmul.msk.f32.gmra.mxu3 %vm346_vm1, %v9263_v11 }
 0x11e   : > { %v967_v5 = vpop.f32.mrf.mxu2  ;;  %v1246_v19 = vpop.f32.mrf.mxu3 }
 0x11f   : > { %v1033_v17 = vadd.f32 %v967_v5, %v722_v8  ;;  %v518_v4 = vpop.f32.mrf.mxu0  ;;  %v724_v9 = vpop.f32.mrf.mxu1 }
 0x120   : > { %v725_v62 = vadd.f32 %v724_v9, %v512_v13 }
 0x121   : > { %v9275_v63 = vadd.f32 %v1246_v19, %v1033_v17 }
 0x122   : > { %7883 = vmatmul.msk.f32.gmra.mxu0 %vm346_vm1, %v8834_v39  ;;  %7941 = vmatmul.msk.f32.vlgmr.msra.gmra.mxu1 %vm346_vm1, %v8737_v22 }
 0x123   : > { %8007 = vmatmul.msk.f32.vlgmr.msra.gmra.mxu2 %vm346_vm1, %v8740_v23  ;;  %8073 = vmatmul.msk.f32.vlgmr.msra.gmra.mxu3 %vm346_vm1, %v8734_v21 }
 0x126   : > { %v970_v1 = vpop.f32.mrf.mxu2  ;;  %v1249_v7 = vpop.f32.mrf.mxu3 }
 0x127   : > { %v1034_v8 = vadd.f32 %v970_v1, %v725_v62  ;;  %v521_v5 = vpop.f32.mrf.mxu0  ;;  %v727_v12 = vpop.f32.mrf.mxu1 }
 0x128   : > { %v728_v21 = vadd.f32 %v727_v12, %v515_v61 }
 0x129   : > { %v9285_v19 = vadd.f32 %v1249_v7, %v1034_v8 }
 0x12a   : > { %7884 = vmatmul.msk.f32.gmra.mxu0 %vm346_vm1, %v8851_v42  ;;  %7942 = vmatmul.msk.f32.gmra.mxu1 %vm346_vm1, %v8753_v25 }
 0x12b   : > { %8008 = vmatmul.msk.f32.gmra.mxu2 %vm346_vm1, %v8756_v26  ;;  %8074 = vmatmul.msk.f32.gmra.mxu3 %vm346_vm1, %v8750_v24 }
 0x12e   : > { %v973_v22 = vpop.f32.mrf.mxu2  ;;  %v1252_v23 = vpop.f32.mrf.mxu3 }
 0x12f   : > { %v1035_v13 = vadd.f32 %v973_v22, %v728_v21  ;;  %v524_v9 = vpop.f32.mrf.mxu0  ;;  %v730_v17 = vpop.f32.mrf.mxu1 }
 0x130   : > { %v731_v24 = vadd.f32 %v730_v17, %v518_v4 }
 0x131   : > { %v9295_v62 = vadd.f32 %v1252_v23, %v1035_v13 }
 0x132   : > { %7885 = vmatmul.msk.f32.gmra.mxu0 %vm346_vm1, %v8872_v46  ;;  %7943 = vmatmul.msk.f32.gmra.mxu1 %vm346_vm1, %v8769_v28 }
 0x133   : > { %8009 = vmatmul.msk.f32.gmra.mxu2 %vm346_vm1, %v8772_v29  ;;  %8075 = vmatmul.msk.f32.gmra.mxu3 %vm346_vm1, %v8766_v27 }
 0x136   : > { %v976_v25 = vpop.f32.mrf.mxu2  ;;  %v1255_v26 = vpop.f32.mrf.mxu3 }
 0x137   : > { %v1036_v12 = vadd.f32 %v976_v25, %v731_v24  ;;  %v527_v61 = vpop.f32.mrf.mxu0  ;;  %v733_v1 = vpop.f32.mrf.mxu1 }
 0x138   : > { %v734_v27 = vadd.f32 %v733_v1, %v521_v5 }
 0x139   : > { %v9305_v7 = vadd.f32 %v1255_v26, %v1036_v12 }
 0x13a   : > { %7886 = vmatmul.msk.f32.gmra.mxu0 %vm346_vm1, %v8889_v49  ;;  %7944 = vmatmul.msk.f32.gmra.mxu1 %vm346_vm1, %v8786_v31 }
 0x13b   : > { %8010 = vmatmul.msk.f32.gmra.mxu2 %vm346_vm1, %v8789_v32  ;;  %8076 = vmatmul.msk.f32.gmra.mxu3 %vm346_vm1, %v8783_v30 }
 0x13e   : > { %v979_v28 = vpop.f32.mrf.mxu2  ;;  %v1258_v29 = vpop.f32.mrf.mxu3 }
 0x13f   : > { %v1037_v4 = vadd.f32 %v979_v28, %v734_v27  ;;  %v530_v8 = vpop.f32.mrf.mxu0  ;;  %v736_v21 = vpop.f32.mrf.mxu1 }
 0x140   : > { %v737_v30 = vadd.f32 %v736_v21, %v524_v9 }
 0x141   : > { %v9315_v22 = vadd.f32 %v1258_v29, %v1037_v4 }
 0x142   : > { %7887 = vmatmul.msk.f32.gmra.mxu0 %vm346_vm1, %v8906_v52  ;;  %7945 = vmatmul.msk.f32.gmra.mxu1 %vm346_vm1, %v8803_v34 }
 0x143   : > { %12378 = vst [vmem:[#allocation56_spill] sm:$0xff] %v9315_v22  ;;  %8011 = vmatmul.msk.f32.gmra.mxu2 %vm346_vm1, %v8806_v35  ;;  %8077 = vmatmul.msk.f32.gmra.mxu3 %vm346_vm1, %v8800_v33 }
 0x146   : > { %v982_v31 = vpop.f32.mrf.mxu2  ;;  %v1261_v32 = vpop.f32.mrf.mxu3 }
 0x147   : > { %v1038_v5 = vadd.f32 %v982_v31, %v737_v30  ;;  %v533_v23 = vpop.f32.mrf.mxu0  ;;  %v739_v13 = vpop.f32.mrf.mxu1 }
 0x148   : > { %v740_v33 = vadd.f32 %v739_v13, %v527_v61 }
 0x149   : > { %v9325_v17 = vadd.f32 %v1261_v32, %v1038_v5 }
 0x14a   : > { %7888 = vmatmul.msk.f32.gmra.mxu0 %vm346_vm1, %v8923_v55  ;;  %7946 = vmatmul.msk.f32.gmra.mxu1 %vm346_vm1, %v8820_v37 }
 0x14b   : > { %12379 = vst [vmem:[#allocation57_spill] sm:$0xff] %v9325_v17  ;;  %8012 = vmatmul.msk.f32.gmra.mxu2 %vm346_vm1, %v8823_v38  ;;  %8078 = vmatmul.msk.f32.gmra.mxu3 %vm346_vm1, %v8817_v36 }
 0x14e   : > { %v985_v34 = vpop.f32.mrf.mxu2  ;;  %v1264_v35 = vpop.f32.mrf.mxu3 }
 0x14f   : > { %v1039_v9 = vadd.f32 %v985_v34, %v740_v33  ;;  %v536_v24 = vpop.f32.mrf.mxu0  ;;  %v742_v25 = vpop.f32.mrf.mxu1  ;;  %v8172_v33 = vld [vmem:[%s12263_s3 + $0x18] sm:$0xff] }
 0x150   : > { %v743_v36 = vadd.f32 %v742_v25, %v530_v8  ;;  %3051 = vmatpush.msrb.mxu1 %v8172_v33  ;;  %v12398_v33 = vld [vmem:[#allocation13_spill] sm:$0xff] }
 0x151   : > { %v9335_v26 = vadd.f32 %v1264_v35, %v1039_v9 }
 0x152   : > { %7889 = vmatmul.msk.f32.gmra.mxu0 %vm346_vm1, %v8942_v60  ;;  %7947 = vmatmul.msk.f32.gmra.mxu1 %vm346_vm1, %v8837_v40 }
 0x153   : > { %12380 = vst [vmem:[#allocation58_spill] sm:$0xff] %v9335_v26  ;;  %8013 = vmatmul.msk.f32.gmra.mxu2 %vm346_vm1, %v8840_v41  ;;  %8079 = vmatmul.msk.f32.gmra.mxu3 %vm346_vm1, %v8834_v39 }
 0x156   : > { %v988_v37 = vpop.f32.mrf.mxu2  ;;  %v1267_v38 = vpop.f32.mrf.mxu3 }
 0x157   : > { %v1040_v12 = vadd.f32 %v988_v37, %v743_v36  ;;  %v539_v61 = vpop.f32.mrf.mxu0  ;;  %v745_v1 = vpop.f32.mrf.mxu1 }
 0x158   : > { %v746_v39 = vadd.f32 %v745_v1, %v533_v23 }
 0x159   : > { %v9345_v27 = vadd.f32 %v1267_v38, %v1040_v12 }
 0x15a   : > { %7890 = vmatmul.msk.f32.gmra.mxu0 %vm346_vm1, %v8965_v3  ;;  %7948 = vmatmul.msk.f32.gmra.mxu1 %vm346_vm1, %v8854_v43 }
 0x15b   : > { %12381 = vst [vmem:[#allocation59_spill] sm:$0xff] %v9345_v27  ;;  %8014 = vmatmul.msk.f32.gmra.mxu2 %vm346_vm1, %v8857_v44  ;;  %8080 = vmatmul.msk.f32.gmra.mxu3 %vm346_vm1, %v8851_v42 }
 0x15e   : > { %v991_v40 = vpop.f32.mrf.mxu2  ;;  %v1270_v41 = vpop.f32.mrf.mxu3 }
 0x15f   : > { %v1041_v28 = vadd.f32 %v991_v40, %v746_v39  ;;  %v748_v29 = vpop.f32.mrf.mxu1  ;;  %v9355_v4 = vpop.f32.mrf.mxu0 }
 0x160   : > { %v749_v42 = vadd.f32 %v748_v29, %v536_v24  ;;  %v12392_v29 = vld [vmem:[#allocation8_spill] sm:$0xff] }
 0x161   : > { %v9357_v8 = vadd.f32 %v1270_v41, %v1041_v28  ;;  %v12391_v28 = vld [vmem:[#allocation26_spill] sm:$0xff] }
 0x162   : > { %7891 = vmatmul.msk.f32.gmra.mxu0 %vm346_vm1, %v8986_v10  ;;  %7949 = vmatmul.msk.f32.gmra.mxu1 %vm346_vm1, %v8875_v47 }
 0x163   : > { %12382 = vst [vmem:[#allocation60_spill] sm:$0xff] %v9357_v8  ;;  %8015 = vmatmul.msk.f32.gmra.mxu2 %vm346_vm1, %v8878_v48  ;;  %8081 = vmatmul.msk.f32.gmra.mxu3 %vm346_vm1, %v8872_v46 }
 0x166   : > { %v994_v43 = vpop.f32.mrf.mxu2  ;;  %v1273_v44 = vpop.f32.mrf.mxu3 }
 0x167   : > { %v1042_v21 = vadd.f32 %v994_v43, %v749_v42  ;;  %v751_v30 = vpop.f32.mrf.mxu1  ;;  %v9367_v31 = vpop.f32.mrf.mxu0  ;;  %v12393_v42 = vld [vmem:[#allocation9_spill] sm:$0xff] }
 0x168   : > { %v752_v46 = vadd.f32 %v751_v30, %v539_v61 }
 0x169   : > { %v9369_v32 = vadd.f32 %v1273_v44, %v1042_v21 }
 0x16a   : > { %7892 = vmatmul.msk.f32.gmra.mxu0 %vm346_vm1, %v9003_v45  ;;  %7950 = vmatmul.msk.f32.gmra.mxu1 %vm346_vm1, %v8892_v50 }
 0x16b   : > { %12383 = vst [vmem:[#allocation61_spill] sm:$0xff] %v9369_v32  ;;  %8016 = vmatmul.msk.f32.gmra.mxu2 %vm346_vm1, %v8895_v51  ;;  %8082 = vmatmul.msk.f32.gmra.mxu3 %vm346_vm1, %v8889_v49 }
 0x16e   : > { %v997_v47 = vpop.f32.mrf.mxu2  ;;  %v1276_v48 = vpop.f32.mrf.mxu3 }
 0x16f   : > { %v1043_v5 = vadd.f32 %v997_v47, %v752_v46  ;;  %v754_v23 = vpop.f32.mrf.mxu1  ;;  %v9379_v13 = vpop.f32.mrf.mxu0 }
 0x170   : > { %v755_v49 = vadd.f32 %v754_v23, %v8939_v59  ;;  %v12397_v23 = vld [vmem:[#allocation12_spill] sm:$0xff] }
 0x171   : > { %v9384_v34 = vadd.f32 %v1276_v48, %v1043_v5  ;;  %v12396_v5 = vld [vmem:[#allocation29_spill] sm:$0xff] }
 0x172   : > { %7893 = vmatmul.msk.f32.gmra.mxu0 %vm346_vm1, %v9022_v18  ;;  %7951 = vmatmul.msk.f32.gmra.mxu1 %vm346_vm1, %v8909_v53 }
 0x173   : > { %12384 = vst [vmem:[#allocation62_spill] sm:$0xff] %v9384_v34  ;;  %8017 = vmatmul.msk.f32.gmra.mxu2 %vm346_vm1, %v8912_v54  ;;  %8083 = vmatmul.msk.f32.gmra.mxu3 %vm346_vm1, %v8906_v52 }
 0x176   : > { %v1000_v50 = vpop.f32.mrf.mxu2  ;;  %v1279_v51 = vpop.f32.mrf.mxu3 }
 0x177   : > { %v1044_v35 = vadd.f32 %v1000_v50, %v755_v49  ;;  %v757_v9 = vpop.f32.mrf.mxu1  ;;  %v9395_v24 = vpop.f32.mrf.mxu0 }
 0x178   : > { %v758_v52 = vadd.f32 %v757_v9, %v8962_v2 }
 0x179   : > { %v9397_v25 = vadd.f32 %v1279_v51, %v1044_v35 }
 0x17a   : > { %7894 = vmatmul.msk.f32.gmra.mxu0 %vm346_vm1, %v9041_v14  ;;  %7952 = vmatmul.msk.f32.gmra.mxu1 %vm346_vm1, %v8926_v56  ;;  %v12387_v56 = vld [vmem:[#allocation4_spill] sm:$0xff] }
 0x17b   : > { %12385 = vst [vmem:[#allocation63_spill] sm:$0xff] %v9397_v25  ;;  %8018 = vmatmul.msk.f32.gmra.mxu2 %vm346_vm1, %v8929_v57  ;;  %8084 = vmatmul.msk.f32.gmra.mxu3 %vm346_vm1, %v8923_v55  ;;  %v12388_v57 = vld [vmem:[#allocation5_spill] sm:$0xff]  ;;  %v12389_v55 = vld [vmem:[#allocation6_spill] sm:$0xff] }
 0x17c   : > { %v9754_v25 = vld [vmem:[%s12262_s2] ss:$0 sm:$0xff] }
 0x17e   : > { %v1003_v53 = vpop.f32.mrf.mxu2  ;;  %v1282_v54 = vpop.f32.mrf.mxu3 }
 0x17f   : > { %v1045_v59 = vadd.f32 %v1003_v53, %v758_v52  ;;  %v760_v36 = vpop.f32.mrf.mxu1  ;;  %v9408_v37 = vpop.f32.mrf.mxu0 }
 0x180   : > { %v761_v2 = vadd.f32 %v760_v36, %v12389_v55  ;;  %v12403_v36 = vld [vmem:[#allocation15_spill] sm:$0xff] }
 0x181   : > { %v9410_v38 = vadd.f32 %v1282_v54, %v1045_v59  ;;  %v12401_v54 = vld [vmem:[#allocation33_spill] sm:$0xff]  ;;  %v12402_v59 = vld [vmem:[#allocation14_spill] sm:$0xff] }
 0x182   : > { %7895 = vmatmul.msk.f32.gmra.mxu0 %vm346_vm1, %v9068_v0  ;;  %7953 = vmatmul.msk.f32.gmra.mxu1 %vm346_vm1, %v12387_v56 }
 0x183   : > { %12386 = vst [vmem:[#allocation64_spill] sm:$0xff] %v9410_v38  ;;  %8019 = vmatmul.msk.f32.gmra.mxu2 %vm346_vm1, %v12388_v57  ;;  %8085 = vmatmul.msk.f32.gmra.mxu3 %vm346_vm1, %v8942_v60  ;;  %v12394_v60 = vld [vmem:[#allocation10_spill] sm:$0xff] }
 0x186   : > { %v1006_v12 = vpop.f32.mrf.mxu2  ;;  %v1285_v61 = vpop.f32.mrf.mxu3 }
 0x187   : > { %v1046_v1 = vadd.f32 %v1006_v12, %v761_v2  ;;  %v763_v39 = vpop.f32.mrf.mxu1  ;;  %v9421_v40 = vpop.f32.mrf.mxu0 }
 0x188   : > { %v764_v43 = vadd.f32 %v763_v39, %v12394_v60  ;;  %v12408_v60 = vld [vmem:[#allocation18_spill] sm:$0xff] }
 0x189   : > { %v9423_v41 = vadd.f32 %v1285_v61, %v1046_v1  ;;  %v9463_v1 = vld [vmem:[%s8693_s16 + $0x139] sm:$0xff] }
 0x18a   : > { %7896 = vmatmul.msk.f32.gmra.mxu0 %vm346_vm1, %v12391_v28  ;;  %7954 = vmatmul.msk.f32.gmra.mxu1 %vm346_vm1, %v12392_v29  ;;  %v12406_v29 = vld [vmem:[#allocation17_spill] sm:$0xff] }
 0x18b   : > { %12390 = vst [vmem:[#allocation4_spill] sm:$0xff] %v9423_v41  ;;  %8020 = vmatmul.msk.f32.gmra.mxu2 %vm346_vm1, %v12393_v42  ;;  %8086 = vmatmul.msk.f32.gmra.mxu3 %vm346_vm1, %v8965_v3  ;;  %v12399_v3 = vld [vmem:[#allocation7_spill] sm:$0xff] }
 0x18e   : > { %v1009_v44 = vpop.f32.mrf.mxu2  ;;  %v1288_v21 = vpop.f32.mrf.mxu3 }
 0x18f   : > { %v1047_v30 = vadd.f32 %v1009_v44, %v764_v43  ;;  %v766_v46 = vpop.f32.mrf.mxu1  ;;  %v9434_v47 = vpop.f32.mrf.mxu0 }
 0x190   : > { %v767_v49 = vadd.f32 %v766_v46, %v12399_v3 }
 0x191   : > { %v9436_v48 = vadd.f32 %v1288_v21, %v1047_v30 }
 0x192   : > { %7897 = vmatmul.msk.f32.gmra.mxu0 %vm346_vm1, %v12396_v5  ;;  %7955 = vmatmul.msk.f32.gmra.mxu1 %vm346_vm1, %v12397_v23 }
 0x193   : > { %12395 = vst [vmem:[#allocation5_spill] sm:$0xff] %v9436_v48  ;;  %8021 = vmatmul.msk.f32.gmra.mxu2 %vm346_vm1, %v12398_v33  ;;  %8087 = vmatmul.msk.f32.gmra.mxu3 %vm346_vm1, %v8986_v10  ;;  %v12404_v10 = vld [vmem:[#allocation11_spill] sm:$0xff] }
 0x194   : > { %v9480_v33 = vld [vmem:[%s8693_s16 + $0x141] sm:$0xff] }
 0x196   : > { %v1012_v50 = vpop.f32.mrf.mxu2  ;;  %v1291_v51 = vpop.f32.mrf.mxu3 }
 0x197   : > { %v1048_v35 = vadd.f32 %v1012_v50, %v767_v49  ;;  %v769_v9 = vpop.f32.mrf.mxu1  ;;  %v9447_v52 = vpop.f32.mrf.mxu0  ;;  %v12410_v49 = vld [vmem:[#allocation19_spill] sm:$0xff]  ;;  %v12411_v50 = vld [vmem:[#allocation21_spill] sm:$0xff] }
 0x198   : > { %v770_v56 = vadd.f32 %v769_v9, %v12404_v10 }
 0x199   : > { %v9449_v53 = vadd.f32 %v1291_v51, %v1048_v35 }
 0x19a   : > { %7898 = vmatmul.msk.f32.gmra.mxu0 %vm346_vm1, %v12401_v54  ;;  %7956 = vmatmul.msk.f32.gmra.mxu1 %vm346_vm1, %v12402_v59 }
 0x19b   : > { %12400 = vst [vmem:[#allocation6_spill] sm:$0xff] %v9449_v53  ;;  %8022 = vmatmul.msk.f32.gmra.mxu2 %vm346_vm1, %v12403_v36  ;;  %8088 = vmatmul.msk.f32.gmra.mxu3 %vm346_vm1, %v9003_v45  ;;  %v12407_v45 = vld [vmem:[#allocation16_spill] sm:$0xff] }
 0x19c   : > { %v1575_v42 = vadd.f32 %v9355_v4, %v12407_v45  ;;  %v12409_v4 = vld [vmem:[#allocation20_spill] sm:$0xff] }
 0x19d   : > { %v8118_v53 = vld [vmem:[%s8693_s16 + $0xca] sm:$0xff] }
 0x19e   : > { %v1015_v57 = vpop.f32.mrf.mxu2  ;;  %v1294_v55 = vpop.f32.mrf.mxu3 }
 0x19f   : > { %v1049_v2 = vadd.f32 %v1015_v57, %v770_v56  ;;  %v9460_v12 = vpop.f32.mrf.mxu0  ;;  %v1757_v61 = vpop.f32.mrf.mxu1  ;;  %v9497_v56 = vld [vmem:[%s8693_s16 + $0x151] sm:$0xff] }
 0x1a0   : > { %v1853_v43 = vadd.f32 %v1757_v61, %v1575_v42 }
 0x1a1   : > { %v9465_v39 = vadd.f32 %v1294_v55, %v1049_v2  ;;  %v12413_v55 = vld [vmem:[#allocation22_spill] sm:$0xff]  ;;  %v12414_v2 = vld [vmem:[#allocation24_spill] sm:$0xff] }
 0x1a2   : > { %7899 = vmatmul.msk.f32.gmra.mxu0 %vm346_vm1, %v9463_v1  ;;  %7957 = vmatmul.msk.f32.gmra.mxu1 %vm346_vm1, %v12406_v29 }
 0x1a3   : > { %12405 = vst [vmem:[#allocation26_spill] sm:$0xff] %v9465_v39  ;;  %8023 = vmatmul.msk.f32.gmra.mxu2 %vm346_vm1, %v12408_v60  ;;  %8089 = vmatmul.msk.f32.gmra.mxu3 %vm346_vm1, %v9022_v18  ;;  %v1576_v18 = vadd.f32 %v9367_v31, %v12410_v49  ;;  %v12412_v31 = vld [vmem:[#allocation23_spill] sm:$0xff] }
 0x1a6   : > { %v2036_v44 = vpop.f32.mrf.mxu2  ;;  %v2314_v21 = vpop.f32.mrf.mxu3 }
 0x1a7   : > { %v2132_v30 = vadd.f32 %v2036_v44, %v1853_v43  ;;  %v9477_v46 = vpop.f32.mrf.mxu0  ;;  %v1760_v23 = vpop.f32.mrf.mxu1  ;;  %v9514_v44 = vld [vmem:[%s8693_s16 + $0x159] sm:$0xff] }
 0x1a8   : > { %v1854_v51 = vadd.f32 %v1760_v23, %v1576_v18 }
 0x1a9   : > { %v9482_v3 = vadd.f32 %v2314_v21, %v2132_v30  ;;  %v12416_v30 = vld [vmem:[#allocation25_spill] sm:$0xff] }
 0x1aa   : > { %7900 = vmatmul.msk.f32.gmra.mxu0 %vm346_vm1, %v9480_v33  ;;  %7958 = vmatmul.msk.f32.gmra.mxu1 %vm346_vm1, %v12409_v4 }
 0x1ab   : > { %8024 = vmatmul.msk.f32.gmra.mxu2 %vm346_vm1, %v12411_v50  ;;  %8090 = vmatmul.msk.f32.gmra.mxu3 %vm346_vm1, %v9041_v14  ;;  %v1577_v14 = vadd.f32 %v9379_v13, %v12413_v55  ;;  %v12415_v13 = vld [vmem:[#allocation27_spill] sm:$0xff] }
 0x1ae   : > { %v2039_v35 = vpop.f32.mrf.mxu2  ;;  %v2317_v9 = vpop.f32.mrf.mxu3 }
 0x1af   : > { %v2133_v59 = vadd.f32 %v2039_v35, %v1854_v51  ;;  %v9494_v36 = vpop.f32.mrf.mxu0  ;;  %v1763_v10 = vpop.f32.mrf.mxu1  ;;  %v9531_v35 = vld [vmem:[%s8693_s16 + $0x169] sm:$0xff] }
 0x1b0   : > { %v1855_v61 = vadd.f32 %v1763_v10, %v1577_v14 }
 0x1b1   : > { %v9499_v57 = vadd.f32 %v2317_v9, %v2133_v59  ;;  %v12419_v59 = vld [vmem:[#allocation31_spill] sm:$0xff] }
 0x1b2   : > { %7901 = vmatmul.msk.f32.gmra.mxu0 %vm346_vm1, %v9497_v56  ;;  %7959 = vmatmul.msk.f32.gmra.mxu1 %vm346_vm1, %v12412_v31 }
 0x1b3   : > { %8025 = vmatmul.msk.f32.gmra.mxu2 %vm346_vm1, %v12414_v2  ;;  %8091 = vmatmul.msk.f32.gmra.mxu3 %vm346_vm1, %v9068_v0  ;;  %v1578_v0 = vadd.f32 %v9395_v24, %v12416_v30  ;;  %v12417_v24 = vld [vmem:[#allocation30_spill] sm:$0xff] }
 0x1b6   : > { %v2042_v29 = vpop.f32.mrf.mxu2  ;;  %v2320_v45 = vpop.f32.mrf.mxu3 }
 0x1b7   : > { %v2134_v42 = vadd.f32 %v2042_v29, %v1855_v61  ;;  %v9511_v60 = vpop.f32.mrf.mxu0  ;;  %v1766_v43 = vpop.f32.mrf.mxu1  ;;  %v9548_v29 = vld [vmem:[%s8693_s16 + $0x171] sm:$0xff] }
 0x1b8   : > { %v1856_v23 = vadd.f32 %v1766_v43, %v1578_v0 }
 0x1b9   : > { %v9516_v21 = vadd.f32 %v2320_v45, %v2134_v42  ;;  %v12421_v42 = vld [vmem:[#allocation32_spill] sm:$0xff] }
 0x1ba   : > { %7902 = vmatmul.msk.f32.gmra.mxu0 %vm346_vm1, %v9514_v44  ;;  %7960 = vmatmul.msk.f32.gmra.mxu1 %vm346_vm1, %v12415_v13 }
 0x1bb   : > { %8026 = vmatmul.msk.f32.gmra.mxu2 %vm346_vm1, %v9097_v15  ;;  %8092 = vmatmul.msk.f32.gmra.mxu3 %vm346_vm1, %v12391_v28  ;;  %v12418_v15 = vld [vmem:[#allocation28_spill] sm:$0xff] }
 0x1bc   : > { %v1579_v28 = vadd.f32 %v9408_v37, %v12418_v15  ;;  %v12420_v37 = vld [vmem:[#allocation34_spill] sm:$0xff] }
 0x1be   : > { %v2045_v4 = vpop.f32.mrf.mxu2  ;;  %v2323_v49 = vpop.f32.mrf.mxu3 }
 0x1bf   : > { %v2135_v18 = vadd.f32 %v2045_v4, %v1856_v23  ;;  %v9528_v50 = vpop.f32.mrf.mxu0  ;;  %v1769_v51 = vpop.f32.mrf.mxu1  ;;  %v7871_v4 = vld [vmem:[%s8693_s16 + $0x181] sm:$0xff] }
 0x1c0   : > { %v1857_v10 = vadd.f32 %v1769_v51, %v1579_v28 }
 0x1c1   : > { %v9533_v9 = vadd.f32 %v2323_v49, %v2135_v18 }
 0x1c2   : > { %7903 = vmatmul.msk.f32.gmra.mxu0 %vm346_vm1, %v9531_v35  ;;  %7961 = vmatmul.msk.f32.gmra.mxu1 %vm346_vm1, %v12417_v24 }
 0x1c3   : > { %8027 = vmatmul.msk.f32.gmra.mxu2 %vm346_vm1, %v12419_v59  ;;  %8093 = vmatmul.msk.f32.gmra.mxu3 %vm346_vm1, %v12396_v5  ;;  %v1580_v5 = vadd.f32 %v9421_v40, %v12421_v42  ;;  %v12422_v40 = vld [vmem:[#allocation36_spill] sm:$0xff] }
 0x1c6   : > { %v2048_v31 = vpop.f32.mrf.mxu2  ;;  %v2326_v55 = vpop.f32.mrf.mxu3 }
 0x1c7   : > { %v2136_v14 = vadd.f32 %v2048_v31, %v1857_v10  ;;  %v9545_v2 = vpop.f32.mrf.mxu0  ;;  %v1772_v61 = vpop.f32.mrf.mxu1  ;;  %v7872_v31 = vld [vmem:[%s8693_s16 + $0x189] sm:$0xff] }
 0x1c8   : > { %v1858_v43 = vadd.f32 %v1772_v61, %v1580_v5  ;;  %v12426_v61 = vld [vmem:[#allocation38_spill] sm:$0xff] }
 0x1c9   : > { %v9550_v45 = vadd.f32 %v2326_v55, %v2136_v14 }
 0x1ca   : > { %7904 = vmatmul.msk.f32.gmra.mxu0 %vm346_vm1, %v9548_v29  ;;  %7962 = vmatmul.msk.f32.gmra.mxu1 %vm346_vm1, %v12420_v37  ;;  %v12427_v37 = vld [vmem:[#allocation40_spill] sm:$0xff] }
 0x1cb   : > { %8028 = vmatmul.msk.f32.gmra.mxu2 %vm346_vm1, %v9135_v16  ;;  %8094 = vmatmul.msk.f32.gmra.mxu3 %vm346_vm1, %v12401_v54  ;;  %v12423_v16 = vld [vmem:[#allocation35_spill] sm:$0xff]  ;;  %v12424_v54 = vld [vmem:[#allocation37_spill] sm:$0xff] }
 0x1cc   : > { %v1581_v51 = vadd.f32 %v9434_v47, %v12423_v16  ;;  %v12425_v47 = vld [vmem:[#allocation39_spill] sm:$0xff]  ;;  %v8106_v16 = vld [vmem:[%s8693_s16 + $0x3a] sm:$0xff] }
 0x1ce   : > { %v2051_v13 = vpop.f32.mrf.mxu2  ;;  %v2329_v30 = vpop.f32.mrf.mxu3 }
 0x1cf   : > { %v2137_v0 = vadd.f32 %v2051_v13, %v1858_v43  ;;  %v9562_v23 = vpop.f32.mrf.mxu0  ;;  %v1775_v49 = vpop.f32.mrf.mxu1 }
 0x1d0   : > { %v1859_v24 = vadd.f32 %v1775_v49, %v1581_v51  ;;  %v12430_v51 = vld [vmem:[#allocation45_spill] sm:$0xff] }
 0x1d1   : > { %v9565_v18 = vadd.f32 %v2329_v30, %v2137_v0  ;;  %v8105_v0 = vld [vmem:[%s8693_s16 + $0x32] sm:$0xff] }
 0x1d2   : > { %7905 = vmatmul.msk.f32.gmra.mxu0 %vm346_vm1, %v7871_v4  ;;  %7963 = vmatmul.msk.f32.gmra.mxu1 %vm346_vm1, %v12422_v40  ;;  %v12428_v40 = vld [vmem:[#allocation42_spill] sm:$0xff] }
 0x1d3   : > { %8029 = vmatmul.msk.f32.gmra.mxu2 %vm346_vm1, %v12424_v54  ;;  %8095 = vmatmul.msk.f32.gmra.mxu3 %vm346_vm1, %v9463_v1  ;;  %v1582_v1 = vadd.f32 %v9447_v52, %v12426_v61  ;;  %v12429_v52 = vld [vmem:[#allocation43_spill] sm:$0xff]  ;;  %v12431_v54 = vld [vmem:[#allocation46_spill] sm:$0xff]  ;;  %v12437_v61 = vld [vmem:[#allocation53_spill] sm:$0xff] }
 0x1d6   : > { %v2054_v15 = vpop.f32.mrf.mxu2  ;;  %v2332_v28 = vpop.f32.mrf.mxu3 }
 0x1d7   : > { %v2138_v59 = vadd.f32 %v2054_v15, %v1859_v24  ;;  %v9576_v10 = vpop.f32.mrf.mxu0  ;;  %v1778_v14 = vpop.f32.mrf.mxu1  ;;  %v8107_v15 = vld [vmem:[%s8693_s16 + $0x4a] sm:$0xff] }
 0x1d8   : > { %v1860_v42 = vadd.f32 %v1778_v14, %v1582_v1  ;;  %v12434_v14 = vld [vmem:[#allocation50_spill] sm:$0xff]  ;;  %v8110_v1 = vld [vmem:[%s8693_s16 + $0x6a] sm:$0xff] }
 0x1d9   : > { %v9579_v55 = vadd.f32 %v2332_v28, %v2138_v59  ;;  %v12432_v28 = vld [vmem:[#allocation48_spill] sm:$0xff] }
 0x1da   : > { %7906 = vmatmul.msk.f32.gmra.mxu0 %vm346_vm1, %v7872_v31  ;;  %7964 = vmatmul.msk.f32.gmra.mxu1 %vm346_vm1, %v12425_v47  ;;  %v8108_v59 = vld [vmem:[%s8693_s16 + $0x52] sm:$0xff] }
 0x1db   : > { %8030 = vmatmul.msk.f32.gmra.mxu2 %vm346_vm1, %v12427_v37  ;;  %8096 = vmatmul.msk.f32.gmra.mxu3 %vm346_vm1, %v9480_v33  ;;  %v12436_v47 = vld [vmem:[#allocation52_spill] sm:$0xff]  ;;  %v8111_v37 = vld [vmem:[%s8693_s16 + $0x7a] sm:$0xff] }
 0x1de   : > { %v2057_v5 = vpop.f32.mrf.mxu2  ;;  %v2335_v43 = vpop.f32.mrf.mxu3 }
 0x1df   : > { %v2139_v13 = vadd.f32 %v2057_v5, %v1860_v42  ;;  %v9590_v30 = vpop.f32.mrf.mxu0  ;;  %v8003_v42 = vld [vmem:[%s8693_s16 + $0x198] sm:$0xff] }
 0x1e0   : > { %v8069_v5 = vld [vmem:[%s8693_s16 + $0x199] sm:$0xff] }
 0x1e1   : > { %v9593_v49 = vadd.f32 %v2335_v43, %v2139_v13  ;;  %v8004_v43 = vld [vmem:[%s8693_s16 + $0x1a0] sm:$0xff] }
 0x1e2   : > { %7965 = vmatmul.msk.f32.gmra.mxu1 %vm346_vm1, %v12428_v40  ;;  %8139 = vmatmul.msk.f32.vlgmr.msra.gmra.mxu0 %vm346_vm1, %v8105_v0  ;;  %v8070_v13 = vld [vmem:[%s8693_s16 + $0x1a1] sm:$0xff]  ;;  %v9681_v40 = vpop.f32.mrf.mxu1 }
 0x1e3   : > { %8031 = vmatmul.msk.f32.gmra.mxu2 %vm346_vm1, %v12429_v52  ;;  %8097 = vmatmul.msk.f32.gmra.mxu3 %vm346_vm1, %v9497_v56  ;;  %v8171_v56 = vld [vmem:[%s12263_s3 + $0x10] sm:$0xff] }
 0x1e4   : > { %3052 = vmatpush.msrb.mxu1 %v8171_v56 }
 0x1e6   : > { %v9679_v0 = vpop.f32.mrf.mxu2 }
 0x1e7   : > { %v9602_v33 = vpop.f32.mrf.mxu0 }
 0x1ea   : > { %7966 = vmatmul.msk.f32.gmra.mxu1 %vm346_vm1, %v12430_v51  ;;  %8140 = vmatmul.msk.f32.gmra.mxu0 %vm346_vm1, %v8106_v16  ;;  %v8113_v16 = vld [vmem:[%s8693_s16 + $0x92] sm:$0xff]  ;;  %v9687_v51 = vpop.f32.mrf.mxu3 }
 0x1eb   : > { %8032 = vmatmul.msk.f32.gmra.mxu2 %vm346_vm1, %v12431_v54  ;;  %8098 = vmatmul.msk.f32.gmra.mxu3 %vm346_vm1, %v9514_v44 }
 0x1ee   : > { %v9689_v54 = vpop.f32.mrf.mxu2 }
 0x1ef   : > { %v9612_v24 = vpop.f32.mrf.mxu0 }
 0x1f2   : > { %7967 = vmatmul.msk.f32.gmra.mxu1 %vm346_vm1, %v12432_v28  ;;  %8141 = vmatmul.msk.f32.gmra.mxu0 %vm346_vm1, %v8107_v15  ;;  %v9691_v15 = vpop.f32.mrf.mxu1  ;;  %v8114_v28 = vld [vmem:[%s8693_s16 + $0x9a] sm:$0xff] }
 0x1f3   : > { %8033 = vmatmul.msk.f32.gmra.mxu2 %vm346_vm1, %v9215_v20  ;;  %8099 = vmatmul.msk.f32.gmra.mxu3 %vm346_vm1, %v9531_v35  ;;  %v8109_v35 = vld [vmem:[%s8693_s16 + $0x62] sm:$0xff] }
 0x1f7   : > { %v9625_v44 = vpop.f32.mrf.mxu0 }
 0x1f8   : > { %12433 = vst [vmem:[#allocation8_spill] sm:$0xff] %v9625_v44 }
 0x1fa   : > { %7968 = vmatmul.msk.f32.gmra.mxu1 %vm346_vm1, %v12434_v14  ;;  %8142 = vmatmul.msk.f32.gmra.mxu0 %vm346_vm1, %v8108_v59  ;;  %v9697_v59 = vpop.f32.mrf.mxu3 }
 0x1fb   : > { %8034 = vmatmul.msk.f32.gmra.mxu2 %vm346_vm1, %v9231_v6  ;;  %8100 = vmatmul.msk.f32.gmra.mxu3 %vm346_vm1, %v9548_v29 }
 0x1ff   : > { %v9635_v20 = vpop.f32.mrf.mxu0 }
 0x200   : > { %12435 = vst [vmem:[#allocation9_spill] sm:$0xff] %v9635_v20 }
 0x202   : > { %7969 = vmatmul.msk.f32.gmra.mxu1 %vm346_vm1, %v12436_v47  ;;  %8143 = vmatmul.msk.f32.gmra.mxu0 %vm346_vm1, %v8109_v35  ;;  %v8115_v35 = vld [vmem:[%s8693_s16 + $0xaa] sm:$0xff]  ;;  %v9702_v47 = vpop.f32.mrf.mxu2 }
 0x203   : > { %8035 = vmatmul.msk.f32.gmra.mxu2 %vm346_vm1, %v12437_v61  ;;  %8101 = vmatmul.msk.f32.gmra.mxu3 %vm346_vm1, %v7871_v4  ;;  %v9656_v4 = vld [vmem:[%s8693_s16 + $0x182] sm:$0xff]  ;;  %v9704_v61 = vpop.f32.mrf.mxu1 }
 0x207   : > { %v9644_v6 = vpop.f32.mrf.mxu0 }
 0x208   : > { %12438 = vst [vmem:[#allocation10_spill] sm:$0xff] %v9644_v6 }
 0x20a   : > { %7970 = vmatmul.msk.f32.gmra.mxu1 %vm346_vm1, %v9260_v58  ;;  %8144 = vmatmul.msk.f32.gmra.mxu0 %vm346_vm1, %v8110_v1  ;;  %v9707_v1 = vpop.f32.mrf.mxu3 }
 0x20b   : > { %8036 = vmatmul.msk.f32.gmra.mxu2 %vm346_vm1, %v9263_v11  ;;  %8102 = vmatmul.msk.f32.gmra.mxu3 %vm346_vm1, %v7872_v31  ;;  %v9669_v11 = vld [vmem:[%s8693_s16 + $0x18a] sm:$0xff]  ;;  %v8112_v31 = vld [vmem:[%s8693_s16 + $0x82] sm:$0xff] }
 0x20f   : > { %v9653_v29 = vpop.f32.mrf.mxu0 }
 0x210   : > { %12439 = vst [vmem:[#allocation29_spill] sm:$0xff] %v9653_v29 }
 0x212   : > { %7971 = vmatmul.msk.f32.gmra.mxu1 %vm346_vm1, %v9656_v4  ;;  %8145 = vmatmul.msk.f32.gmra.mxu0 %vm346_vm1, %v8111_v37 }
 0x213   : > { %8037 = vmatmul.msk.f32.gmra.mxu2 %vm346_vm1, %v8003_v42  ;;  %8103 = vmatmul.msk.f32.gmra.mxu3 %vm346_vm1, %v8069_v5  ;;  %v8116_v42 = vld [vmem:[%s8693_s16 + $0xb2] sm:$0xff]  ;;  %v9712_v5 = vpop.f32.mrf.mxu2 }
 0x217   : > { %v9666_v58 = vpop.f32.mrf.mxu0 }
 0x218   : > { %12440 = vst [vmem:[#allocation12_spill] sm:$0xff] %v9666_v58  ;;  %v2905_v58 = vld [vmem:[%s12263_s3 + $0x8] sm:$0xff] }
 0x219   : > { %3260 = vmatpush.msrb.mxu2 %v2905_v58 }
 0x21a   : > { %7972 = vmatmul.msk.f32.gmra.mxu1 %vm346_vm1, %v9669_v11  ;;  %8146 = vmatmul.msk.f32.gmra.mxu0 %vm346_vm1, %v8112_v31  ;;  %v9715_v31 = vpop.f32.mrf.mxu1 }
 0x21b   : > { %8038 = vmatmul.msk.f32.gmra.mxu2 %vm346_vm1, %v8004_v43  ;;  %8104 = vmatmul.msk.f32.gmra.mxu3 %vm346_vm1, %v8070_v13  ;;  %v8117_v13 = vld [vmem:[%s8693_s16 + $0xc2] sm:$0xff] }
 0x21f   : > { %v9683_v52 = vpop.f32.mrf.mxu0 }
 0x220   : > { %12441 = vst [vmem:[#allocation13_spill] sm:$0xff] %v9683_v52 }
 0x222   : > { %8147 = vmatmul.msk.f32.gmra.mxu0 %vm346_vm1, %v8113_v16  ;;  %v9720_v16 = vpop.f32.mrf.mxu3 }
 0x227   : > { %v9693_v56 = vpop.f32.mrf.mxu0 }
 0x228   : > { %12442 = vst [vmem:[#allocation7_spill] sm:$0xff] %v9693_v56 }
 0x22a   : > { %8148 = vmatmul.msk.f32.gmra.mxu0 %vm346_vm1, %v8114_v28  ;;  %v9723_v28 = vpop.f32.mrf.mxu2 }
 0x22f   : > { %v9699_v14 = vpop.f32.mrf.mxu0 }
 0x230   : > { %12443 = vst [vmem:[#allocation33_spill] sm:$0xff] %v9699_v14 }
 0x232   : > { %8149 = vmatmul.msk.f32.gmra.mxu0 %vm346_vm1, %v8115_v35  ;;  %v9725_v35 = vpop.f32.mrf.mxu1  ;;  %v9733_v48 = vpop.f32.mrf.mxu2 }
 0x237   : > { %v9709_v37 = vpop.f32.mrf.mxu0 }
 0x238   : > { %12444 = vst [vmem:[#allocation14_spill] sm:$0xff] %v9709_v37  ;;  %v8119_v37 = vld [vmem:[%s8693_s16 + $0xda] sm:$0xff] }
 0x23a   : > { %8150 = vmatmul.msk.f32.gmra.mxu0 %vm346_vm1, %v8116_v42  ;;  %v9731_v42 = vpop.f32.mrf.mxu3  ;;  %v9746_v14 = vpop.f32.mrf.mxu2 }
 0x23f   : > { %v9717_v43 = vpop.f32.mrf.mxu0 }
 0x240   : > { %12445 = vst [vmem:[#allocation15_spill] sm:$0xff] %v9717_v43  ;;  %v9735_v43 = vpop.f32.mrf.mxu1 }
 0x242   : > { %8151 = vmatmul.msk.f32.gmra.mxu0 %vm346_vm1, %v8117_v13  ;;  %v9741_v13 = vpop.f32.mrf.mxu3 }
 0x247   : > { %v9727_v39 = vpop.f32.mrf.mxu0 }
 0x248   : > { %12446 = vst [vmem:[#allocation11_spill] sm:$0xff] %v9727_v39  ;;  %v8120_v39 = vld [vmem:[%s8693_s16 + $0xe2] sm:$0xff] }
 0x24a   : > { %8152 = vmatmul.msk.f32.gmra.mxu0 %vm346_vm1, %v8118_v53  ;;  %v9748_v53 = vpop.f32.mrf.mxu1 }
 0x24f   : > { %v9737_v41 = vpop.f32.mrf.mxu0 }
 0x250   : > { %12447 = vst [vmem:[#allocation17_spill] sm:$0xff] %v9737_v41  ;;  %v9756_v41 = vpop.f32.mrf.mxu3 }
 0x252   : > { %8153 = vmatmul.msk.f32.gmra.mxu0 %vm346_vm1, %v8119_v37  ;;  %v8121_v37 = vld [vmem:[%s8693_s16 + $0xf2] sm:$0xff]  ;;  %v9764_v32 = vpop.f32.mrf.mxu1 }
 0x257   : > { %v9743_v38 = vpop.f32.mrf.mxu0 }
 0x258   : > { %12448 = vst [vmem:[#allocation16_spill] sm:$0xff] %v9743_v38  ;;  %v9760_v38 = vpop.f32.mrf.mxu2  ;;  %v9779_v8 = vpop.f32.mrf.mxu3 }
 0x25a   : > { %8154 = vmatmul.msk.f32.gmra.mxu0 %vm346_vm1, %v8120_v39  ;;  %v9785_v27 = vpop.f32.mrf.mxu1 }
 0x25f   : > { %v2592_v56 = vpop.f32.mrf.mxu0 }
 0x260   : > { %v2688_v34 = vadd.f32 %v2592_v56, %v9482_v3  ;;  %v2904_v3 = vld [vmem:[%s12263_s3] sm:$0xff]  ;;  %v9783_v29 = vpop.f32.mrf.mxu2 }
 0x261   : > { %v8122_v56 = vld [vmem:[%s8693_s16 + $0xfa] sm:$0xff]  ;;  %3261 = vmatpush.msrb.mxu2 %v2904_v3 }
 0x262   : > { %v2724_v52 = vadd.f32 %v9754_v25, %v2688_v34  ;;  %8155 = vmatmul.msk.f32.gmra.mxu0 %vm346_vm1, %v8121_v37  ;;  %v8238_v37 = vld [vmem:[%s12263_s3 + $0x28] sm:$0xff] }
 0x263   : > { %3504 = vmatpush.msrb.mxu3 %v8238_v37 }
 0x264   : > { %v2756_v39 = vmax.f32 %v2724_v52, 0.0 }
 0x266   : > { %2790 = vst.msk [vmem:[#allocation2 + $0x19] sm:$0xff] %vm2789_vm2, %v2756_v39 }
 0x267   : > { %2823 = vst.msk [vmem:[#allocation2 + $0x17] sm:$0x2] %vm2822_vm3, %v2756_v39  ;;  %v2595_v34 = vpop.f32.mrf.mxu0 }
 0x268   : > { %v2689_v52 = vadd.f32 %v2595_v34, %v9499_v57  ;;  %v8237_v57 = vld [vmem:[%s12263_s3 + $0x20] sm:$0xff]  ;;  %v8123_v34 = vld [vmem:[%s8693_s16 + $0x10a] sm:$0xff]  ;;  %v9804_v26 = vpop.f32.mrf.mxu2 }
 0x269   : > { %3505 = vmatpush.msrb.mxu3 %v8237_v57  ;;  %v9807_v57 = vpop.f32.mrf.mxu1 }
 0x26a   : > { %v2725_v58 = vadd.f32 %v9754_v25, %v2689_v52  ;;  %8156 = vmatmul.msk.f32.gmra.mxu0 %vm346_vm1, %v8122_v56  ;;  %v8272_v56 = vld [vmem:[%s12263_s3 + $0x38] sm:$0xff]  ;;  %v8306_v52 = vld [vmem:[%s12263_s3 + $0x48] sm:$0xff] }
 0x26b   : > { %3780 = vmatpush.msrb.mxu0 %v8272_v56  ;;  %4056 = vmatpush.msra.mxu1 %v8306_v52 }
 0x26c   : > { %v2757_v39 = vmax.f32 %v2725_v58, 0.0 }
 0x26e   : > { %2791 = vst.msk [vmem:[#allocation2 + $0x21] sm:$0xff] %vm2789_vm2, %v2757_v39 }
 0x26f   : > { %2840 = vst.msk [vmem:[#allocation2 + $0x23] sm:$0x40] %vm2839_vm4, %v2757_v39  ;;  %v2598_v3 = vpop.f32.mrf.mxu0  ;;  %v9802_v39 = vpop.f32.mrf.mxu3 }
 0x270   : > { %v2690_v37 = vadd.f32 %v2598_v3, %v9516_v21  ;;  %v8124_v21 = vld [vmem:[%s8693_s16 + $0x112] sm:$0xff]  ;;  %v9822_v17 = vpop.f32.mrf.mxu2 }
 0x271   : > { %12450 = vst [vmem:[#allocation20_spill] sm:$0xff] %v9822_v17 }
 0x272   : > { %v2726_v58 = vadd.f32 %v9754_v25, %v2690_v37  ;;  %8157 = vmatmul.msk.f32.gmra.mxu0 %vm346_vm1, %v8123_v34 }
 0x274   : > { %v2758_v6 = vmax.f32 %v2726_v58, 0.0 }
 0x276   : > { %2792 = vst.msk [vmem:[#allocation2 + $0x31] sm:$0xff] %vm2789_vm2, %v2758_v6 }
 0x277   : > { %2824 = vst.msk [vmem:[#allocation2 + $0x2f] sm:$0x2] %vm2822_vm3, %v2758_v6  ;;  %v2601_v20 = vpop.f32.mrf.mxu0  ;;  %v9814_v52 = vpop.f32.mrf.mxu3  ;;  %v8125_v6 = vld [vmem:[%s8693_s16 + $0x122] sm:$0xff] }
 0x278   : > { %v2691_v3 = vadd.f32 %v2601_v20, %v9533_v9  ;;  %12449 = vst [vmem:[#allocation18_spill] sm:$0xff] %v9814_v52  ;;  %v9826_v20 = vpop.f32.mrf.mxu1 }
 0x279   : > { %12451 = vst [vmem:[#allocation19_spill] sm:$0xff] %v9826_v20 }
 0x27a   : > { %v2727_v56 = vadd.f32 %v9754_v25, %v2691_v3  ;;  %8158 = vmatmul.msk.f32.gmra.mxu0 %vm346_vm1, %v8124_v21 }
 0x27c   : > { %v2759_v34 = vmax.f32 %v2727_v56, 0.0 }
 0x27e   : > { %v9816_v37 = vld [vmem:[#allocation2 + $0x30] sm:$0xff]  ;;  %2793 = vst.msk [vmem:[#allocation2 + $0x39] sm:$0xff] %vm2789_vm2, %v2759_v34 }
 0x27f   : > { %2860 = vst.msk [vmem:[#allocation2] sm:$0xff] %vm2789_vm2, %v9816_v37  ;;  %v2604_v58 = vpop.f32.mrf.mxu0  ;;  %v9834_v22 = vpop.f32.mrf.mxu3 }
 0x280   : > { %2841 = vst.msk [vmem:[#allocation2 + $0x3b] sm:$0x40] %vm2839_vm4, %v2759_v34  ;;  %v2692_v9 = vadd.f32 %v2604_v58, %v9550_v45  ;;  %v8126_v34 = vld [vmem:[%s8693_s16 + $0x12a] sm:$0xff] }
 0x281   : > { %12452 = vst [vmem:[#allocation21_spill] sm:$0xff] %v9834_v22  ;;  %v9846_v22 = vpop.f32.mrf.mxu1 }
 0x282   : > { %v2728_v21 = vadd.f32 %v9754_v25, %v2692_v9  ;;  %8159 = vmatmul.msk.f32.gmra.mxu0 %vm346_vm1, %v8125_v6  ;;  %v9842_v9 = vpop.f32.mrf.mxu2  ;;  %12454 = vst [vmem:[#allocation22_spill] sm:$0xff] %v9846_v22 }
 0x283   : > { %12453 = vst [vmem:[#allocation23_spill] sm:$0xff] %v9842_v9  ;;  %v12458_v9 = vld [vmem:[#allocation41_spill] sm:$0xff] }
 0x284   : > { %v2760_v3 = vmax.f32 %v2728_v21, 0.0 }
 0x285   : > { %v9830_v56 = vld [vmem:[#allocation2 + $0x38] sm:$0xff] }
 0x286   : > { %2861 = vst.msk [vmem:[#allocation2 + $0x8] sm:$0xff] %vm2789_vm2, %v9830_v56  ;;  %v2872_v44 = vld [vmem:[#allocation2] sm:$0xff] }
 0x287   : > { %2794 = vst.msk [vmem:[#allocation2 + $0x49] sm:$0xff] %vm2789_vm2, %v2760_v3  ;;  %8205 = vmatmul.msk.f32.vlgmr.msrb.gmra.mxu2 %vm2789_vm2, %v2872_v44  ;;  %v2607_v45 = vpop.f32.mrf.mxu0  ;;  %v2859_v58 = vld [vmem:[#allocation2 + $0x40] sm:$0x3] }
 0x288   : > { %2825 = vst.msk [vmem:[#allocation2 + $0x47] sm:$0x2] %vm2822_vm3, %v2760_v3  ;;  %v2693_v6 = vadd.f32 %v2607_v45, %v9565_v18  ;;  %v8127_v3 = vld [vmem:[%s8693_s16 + $0x13a] sm:$0xff] }
 0x289   : > { %2863 = vst.msk [vmem:[#allocation2 + $0x10] sm:$0x3] %vm2862_vm5, %v2859_v58 }
 0x28a   : > { %v2729_v21 = vadd.f32 %v9754_v25, %v2693_v6  ;;  %8160 = vmatmul.msk.f32.gmra.mxu0 %vm346_vm1, %v8126_v34  ;;  %v9855_v34 = vpop.f32.mrf.mxu3  ;;  %v9859_v6 = vpop.f32.mrf.mxu2 }
 0x28b   : > { %12455 = vst [vmem:[#allocation24_spill] sm:$0xff] %v9855_v34 }
 0x28c   : > { %v2761_v17 = vmax.f32 %v2729_v21, 0.0  ;;  %12456 = vst [vmem:[#allocation27_spill] sm:$0xff] %v9859_v6  ;;  %v3361_v6 = vld [vmem:[#allocation2 + $0x1a] sm:$0xff] }
 0x28d   : > { %v2906_v44 = vld [vmem:[#allocation2 + $0x1] sm:$0xff] }
 0x28e   : > { %v2873_v20 = vld [vmem:[#allocation2 + $0x8] sm:$0xff]  ;;  %2795 = vst.msk [vmem:[#allocation2 + $0x51] sm:$0xff] %vm2789_vm2, %v2761_v17  ;;  %8173 = vmatmul.msk.f32.vlgmr.msrb.gmra.mxu1 %vm2789_vm2, %v2906_v44  ;;  %v9861_v44 = vpop.f32.mrf.mxu1 }
 0x28f   : > { %v3359_v52 = vld [vmem:[#allocation2 + $0x2] sm:$0xff]  ;;  %2842 = vst.msk [vmem:[#allocation2 + $0x53] sm:$0x40] %vm2839_vm4, %v2761_v17  ;;  %8206 = vmatmul.msk.f32.gmra.mxu2 %vm2789_vm2, %v2873_v20  ;;  %v2610_v18 = vpop.f32.mrf.mxu0  ;;  %v1583_v20 = vadd.f32 %v9460_v12, %v12458_v9 }
 0x290   : > { %8239 = vmatmul.msk.f32.vlgmr.msrb.gmra.mxu3 %vm2789_vm2, %v3359_v52  ;;  %v2694_v45 = vadd.f32 %v2610_v18, %v9579_v55  ;;  %12457 = vst [vmem:[#allocation25_spill] sm:$0xff] %v9861_v44  ;;  %v2907_v52 = vld [vmem:[#allocation2 + $0x9] sm:$0xff]  ;;  %v9867_v55 = vld [vmem:[#allocation2 + $0x18] sm:$0xff] }
 0x291   : > { %v3360_v17 = vld [vmem:[#allocation2 + $0xa] sm:$0xff] }
 0x292   : > { %v2730_v58 = vadd.f32 %v9754_v25, %v2694_v45  ;;  %8161 = vmatmul.msk.f32.gmra.mxu0 %vm346_vm1, %v8127_v3  ;;  %v8128_v3 = vld [vmem:[%s8693_s16 + $0x142] sm:$0xff]  ;;  %v1861_v45 = vadd.f32 %v9681_v40, %v1583_v20  ;;  %v12459_v44 = vld [vmem:[#allocation44_spill] sm:$0xff]  ;;  %v9884_v40 = vpop.f32.mrf.mxu2 }
 0x293   : > { %v1584_v34 = vadd.f32 %v9477_v46, %v12459_v44  ;;  %v8129_v44 = vld [vmem:[%s8693_s16 + $0x152] sm:$0xff] }
 0x294   : > { %v2762_v21 = vmax.f32 %v2730_v58, 0.0  ;;  %v2140_v12 = vadd.f32 %v9679_v0, %v1861_v45 }
 0x296   : > { %2796 = vst.msk [vmem:[#allocation2 + $0x61] sm:$0xff] %vm2789_vm2, %v2762_v21  ;;  %8174 = vmatmul.msk.f32.gmra.mxu1 %vm2789_vm2, %v2907_v52  ;;  %v9879_v52 = vpop.f32.mrf.mxu3  ;;  %v2418_v22 = vadd.f32 %v9687_v51, %v2140_v12  ;;  %v9891_v0 = vpop.f32.mrf.mxu1  ;;  %v1862_v51 = vadd.f32 %v9691_v15, %v1584_v34  ;;  %v3362_v12 = vld [vmem:[#allocation2 + $0x22] sm:$0xff] }
 0x297   : > { %2826 = vst.msk [vmem:[#allocation2 + $0x5f] sm:$0x2] %vm2822_vm3, %v2762_v21  ;;  %8207 = vmatmul.msk.f32.gmra.mxu2 %vm2789_vm2, %v9867_v55  ;;  %v2613_v18 = vpop.f32.mrf.mxu0  ;;  %v2908_v21 = vld [vmem:[#allocation2 + $0x19] sm:$0xff] }
 0x298   : > { %8240 = vmatmul.msk.f32.gmra.mxu3 %vm2789_vm2, %v3360_v17  ;;  %v2695_v58 = vadd.f32 %v2613_v18, %v9593_v49  ;;  %v9888_v49 = vld [vmem:[#allocation2 + $0x20] sm:$0xff]  ;;  %v2141_v18 = vadd.f32 %v9689_v54, %v1862_v51 }
 0x299   : > { %v8130_v54 = vld [vmem:[%s8693_s16 + $0x15a] sm:$0xff] }
 0x29a   : > { %v2731_v9 = vadd.f32 %v9754_v25, %v2695_v58  ;;  %8162 = vmatmul.msk.f32.gmra.mxu0 %vm346_vm1, %v8128_v3  ;;  %v2909_v58 = vld [vmem:[#allocation2 + $0x21] sm:$0xff]  ;;  %v9914_v34 = vpop.f32.mrf.mxu2 }
 0x29c   : > { %v2763_v17 = vmax.f32 %v2731_v9, 0.0  ;;  %v12460_v9 = vld [vmem:[#allocation47_spill] sm:$0xff] }
 0x29e   : > { %2797 = vst.msk [vmem:[#allocation2 + $0x69] sm:$0xff] %vm2789_vm2, %v2763_v17  ;;  %8175 = vmatmul.msk.f32.gmra.mxu1 %vm2789_vm2, %v2908_v21  ;;  %v9901_v45 = vpop.f32.mrf.mxu3  ;;  %v2419_v21 = vadd.f32 %v9697_v59, %v2141_v18  ;;  %v3363_v18 = vld [vmem:[#allocation2 + $0x32] sm:$0xff] }
 0x29f   : > { %2843 = vst.msk [vmem:[#allocation2 + $0x6b] sm:$0x40] %vm2839_vm4, %v2763_v17  ;;  %8208 = vmatmul.msk.f32.gmra.mxu2 %vm2789_vm2, %v9888_v49  ;;  %v2616_v46 = vpop.f32.mrf.mxu0  ;;  %v1585_v17 = vadd.f32 %v9494_v36, %v12460_v9 }
 0x2a0   : > { %8241 = vmatmul.msk.f32.gmra.mxu3 %vm2789_vm2, %v3361_v6  ;;  %v2696_v20 = vadd.f32 %v2616_v46, %v2418_v22  ;;  %v9916_v46 = vpop.f32.mrf.mxu1 }
 0x2a1   : > { %v1863_v15 = vadd.f32 %v9704_v61, %v1585_v17 }
 0x2a2   : > { %v2732_v3 = vadd.f32 %v9754_v25, %v2696_v20  ;;  %8163 = vmatmul.msk.f32.gmra.mxu0 %vm346_vm1, %v8129_v44  ;;  %v2910_v20 = vld [vmem:[#allocation2 + $0x31] sm:$0xff]  ;;  %v9935_v17 = vpop.f32.mrf.mxu2 }
 0x2a3   : > { %v2142_v59 = vadd.f32 %v9702_v47, %v1863_v15  ;;  %v2911_v15 = vld [vmem:[#allocation2 + $0x39] sm:$0xff] }
 0x2a4   : > { %v2764_v6 = vmax.f32 %v2732_v3, 0.0  ;;  %v12461_v3 = vld [vmem:[#allocation49_spill] sm:$0xff] }
 0x2a5   : > { %v2420_v61 = vadd.f32 %v9707_v1, %v2142_v59  ;;  %v12462_v59 = vld [vmem:[#allocation51_spill] sm:$0xff] }
 0x2a6   : > { %2798 = vst.msk [vmem:[#allocation2 + $0x79] sm:$0xff] %vm2789_vm2, %v2764_v6  ;;  %8176 = vmatmul.msk.f32.gmra.mxu1 %vm2789_vm2, %v2909_v58  ;;  %v9927_v58 = vpop.f32.mrf.mxu3 }
 0x2a7   : > { %2827 = vst.msk [vmem:[#allocation2 + $0x77] sm:$0x2] %vm2822_vm3, %v2764_v6  ;;  %8209 = vmatmul.msk.f32.gmra.mxu2 %vm2789_vm2, %v9816_v37  ;;  %v2619_v22 = vpop.f32.mrf.mxu0  ;;  %v1586_v6 = vadd.f32 %v9511_v60, %v12461_v3 }
 0x2a8   : > { %8242 = vmatmul.msk.f32.gmra.mxu3 %vm2789_vm2, %v3362_v12  ;;  %v2697_v36 = vadd.f32 %v2619_v22, %v2419_v21  ;;  %v8131_v12 = vld [vmem:[%s8693_s16 + $0x16a] sm:$0xff]  ;;  %v9939_v22 = vpop.f32.mrf.mxu1 }
 0x2a9   : > { %v1864_v9 = vadd.f32 %v9715_v31, %v1586_v6 }
 0x2aa   : > { %v2733_v44 = vadd.f32 %v9754_v25, %v2697_v36  ;;  %8164 = vmatmul.msk.f32.gmra.mxu0 %vm346_vm1, %v8130_v54  ;;  %v3364_v36 = vld [vmem:[#allocation2 + $0x3a] sm:$0xff] }
 0x2ab   : > { %v2143_v1 = vadd.f32 %v9712_v5, %v1864_v9  ;;  %v9946_v5 = vld [vmem:[#allocation2 + $0x48] sm:$0xff] }
 0x2ac   : > { %v2765_v51 = vmax.f32 %v2733_v44, 0.0  ;;  %v1587_v44 = vadd.f32 %v9528_v50, %v12462_v59  ;;  %v2912_v9 = vld [vmem:[#allocation2 + $0x49] sm:$0xff] }
 0x2ad   : > { %v2421_v31 = vadd.f32 %v9720_v16, %v2143_v1  ;;  %v12463_v1 = vld [vmem:[#allocation54_spill] sm:$0xff] }
 0x2ae   : > { %2799 = vst.msk [vmem:[#allocation2 + $0x81] sm:$0xff] %vm2789_vm2, %v2765_v51  ;;  %8177 = vmatmul.msk.f32.gmra.mxu1 %vm2789_vm2, %v2910_v20  ;;  %v8132_v20 = vld [vmem:[%s8693_s16 + $0x172] sm:$0xff]  ;;  %v9954_v3 = vpop.f32.mrf.mxu3 }
 0x2af   : > { %2844 = vst.msk [vmem:[#allocation2 + $0x83] sm:$0x40] %vm2839_vm4, %v2765_v51  ;;  %8210 = vmatmul.msk.f32.gmra.mxu2 %vm2789_vm2, %v9830_v56  ;;  %v2622_v47 = vpop.f32.mrf.mxu0 }
 0x2b0   : > { %8243 = vmatmul.msk.f32.gmra.mxu3 %vm2789_vm2, %v3363_v18  ;;  %v2698_v60 = vadd.f32 %v2622_v47, %v2420_v61  ;;  %v1865_v18 = vadd.f32 %v9725_v35, %v1587_v44  ;;  %v9959_v61 = vpop.f32.mrf.mxu2  ;;  %v8271_v44 = vld [vmem:[%s12263_s3 + $0x30] sm:$0xff] }
 0x2b1   : > { %3781 = vmatpush.msrb.mxu0 %v8271_v44 }
 0x2b2   : > { %v2734_v21 = vadd.f32 %v9754_v25, %v2698_v60  ;;  %8165 = vmatmul.msk.f32.gmra.mxu0 %vm346_vm1, %v8131_v12  ;;  %v2144_v16 = vadd.f32 %v9723_v28, %v1865_v18  ;;  %v9961_v12 = vpop.f32.mrf.mxu1  ;;  %v3365_v60 = vld [vmem:[#allocation2 + $0x4a] sm:$0xff] }
 0x2b3   : > { %v9968_v28 = vld [vmem:[#allocation2 + $0x50] sm:$0xff]  ;;  %v12464_v18 = vld [vmem:[#allocation55_spill] sm:$0xff] }
 0x2b4   : > { %v2766_v54 = vmax.f32 %v2734_v21, 0.0  ;;  %v1588_v21 = vadd.f32 %v9545_v2, %v12463_v1  ;;  %v2422_v35 = vadd.f32 %v9731_v42, %v2144_v16 }
 0x2b6   : > { %2800 = vst.msk [vmem:[#allocation2 + $0x91] sm:$0xff] %vm2789_vm2, %v2766_v54  ;;  %8178 = vmatmul.msk.f32.gmra.mxu1 %vm2789_vm2, %v2911_v15  ;;  %v1866_v15 = vadd.f32 %v9735_v43, %v1588_v21  ;;  %v9979_v59 = vpop.f32.mrf.mxu3  ;;  %v1589_v43 = vadd.f32 %v9562_v23, %v12464_v18  ;;  %v2914_v21 = vld [vmem:[#allocation2 + $0x61] sm:$0xff]  ;;  %v10031_v18 = vld [vmem:[#allocation2 + $0x78] sm:$0xff] }
 0x2b7   : > { %2828 = vst.msk [vmem:[#allocation2 + $0x8f] sm:$0x2] %vm2822_vm3, %v2766_v54  ;;  %8211 = vmatmul.msk.f32.gmra.mxu2 %vm2789_vm2, %v9946_v5  ;;  %v2625_v51 = vpop.f32.mrf.mxu0 }
 0x2b8   : > { %8244 = vmatmul.msk.f32.gmra.mxu3 %vm2789_vm2, %v3364_v36  ;;  %v2699_v50 = vadd.f32 %v2625_v51, %v2421_v31  ;;  %v2145_v2 = vadd.f32 %v9733_v48, %v1866_v15  ;;  %v2913_v51 = vld [vmem:[#allocation2 + $0x51] sm:$0xff] }
 0x2ba   : > { %v2735_v6 = vadd.f32 %v9754_v25, %v2699_v50  ;;  %8166 = vmatmul.msk.f32.gmra.mxu0 %vm346_vm1, %v8132_v20  ;;  %v3366_v20 = vld [vmem:[#allocation2 + $0x52] sm:$0xff]  ;;  %v2423_v48 = vadd.f32 %v9741_v13, %v2145_v2  ;;  %v9987_v50 = vpop.f32.mrf.mxu2  ;;  %v9994_v16 = vpop.f32.mrf.mxu1  ;;  %v1867_v13 = vadd.f32 %v9748_v53, %v1589_v43  ;;  %v8135_v53 = vld [vmem:[%s8693_s16 + $0x19a] sm:$0xff] }
 0x2bc   : > { %v2767_v47 = vmax.f32 %v2735_v6, 0.0 }
 0x2be   : > { %2801 = vst.msk [vmem:[#allocation2 + $0x99] sm:$0xff] %vm2789_vm2, %v2767_v47  ;;  %8179 = vmatmul.msk.f32.gmra.mxu1 %vm2789_vm2, %v2912_v9  ;;  %v10004_v1 = vpop.f32.mrf.mxu3 }
 0x2bf   : > { %2845 = vst.msk [vmem:[#allocation2 + $0x9b] sm:$0x40] %vm2839_vm4, %v2767_v47  ;;  %8212 = vmatmul.msk.f32.gmra.mxu2 %vm2789_vm2, %v9968_v28  ;;  %v2628_v54 = vpop.f32.mrf.mxu0  ;;  %v2146_v47 = vadd.f32 %v9746_v14, %v1867_v13  ;;  %v10011_v14 = vld [vmem:[#allocation2 + $0x68] sm:$0xff] }
 0x2c0   : > { %8245 = vmatmul.msk.f32.gmra.mxu3 %vm2789_vm2, %v3365_v60  ;;  %v2700_v36 = vadd.f32 %v2628_v54, %v2422_v35  ;;  %v3367_v35 = vld [vmem:[#allocation2 + $0x62] sm:$0xff]  ;;  %v1590_v54 = vadd.f32 %v9576_v10, %v9275_v63 }
 0x2c1   : > { %v2424_v15 = vadd.f32 %v9756_v41, %v2146_v47 }
 0x2c2   : > { %v2736_v42 = vadd.f32 %v9754_v25, %v2700_v36  ;;  %8167 = vmatmul.msk.f32.gmra.mxu0 %vm346_vm1, %v9656_v4  ;;  %v9991_v4 = vld [vmem:[#allocation2 + $0x60] sm:$0xff]  ;;  %v1868_v36 = vadd.f32 %v9764_v32, %v1590_v54  ;;  %v10019_v63 = vpop.f32.mrf.mxu2  ;;  %v10021_v10 = vpop.f32.mrf.mxu1 }
 0x2c4   : > { %v2768_v31 = vmax.f32 %v2736_v42, 0.0  ;;  %v2147_v2 = vadd.f32 %v9760_v38, %v1868_v36 }
 0x2c6   : > { %2802 = vst.msk [vmem:[#allocation2 + $0xa9] sm:$0xff] %vm2789_vm2, %v2768_v31  ;;  %8180 = vmatmul.msk.f32.gmra.mxu1 %vm2789_vm2, %v2913_v51  ;;  %v3368_v51 = vld [vmem:[#allocation2 + $0x6a] sm:$0xff]  ;;  %v2425_v32 = vadd.f32 %v9779_v8, %v2147_v2  ;;  %v10034_v38 = vpop.f32.mrf.mxu3  ;;  %v10075_v2 = vld [vmem:[#allocation2 + $0x82] sm:$0xff] }
 0x2c7   : > { %2829 = vst.msk [vmem:[#allocation2 + $0xa7] sm:$0x2] %vm2822_vm3, %v2768_v31  ;;  %8213 = vmatmul.msk.f32.gmra.mxu2 %vm2789_vm2, %v9991_v4  ;;  %v2631_v23 = vpop.f32.mrf.mxu0  ;;  %v2915_v31 = vld [vmem:[#allocation2 + $0x69] sm:$0xff] }
 0x2c8   : > { %8246 = vmatmul.msk.f32.gmra.mxu3 %vm2789_vm2, %v3366_v20  ;;  %v2701_v6 = vadd.f32 %v2631_v23, %v2423_v48  ;;  %v1591_v20 = vadd.f32 %v9590_v30, %v9285_v19  ;;  %v8136_v48 = vld [vmem:[%s8693_s16 + $0x1a2] sm:$0xff] }
 0x2ca   : > { %v2737_v9 = vadd.f32 %v9754_v25, %v2701_v6  ;;  %8168 = vmatmul.msk.f32.gmra.mxu0 %vm346_vm1, %v9669_v11  ;;  %v1869_v19 = vadd.f32 %v9785_v27, %v1591_v20  ;;  %v10042_v23 = vpop.f32.mrf.mxu2  ;;  %v10046_v6 = vpop.f32.mrf.mxu1 }
 0x2cc   : > { %v2769_v60 = vmax.f32 %v2737_v9, 0.0  ;;  %v2148_v30 = vadd.f32 %v9783_v29, %v1869_v19  ;;  %v2916_v9 = vld [vmem:[#allocation2 + $0x79] sm:$0xff]  ;;  %v10097_v19 = vld [vmem:[#allocation2 + $0x91] sm:$0xff] }
 0x2cd   : > { %v10055_v29 = vld [vmem:[#allocation2 + $0x80] sm:$0xff] }
 0x2ce   : > { %2803 = vst.msk [vmem:[#allocation2 + $0xb1] sm:$0xff] %vm2789_vm2, %v2769_v60  ;;  %8181 = vmatmul.msk.f32.gmra.mxu1 %vm2789_vm2, %v2914_v21  ;;  %v1592_v21 = vadd.f32 %v9602_v33, %v9295_v62  ;;  %v2426_v27 = vadd.f32 %v9802_v39, %v2148_v30  ;;  %v10063_v33 = vpop.f32.mrf.mxu3  ;;  %v12468_v30 = vld [vmem:[#allocation56_spill] sm:$0xff] }
 0x2cf   : > { %2846 = vst.msk [vmem:[#allocation2 + $0xb3] sm:$0x40] %vm2839_vm4, %v2769_v60  ;;  %8214 = vmatmul.msk.f32.gmra.mxu2 %vm2789_vm2, %v10011_v14  ;;  %v2634_v11 = vpop.f32.mrf.mxu0  ;;  %v10048_v60 = vld [vmem:[#allocation2 + $0x7a] sm:$0xff] }
 0x2d0   : > { %8247 = vmatmul.msk.f32.gmra.mxu3 %vm2789_vm2, %v3367_v35  ;;  %v2702_v41 = vadd.f32 %v2634_v11, %v2424_v15  ;;  %v1870_v54 = vadd.f32 %v9807_v57, %v1592_v21  ;;  %v1593_v57 = vadd.f32 %v9612_v24, %v9305_v7 }
 0x2d2   : > { %v2738_v42 = vadd.f32 %v9754_v25, %v2702_v41  ;;  %8169 = vmatmul.msk.f32.gmra.mxu0 %vm346_vm1, %v8135_v53  ;;  %v2149_v39 = vadd.f32 %v9804_v26, %v1870_v54  ;;  %v10069_v11 = vpop.f32.mrf.mxu2  ;;  %v10071_v36 = vpop.f32.mrf.mxu1  ;;  %v10073_v41 = vld [vmem:[#allocation2 + $0x81] sm:$0xff]  ;;  %v10083_v26 = vld [vmem:[#allocation2 + $0x90] sm:$0xff] }
 0x2d4   : > { %v2770_v44 = vmax.f32 %v2738_v42, 0.0  ;;  %v12465_v42 = vld [vmem:[#allocation18_spill] sm:$0xff] }
 0x2d6   : > { %2804 = vst.msk [vmem:[#allocation2 + $0xc1] sm:$0xff] %vm2789_vm2, %v2770_v44  ;;  %8182 = vmatmul.msk.f32.gmra.mxu1 %vm2789_vm2, %v2915_v31  ;;  %v12466_v31 = vld [vmem:[#allocation19_spill] sm:$0xff] }
 0x2d7   : > { %2830 = vst.msk [vmem:[#allocation2 + $0xbf] sm:$0x2] %vm2822_vm3, %v2770_v44  ;;  %8215 = vmatmul.msk.f32.gmra.mxu2 %vm2789_vm2, %v10031_v18  ;;  %v2637_v43 = vpop.f32.mrf.mxu0  ;;  %v2427_v44 = vadd.f32 %v12465_v42, %v2149_v39  ;;  %v1871_v7 = vadd.f32 %v12466_v31, %v1593_v57  ;;  %v12471_v39 = vld [vmem:[#allocation22_spill] sm:$0xff]  ;;  %v12472_v57 = vld [vmem:[#allocation23_spill] sm:$0xff] }
 0x2d8   : > { %8248 = vmatmul.msk.f32.gmra.mxu3 %vm2789_vm2, %v3368_v51  ;;  %v2703_v8 = vadd.f32 %v2637_v43, %v2425_v32  ;;  %v12467_v51 = vld [vmem:[#allocation20_spill] sm:$0xff]  ;;  %v10095_v43 = vpop.f32.mrf.mxu3 }
 0x2d9   : > { %v2150_v20 = vadd.f32 %v12467_v51, %v1871_v7  ;;  %v10128_v7 = vld [vmem:[#allocation2 + $0x99] sm:$0xff] }
 0x2da   : > { %v2739_v13 = vadd.f32 %v9754_v25, %v2703_v8  ;;  %8170 = vmatmul.msk.f32.gmra.mxu0 %vm346_vm1, %v8136_v48  ;;  %v10099_v8 = vld [vmem:[#allocation2 + $0x92] sm:$0xff] }
 0x2db   : > { %v12473_v51 = vld [vmem:[#allocation57_spill] sm:$0xff] }
 0x2dc   : > { %v2771_v47 = vmax.f32 %v2739_v13, 0.0  ;;  %v12469_v13 = vld [vmem:[#allocation8_spill] sm:$0xff] }
 0x2de   : > { %2805 = vst.msk [vmem:[#allocation2 + $0xc9] sm:$0xff] %vm2789_vm2, %v2771_v47  ;;  %8183 = vmatmul.msk.f32.gmra.mxu1 %vm2789_vm2, %v2916_v9  ;;  %v12470_v9 = vld [vmem:[#allocation21_spill] sm:$0xff] }
 0x2df   : > { %2847 = vst.msk [vmem:[#allocation2 + $0xcb] sm:$0x40] %vm2839_vm4, %v2771_v47  ;;  %8216 = vmatmul.msk.f32.gmra.mxu2 %vm2789_vm2, %v10055_v29  ;;  %v2640_v35 = vpop.f32.mrf.mxu0  ;;  %v1594_v47 = vadd.f32 %v12469_v13, %v12468_v30  ;;  %v2428_v21 = vadd.f32 %v12470_v9, %v2150_v20  ;;  %v12474_v20 = vld [vmem:[#allocation9_spill] sm:$0xff]  ;;  %v10138_v13 = vld [vmem:[#allocation2 + $0xa8] sm:$0xff] }
 0x2e0   : > { %8249 = vmatmul.msk.f32.gmra.mxu3 %vm2789_vm2, %v10048_v60  ;;  %v2704_v62 = vadd.f32 %v2640_v35, %v2426_v27  ;;  %v10104_v27 = vpop.f32.mrf.mxu2  ;;  %v10113_v35 = vpop.f32.mrf.mxu1 }
 0x2e1   : > { %v10126_v31 = vpop.f32.mrf.mxu3 }
 0x2e2   : > { %v2740_v15 = vadd.f32 %v9754_v25, %v2704_v62  ;;  %8273 = vmatmul.msk.f32.vlgmr.msrb.gmra.mxu0 %vm2789_vm2, %v9867_v55  ;;  %v8305_v62 = vld [vmem:[%s12263_s3 + $0x40] sm:$0xff] }
 0x2e3   : > { %4057 = vmatpush.msra.mxu1 %v8305_v62 }
 0x2e4   : > { %v2772_v53 = vmax.f32 %v2740_v15, 0.0  ;;  %v1872_v15 = vadd.f32 %v12471_v39, %v1594_v47  ;;  %v12476_v47 = vld [vmem:[#allocation25_spill] sm:$0xff]  ;;  %v12477_v39 = vld [vmem:[#allocation27_spill] sm:$0xff] }
 0x2e6   : > { %2806 = vst.msk [vmem:[#allocation2 + $0xd9] sm:$0xff] %vm2789_vm2, %v2772_v53  ;;  %8184 = vmatmul.msk.f32.gmra.mxu1 %vm2789_vm2, %v10073_v41  ;;  %v2151_v42 = vadd.f32 %v12472_v57, %v1872_v15 }
 0x2e7   : > { %2831 = vst.msk [vmem:[#allocation2 + $0xd7] sm:$0x2] %vm2822_vm3, %v2772_v53  ;;  %8217 = vmatmul.msk.f32.gmra.mxu2 %vm2789_vm2, %v10083_v26  ;;  %v2643_v55 = vpop.f32.mrf.mxu0 }
 0x2e8   : > { %8250 = vmatmul.msk.f32.gmra.mxu3 %vm2789_vm2, %v10075_v2  ;;  %v2705_v24 = vadd.f32 %v2643_v55, %v2427_v44  ;;  %v10148_v62 = vpop.f32.mrf.mxu1 }
 0x2ea   : > { %v2741_v32 = vadd.f32 %v9754_v25, %v2705_v24  ;;  %8274 = vmatmul.msk.f32.gmra.mxu0 %vm2789_vm2, %v9888_v49  ;;  %v10109_v49 = vld [vmem:[#allocation2 + $0x98] sm:$0xff] }
 0x2eb   : > { %v10130_v24 = vld [vmem:[#allocation2 + $0x9a] sm:$0xff] }
 0x2ec   : > { %v2773_v48 = vmax.f32 %v2741_v32, 0.0  ;;  %v1595_v32 = vadd.f32 %v12474_v20, %v12473_v51  ;;  %v12479_v51 = vld [vmem:[#allocation10_spill] sm:$0xff] }
 0x2ee   : > { %2807 = vst.msk [vmem:[#allocation2 + $0xe1] sm:$0xff] %vm2789_vm2, %v2773_v48  ;;  %8185 = vmatmul.msk.f32.gmra.mxu1 %vm2789_vm2, %v10097_v19  ;;  %v1873_v9 = vadd.f32 %v12476_v47, %v1595_v32 }
 0x2ef   : > { %2848 = vst.msk [vmem:[#allocation2 + $0xe3] sm:$0x40] %vm2839_vm4, %v2773_v48  ;;  %8218 = vmatmul.msk.f32.gmra.mxu2 %vm2789_vm2, %v10109_v49  ;;  %v2646_v54 = vpop.f32.mrf.mxu0  ;;  %v12475_v48 = vld [vmem:[#allocation24_spill] sm:$0xff] }
 0x2f0   : > { %8251 = vmatmul.msk.f32.gmra.mxu3 %vm2789_vm2, %v10099_v8  ;;  %v2706_v53 = vadd.f32 %v2646_v54, %v2428_v21  ;;  %v2429_v30 = vadd.f32 %v12475_v48, %v2151_v42  ;;  %v10146_v21 = vpop.f32.mrf.mxu2  ;;  %v2152_v15 = vadd.f32 %v12477_v39, %v1873_v9  ;;  %v10154_v42 = vld [vmem:[#allocation2 + $0xa9] sm:$0xff]  ;;  %v10180_v39 = vpop.f32.mrf.mxu1 }
 0x2f1   : > { %v10164_v48 = vld [vmem:[#allocation2 + $0xb0] sm:$0xff] }
 0x2f2   : > { %v2742_v44 = vadd.f32 %v9754_v25, %v2706_v53  ;;  %8275 = vmatmul.msk.f32.gmra.mxu0 %vm2789_vm2, %v9816_v37  ;;  %v2430_v32 = vadd.f32 %v9879_v52, %v2152_v15 }
 0x2f4   : > { %v2774_v55 = vmax.f32 %v2742_v44, 0.0  ;;  %v10156_v44 = vld [vmem:[#allocation2 + $0xaa] sm:$0xff] }
 0x2f6   : > { %2808 = vst.msk [vmem:[#allocation2 + $0xf1] sm:$0xff] %vm2789_vm2, %v2774_v55  ;;  %8186 = vmatmul.msk.f32.gmra.mxu1 %vm2789_vm2, %v10128_v7 }
 0x2f7   : > { %2832 = vst.msk [vmem:[#allocation2 + $0xef] sm:$0x2] %vm2822_vm3, %v2774_v55  ;;  %8219 = vmatmul.msk.f32.gmra.mxu2 %vm2789_vm2, %v10138_v13  ;;  %v2649_v37 = vpop.f32.mrf.mxu0  ;;  %v12478_v55 = vld [vmem:[#allocation58_spill] sm:$0xff] }
 0x2f8   : > { %8252 = vmatmul.msk.f32.gmra.mxu3 %vm2789_vm2, %v10130_v24  ;;  %v2707_v54 = vadd.f32 %v2649_v37, %v2429_v30  ;;  %v1596_v20 = vadd.f32 %v12479_v51, %v12478_v55  ;;  %v10175_v9 = vpop.f32.mrf.mxu2  ;;  %v12482_v55 = vld [vmem:[#allocation59_spill] sm:$0xff]  ;;  %v12483_v51 = vld [vmem:[#allocation29_spill] sm:$0xff] }
 0x2fa   : > { %v2743_v53 = vadd.f32 %v9754_v25, %v2707_v54  ;;  %8276 = vmatmul.msk.f32.gmra.mxu0 %vm2789_vm2, %v9830_v56  ;;  %v10168_v56 = vpop.f32.mrf.mxu3  ;;  %v1874_v52 = vadd.f32 %v9891_v0, %v1596_v20  ;;  %v1597_v0 = vadd.f32 %v12483_v51, %v12482_v55  ;;  %v10208_v51 = vld [vmem:[#allocation2 + $0xc2] sm:$0xff] }
 0x2fb   : > { %12485 = vst [vmem:[#allocation34_spill] sm:$0xff] %v10208_v51 }
 0x2fc   : > { %v2775_v57 = vmax.f32 %v2743_v53, 0.0  ;;  %v2153_v47 = vadd.f32 %v9884_v40, %v1874_v52  ;;  %v10182_v53 = vld [vmem:[#allocation2 + $0xb1] sm:$0xff]  ;;  %v10192_v40 = vld [vmem:[#allocation2 + $0xc0] sm:$0xff] }
 0x2fd   : > { %12480 = vst [vmem:[#allocation30_spill] sm:$0xff] %v10182_v53 }
 0x2fe   : > { %2809 = vst.msk [vmem:[#allocation2 + $0xf9] sm:$0xff] %vm2789_vm2, %v2775_v57  ;;  %8187 = vmatmul.msk.f32.gmra.mxu1 %vm2789_vm2, %v10154_v42  ;;  %v2431_v20 = vadd.f32 %v9901_v45, %v2153_v47 }
 0x2ff   : > { %2849 = vst.msk [vmem:[#allocation2 + $0xfb] sm:$0x40] %vm2839_vm4, %v2775_v57  ;;  %8220 = vmatmul.msk.f32.gmra.mxu2 %vm2789_vm2, %v10164_v48  ;;  %v2652_v30 = vpop.f32.mrf.mxu0  ;;  %v10184_v57 = vld [vmem:[#allocation2 + $0xb2] sm:$0xff] }
 0x300   : > { %8253 = vmatmul.msk.f32.gmra.mxu3 %vm2789_vm2, %v10156_v44  ;;  %v2708_v37 = vadd.f32 %v2652_v30, %v2430_v32  ;;  %12481 = vst [vmem:[#allocation28_spill] sm:$0xff] %v10184_v57  ;;  %v1875_v32 = vadd.f32 %v9916_v46, %v1597_v0 }
 0x302   : > { %v2744_v54 = vadd.f32 %v9754_v25, %v2708_v37  ;;  %8277 = vmatmul.msk.f32.gmra.mxu0 %vm2789_vm2, %v9946_v5  ;;  %v10200_v45 = vpop.f32.mrf.mxu3  ;;  %v2154_v52 = vadd.f32 %v9914_v34, %v1875_v32  ;;  %v10216_v34 = vld [vmem:[#allocation2 + $0xc8] sm:$0xff] }
 0x304   : > { %v2776_v15 = vmax.f32 %v2744_v54, 0.0  ;;  %v2432_v0 = vadd.f32 %v9927_v58, %v2154_v52 }
 0x306   : > { %2810 = vst.msk [vmem:[#allocation2 + $0x109] sm:$0xff] %vm2789_vm2, %v2776_v15  ;;  %8188 = vmatmul.msk.f32.gmra.mxu1 %vm2789_vm2, %v10182_v53  ;;  %v12486_v53 = vld [vmem:[#allocation60_spill] sm:$0xff] }
 0x307   : > { %2833 = vst.msk [vmem:[#allocation2 + $0x107] sm:$0x2] %vm2822_vm3, %v2776_v15  ;;  %8221 = vmatmul.msk.f32.gmra.mxu2 %vm2789_vm2, %v10192_v40  ;;  %v2655_v5 = vpop.f32.mrf.mxu0  ;;  %v10206_v15 = vld [vmem:[#allocation2 + $0xc1] sm:$0xff] }
 0x308   : > { %8254 = vmatmul.msk.f32.gmra.mxu3 %vm2789_vm2, %v10184_v57  ;;  %v2709_v30 = vadd.f32 %v2655_v5, %v2431_v20  ;;  %12484 = vst [vmem:[#allocation31_spill] sm:$0xff] %v10206_v15  ;;  %v12487_v57 = vld [vmem:[#allocation12_spill] sm:$0xff] }
 0x309   : > { %v1598_v46 = vadd.f32 %v12487_v57, %v12486_v53 }
 0x30a   : > { %v2745_v37 = vadd.f32 %v9754_v25, %v2709_v30  ;;  %v3263_v47 = vpop.f32.mrf.mxu2  ;;  %8278 = vmatmul.msk.f32.gmra.mxu0 %vm2789_vm2, %v9968_v28 }
 0x30b   : > { %v3054_v54 = vpop.f32.mrf.mxu1  ;;  %v1876_v53 = vadd.f32 %v9939_v22, %v1598_v46  ;;  %v12488_v22 = vld [vmem:[#allocation61_spill] sm:$0xff] }
 0x30c   : > { %v2777_v55 = vmax.f32 %v2745_v37, 0.0  ;;  %v3264_v57 = vadd.f32 %v3263_v47, %v3054_v54  ;;  %v12489_v47 = vld [vmem:[#allocation13_spill] sm:$0xff] }
 0x30d   : > { %v2155_v5 = vadd.f32 %v9935_v17, %v1876_v53  ;;  %v1599_v54 = vadd.f32 %v12489_v47, %v12488_v22  ;;  %v10240_v17 = vld [vmem:[#allocation2 + $0xd8] sm:$0xff] }
 0x30e   : > { %2811 = vst.msk [vmem:[#allocation2 + $0x111] sm:$0xff] %vm2789_vm2, %v2777_v55  ;;  %8189 = vmatmul.msk.f32.gmra.mxu1 %vm2789_vm2, %v10206_v15  ;;  %v10230_v15 = vld [vmem:[#allocation2 + $0xc9] sm:$0xff]  ;;  %v10254_v22 = vld [vmem:[#allocation2 + $0xd9] sm:$0xff] }
 0x30f   : > { %2850 = vst.msk [vmem:[#allocation2 + $0x113] sm:$0x40] %vm2839_vm4, %v2777_v55  ;;  %8222 = vmatmul.msk.f32.gmra.mxu2 %vm2789_vm2, %v10216_v34  ;;  %v2658_v28 = vpop.f32.mrf.mxu0  ;;  %v2433_v46 = vadd.f32 %v9954_v3, %v2155_v5  ;;  %v10256_v47 = vld [vmem:[#allocation2 + $0xda] sm:$0xff] }
 0x310   : > { %8255 = vmatmul.msk.f32.gmra.mxu3 %vm2789_vm2, %v10208_v51  ;;  %v2710_v58 = vadd.f32 %v2658_v28, %v2432_v0  ;;  %v10232_v51 = vld [vmem:[#allocation2 + $0xca] sm:$0xff]  ;;  %v1877_v0 = vadd.f32 %v9961_v12, %v1599_v54  ;;  %v12490_v12 = vld [vmem:[#allocation62_spill] sm:$0xff] }
 0x312   : > { %v2746_v32 = vadd.f32 %v9754_v25, %v2710_v58  ;;  %v3266_v30 = vpop.f32.mrf.mxu2  ;;  %8279 = vmatmul.msk.f32.gmra.mxu0 %vm2789_vm2, %v9991_v4 }
 0x313   : > { %v3507_v20 = vpop.f32.mrf.mxu3  ;;  %v3057_v37 = vpop.f32.mrf.mxu1 }
 0x314   : > { %v10226_v52 = vadd.f32 %v3507_v20, %v3264_v57  ;;  %v2778_v55 = vmax.f32 %v2746_v32, 0.0  ;;  %v3267_v28 = vadd.f32 %v3266_v30, %v3057_v37  ;;  %v2156_v57 = vadd.f32 %v9959_v61, %v1877_v0  ;;  %v12491_v30 = vld [vmem:[#allocation7_spill] sm:$0xff]  ;;  %v10264_v61 = vld [vmem:[#allocation2 + $0xe0] sm:$0xff] }
 0x315   : > { %v1600_v37 = vadd.f32 %v12491_v30, %v12490_v12  ;;  %v10278_v12 = vld [vmem:[#allocation2 + $0xe1] sm:$0xff] }
 0x316   : > { %2812 = vst.msk [vmem:[#allocation2 + $0x121] sm:$0xff] %vm2789_vm2, %v2778_v55  ;;  %8190 = vmatmul.msk.f32.gmra.mxu1 %vm2789_vm2, %v10230_v15  ;;  %v2434_v54 = vadd.f32 %v9979_v59, %v2156_v57  ;;  %v10280_v30 = vld [vmem:[#allocation2 + $0xe2] sm:$0xff] }
 0x317   : > { %2834 = vst.msk [vmem:[#allocation2 + $0x11f] sm:$0x2] %vm2822_vm3, %v2778_v55  ;;  %8223 = vmatmul.msk.f32.gmra.mxu2 %vm2789_vm2, %v10240_v17  ;;  %v2661_v4 = vpop.f32.mrf.mxu0 }
 0x318   : > { %8256 = vmatmul.msk.f32.gmra.mxu3 %vm2789_vm2, %v10232_v51  ;;  %v2711_v3 = vadd.f32 %v2661_v4, %v2433_v46  ;;  %v1878_v46 = vadd.f32 %v9994_v16, %v1600_v37  ;;  %v12493_v16 = vld [vmem:[#allocation63_spill] sm:$0xff] }
 0x31a   : > { %v2747_v58 = vadd.f32 %v9754_v25, %v2711_v3  ;;  %v3269_v20 = vpop.f32.mrf.mxu2  ;;  %8280 = vmatmul.msk.f32.gmra.mxu0 %vm2789_vm2, %v10011_v14 }
 0x31b   : > { %v3510_v53 = vpop.f32.mrf.mxu3  ;;  %v3060_v32 = vpop.f32.mrf.mxu1 }
 0x31c   : > { %v10250_v5 = vadd.f32 %v3510_v53, %v3267_v28  ;;  %v2779_v55 = vmax.f32 %v2747_v58, 0.0  ;;  %v3270_v4 = vadd.f32 %v3269_v20, %v3060_v32  ;;  %v2157_v28 = vadd.f32 %v9987_v50, %v1878_v46  ;;  %v12494_v20 = vld [vmem:[#allocation33_spill] sm:$0xff]  ;;  %v10288_v50 = vld [vmem:[#allocation2 + $0xf0] sm:$0xff] }
 0x31d   : > { %v1601_v32 = vadd.f32 %v12494_v20, %v12493_v16  ;;  %v10302_v20 = vld [vmem:[#allocation2 + $0xf1] sm:$0xff] }
 0x31e   : > { %2813 = vst.msk [vmem:[#allocation2 + $0x129] sm:$0xff] %vm2789_vm2, %v2779_v55  ;;  %8191 = vmatmul.msk.f32.gmra.mxu1 %vm2789_vm2, %v10254_v22  ;;  %v2435_v37 = vadd.f32 %v10004_v1, %v2157_v28 }
 0x31f   : > { %2851 = vst.msk [vmem:[#allocation2 + $0x12b] sm:$0x40] %vm2839_vm4, %v2779_v55  ;;  %8224 = vmatmul.msk.f32.gmra.mxu2 %vm2789_vm2, %v10264_v61  ;;  %v2664_v14 = vpop.f32.mrf.mxu0 }
 0x320   : > { %8257 = vmatmul.msk.f32.gmra.mxu3 %vm2789_vm2, %v10256_v47  ;;  %v2712_v59 = vadd.f32 %v2664_v14, %v2434_v54  ;;  %v1879_v14 = vadd.f32 %v10021_v10, %v1601_v32  ;;  %v12496_v10 = vld [vmem:[#allocation64_spill] sm:$0xff] }
 0x322   : > { %v2748_v3 = vadd.f32 %v9754_v25, %v2712_v59  ;;  %v3272_v53 = vpop.f32.mrf.mxu2  ;;  %8281 = vmatmul.msk.f32.gmra.mxu0 %vm2789_vm2, %v10031_v18  ;;  %v2158_v59 = vadd.f32 %v10019_v63, %v1879_v14  ;;  %v10312_v63 = vld [vmem:[#allocation2 + $0xf8] sm:$0xff] }
 0x323   : > { %v3513_v0 = vpop.f32.mrf.mxu3  ;;  %v3063_v58 = vpop.f32.mrf.mxu1 }
 0x324   : > { %v10274_v57 = vadd.f32 %v3513_v0, %v3270_v4  ;;  %v2780_v55 = vmax.f32 %v2748_v3, 0.0  ;;  %v3273_v46 = vadd.f32 %v3272_v53, %v3063_v58  ;;  %v12497_v53 = vld [vmem:[#allocation14_spill] sm:$0xff]  ;;  %v2436_v32 = vadd.f32 %v10034_v38, %v2158_v59 }
 0x325   : > { %v1602_v58 = vadd.f32 %v12497_v53, %v12496_v10  ;;  %v10326_v53 = vld [vmem:[#allocation2 + $0xf9] sm:$0xff] }
 0x326   : > { %12492 = vst [vmem:[#allocation32_spill] sm:$0xff] %v10274_v57  ;;  %8192 = vmatmul.msk.f32.gmra.mxu1 %vm2789_vm2, %v10278_v12  ;;  %v10304_v57 = vld [vmem:[#allocation2 + $0xf2] sm:$0xff] }
 0x327   : > { %2814 = vst.msk [vmem:[#allocation2 + $0x139] sm:$0xff] %vm2789_vm2, %v2780_v55  ;;  %8225 = vmatmul.msk.f32.gmra.mxu2 %vm2789_vm2, %v10288_v50  ;;  %v2667_v54 = vpop.f32.mrf.mxu0 }
 0x328   : > { %8258 = vmatmul.msk.f32.gmra.mxu3 %vm2789_vm2, %v10280_v30  ;;  %2835 = vst.msk [vmem:[#allocation2 + $0x137] sm:$0x2] %vm2822_vm3, %v2780_v55  ;;  %v2713_v1 = vadd.f32 %v2667_v54, %v2435_v37  ;;  %v1880_v54 = vadd.f32 %v10046_v6, %v1602_v58  ;;  %v12498_v6 = vld [vmem:[#allocation4_spill] sm:$0xff] }
 0x32a   : > { %v2749_v0 = vadd.f32 %v9754_v25, %v2713_v1  ;;  %v3275_v28 = vpop.f32.mrf.mxu2  ;;  %8282 = vmatmul.msk.f32.gmra.mxu0 %vm2789_vm2, %v10055_v29  ;;  %v2159_v1 = vadd.f32 %v10042_v23, %v1880_v54 }
 0x32b   : > { %v3516_v4 = vpop.f32.mrf.mxu3  ;;  %v3066_v55 = vpop.f32.mrf.mxu1 }
 0x32c   : > { %v10298_v3 = vadd.f32 %v3516_v4, %v3273_v46  ;;  %v2781_v16 = vmax.f32 %v2749_v0, 0.0  ;;  %v3276_v14 = vadd.f32 %v3275_v28, %v3066_v55  ;;  %v12499_v28 = vld [vmem:[#allocation15_spill] sm:$0xff]  ;;  %v2437_v58 = vadd.f32 %v10063_v33, %v2159_v1 }
 0x32d   : > { %v1603_v55 = vadd.f32 %v12499_v28, %v12498_v6  ;;  %v12503_v6 = vld [vmem:[#allocation11_spill] sm:$0xff] }
 0x32e   : > { %12495 = vst [vmem:[#allocation36_spill] sm:$0xff] %v10298_v3  ;;  %8193 = vmatmul.msk.f32.gmra.mxu1 %vm2789_vm2, %v10302_v20  ;;  %v10328_v3 = vld [vmem:[#allocation2 + $0xfa] sm:$0xff] }
 0x32f   : > { %2815 = vst.msk [vmem:[#allocation2 + $0x141] sm:$0xff] %vm2789_vm2, %v2781_v16  ;;  %8226 = vmatmul.msk.f32.gmra.mxu2 %vm2789_vm2, %v10312_v63  ;;  %v2670_v37 = vpop.f32.mrf.mxu0 }
 0x330   : > { %8259 = vmatmul.msk.f32.gmra.mxu3 %vm2789_vm2, %v10304_v57  ;;  %2852 = vst.msk [vmem:[#allocation2 + $0x143] sm:$0x40] %vm2839_vm4, %v2781_v16  ;;  %v2714_v38 = vadd.f32 %v2670_v37, %v2436_v32  ;;  %v1881_v32 = vadd.f32 %v10071_v36, %v1603_v55 }
 0x332   : > { %v2750_v4 = vadd.f32 %v9754_v25, %v2714_v38  ;;  %v3278_v59 = vpop.f32.mrf.mxu2  ;;  %8283 = vmatmul.msk.f32.gmra.mxu0 %vm2789_vm2, %v10083_v26  ;;  %v10336_v25 = vld [vmem:[#allocation2 + $0x108] sm:$0xff]  ;;  %v10348_v38 = vld [vmem:[%s12262_s2] ss:$0 sm:$0xff] }
 0x333   : > { %v3519_v46 = vpop.f32.mrf.mxu3  ;;  %v3069_v16 = vpop.f32.mrf.mxu1 }
 0x334   : > { %v10322_v0 = vadd.f32 %v3519_v46, %v3276_v14  ;;  %v2782_v10 = vmax.f32 %v2750_v4, 0.0  ;;  %v3279_v37 = vadd.f32 %v3278_v59, %v3069_v16  ;;  %v2160_v14 = vadd.f32 %v10069_v11, %v1881_v32  ;;  %v10355_v59 = vld [vmem:[#allocation2 + $0x109] sm:$0xff]  ;;  %v12502_v11 = vld [vmem:[#allocation5_spill] sm:$0xff] }
 0x335   : > { %12501 = vst [vmem:[#allocation37_spill] sm:$0xff] %v10355_v59  ;;  %v10357_v16 = vld [vmem:[#allocation2 + $0x10a] sm:$0xff]  ;;  %v1604_v28 = vadd.f32 %v12503_v6, %v12502_v11 }
 0x336   : > { %2816 = vst.msk [vmem:[#allocation2 + $0x151] sm:$0xff] %vm2789_vm2, %v2782_v10  ;;  %8194 = vmatmul.msk.f32.gmra.mxu1 %vm2789_vm2, %v10326_v53  ;;  %v2438_v55 = vadd.f32 %v10095_v43, %v2160_v14 }
 0x337   : > { %2836 = vst.msk [vmem:[#allocation2 + $0x14f] sm:$0x2] %vm2822_vm3, %v2782_v10  ;;  %8227 = vmatmul.msk.f32.gmra.mxu2 %vm2789_vm2, %v10336_v25  ;;  %v2673_v23 = vpop.f32.mrf.mxu0  ;;  %v1882_v32 = vadd.f32 %v10113_v35, %v1604_v28  ;;  %v12506_v35 = vld [vmem:[#allocation6_spill] sm:$0xff] }
 0x338   : > { %8260 = vmatmul.msk.f32.gmra.mxu3 %vm2789_vm2, %v10328_v3  ;;  %v2715_v33 = vadd.f32 %v2673_v23, %v2437_v58  ;;  %v10365_v58 = vld [vmem:[#allocation2 + $0x110] sm:$0xff] }
 0x33a   : > { %v2751_v46 = vadd.f32 %v10348_v38, %v2715_v33  ;;  %v3281_v1 = vpop.f32.mrf.mxu2  ;;  %8284 = vmatmul.msk.f32.gmra.mxu0 %vm2789_vm2, %v10109_v49 }
 0x33b   : > { %v3522_v54 = vpop.f32.mrf.mxu3  ;;  %v3072_v10 = vpop.f32.mrf.mxu1 }
 0x33c   : > { %v10351_v4 = vadd.f32 %v3522_v54, %v3279_v37  ;;  %v2783_v36 = vmax.f32 %v2751_v46, 0.0  ;;  %v3282_v37 = vadd.f32 %v3281_v1, %v3072_v10  ;;  %v2161_v54 = vadd.f32 %v10104_v27, %v1882_v32  ;;  %v12507_v1 = vld [vmem:[#allocation17_spill] sm:$0xff]  ;;  %v10389_v27 = vld [vmem:[#allocation2 + $0x120] sm:$0xff] }
 0x33d   : > { %v1605_v10 = vadd.f32 %v12507_v1, %v12506_v35  ;;  %v10403_v1 = vld [vmem:[#allocation2 + $0x121] sm:$0xff] }
 0x33e   : > { %12500 = vst [vmem:[#allocation35_spill] sm:$0xff] %v10351_v4  ;;  %8195 = vmatmul.msk.f32.gmra.mxu1 %vm2789_vm2, %v10355_v59  ;;  %v10379_v4 = vld [vmem:[#allocation2 + $0x111] sm:$0xff]  ;;  %v2439_v28 = vadd.f32 %v10126_v31, %v2161_v54 }
 0x33f   : > { %2817 = vst.msk [vmem:[#allocation2 + $0x159] sm:$0xff] %vm2789_vm2, %v2783_v36  ;;  %8228 = vmatmul.msk.f32.gmra.mxu2 %vm2789_vm2, %v10365_v58  ;;  %v2676_v23 = vpop.f32.mrf.mxu0  ;;  %v10381_v59 = vld [vmem:[#allocation2 + $0x112] sm:$0xff] }
 0x340   : > { %8261 = vmatmul.msk.f32.gmra.mxu3 %vm2789_vm2, %v10357_v16  ;;  %2853 = vst.msk [vmem:[#allocation2 + $0x15b] sm:$0x40] %vm2839_vm4, %v2783_v36  ;;  %v2716_v43 = vadd.f32 %v2676_v23, %v2438_v55  ;;  %v1883_v23 = vadd.f32 %v10148_v62, %v1605_v10  ;;  %v12511_v62 = vld [vmem:[#allocation26_spill] sm:$0xff] }
 0x341   : > { %12505 = vst [vmem:[#allocation38_spill] sm:$0xff] %v10379_v4 }
 0x342   : > { %v2752_v14 = vadd.f32 %v10348_v38, %v2716_v43  ;;  %v3284_v46 = vpop.f32.mrf.mxu2  ;;  %8285 = vmatmul.msk.f32.gmra.mxu0 %vm2789_vm2, %v10138_v13  ;;  %v2162_v43 = vadd.f32 %v10146_v21, %v1883_v23  ;;  %12509 = vst [vmem:[#allocation42_spill] sm:$0xff] %v10403_v1  ;;  %v10413_v21 = vld [vmem:[#allocation2 + $0x128] sm:$0xff] }
 0x343   : > { %v3525_v33 = vpop.f32.mrf.mxu3  ;;  %v3075_v36 = vpop.f32.mrf.mxu1 }
 0x344   : > { %v10375_v11 = vadd.f32 %v3525_v33, %v3282_v37  ;;  %v2784_v6 = vmax.f32 %v2752_v14, 0.0  ;;  %v3285_v32 = vadd.f32 %v3284_v46, %v3075_v36  ;;  %v12512_v46 = vld [vmem:[#allocation16_spill] sm:$0xff]  ;;  %v2440_v10 = vadd.f32 %v10168_v56, %v2162_v43 }
 0x345   : > { %v1606_v36 = vadd.f32 %v12512_v46, %v12511_v62 }
 0x346   : > { %12504 = vst [vmem:[#allocation39_spill] sm:$0xff] %v10375_v11  ;;  %8196 = vmatmul.msk.f32.gmra.mxu1 %vm2789_vm2, %v10379_v4  ;;  %v10405_v11 = vld [vmem:[#allocation2 + $0x122] sm:$0xff]  ;;  %v8583_v4 = vld [vmem:[#allocation2 + $0x19] sm:$0xff] }
 0x347   : > { %2818 = vst.msk [vmem:[#allocation2 + $0x169] sm:$0xff] %vm2789_vm2, %v2784_v6  ;;  %8229 = vmatmul.msk.f32.gmra.mxu2 %vm2789_vm2, %v10389_v27  ;;  %v2679_v55 = vpop.f32.mrf.mxu0  ;;  %v1884_v23 = vadd.f32 %v10180_v39, %v1606_v36  ;;  %v10430_v39 = vld [vmem:[#allocation2 + $0x12a] sm:$0xff] }
 0x348   : > { %8262 = vmatmul.msk.f32.gmra.mxu3 %vm2789_vm2, %v10381_v59  ;;  %2837 = vst.msk [vmem:[#allocation2 + $0x167] sm:$0x2] %vm2822_vm3, %v2784_v6  ;;  %v2717_v31 = vadd.f32 %v2679_v55, %v2439_v28 }
 0x349   : > { %12510 = vst [vmem:[#allocation43_spill] sm:$0xff] %v10405_v11 }
 0x34a   : > { %v2753_v33 = vadd.f32 %v10348_v38, %v2717_v31  ;;  %v3287_v54 = vpop.f32.mrf.mxu2  ;;  %8286 = vmatmul.msk.f32.gmra.mxu0 %vm2789_vm2, %v10164_v48  ;;  %12515 = vst [vmem:[#allocation48_spill] sm:$0xff] %v10430_v39 }
 0x34b   : > { %v3528_v37 = vpop.f32.mrf.mxu3  ;;  %v3078_v6 = vpop.f32.mrf.mxu1 }
 0x34c   : > { %v10399_v14 = vadd.f32 %v3528_v37, %v3285_v32  ;;  %v2785_v35 = vmax.f32 %v2753_v33, 0.0  ;;  %v3288_v56 = vadd.f32 %v3287_v54, %v3078_v6  ;;  %v2163_v37 = vadd.f32 %v10175_v9, %v1884_v23  ;;  %v10436_v9 = vld [vmem:[#allocation2 + $0x138] sm:$0xff] }
 0x34e   : > { %12508 = vst [vmem:[#allocation40_spill] sm:$0xff] %v10399_v14  ;;  %8197 = vmatmul.msk.f32.gmra.mxu1 %vm2789_vm2, %v10403_v1  ;;  %v10428_v14 = vld [vmem:[#allocation2 + $0x129] sm:$0xff]  ;;  %v2441_v54 = vadd.f32 %v10200_v45, %v2163_v37 }
 0x34f   : > { %2819 = vst.msk [vmem:[#allocation2 + $0x171] sm:$0xff] %vm2789_vm2, %v2785_v35  ;;  %v2865_v28 = vld [vmem:[#allocation2 + $0x168] sm:$0xff]  ;;  %8230 = vmatmul.msk.f32.gmra.mxu2 %vm2789_vm2, %v10413_v21  ;;  %v2682_v55 = vpop.f32.mrf.mxu0 }
 0x350   : > { %8263 = vmatmul.msk.f32.gmra.mxu3 %vm2789_vm2, %v10405_v11  ;;  %2854 = vst.msk [vmem:[#allocation2 + $0x173] sm:$0x40] %vm2839_vm4, %v2785_v35  ;;  %v2718_v32 = vadd.f32 %v2682_v55, %v2440_v10  ;;  %v4463_v11 = vld [vmem:[#allocation2 + $0x30] sm:$0xff] }
 0x351   : > { %2869 = vst.msk [vmem:[#allocation2 + $0x198] sm:$0xff] %vm2789_vm2, %v2865_v28 }
 0x352   : > { %v2754_v43 = vadd.f32 %v10348_v38, %v2718_v32  ;;  %v3290_v33 = vpop.f32.mrf.mxu2  ;;  %8287 = vmatmul.msk.f32.gmra.mxu0 %vm2789_vm2, %v10192_v40  ;;  %12514 = vst [vmem:[#allocation46_spill] sm:$0xff] %v10428_v14 }
 0x353   : > { %v3531_v31 = vpop.f32.mrf.mxu3  ;;  %v3081_v35 = vpop.f32.mrf.mxu1 }
 0x354   : > { %v10424_v62 = vadd.f32 %v3531_v31, %v3288_v56  ;;  %v2786_v46 = vmax.f32 %v2754_v43, 0.0  ;;  %v3291_v28 = vadd.f32 %v3290_v33, %v3081_v35  ;;  %v10450_v43 = vld [vmem:[#allocation2 + $0x139] sm:$0xff] }
 0x355   : > { %12517 = vst [vmem:[#allocation52_spill] sm:$0xff] %v10450_v43  ;;  %v10457_v33 = vld [vmem:[#allocation2 + $0x140] sm:$0xff] }
 0x356   : > { %12513 = vst [vmem:[#allocation45_spill] sm:$0xff] %v10424_v62  ;;  %8198 = vmatmul.msk.f32.gmra.mxu1 %vm2789_vm2, %v10428_v14  ;;  %v2866_v6 = vld [vmem:[#allocation2 + $0x170] sm:$0xff] }
 0x357   : > { %2820 = vst.msk [vmem:[#allocation2 + $0x181] sm:$0xff] %vm2789_vm2, %v2786_v46  ;;  %8231 = vmatmul.msk.f32.gmra.mxu2 %vm2789_vm2, %v10436_v9  ;;  %v2685_v36 = vpop.f32.mrf.mxu0  ;;  %v2867_v10 = vld [vmem:[#allocation2 + $0x178] sm:$0x3] }
 0x358   : > { %8264 = vmatmul.msk.f32.gmra.mxu3 %vm2789_vm2, %v10430_v39  ;;  %2838 = vst.msk [vmem:[#allocation2 + $0x17f] sm:$0x2] %vm2822_vm3, %v2786_v46  ;;  %v2719_v45 = vadd.f32 %v2685_v36, %v2441_v54  ;;  %v10452_v46 = vld [vmem:[#allocation2 + $0x13a] sm:$0xff]  ;;  %v10503_v62 = vld [vmem:[#allocation2 + $0x151] sm:$0xff] }
 0x359   : > { %2870 = vst.msk [vmem:[#allocation2 + $0x1a0] sm:$0xff] %vm2789_vm2, %v2866_v6  ;;  %v10562_v39 = vld [vmem:[#allocation2 + $0x172] sm:$0xff] }
 0x35a   : > { %2871 = vst.msk [vmem:[#allocation2 + $0x1a8] sm:$0x3] %vm2862_vm5, %v2867_v10  ;;  %v2755_v23 = vadd.f32 %v10348_v38, %v2719_v45  ;;  %v3293_v56 = vpop.f32.mrf.mxu2  ;;  %8288 = vmatmul.msk.f32.gmra.mxu0 %vm2789_vm2, %v10216_v34  ;;  %v8340_v10 = vld [vmem:[%s12263_s3 + $0x58] sm:$0xff]  ;;  %v8374_v45 = vld [vmem:[%s12263_s3 + $0x68] sm:$0xff] }
 0x35b   : > { %v3534_v55 = vpop.f32.mrf.mxu3  ;;  %v3084_v31 = vpop.f32.mrf.mxu1  ;;  %12518 = vst [vmem:[#allocation53_spill] sm:$0xff] %v10452_v46  ;;  %4332 = vmatpush.msra.mxu2 %v8340_v10  ;;  %4608 = vmatpush.msra.mxu3 %v8374_v45 }
 0x35c   : > { %v10446_v32 = vadd.f32 %v3534_v55, %v3291_v28  ;;  %v2787_v37 = vmax.f32 %v2755_v23, 0.0  ;;  %v3294_v35 = vadd.f32 %v3293_v56, %v3084_v31  ;;  %v8339_v55 = vld [vmem:[%s12263_s3 + $0x50] sm:$0xff]  ;;  %v10479_v23 = vld [vmem:[#allocation2 + $0x141] sm:$0xff]  ;;  %12523 = vst [vmem:[#allocation51_spill] sm:$0xff] %v10503_v62 }
 0x35d   : > { %12520 = vst [vmem:[#allocation44_spill] sm:$0xff] %v10479_v23  ;;  %v10481_v56 = vld [vmem:[#allocation2 + $0x142] sm:$0xff]  ;;  %4333 = vmatpush.msra.mxu2 %v8339_v55  ;;  %v10485_v31 = vld [vmem:[#allocation2 + $0x150] sm:$0xff]  ;;  %v8408_v55 = vld [vmem:[%s12263_s3 + $0x78] sm:$0xff] }
 0x35e   : > { %12516 = vst [vmem:[#allocation50_spill] sm:$0xff] %v10446_v32  ;;  %8199 = vmatmul.msk.f32.gmra.mxu1 %vm2789_vm2, %v10450_v43  ;;  %v8373_v32 = vld [vmem:[%s12263_s3 + $0x60] sm:$0xff]  ;;  %4884 = vmatpush.msra.mxu0 %v8408_v55  ;;  %v10530_v43 = vld [vmem:[#allocation2 + $0x168] sm:$0xff] }
 0x35f   : > { %2821 = vst.msk [vmem:[#allocation2 + $0x189] sm:$0xff] %vm2789_vm2, %v2787_v37  ;;  %8232 = vmatmul.msk.f32.gmra.mxu2 %vm2789_vm2, %v10457_v33  ;;  %v10464_v38 = vpop.f32.mrf.mxu0  ;;  %4609 = vmatpush.msra.mxu3 %v8373_v32 }
 0x360   : > { %8265 = vmatmul.msk.f32.gmra.mxu3 %vm2789_vm2, %v10452_v46  ;;  %2855 = vst.msk [vmem:[#allocation2 + $0x18b] sm:$0x40] %vm2839_vm4, %v2787_v37  ;;  %v10544_v46 = vld [vmem:[#allocation2 + $0x16a] sm:$0xff] }
 0x361   : > { %12521 = vst [vmem:[#allocation47_spill] sm:$0xff] %v10481_v56 }
 0x362   : > { %v3296_v6 = vpop.f32.mrf.mxu2  ;;  %8289 = vmatmul.msk.f32.gmra.mxu0 %vm2789_vm2, %v10240_v17  ;;  %12530 = vst [vmem:[#allocation8_spill] sm:$0xff] %v10544_v46 }
 0x363   : > { %v3537_v54 = vpop.f32.mrf.mxu3  ;;  %v3087_v28 = vpop.f32.mrf.mxu1  ;;  %12533 = vst [vmem:[#allocation23_spill] sm:$0xff] %v10562_v39 }
 0x364   : > { %v10466_v36 = vadd.f32 %v3537_v54, %v3294_v35  ;;  %v3297_v35 = vadd.f32 %v3296_v6, %v3087_v28  ;;  %v10509_v6 = vld [vmem:[#allocation2 + $0x158] sm:$0xff] }
 0x366   : > { %12519 = vst [vmem:[#allocation41_spill] sm:$0xff] %v10466_v36  ;;  %8200 = vmatmul.msk.f32.gmra.mxu1 %vm2789_vm2, %v10479_v23  ;;  %v10505_v23 = vld [vmem:[#allocation2 + $0x152] sm:$0xff] }
 0x367   : > { %8233 = vmatmul.msk.f32.gmra.mxu2 %vm2789_vm2, %v10485_v31  ;;  %v10491_v37 = vpop.f32.mrf.mxu0  ;;  %12524 = vst [vmem:[#allocation54_spill] sm:$0xff] %v10505_v23 }
 0x368   : > { %8266 = vmatmul.msk.f32.gmra.mxu3 %vm2789_vm2, %v10481_v56  ;;  %v10526_v56 = vld [vmem:[#allocation2 + $0x15a] sm:$0xff] }
 0x369   : > { %12527 = vst [vmem:[#allocation19_spill] sm:$0xff] %v10526_v56 }
 0x36a   : > { %v3299_v10 = vpop.f32.mrf.mxu2  ;;  %8290 = vmatmul.msk.f32.gmra.mxu0 %vm2789_vm2, %v10264_v61 }
 0x36b   : > { %v3540_v54 = vpop.f32.mrf.mxu3  ;;  %v3090_v45 = vpop.f32.mrf.mxu1 }
 0x36c   : > { %v10493_v36 = vadd.f32 %v3540_v54, %v3297_v35  ;;  %v8442_v35 = vld [vmem:[%s12263_s3 + $0x88] sm:$0xff]  ;;  %v3300_v54 = vadd.f32 %v3299_v10, %v3090_v45 }
 0x36d   : > { %5160 = vmatpush.msrb.mxu1 %v8442_v35 }
 0x36e   : > { %12522 = vst [vmem:[#allocation49_spill] sm:$0xff] %v10493_v36  ;;  %8201 = vmatmul.msk.f32.gmra.mxu1 %vm2789_vm2, %v10503_v62 }
 0x36f   : > { %8234 = vmatmul.msk.f32.gmra.mxu2 %vm2789_vm2, %v10509_v6  ;;  %v10515_v28 = vpop.f32.mrf.mxu0 }
 0x370   : > { %8267 = vmatmul.msk.f32.gmra.mxu3 %vm2789_vm2, %v10505_v23  ;;  %v10524_v23 = vld [vmem:[#allocation2 + $0x159] sm:$0xff] }
 0x371   : > { %12526 = vst [vmem:[#allocation18_spill] sm:$0xff] %v10524_v23 }
 0x372   : > { %v3302_v55 = vpop.f32.mrf.mxu2  ;;  %8291 = vmatmul.msk.f32.gmra.mxu0 %vm2789_vm2, %v10288_v50 }
 0x373   : > { %v3543_v32 = vpop.f32.mrf.mxu3  ;;  %v3093_v62 = vpop.f32.mrf.mxu1 }
 0x374   : > { %v10520_v36 = vadd.f32 %v3543_v32, %v3300_v54  ;;  %v3303_v45 = vadd.f32 %v3302_v55, %v3093_v62 }
 0x376   : > { %12525 = vst [vmem:[#allocation55_spill] sm:$0xff] %v10520_v36  ;;  %8202 = vmatmul.msk.f32.gmra.mxu1 %vm2789_vm2, %v10524_v23  ;;  %v10542_v23 = vld [vmem:[#allocation2 + $0x169] sm:$0xff] }
 0x377   : > { %8235 = vmatmul.msk.f32.gmra.mxu2 %vm2789_vm2, %v10530_v43  ;;  %v10536_v10 = vpop.f32.mrf.mxu0  ;;  %12529 = vst [vmem:[#allocation56_spill] sm:$0xff] %v10542_v23 }
 0x378   : > { %8268 = vmatmul.msk.f32.gmra.mxu3 %vm2789_vm2, %v10526_v56  ;;  %v10548_v56 = vld [vmem:[#allocation2 + $0x170] sm:$0xff] }
 0x37a   : > { %v3305_v54 = vpop.f32.mrf.mxu2  ;;  %8292 = vmatmul.msk.f32.gmra.mxu0 %vm2789_vm2, %v10312_v63 }
 0x37b   : > { %v3546_v35 = vpop.f32.mrf.mxu3  ;;  %v3096_v36 = vpop.f32.mrf.mxu1 }
 0x37c   : > { %v10538_v32 = vadd.f32 %v3546_v35, %v3303_v45  ;;  %v3306_v55 = vadd.f32 %v3305_v54, %v3096_v36 }
 0x37e   : > { %12528 = vst [vmem:[#allocation20_spill] sm:$0xff] %v10538_v32  ;;  %8203 = vmatmul.msk.f32.gmra.mxu1 %vm2789_vm2, %v10542_v23  ;;  %v10560_v23 = vld [vmem:[#allocation2 + $0x171] sm:$0xff] }
 0x37f   : > { %8236 = vmatmul.msk.f32.gmra.mxu2 %vm2789_vm2, %v10548_v56  ;;  %v10554_v62 = vpop.f32.mrf.mxu0  ;;  %12532 = vst [vmem:[#allocation22_spill] sm:$0xff] %v10560_v23 }
 0x380   : > { %8269 = vmatmul.msk.f32.gmra.mxu3 %vm2789_vm2, %v10544_v46  ;;  %v8582_v46 = vld [vmem:[#allocation2 + $0x1a] sm:$0xff] }
 0x382   : > { %v3308_v35 = vpop.f32.mrf.mxu2  ;;  %8293 = vmatmul.msk.f32.gmra.mxu0 %vm2789_vm2, %v10336_v25 }
 0x383   : > { %v3549_v45 = vpop.f32.mrf.mxu3  ;;  %v3099_v14 = vpop.f32.mrf.mxu1 }
 0x384   : > { %v10556_v32 = vadd.f32 %v3549_v45, %v3306_v55  ;;  %v3309_v54 = vadd.f32 %v3308_v35, %v3099_v14 }
 0x386   : > { %12531 = vst [vmem:[#allocation21_spill] sm:$0xff] %v10556_v32  ;;  %8204 = vmatmul.msk.f32.gmra.mxu1 %vm2789_vm2, %v10560_v23  ;;  %v8584_v23 = vld [vmem:[#allocation2 + $0x22] sm:$0xff] }
 0x387   : > { %8341 = vmatmul.msk.f32.vlgmr.msra.gmra.mxu2 %vm2789_vm2, %v8582_v46  ;;  %v10569_v36 = vpop.f32.mrf.mxu0 }
 0x388   : > { %8270 = vmatmul.msk.f32.gmra.mxu3 %vm2789_vm2, %v10562_v39  ;;  %12534 = vst [vmem:[#allocation57_spill] sm:$0xff] %v10569_v36  ;;  %v8585_v36 = vld [vmem:[#allocation2 + $0x21] sm:$0xff] }
 0x38a   : > { %v3311_v45 = vpop.f32.mrf.mxu2  ;;  %8294 = vmatmul.msk.f32.gmra.mxu0 %vm2789_vm2, %v10365_v58 }
 0x38b   : > { %v3552_v55 = vpop.f32.mrf.mxu3  ;;  %v3102_v1 = vpop.f32.mrf.mxu1 }
 0x38c   : > { %v10571_v32 = vadd.f32 %v3552_v55, %v3309_v54  ;;  %v3312_v14 = vadd.f32 %v3311_v45, %v3102_v1 }
 0x38e   : > { %12535 = vst [vmem:[#allocation9_spill] sm:$0xff] %v10571_v32  ;;  %8307 = vmatmul.msk.f32.vlgmr.msra.gmra.mxu1 %vm2789_vm2, %v8583_v4  ;;  %v4464_v32 = vld [vmem:[#allocation2 + $0x38] sm:$0xff] }
 0x38f   : > { %8342 = vmatmul.msk.f32.gmra.mxu2 %vm2789_vm2, %v8584_v23  ;;  %v10578_v46 = vpop.f32.mrf.mxu0  ;;  %v8586_v4 = vld [vmem:[#allocation2 + $0x32] sm:$0xff] }
 0x390   : > { %8375 = vmatmul.msk.f32.vlgmr.msra.gmra.mxu3 %vm2789_vm2, %v4463_v11 }
 0x392   : > { %v3314_v39 = vpop.f32.mrf.mxu2  ;;  %8295 = vmatmul.msk.f32.gmra.mxu0 %vm2789_vm2, %v10389_v27 }
 0x393   : > { %v3555_v35 = vpop.f32.mrf.mxu3  ;;  %v3105_v55 = vpop.f32.mrf.mxu1 }
 0x394   : > { %v10580_v54 = vadd.f32 %v3555_v35, %v3312_v14  ;;  %v3315_v1 = vadd.f32 %v3314_v39, %v3105_v55 }
 0x396   : > { %12536 = vst [vmem:[#allocation24_spill] sm:$0xff] %v10580_v54  ;;  %8308 = vmatmul.msk.f32.gmra.mxu1 %vm2789_vm2, %v8585_v36  ;;  %v8587_v54 = vld [vmem:[#allocation2 + $0x31] sm:$0xff]  ;;  %v8588_v36 = vld [vmem:[#allocation2 + $0x48] sm:$0xff] }
 0x397   : > { %8343 = vmatmul.msk.f32.gmra.mxu2 %vm2789_vm2, %v8586_v4  ;;  %v10587_v11 = vpop.f32.mrf.mxu0 }
 0x398   : > { %8376 = vmatmul.msk.f32.gmra.mxu3 %vm2789_vm2, %v4464_v32  ;;  %12537 = vst [vmem:[#allocation25_spill] sm:$0xff] %v10587_v11  ;;  %v8589_v32 = vld [vmem:[#allocation2 + $0x3a] sm:$0xff] }
 0x39a   : > { %v3317_v45 = vpop.f32.mrf.mxu2  ;;  %8296 = vmatmul.msk.f32.gmra.mxu0 %vm2789_vm2, %v10413_v21 }
 0x39b   : > { %v3558_v23 = vpop.f32.mrf.mxu3  ;;  %v3108_v35 = vpop.f32.mrf.mxu1 }
 0x39c   : > { %v10589_v14 = vadd.f32 %v3558_v23, %v3315_v1  ;;  %v3318_v39 = vadd.f32 %v3317_v45, %v3108_v35 }
 0x39e   : > { %12538 = vst [vmem:[#allocation27_spill] sm:$0xff] %v10589_v14  ;;  %8309 = vmatmul.msk.f32.gmra.mxu1 %vm2789_vm2, %v8587_v54  ;;  %v8590_v14 = vld [vmem:[#allocation2 + $0x39] sm:$0xff]  ;;  %v8591_v54 = vld [vmem:[#allocation2 + $0x50] sm:$0xff] }
 0x39f   : > { %8344 = vmatmul.msk.f32.gmra.mxu2 %vm2789_vm2, %v8589_v32  ;;  %v10596_v4 = vpop.f32.mrf.mxu0 }
 0x3a0   : > { %8377 = vmatmul.msk.f32.gmra.mxu3 %vm2789_vm2, %v8588_v36  ;;  %12539 = vst [vmem:[#allocation58_spill] sm:$0xff] %v10596_v4  ;;  %v8592_v36 = vld [vmem:[#allocation2 + $0x4a] sm:$0xff] }
 0x3a2   : > { %v3320_v11 = vpop.f32.mrf.mxu2  ;;  %8297 = vmatmul.msk.f32.gmra.mxu0 %vm2789_vm2, %v10436_v9 }
 0x3a3   : > { %v3561_v55 = vpop.f32.mrf.mxu3  ;;  %v3111_v23 = vpop.f32.mrf.mxu1 }
 0x3a4   : > { %v10598_v1 = vadd.f32 %v3561_v55, %v3318_v39  ;;  %v3321_v45 = vadd.f32 %v3320_v11, %v3111_v23 }
 0x3a6   : > { %12540 = vst [vmem:[#allocation10_spill] sm:$0xff] %v10598_v1  ;;  %8310 = vmatmul.msk.f32.gmra.mxu1 %vm2789_vm2, %v8590_v14  ;;  %v8593_v1 = vld [vmem:[#allocation2 + $0x49] sm:$0xff]  ;;  %v8594_v14 = vld [vmem:[#allocation2 + $0x60] sm:$0xff] }
 0x3a7   : > { %8345 = vmatmul.msk.f32.gmra.mxu2 %vm2789_vm2, %v8592_v36  ;;  %v10605_v32 = vpop.f32.mrf.mxu0 }
 0x3a8   : > { %8378 = vmatmul.msk.f32.gmra.mxu3 %vm2789_vm2, %v8591_v54  ;;  %12541 = vst [vmem:[#allocation59_spill] sm:$0xff] %v10605_v32  ;;  %v8595_v54 = vld [vmem:[#allocation2 + $0x52] sm:$0xff] }
 0x3aa   : > { %v3323_v4 = vpop.f32.mrf.mxu2  ;;  %8298 = vmatmul.msk.f32.gmra.mxu0 %vm2789_vm2, %v10457_v33 }
 0x3ab   : > { %v3564_v35 = vpop.f32.mrf.mxu3  ;;  %v3114_v55 = vpop.f32.mrf.mxu1 }
 0x3ac   : > { %v10607_v39 = vadd.f32 %v3564_v35, %v3321_v45  ;;  %v3324_v11 = vadd.f32 %v3323_v4, %v3114_v55 }
 0x3ae   : > { %12542 = vst [vmem:[#allocation29_spill] sm:$0xff] %v10607_v39  ;;  %8311 = vmatmul.msk.f32.gmra.mxu1 %vm2789_vm2, %v8593_v1  ;;  %v8596_v39 = vld [vmem:[#allocation2 + $0x51] sm:$0xff]  ;;  %v8597_v1 = vld [vmem:[#allocation2 + $0x68] sm:$0xff] }
 0x3af   : > { %8346 = vmatmul.msk.f32.gmra.mxu2 %vm2789_vm2, %v8595_v54  ;;  %v10614_v36 = vpop.f32.mrf.mxu0 }
 0x3b0   : > { %8379 = vmatmul.msk.f32.gmra.mxu3 %vm2789_vm2, %v8594_v14  ;;  %12543 = vst [vmem:[#allocation60_spill] sm:$0xff] %v10614_v36  ;;  %v8598_v14 = vld [vmem:[#allocation2 + $0x62] sm:$0xff] }
 0x3b2   : > { %v3326_v32 = vpop.f32.mrf.mxu2  ;;  %8299 = vmatmul.msk.f32.gmra.mxu0 %vm2789_vm2, %v10485_v31 }
 0x3b3   : > { %v3567_v23 = vpop.f32.mrf.mxu3  ;;  %v3117_v35 = vpop.f32.mrf.mxu1 }
 0x3b4   : > { %v10616_v45 = vadd.f32 %v3567_v23, %v3324_v11  ;;  %v3327_v4 = vadd.f32 %v3326_v32, %v3117_v35 }
 0x3b6   : > { %12544 = vst [vmem:[#allocation12_spill] sm:$0xff] %v10616_v45  ;;  %8312 = vmatmul.msk.f32.gmra.mxu1 %vm2789_vm2, %v8596_v39  ;;  %v8599_v45 = vld [vmem:[#allocation2 + $0x61] sm:$0xff]  ;;  %v8600_v39 = vld [vmem:[#allocation2 + $0x6a] sm:$0xff] }
 0x3b7   : > { %8347 = vmatmul.msk.f32.gmra.mxu2 %vm2789_vm2, %v8598_v14  ;;  %v10623_v54 = vpop.f32.mrf.mxu0 }
 0x3b8   : > { %8380 = vmatmul.msk.f32.gmra.mxu3 %vm2789_vm2, %v8597_v1 }
 0x3ba   : > { %v3329_v36 = vpop.f32.mrf.mxu2  ;;  %8300 = vmatmul.msk.f32.gmra.mxu0 %vm2789_vm2, %v10509_v6 }
 0x3bb   : > { %v3570_v55 = vpop.f32.mrf.mxu3  ;;  %v3120_v23 = vpop.f32.mrf.mxu1 }
 0x3bc   : > { %v10625_v11 = vadd.f32 %v3570_v55, %v3327_v4  ;;  %v3330_v32 = vadd.f32 %v3329_v36, %v3120_v23 }
 0x3be   : > { %8313 = vmatmul.msk.f32.gmra.mxu1 %vm2789_vm2, %v8599_v45  ;;  %v8407_v45 = vld [vmem:[%s12263_s3 + $0x70] sm:$0xff] }
 0x3bf   : > { %8348 = vmatmul.msk.f32.gmra.mxu2 %vm2789_vm2, %v8600_v39  ;;  %v10633_v1 = vpop.f32.mrf.mxu0  ;;  %4885 = vmatpush.msra.mxu0 %v8407_v45 }
 0x3c0   : > { %8381 = vmatmul.msk.f32.gmra.mxu3 %vm2789_vm2, %v10031_v18  ;;  %v8601_v18 = vld [vmem:[#allocation2 + $0x69] sm:$0xff] }
 0x3c2   : > { %v3332_v14 = vpop.f32.mrf.mxu2  ;;  %8301 = vmatmul.msk.f32.gmra.mxu0 %vm2789_vm2, %v10530_v43 }
 0x3c3   : > { %v3573_v35 = vpop.f32.mrf.mxu3  ;;  %v3123_v55 = vpop.f32.mrf.mxu1 }
 0x3c4   : > { %v10635_v4 = vadd.f32 %v3573_v35, %v3330_v32  ;;  %v3333_v23 = vadd.f32 %v3332_v14, %v3123_v55  ;;  %v10660_v55 = vld [vmem:[#allocation2 + $0x180] sm:$0xff] }
 0x3c6   : > { %12545 = vst [vmem:[#allocation61_spill] sm:$0xff] %v10635_v4  ;;  %8314 = vmatmul.msk.f32.gmra.mxu1 %vm2789_vm2, %v8601_v18  ;;  %v8602_v4 = vld [vmem:[#allocation2 + $0x79] sm:$0xff] }
 0x3c7   : > { %8349 = vmatmul.msk.f32.gmra.mxu2 %vm2789_vm2, %v10048_v60  ;;  %v10647_v36 = vpop.f32.mrf.mxu0 }
 0x3c8   : > { %8382 = vmatmul.msk.f32.gmra.mxu3 %vm2789_vm2, %v10055_v29 }
 0x3ca   : > { %v3335_v32 = vpop.f32.mrf.mxu2  ;;  %8302 = vmatmul.msk.f32.gmra.mxu0 %vm2789_vm2, %v10548_v56 }
 0x3cb   : > { %v3576_v39 = vpop.f32.mrf.mxu3  ;;  %v3126_v45 = vpop.f32.mrf.mxu1 }
 0x3cc   : > { %v10649_v35 = vadd.f32 %v3576_v39, %v3333_v23  ;;  %v3336_v29 = vadd.f32 %v3335_v32, %v3126_v45  ;;  %v10674_v32 = vld [vmem:[#allocation2 + $0x188] sm:$0xff] }
 0x3ce   : > { %8315 = vmatmul.msk.f32.gmra.mxu1 %vm2789_vm2, %v8602_v4 }
 0x3cf   : > { %8350 = vmatmul.msk.f32.gmra.mxu2 %vm2789_vm2, %v10075_v2  ;;  %v10658_v60 = vpop.f32.mrf.mxu0 }
 0x3d0   : > { %8383 = vmatmul.msk.f32.gmra.mxu3 %vm2789_vm2, %v10083_v26 }
 0x3d2   : > { %v3338_v18 = vpop.f32.mrf.mxu2  ;;  %8303 = vmatmul.msk.f32.gmra.mxu0 %vm2789_vm2, %v10660_v55 }
 0x3d3   : > { %v3579_v14 = vpop.f32.mrf.mxu3  ;;  %v3129_v39 = vpop.f32.mrf.mxu1 }
 0x3d4   : > { %v10662_v23 = vadd.f32 %v3579_v14, %v3336_v29  ;;  %v3339_v26 = vadd.f32 %v3338_v18, %v3129_v39  ;;  %v4739_v18 = vld [vmem:[#allocation2 + $0x31] sm:$0xff] }
 0x3d6   : > { %8316 = vmatmul.msk.f32.gmra.mxu1 %vm2789_vm2, %v10073_v41 }
 0x3d7   : > { %8351 = vmatmul.msk.f32.gmra.mxu2 %vm2789_vm2, %v10099_v8  ;;  %v10672_v2 = vpop.f32.mrf.mxu0 }
 0x3d8   : > { %8384 = vmatmul.msk.f32.gmra.mxu3 %vm2789_vm2, %v10109_v49 }
 0x3da   : > { %v3341_v45 = vpop.f32.mrf.mxu2  ;;  %8304 = vmatmul.msk.f32.gmra.mxu0 %vm2789_vm2, %v10674_v32 }
 0x3db   : > { %v3582_v4 = vpop.f32.mrf.mxu3  ;;  %v3132_v14 = vpop.f32.mrf.mxu1 }
 0x3dc   : > { %v10676_v29 = vadd.f32 %v3582_v4, %v3339_v26  ;;  %v3342_v8 = vadd.f32 %v3341_v45, %v3132_v14  ;;  %v4740_v45 = vld [vmem:[#allocation2 + $0x39] sm:$0xff] }
 0x3de   : > { %8317 = vmatmul.msk.f32.gmra.mxu1 %vm2789_vm2, %v10097_v19 }
 0x3df   : > { %8352 = vmatmul.msk.f32.gmra.mxu2 %vm2789_vm2, %v10130_v24  ;;  %v10686_v41 = vpop.f32.mrf.mxu0 }
 0x3e0   : > { %8385 = vmatmul.msk.f32.gmra.mxu3 %vm2789_vm2, %v10138_v13 }
 0x3e2   : > { %v3344_v39 = vpop.f32.mrf.mxu2  ;;  %8409 = vmatmul.msk.f32.vlgmr.msra.gmra.mxu0 %vm2789_vm2, %v4739_v18 }
 0x3e3   : > { %v3585_v49 = vpop.f32.mrf.mxu3  ;;  %v3135_v4 = vpop.f32.mrf.mxu1 }
 0x3e4   : > { %v10688_v26 = vadd.f32 %v3585_v49, %v3342_v8  ;;  %v3345_v24 = vadd.f32 %v3344_v39, %v3135_v4  ;;  %v4741_v4 = vld [vmem:[#allocation2 + $0x49] sm:$0xff] }
 0x3e6   : > { %8318 = vmatmul.msk.f32.gmra.mxu1 %vm2789_vm2, %v10128_v7  ;;  %v12547_v7 = vld [vmem:[#allocation28_spill] sm:$0xff] }
 0x3e7   : > { %8353 = vmatmul.msk.f32.gmra.mxu2 %vm2789_vm2, %v10156_v44  ;;  %v10697_v19 = vpop.f32.mrf.mxu0 }
 0x3e8   : > { %8386 = vmatmul.msk.f32.gmra.mxu3 %vm2789_vm2, %v10164_v48  ;;  %v8441_v48 = vld [vmem:[%s12263_s3 + $0x80] sm:$0xff] }
 0x3e9   : > { %5161 = vmatpush.msrb.mxu1 %v8441_v48  ;;  %v4742_v48 = vld [vmem:[#allocation2 + $0x51] sm:$0xff] }
 0x3ea   : > { %v3347_v14 = vpop.f32.mrf.mxu2  ;;  %8410 = vmatmul.msk.f32.gmra.mxu0 %vm2789_vm2, %v4740_v45  ;;  %v12549_v45 = vld [vmem:[#allocation34_spill] sm:$0xff] }
 0x3eb   : > { %v3588_v13 = vpop.f32.mrf.mxu3  ;;  %v3138_v49 = vpop.f32.mrf.mxu1 }
 0x3ec   : > { %v10699_v8 = vadd.f32 %v3588_v13, %v3345_v24  ;;  %v3348_v18 = vadd.f32 %v3347_v14, %v3138_v49 }
 0x3ee   : > { %12546 = vst [vmem:[#allocation13_spill] sm:$0xff] %v10699_v8  ;;  %8319 = vmatmul.msk.f32.gmra.mxu1 %vm2789_vm2, %v10154_v42 }
 0x3ef   : > { %8354 = vmatmul.msk.f32.gmra.mxu2 %vm2789_vm2, %v12547_v7  ;;  %v10708_v44 = vpop.f32.mrf.mxu0 }
 0x3f0   : > { %8387 = vmatmul.msk.f32.gmra.mxu3 %vm2789_vm2, %v10192_v40  ;;  %v12548_v40 = vld [vmem:[#allocation30_spill] sm:$0xff] }
 0x3f2   : > { %v3350_v24 = vpop.f32.mrf.mxu2  ;;  %8411 = vmatmul.msk.f32.gmra.mxu0 %vm2789_vm2, %v4741_v4  ;;  %v12550_v4 = vld [vmem:[#allocation31_spill] sm:$0xff] }
 0x3f3   : > { %v3591_v39 = vpop.f32.mrf.mxu3  ;;  %v3141_v42 = vpop.f32.mrf.mxu1 }
 0x3f4   : > { %v10713_v13 = vadd.f32 %v3591_v39, %v3348_v18  ;;  %v3351_v14 = vadd.f32 %v3350_v24, %v3141_v42 }
 0x3f6   : > { %8320 = vmatmul.msk.f32.gmra.mxu1 %vm2789_vm2, %v12548_v40  ;;  %v4743_v40 = vld [vmem:[#allocation2 + $0x61] sm:$0xff] }
 0x3f7   : > { %8355 = vmatmul.msk.f32.gmra.mxu2 %vm2789_vm2, %v12549_v45  ;;  %v10722_v7 = vpop.f32.mrf.mxu0 }
 0x3f8   : > { %8388 = vmatmul.msk.f32.gmra.mxu3 %vm2789_vm2, %v10216_v34 }
 0x3fa   : > { %v3353_v8 = vpop.f32.mrf.mxu2  ;;  %8412 = vmatmul.msk.f32.gmra.mxu0 %vm2789_vm2, %v4742_v48  ;;  %v4744_v48 = vld [vmem:[#allocation2 + $0x69] sm:$0xff] }
 0x3fb   : > { %v3594_v49 = vpop.f32.mrf.mxu3  ;;  %v3144_v39 = vpop.f32.mrf.mxu1 }
 0x3fc   : > { %v10724_v18 = vadd.f32 %v3594_v49, %v3351_v14  ;;  %v3354_v24 = vadd.f32 %v3353_v8, %v3144_v39  ;;  %v3879_v39 = vadd.f32 %v10464_v38, %v10226_v52  ;;  %v4745_v38 = vld [vmem:[#allocation2 + $0x79] sm:$0xff] }
 0x3fe   : > { %8321 = vmatmul.msk.f32.gmra.mxu1 %vm2789_vm2, %v12550_v4 }
 0x3ff   : > { %8356 = vmatmul.msk.f32.gmra.mxu2 %vm2789_vm2, %v10232_v51  ;;  %v10733_v34 = vpop.f32.mrf.mxu0 }
 0x400   : > { %8389 = vmatmul.msk.f32.gmra.mxu3 %vm2789_vm2, %v10240_v17 }
 0x402   : > { %v3356_v45 = vpop.f32.mrf.mxu2  ;;  %8413 = vmatmul.msk.f32.gmra.mxu0 %vm2789_vm2, %v4743_v40  ;;  %v3880_v40 = vadd.f32 %v10491_v37, %v10250_v5  ;;  %v4746_v37 = vld [vmem:[#allocation2 + $0x81] sm:$0xff] }
 0x403   : > { %v3597_v42 = vpop.f32.mrf.mxu3  ;;  %v3147_v49 = vpop.f32.mrf.mxu1 }
 0x404   : > { %v10735_v14 = vadd.f32 %v3597_v42, %v3354_v24  ;;  %v3357_v17 = vadd.f32 %v3356_v45, %v3147_v49 }
 0x406   : > { %8322 = vmatmul.msk.f32.gmra.mxu1 %vm2789_vm2, %v10230_v15 }
 0x407   : > { %8357 = vmatmul.msk.f32.gmra.mxu2 %vm2789_vm2, %v10256_v47  ;;  %v10744_v51 = vpop.f32.mrf.mxu0 }
 0x408   : > { %8390 = vmatmul.msk.f32.gmra.mxu3 %vm2789_vm2, %v10264_v61 }
 0x40a   : > { %v4335_v24 = vpop.f32.mrf.mxu2  ;;  %8414 = vmatmul.msk.f32.gmra.mxu0 %vm2789_vm2, %v4744_v48 }
 0x40b   : > { %v3600_v8 = vpop.f32.mrf.mxu3  ;;  %v4059_v15 = vpop.f32.mrf.mxu1 }
 0x40c   : > { %v10748_v4 = vadd.f32 %v3600_v8, %v3357_v17  ;;  %v4155_v42 = vadd.f32 %v4059_v15, %v3879_v39  ;;  %v12552_v8 = vld [vmem:[#allocation32_spill] sm:$0xff] }
 0x40d   : > { %v3881_v48 = vadd.f32 %v10515_v28, %v12552_v8  ;;  %v12557_v8 = vld [vmem:[#allocation37_spill] sm:$0xff] }
 0x40e   : > { %12551 = vst [vmem:[#allocation62_spill] sm:$0xff] %v10748_v4  ;;  %8323 = vmatmul.msk.f32.gmra.mxu1 %vm2789_vm2, %v10254_v22  ;;  %v4431_v47 = vadd.f32 %v4335_v24, %v4155_v42  ;;  %v4747_v42 = vld [vmem:[#allocation2 + $0x91] sm:$0xff]  ;;  %v4759_v4 = vld [vmem:[#allocation2 + $0x121] sm:$0xff] }
 0x40f   : > { %8358 = vmatmul.msk.f32.gmra.mxu2 %vm2789_vm2, %v10280_v30  ;;  %v10757_v61 = vpop.f32.mrf.mxu0 }
 0x410   : > { %8391 = vmatmul.msk.f32.gmra.mxu3 %vm2789_vm2, %v10288_v50 }
 0x412   : > { %v4338_v45 = vpop.f32.mrf.mxu2  ;;  %8415 = vmatmul.msk.f32.gmra.mxu0 %vm2789_vm2, %v4745_v38 }
 0x413   : > { %v4611_v52 = vpop.f32.mrf.mxu3  ;;  %v4062_v22 = vpop.f32.mrf.mxu1 }
 0x414   : > { %v10761_v49 = vadd.f32 %v4611_v52, %v4431_v47  ;;  %v4156_v17 = vadd.f32 %v4062_v22, %v3880_v40  ;;  %v12554_v47 = vld [vmem:[#allocation36_spill] sm:$0xff]  ;;  %v4748_v22 = vld [vmem:[#allocation2 + $0x99] sm:$0xff] }
 0x415   : > { %v3882_v52 = vadd.f32 %v10536_v10, %v12554_v47  ;;  %v12561_v47 = vld [vmem:[#allocation38_spill] sm:$0xff] }
 0x416   : > { %8324 = vmatmul.msk.f32.gmra.mxu1 %vm2789_vm2, %v10278_v12  ;;  %v4432_v30 = vadd.f32 %v4338_v45, %v4156_v17  ;;  %v3883_v17 = vadd.f32 %v10554_v62, %v10322_v0  ;;  %v4749_v62 = vld [vmem:[#allocation2 + $0xa9] sm:$0xff] }
 0x417   : > { %8359 = vmatmul.msk.f32.gmra.mxu2 %vm2789_vm2, %v10304_v57  ;;  %v10770_v50 = vpop.f32.mrf.mxu0 }
 0x418   : > { %8392 = vmatmul.msk.f32.gmra.mxu3 %vm2789_vm2, %v10312_v63 }
 0x41a   : > { %v4341_v39 = vpop.f32.mrf.mxu2  ;;  %8416 = vmatmul.msk.f32.gmra.mxu0 %vm2789_vm2, %v4746_v37 }
 0x41b   : > { %v4614_v5 = vpop.f32.mrf.mxu3  ;;  %v4065_v12 = vpop.f32.mrf.mxu1 }
 0x41c   : > { %v10774_v24 = vadd.f32 %v4614_v5, %v4432_v30  ;;  %v4157_v15 = vadd.f32 %v4065_v12, %v3881_v48  ;;  %v12558_v48 = vld [vmem:[#allocation35_spill] sm:$0xff] }
 0x41e   : > { %12553 = vst [vmem:[#allocation7_spill] sm:$0xff] %v10774_v24  ;;  %8325 = vmatmul.msk.f32.gmra.mxu1 %vm2789_vm2, %v10302_v20  ;;  %v4433_v57 = vadd.f32 %v4341_v39, %v4157_v15  ;;  %v12559_v39 = vld [vmem:[#allocation57_spill] sm:$0xff] }
 0x41f   : > { %8360 = vmatmul.msk.f32.gmra.mxu2 %vm2789_vm2, %v10328_v3  ;;  %v10783_v63 = vpop.f32.mrf.mxu0  ;;  %v3884_v12 = vadd.f32 %v12559_v39, %v12558_v48  ;;  %v12652_v24 = vld [vmem:[#allocation21_spill] sm:$0xff] }
 0x420   : > { %8393 = vmatmul.msk.f32.gmra.mxu3 %vm2789_vm2, %v10336_v25 }
 0x422   : > { %v4344_v38 = vpop.f32.mrf.mxu2  ;;  %8417 = vmatmul.msk.f32.gmra.mxu0 %vm2789_vm2, %v4747_v42 }
 0x423   : > { %v4617_v28 = vpop.f32.mrf.mxu3  ;;  %v4068_v20 = vpop.f32.mrf.mxu1 }
 0x424   : > { %v10787_v40 = vadd.f32 %v4617_v28, %v4433_v57  ;;  %v4158_v45 = vadd.f32 %v4068_v20, %v3882_v52  ;;  %v4750_v20 = vld [vmem:[#allocation2 + $0xb1] sm:$0xff] }
 0x426   : > { %12555 = vst [vmem:[#allocation63_spill] sm:$0xff] %v10787_v40  ;;  %8326 = vmatmul.msk.f32.gmra.mxu1 %vm2789_vm2, %v10326_v53  ;;  %v4434_v3 = vadd.f32 %v4344_v38, %v4158_v45  ;;  %v12563_v45 = vld [vmem:[#allocation39_spill] sm:$0xff]  ;;  %v12647_v40 = vld [vmem:[#allocation60_spill] sm:$0xff] }
 0x427   : > { %8361 = vmatmul.msk.f32.gmra.mxu2 %vm2789_vm2, %v10357_v16  ;;  %v10796_v25 = vpop.f32.mrf.mxu0 }
 0x428   : > { %8394 = vmatmul.msk.f32.gmra.mxu3 %vm2789_vm2, %v10365_v58 }
 0x42a   : > { %v4347_v30 = vpop.f32.mrf.mxu2  ;;  %8418 = vmatmul.msk.f32.gmra.mxu0 %vm2789_vm2, %v4748_v22 }
 0x42b   : > { %v4620_v10 = vpop.f32.mrf.mxu3  ;;  %v4071_v53 = vpop.f32.mrf.mxu1 }
 0x42c   : > { %v10800_v5 = vadd.f32 %v4620_v10, %v4434_v3  ;;  %v4159_v37 = vadd.f32 %v4071_v53, %v3883_v17  ;;  %v3885_v3 = vadd.f32 %v10578_v46, %v12563_v45  ;;  %v12565_v53 = vld [vmem:[#allocation42_spill] sm:$0xff] }
 0x42e   : > { %12556 = vst [vmem:[#allocation33_spill] sm:$0xff] %v10800_v5  ;;  %8327 = vmatmul.msk.f32.gmra.mxu1 %vm2789_vm2, %v12557_v8  ;;  %v4435_v16 = vadd.f32 %v4347_v30, %v4159_v37  ;;  %v12566_v37 = vld [vmem:[#allocation48_spill] sm:$0xff] }
 0x42f   : > { %8362 = vmatmul.msk.f32.gmra.mxu2 %vm2789_vm2, %v10381_v59  ;;  %v10809_v58 = vpop.f32.mrf.mxu0 }
 0x430   : > { %8395 = vmatmul.msk.f32.gmra.mxu3 %vm2789_vm2, %v10389_v27  ;;  %v12562_v27 = vld [vmem:[#allocation43_spill] sm:$0xff] }
 0x432   : > { %v4350_v15 = vpop.f32.mrf.mxu2  ;;  %8419 = vmatmul.msk.f32.gmra.mxu0 %vm2789_vm2, %v4749_v62  ;;  %v12568_v62 = vld [vmem:[#allocation25_spill] sm:$0xff] }
 0x433   : > { %v4623_v0 = vpop.f32.mrf.mxu3  ;;  %v4074_v28 = vpop.f32.mrf.mxu1 }
 0x434   : > { %v10813_v57 = vadd.f32 %v4623_v0, %v4435_v16  ;;  %v4160_v42 = vadd.f32 %v4074_v28, %v3884_v12  ;;  %v4751_v16 = vld [vmem:[#allocation2 + $0xc1] sm:$0xff]  ;;  %v12567_v0 = vld [vmem:[#allocation40_spill] sm:$0xff] }
 0x435   : > { %v3886_v48 = vadd.f32 %v12568_v62, %v12567_v0  ;;  %v4754_v0 = vld [vmem:[#allocation2 + $0xe1] sm:$0xff] }
 0x436   : > { %12560 = vst [vmem:[#allocation64_spill] sm:$0xff] %v10813_v57  ;;  %8328 = vmatmul.msk.f32.gmra.mxu1 %vm2789_vm2, %v12561_v47  ;;  %v4436_v59 = vadd.f32 %v4350_v15, %v4160_v42  ;;  %v12570_v42 = vld [vmem:[#allocation46_spill] sm:$0xff]  ;;  %v12571_v47 = vld [vmem:[#allocation53_spill] sm:$0xff] }
 0x437   : > { %8363 = vmatmul.msk.f32.gmra.mxu2 %vm2789_vm2, %v12562_v27  ;;  %v10822_v52 = vpop.f32.mrf.mxu0 }
 0x438   : > { %8396 = vmatmul.msk.f32.gmra.mxu3 %vm2789_vm2, %v10413_v21 }
 0x43a   : > { %v4353_v10 = vpop.f32.mrf.mxu2  ;;  %8420 = vmatmul.msk.f32.gmra.mxu0 %vm2789_vm2, %v4750_v20 }
 0x43b   : > { %v4626_v38 = vpop.f32.mrf.mxu3  ;;  %v4077_v17 = vpop.f32.mrf.mxu1 }
 0x43c   : > { %v10826_v22 = vadd.f32 %v4626_v38, %v4436_v59  ;;  %v4161_v30 = vadd.f32 %v4077_v17, %v3885_v3  ;;  %v4752_v38 = vld [vmem:[#allocation2 + $0xc9] sm:$0xff] }
 0x43e   : > { %12564 = vst [vmem:[#allocation14_spill] sm:$0xff] %v10826_v22  ;;  %8329 = vmatmul.msk.f32.gmra.mxu1 %vm2789_vm2, %v12565_v53  ;;  %v4437_v21 = vadd.f32 %v4353_v10, %v4161_v30  ;;  %v12573_v10 = vld [vmem:[#allocation52_spill] sm:$0xff]  ;;  %v4753_v30 = vld [vmem:[#allocation2 + $0xd9] sm:$0xff] }
 0x43f   : > { %8364 = vmatmul.msk.f32.gmra.mxu2 %vm2789_vm2, %v12566_v37  ;;  %v10835_v8 = vpop.f32.mrf.mxu0  ;;  %v4494_v22 = vld [vmem:[#allocation2 + $0x1a0] sm:$0xff] }
 0x440   : > { %8397 = vmatmul.msk.f32.gmra.mxu3 %vm2789_vm2, %v10436_v9 }
 0x442   : > { %v4356_v39 = vpop.f32.mrf.mxu2  ;;  %8421 = vmatmul.msk.f32.gmra.mxu0 %vm2789_vm2, %v4751_v16 }
 0x443   : > { %v4629_v46 = vpop.f32.mrf.mxu3  ;;  %v4080_v15 = vpop.f32.mrf.mxu1 }
 0x444   : > { %v10839_v12 = vadd.f32 %v4629_v46, %v4437_v21  ;;  %v4162_v28 = vadd.f32 %v4080_v15, %v3886_v48  ;;  %v12575_v46 = vld [vmem:[#allocation44_spill] sm:$0xff]  ;;  %v12578_v15 = vld [vmem:[#allocation51_spill] sm:$0xff] }
 0x446   : > { %12569 = vst [vmem:[#allocation4_spill] sm:$0xff] %v10839_v12  ;;  %8330 = vmatmul.msk.f32.gmra.mxu1 %vm2789_vm2, %v12570_v42  ;;  %v4438_v9 = vadd.f32 %v4356_v39, %v4162_v28  ;;  %v4755_v42 = vld [vmem:[#allocation2 + $0xf1] sm:$0xff]  ;;  %v10955_v12 = vld [vmem:[#allocation2 + $0x189] sm:$0xff] }
 0x447   : > { %8365 = vmatmul.msk.f32.gmra.mxu2 %vm2789_vm2, %v12571_v47  ;;  %v10848_v59 = vpop.f32.mrf.mxu0 }
 0x448   : > { %8398 = vmatmul.msk.f32.gmra.mxu3 %vm2789_vm2, %v10457_v33  ;;  %v12574_v33 = vld [vmem:[#allocation47_spill] sm:$0xff] }
 0x44a   : > { %v10850_v20 = vpop.f32.mrf.mxu2  ;;  %8422 = vmatmul.msk.f32.gmra.mxu0 %vm2789_vm2, %v4752_v38  ;;  %v12581_v38 = vld [vmem:[#allocation8_spill] sm:$0xff] }
 0x44b   : > { %v4632_v27 = vpop.f32.mrf.mxu3  ;;  %v10855_v3 = vpop.f32.mrf.mxu1 }
 0x44c   : > { %v10852_v45 = vadd.f32 %v4632_v27, %v4438_v9  ;;  %v12580_v27 = vld [vmem:[#allocation18_spill] sm:$0xff] }
 0x44e   : > { %12572 = vst [vmem:[#allocation15_spill] sm:$0xff] %v10852_v45  ;;  %8331 = vmatmul.msk.f32.gmra.mxu1 %vm2789_vm2, %v12573_v10 }
 0x44f   : > { %8366 = vmatmul.msk.f32.gmra.mxu2 %vm2789_vm2, %v12574_v33  ;;  %v10863_v17 = vpop.f32.mrf.mxu0  ;;  %v4756_v33 = vld [vmem:[#allocation2 + $0xf9] sm:$0xff] }
 0x450   : > { %8399 = vmatmul.msk.f32.gmra.mxu3 %vm2789_vm2, %v10485_v31  ;;  %v12576_v31 = vld [vmem:[#allocation54_spill] sm:$0xff] }
 0x452   : > { %8423 = vmatmul.msk.f32.gmra.mxu0 %vm2789_vm2, %v4753_v30  ;;  %v10870_v37 = vpop.f32.mrf.mxu2 }
 0x453   : > { %v10865_v53 = vpop.f32.mrf.mxu3  ;;  %v10868_v21 = vpop.f32.mrf.mxu1 }
 0x456   : > { %8332 = vmatmul.msk.f32.gmra.mxu1 %vm2789_vm2, %v12575_v46  ;;  %v12583_v46 = vld [vmem:[#allocation56_spill] sm:$0xff] }
 0x457   : > { %8367 = vmatmul.msk.f32.gmra.mxu2 %vm2789_vm2, %v12576_v31  ;;  %v10878_v16 = vpop.f32.mrf.mxu0  ;;  %v12584_v31 = vld [vmem:[#allocation23_spill] sm:$0xff] }
 0x458   : > { %8400 = vmatmul.msk.f32.gmra.mxu3 %vm2789_vm2, %v10509_v6  ;;  %12577 = vst [vmem:[#allocation5_spill] sm:$0xff] %v10878_v16  ;;  %v12579_v6 = vld [vmem:[#allocation19_spill] sm:$0xff] }
 0x459   : > { %v10942_v16 = vld [vmem:[#allocation2 + $0x181] sm:$0xff] }
 0x45a   : > { %8424 = vmatmul.msk.f32.gmra.mxu0 %vm2789_vm2, %v4754_v0  ;;  %v10885_v39 = vpop.f32.mrf.mxu2 }
 0x45b   : > { %v10881_v62 = vpop.f32.mrf.mxu1  ;;  %v10883_v48 = vpop.f32.mrf.mxu3 }
 0x45e   : > { %8333 = vmatmul.msk.f32.gmra.mxu1 %vm2789_vm2, %v12578_v15  ;;  %v4757_v15 = vld [vmem:[#allocation2 + $0x109] sm:$0xff] }
 0x45f   : > { %8368 = vmatmul.msk.f32.gmra.mxu2 %vm2789_vm2, %v12579_v6  ;;  %v10893_v28 = vpop.f32.mrf.mxu0 }
 0x460   : > { %8401 = vmatmul.msk.f32.gmra.mxu3 %vm2789_vm2, %v10530_v43 }
 0x462   : > { %8425 = vmatmul.msk.f32.gmra.mxu0 %vm2789_vm2, %v4755_v42  ;;  %v10908_v10 = vpop.f32.mrf.mxu2 }
 0x463   : > { %v10896_v9 = vpop.f32.mrf.mxu1  ;;  %v10898_v47 = vpop.f32.mrf.mxu3 }
 0x466   : > { %8334 = vmatmul.msk.f32.gmra.mxu1 %vm2789_vm2, %v12580_v27  ;;  %v12587_v27 = vld [vmem:[#allocation22_spill] sm:$0xff] }
 0x467   : > { %8369 = vmatmul.msk.f32.gmra.mxu2 %vm2789_vm2, %v12581_v38  ;;  %v10906_v43 = vpop.f32.mrf.mxu0  ;;  %v4217_v38 = vld [vmem:[#allocation2 + $0x182] sm:$0xff] }
 0x468   : > { %8402 = vmatmul.msk.f32.gmra.mxu3 %vm2789_vm2, %v10548_v56  ;;  %12582 = vst [vmem:[#allocation11_spill] sm:$0xff] %v10906_v43  ;;  %v12651_v43 = vld [vmem:[#allocation20_spill] sm:$0xff] }
 0x46a   : > { %8426 = vmatmul.msk.f32.gmra.mxu0 %vm2789_vm2, %v4756_v33  ;;  %v10923_v6 = vpop.f32.mrf.mxu2  ;;  %v4758_v33 = vld [vmem:[#allocation2 + $0x111] sm:$0xff] }
 0x46b   : > { %v10911_v30 = vpop.f32.mrf.mxu1  ;;  %v10921_v0 = vpop.f32.mrf.mxu3 }
 0x46c   : > { %12586 = vst [vmem:[#allocation17_spill] sm:$0xff] %v10921_v0  ;;  %v12648_v0 = vld [vmem:[#allocation49_spill] sm:$0xff] }
 0x46e   : > { %8335 = vmatmul.msk.f32.gmra.mxu1 %vm2789_vm2, %v12583_v46 }
 0x46f   : > { %8370 = vmatmul.msk.f32.gmra.mxu2 %vm2789_vm2, %v12584_v31  ;;  %v10919_v56 = vpop.f32.mrf.mxu0 }
 0x470   : > { %8403 = vmatmul.msk.f32.gmra.mxu3 %vm2789_vm2, %v10660_v55  ;;  %12585 = vst [vmem:[#allocation6_spill] sm:$0xff] %v10919_v56  ;;  %v12646_v56 = vld [vmem:[#allocation41_spill] sm:$0xff] }
 0x472   : > { %8427 = vmatmul.msk.f32.gmra.mxu0 %vm2789_vm2, %v4757_v15  ;;  %v10940_v15 = vpop.f32.mrf.mxu2 }
 0x473   : > { %v10926_v42 = vpop.f32.mrf.mxu1  ;;  %v10935_v46 = vpop.f32.mrf.mxu3  ;;  %12590 = vst [vmem:[#allocation28_spill] sm:$0xff] %v10940_v15 }
 0x474   : > { %12589 = vst [vmem:[#allocation16_spill] sm:$0xff] %v10935_v46  ;;  %v4762_v46 = vld [vmem:[#allocation2 + $0x141] sm:$0xff] }
 0x476   : > { %8336 = vmatmul.msk.f32.gmra.mxu1 %vm2789_vm2, %v12587_v27  ;;  %v4493_v27 = vld [vmem:[#allocation2 + $0x198] sm:$0xff] }
 0x477   : > { %8371 = vmatmul.msk.f32.gmra.mxu2 %vm2789_vm2, %v4217_v38  ;;  %v10933_v55 = vpop.f32.mrf.mxu0 }
 0x478   : > { %8404 = vmatmul.msk.f32.gmra.mxu3 %vm2789_vm2, %v10674_v32  ;;  %12588 = vst [vmem:[#allocation26_spill] sm:$0xff] %v10933_v55  ;;  %v4218_v32 = vld [vmem:[#allocation2 + $0x18a] sm:$0xff]  ;;  %v4761_v55 = vld [vmem:[#allocation2 + $0x139] sm:$0xff] }
 0x47a   : > { %8428 = vmatmul.msk.f32.gmra.mxu0 %vm2789_vm2, %v4758_v33  ;;  %v10957_v57 = vpop.f32.mrf.mxu2 }
 0x47b   : > { %v10938_v31 = vpop.f32.mrf.mxu1  ;;  %v10953_v45 = vpop.f32.mrf.mxu3  ;;  %12593 = vst [vmem:[#allocation31_spill] sm:$0xff] %v10957_v57 }
 0x47c   : > { %12592 = vst [vmem:[#allocation34_spill] sm:$0xff] %v10953_v45 }
 0x47e   : > { %8337 = vmatmul.msk.f32.gmra.mxu1 %vm2789_vm2, %v10942_v16 }
 0x47f   : > { %8372 = vmatmul.msk.f32.gmra.mxu2 %vm2789_vm2, %v4218_v32  ;;  %v10948_v38 = vpop.f32.mrf.mxu0  ;;  %v4760_v32 = vld [vmem:[#allocation2 + $0x129] sm:$0xff] }
 0x480   : > { %8405 = vmatmul.msk.f32.gmra.mxu3 %vm2789_vm2, %v4493_v27  ;;  %12591 = vst [vmem:[#allocation30_spill] sm:$0xff] %v10948_v38  ;;  %v5015_v38 = vld [vmem:[#allocation2 + $0x32] sm:$0xff] }
 0x482   : > { %8429 = vmatmul.msk.f32.gmra.mxu0 %vm2789_vm2, %v4759_v4  ;;  %v10972_v57 = vpop.f32.mrf.mxu2 }
 0x483   : > { %v10951_v33 = vpop.f32.mrf.mxu1  ;;  %v10967_v15 = vpop.f32.mrf.mxu3  ;;  %12597 = vst [vmem:[#allocation35_spill] sm:$0xff] %v10972_v57  ;;  %v4763_v57 = vld [vmem:[#allocation2 + $0x151] sm:$0xff] }
 0x484   : > { %12595 = vst [vmem:[#allocation36_spill] sm:$0xff] %v10967_v15 }
 0x486   : > { %8338 = vmatmul.msk.f32.gmra.mxu1 %vm2789_vm2, %v10955_v12 }
 0x487   : > { %v10962_v27 = vpop.f32.mrf.mxu0 }
 0x488   : > { %8406 = vmatmul.msk.f32.gmra.mxu3 %vm2789_vm2, %v4494_v22  ;;  %12594 = vst [vmem:[#allocation32_spill] sm:$0xff] %v10962_v27  ;;  %v5016_v27 = vld [vmem:[#allocation2 + $0x3a] sm:$0xff] }
 0x48a   : > { %8430 = vmatmul.msk.f32.gmra.mxu0 %vm2789_vm2, %v4760_v32  ;;  %v10982_v15 = vpop.f32.mrf.mxu2 }
 0x48b   : > { %v10965_v4 = vpop.f32.mrf.mxu1  ;;  %v10980_v5 = vpop.f32.mrf.mxu3  ;;  %12601 = vst [vmem:[#allocation39_spill] sm:$0xff] %v10982_v15  ;;  %v4764_v15 = vld [vmem:[#allocation2 + $0x159] sm:$0xff] }
 0x48c   : > { %12600 = vst [vmem:[#allocation43_spill] sm:$0xff] %v10980_v5  ;;  %v5018_v5 = vld [vmem:[#allocation2 + $0x52] sm:$0xff] }
 0x48e   : > { %8443 = vmatmul.msk.f32.vlgmr.msrb.gmra.mxu1 %vm2789_vm2, %v5015_v38 }
 0x48f   : > { %v10970_v45 = vpop.f32.mrf.mxu0 }
 0x490   : > { %12596 = vst [vmem:[#allocation37_spill] sm:$0xff] %v10970_v45  ;;  %v5017_v45 = vld [vmem:[#allocation2 + $0x4a] sm:$0xff] }
 0x492   : > { %8431 = vmatmul.msk.f32.gmra.mxu0 %vm2789_vm2, %v4761_v55 }
 0x493   : > { %v10975_v22 = vpop.f32.mrf.mxu1 }
 0x494   : > { %12598 = vst [vmem:[#allocation57_spill] sm:$0xff] %v10975_v22  ;;  %v10990_v22 = vpop.f32.mrf.mxu3 }
 0x495   : > { %12604 = vst [vmem:[#allocation40_spill] sm:$0xff] %v10990_v22 }
 0x496   : > { %8444 = vmatmul.msk.f32.gmra.mxu1 %vm2789_vm2, %v5016_v27 }
 0x497   : > { %v10978_v32 = vpop.f32.mrf.mxu0 }
 0x498   : > { %12599 = vst [vmem:[#allocation38_spill] sm:$0xff] %v10978_v32  ;;  %v10995_v32 = vpop.f32.mrf.mxu2 }
 0x499   : > { %12606 = vst [vmem:[#allocation46_spill] sm:$0xff] %v10995_v32  ;;  %v4765_v32 = vld [vmem:[#allocation2 + $0x169] sm:$0xff] }
 0x49a   : > { %8432 = vmatmul.msk.f32.gmra.mxu0 %vm2789_vm2, %v4762_v46 }
 0x49b   : > { %v10985_v38 = vpop.f32.mrf.mxu1 }
 0x49c   : > { %12602 = vst [vmem:[#allocation42_spill] sm:$0xff] %v10985_v38  ;;  %v5019_v38 = vld [vmem:[#allocation2 + $0x62] sm:$0xff] }
 0x49e   : > { %8445 = vmatmul.msk.f32.gmra.mxu1 %vm2789_vm2, %v5017_v45 }
 0x49f   : > { %v10988_v55 = vpop.f32.mrf.mxu0 }
 0x4a0   : > { %12603 = vst [vmem:[#allocation48_spill] sm:$0xff] %v10988_v55  ;;  %v11003_v55 = vpop.f32.mrf.mxu3  ;;  %v11005_v22 = vpop.f32.mrf.mxu2 }
 0x4a1   : > { %12609 = vst [vmem:[#allocation47_spill] sm:$0xff] %v11003_v55  ;;  %v5020_v55 = vld [vmem:[#allocation2 + $0x6a] sm:$0xff] }
 0x4a2   : > { %8433 = vmatmul.msk.f32.gmra.mxu0 %vm2789_vm2, %v4763_v57  ;;  %12610 = vst [vmem:[#allocation44_spill] sm:$0xff] %v11005_v22 }
 0x4a3   : > { %v10993_v27 = vpop.f32.mrf.mxu1 }
 0x4a4   : > { %12605 = vst [vmem:[#allocation25_spill] sm:$0xff] %v10993_v27 }
 0x4a6   : > { %8446 = vmatmul.msk.f32.gmra.mxu1 %vm2789_vm2, %v5018_v5  ;;  %v8476_v5 = vld [vmem:[%s12265_s5 + $0x18] sm:$0xff] }
 0x4a7   : > { %v10998_v46 = vpop.f32.mrf.mxu0  ;;  %6902 = vmatpush.msrb.mxu2 %v8476_v5  ;;  %v5021_v5 = vld [vmem:[#allocation2 + $0x7a] sm:$0xff] }
 0x4a8   : > { %12607 = vst [vmem:[#allocation53_spill] sm:$0xff] %v10998_v46  ;;  %v11019_v22 = vpop.f32.mrf.mxu3 }
 0x4a9   : > { %12613 = vst [vmem:[#allocation19_spill] sm:$0xff] %v11019_v22 }
 0x4aa   : > { %8434 = vmatmul.msk.f32.gmra.mxu0 %vm2789_vm2, %v4764_v15  ;;  %v6852_v15 = vld [vmem:[%s12265_s5 + $0x8] sm:$0xff] }
 0x4ab   : > { %v11001_v45 = vpop.f32.mrf.mxu1  ;;  %6967 = vmatpush.msrb.mxu3 %v6852_v15 }
 0x4ac   : > { %12608 = vst [vmem:[#allocation52_spill] sm:$0xff] %v11001_v45  ;;  %v4766_v45 = vld [vmem:[#allocation2 + $0x171] sm:$0xff] }
 0x4ae   : > { %8447 = vmatmul.msk.f32.gmra.mxu1 %vm2789_vm2, %v5019_v38 }
 0x4af   : > { %v11008_v57 = vpop.f32.mrf.mxu0 }
 0x4b0   : > { %12611 = vst [vmem:[#allocation54_spill] sm:$0xff] %v11008_v57  ;;  %v11024_v57 = vpop.f32.mrf.mxu2  ;;  %v11032_v15 = vpop.f32.mrf.mxu3 }
 0x4b1   : > { %12615 = vst [vmem:[#allocation8_spill] sm:$0xff] %v11024_v57  ;;  %v12645_v57 = vld [vmem:[#allocation59_spill] sm:$0xff] }
 0x4b2   : > { %8435 = vmatmul.msk.f32.gmra.mxu0 %vm2789_vm2, %v4765_v32  ;;  %12618 = vst [vmem:[#allocation22_spill] sm:$0xff] %v11032_v15  ;;  %v5023_v15 = vld [vmem:[#allocation2 + $0x92] sm:$0xff] }
 0x4b3   : > { %v11017_v46 = vpop.f32.mrf.mxu1 }
 0x4b4   : > { %12612 = vst [vmem:[#allocation51_spill] sm:$0xff] %v11017_v46 }
 0x4b6   : > { %8448 = vmatmul.msk.f32.gmra.mxu1 %vm2789_vm2, %v5020_v55 }
 0x4b7   : > { %v11022_v38 = vpop.f32.mrf.mxu0 }
 0x4b8   : > { %12614 = vst [vmem:[#allocation18_spill] sm:$0xff] %v11022_v38  ;;  %v11034_v46 = vpop.f32.mrf.mxu2  ;;  %v5022_v38 = vld [vmem:[#allocation2 + $0x82] sm:$0xff]  ;;  %v11043_v22 = vpop.f32.mrf.mxu3 }
 0x4b9   : > { %12619 = vst [vmem:[#allocation65_spill] sm:$0xff] %v11034_v46 }
 0x4ba   : > { %8436 = vmatmul.msk.f32.gmra.mxu0 %vm2789_vm2, %v4766_v45  ;;  %12622 = vst [vmem:[#allocation68_spill] sm:$0xff] %v11043_v22  ;;  %v5024_v22 = vld [vmem:[#allocation2 + $0x9a] sm:$0xff] }
 0x4bb   : > { %v11027_v32 = vpop.f32.mrf.mxu1 }
 0x4bc   : > { %12616 = vst [vmem:[#allocation56_spill] sm:$0xff] %v11027_v32 }
 0x4be   : > { %8449 = vmatmul.msk.f32.gmra.mxu1 %vm2789_vm2, %v5021_v5 }
 0x4bf   : > { %v11030_v27 = vpop.f32.mrf.mxu0 }
 0x4c0   : > { %12617 = vst [vmem:[#allocation23_spill] sm:$0xff] %v11030_v27  ;;  %v11049_v27 = vpop.f32.mrf.mxu2 }
 0x4c1   : > { %12624 = vst [vmem:[#allocation70_spill] sm:$0xff] %v11049_v27 }
 0x4c2   : > { %8437 = vmatmul.msk.f32.gmra.mxu0 %vm2789_vm2, %v10942_v16  ;;  %v4769_v16 = vld [vmem:[#allocation2 + $0x199] sm:$0xff] }
 0x4c3   : > { %v11038_v55 = vpop.f32.mrf.mxu1 }
 0x4c4   : > { %12620 = vst [vmem:[#allocation66_spill] sm:$0xff] %v11038_v55 }
 0x4c6   : > { %8450 = vmatmul.msk.f32.gmra.mxu1 %vm2789_vm2, %v5022_v38 }
 0x4c7   : > { %v11041_v45 = vpop.f32.mrf.mxu0 }
 0x4c8   : > { %12621 = vst [vmem:[#allocation67_spill] sm:$0xff] %v11041_v45  ;;  %v11057_v45 = vpop.f32.mrf.mxu3  ;;  %v11059_v55 = vpop.f32.mrf.mxu2 }
 0x4c9   : > { %12627 = vst [vmem:[#allocation73_spill] sm:$0xff] %v11057_v45 }
 0x4ca   : > { %8438 = vmatmul.msk.f32.gmra.mxu0 %vm2789_vm2, %v10955_v12  ;;  %12628 = vst [vmem:[#allocation74_spill] sm:$0xff] %v11059_v55  ;;  %v4770_v12 = vld [vmem:[#allocation2 + $0x1a1] sm:$0xff] }
 0x4cb   : > { %v11047_v5 = vpop.f32.mrf.mxu1 }
 0x4cc   : > { %12623 = vst [vmem:[#allocation69_spill] sm:$0xff] %v11047_v5  ;;  %v5025_v5 = vld [vmem:[#allocation2 + $0xaa] sm:$0xff] }
 0x4ce   : > { %8451 = vmatmul.msk.f32.gmra.mxu1 %vm2789_vm2, %v5023_v15 }
 0x4cf   : > { %v11052_v46 = vpop.f32.mrf.mxu0 }
 0x4d0   : > { %12625 = vst [vmem:[#allocation71_spill] sm:$0xff] %v11052_v46  ;;  %v11067_v46 = vpop.f32.mrf.mxu3 }
 0x4d1   : > { %12631 = vst [vmem:[#allocation77_spill] sm:$0xff] %v11067_v46 }
 0x4d2   : > { %8439 = vmatmul.msk.f32.gmra.mxu0 %vm2789_vm2, %v4769_v16  ;;  %v11070_v16 = vpop.f32.mrf.mxu2 }
 0x4d3   : > { %v11055_v38 = vpop.f32.mrf.mxu1  ;;  %12632 = vst [vmem:[#allocation78_spill] sm:$0xff] %v11070_v16 }
 0x4d4   : > { %12626 = vst [vmem:[#allocation72_spill] sm:$0xff] %v11055_v38  ;;  %v5026_v38 = vld [vmem:[#allocation2 + $0xb2] sm:$0xff] }
 0x4d6   : > { %8452 = vmatmul.msk.f32.gmra.mxu1 %vm2789_vm2, %v5024_v22 }
 0x4d7   : > { %v11065_v15 = vpop.f32.mrf.mxu0 }
 0x4d8   : > { %12630 = vst [vmem:[#allocation76_spill] sm:$0xff] %v11065_v15  ;;  %v11077_v22 = vpop.f32.mrf.mxu3  ;;  %v5027_v15 = vld [vmem:[#allocation2 + $0xc2] sm:$0xff] }
 0x4d9   : > { %12635 = vst [vmem:[#allocation81_spill] sm:$0xff] %v11077_v22  ;;  %v12643_v22 = vld [vmem:[#allocation58_spill] sm:$0xff] }
 0x4da   : > { %8440 = vmatmul.msk.f32.gmra.mxu0 %vm2789_vm2, %v4770_v12  ;;  %v11079_v12 = vpop.f32.mrf.mxu2 }
 0x4db   : > { %v11063_v27 = vpop.f32.mrf.mxu1  ;;  %12636 = vst [vmem:[#allocation82_spill] sm:$0xff] %v11079_v12  ;;  %v12644_v12 = vld [vmem:[#allocation50_spill] sm:$0xff] }
 0x4dc   : > { %12629 = vst [vmem:[#allocation75_spill] sm:$0xff] %v11063_v27 }
 0x4de   : > { %8453 = vmatmul.msk.f32.gmra.mxu1 %vm2789_vm2, %v5025_v5 }
 0x4df   : > { %v11074_v55 = vpop.f32.mrf.mxu0 }
 0x4e0   : > { %12634 = vst [vmem:[#allocation80_spill] sm:$0xff] %v11074_v55  ;;  %v11086_v5 = vpop.f32.mrf.mxu3  ;;  %v5028_v55 = vld [vmem:[#allocation2 + $0xca] sm:$0xff] }
 0x4e1   : > { %12639 = vst [vmem:[#allocation85_spill] sm:$0xff] %v11086_v5 }
 0x4e3   : > { %v11072_v45 = vpop.f32.mrf.mxu1 }
 0x4e4   : > { %12633 = vst [vmem:[#allocation79_spill] sm:$0xff] %v11072_v45  ;;  %v11090_v45 = vpop.f32.mrf.mxu2 }
 0x4e5   : > { %12641 = vst [vmem:[#allocation87_spill] sm:$0xff] %v11090_v45 }
 0x4e6   : > { %8454 = vmatmul.msk.f32.gmra.mxu1 %vm2789_vm2, %v5026_v38  ;;  %v12642_v38 = vld [vmem:[#allocation45_spill] sm:$0xff] }
 0x4e7   : > { %v11084_v46 = vpop.f32.mrf.mxu0  ;;  %v3887_v32 = vadd.f32 %v12643_v22, %v12642_v38  ;;  %v3893_v22 = vadd.f32 %v10658_v60, %v12652_v24  ;;  %v12658_v24 = vld [vmem:[#allocation12_spill] sm:$0xff] }
 0x4e8   : > { %12638 = vst [vmem:[#allocation84_spill] sm:$0xff] %v11084_v46  ;;  %v3890_v46 = vadd.f32 %v10623_v54, %v12648_v0  ;;  %v12655_v0 = vld [vmem:[#allocation27_spill] sm:$0xff] }
 0x4e9   : > { %v4163_v38 = vadd.f32 %v10855_v3, %v3887_v32  ;;  %v3899_v3 = vadd.f32 %v10733_v34, %v12658_v24  ;;  %v11142_v34 = vadd.f32 %v10796_v25, %v10676_v29  ;;  %v11164_v29 = vadd.f32 %v10863_v17, %v10735_v14  ;;  %v12675_v24 = vld [vmem:[#allocation25_spill] sm:$0xff] }
 0x4ea   : > { %v4983_v14 = vadd.f32 %v10893_v28, %v10761_v49  ;;  %v12667_v49 = vld [vmem:[#allocation16_spill] sm:$0xff] }
 0x4eb   : > { %v11081_v27 = vpop.f32.mrf.mxu1 }
 0x4ec   : > { %12637 = vst [vmem:[#allocation83_spill] sm:$0xff] %v11081_v27  ;;  %v3888_v27 = vadd.f32 %v12645_v57, %v12644_v12  ;;  %v12653_v12 = vld [vmem:[#allocation9_spill] sm:$0xff] }
 0x4ee   : > { %8455 = vmatmul.msk.f32.gmra.mxu1 %vm2789_vm2, %v5027_v15  ;;  %v3889_v15 = vadd.f32 %v12647_v40, %v12646_v56  ;;  %v3894_v40 = vadd.f32 %v10672_v2, %v12653_v12  ;;  %v12654_v56 = vld [vmem:[#allocation24_spill] sm:$0xff]  ;;  %v3900_v2 = vadd.f32 %v10744_v51, %v10625_v11  ;;  %v4164_v32 = vadd.f32 %v10868_v21, %v3888_v27  ;;  %v12659_v12 = vld [vmem:[#allocation61_spill] sm:$0xff] }
 0x4ef   : > { %v11101_v5 = vpop.f32.mrf.mxu0  ;;  %v3895_v54 = vadd.f32 %v10686_v41, %v12654_v56  ;;  %v5029_v41 = vld [vmem:[#allocation2 + $0xda] sm:$0xff]  ;;  %v3903_v11 = vadd.f32 %v10783_v63, %v10662_v23  ;;  %v4439_v51 = vadd.f32 %v10850_v20, %v4163_v38  ;;  %v11160_v23 = vadd.f32 %v10848_v59, %v10724_v18 }
 0x4f0   : > { %12649 = vst [vmem:[#allocation45_spill] sm:$0xff] %v11101_v5  ;;  %v3896_v5 = vadd.f32 %v10697_v19, %v12655_v0  ;;  %v3901_v19 = vadd.f32 %v10757_v61, %v12659_v12  ;;  %v4165_v56 = vadd.f32 %v10881_v62, %v3889_v15  ;;  %v4166_v0 = vadd.f32 %v10896_v9, %v3890_v46  ;;  %v12670_v46 = vld [vmem:[#allocation28_spill] sm:$0xff]  ;;  %v12676_v12 = vld [vmem:[#allocation34_spill] sm:$0xff] }
 0x4f1   : > { %v11156_v62 = vadd.f32 %v10835_v8, %v10713_v13  ;;  %v4715_v63 = vadd.f32 %v10865_v53, %v4439_v51  ;;  %v4169_v13 = vadd.f32 %v10938_v31, %v3893_v22  ;;  %v4170_v8 = vadd.f32 %v10951_v33, %v3894_v40  ;;  %v12666_v31 = vld [vmem:[#allocation6_spill] sm:$0xff]  ;;  %v12672_v22 = vld [vmem:[#allocation31_spill] sm:$0xff] }
 0x4f2   : > { %v4171_v20 = vadd.f32 %v10965_v4, %v3895_v54  ;;  %v12669_v4 = vld [vmem:[#allocation26_spill] sm:$0xff]  ;;  %v12673_v40 = vld [vmem:[#allocation35_spill] sm:$0xff] }
 0x4f3   : > { %v11088_v16 = vpop.f32.mrf.mxu1  ;;  %v4445_v38 = vadd.f32 %v12672_v22, %v4169_v13  ;;  %v4446_v54 = vadd.f32 %v12673_v40, %v4170_v8  ;;  %v12678_v51 = vld [vmem:[#allocation30_spill] sm:$0xff] }
 0x4f4   : > { %12640 = vst [vmem:[#allocation86_spill] sm:$0xff] %v11088_v16  ;;  %v12650_v16 = vld [vmem:[#allocation55_spill] sm:$0xff]  ;;  %v12682_v13 = vld [vmem:[#allocation14_spill] sm:$0xff] }
 0x4f5   : > { %v3891_v45 = vadd.f32 %v10633_v1, %v12650_v16  ;;  %v12656_v1 = vld [vmem:[#allocation10_spill] sm:$0xff] }
 0x4f6   : > { %8456 = vmatmul.msk.f32.gmra.mxu1 %vm2789_vm2, %v5028_v55  ;;  %v3892_v55 = vadd.f32 %v10647_v36, %v12651_v43  ;;  %v3897_v16 = vadd.f32 %v10708_v44, %v12656_v1  ;;  %v11120_v36 = vpop.f32.mrf.mxu3  ;;  %v12657_v43 = vld [vmem:[#allocation29_spill] sm:$0xff]  ;;  %v3902_v44 = vadd.f32 %v10770_v50, %v10649_v35  ;;  %v11148_v35 = vadd.f32 %v10809_v58, %v10688_v26  ;;  %v12674_v1 = vld [vmem:[#allocation42_spill] sm:$0xff] }
 0x4f7   : > { %v3898_v60 = vadd.f32 %v10722_v7, %v12657_v43  ;;  %v11135_v7 = vpop.f32.mrf.mxu2  ;;  %v4167_v61 = vadd.f32 %v10911_v30, %v3891_v45  ;;  %v12660_v50 = vld [vmem:[#allocation13_spill] sm:$0xff]  ;;  %v4440_v26 = vadd.f32 %v10870_v37, %v4164_v32  ;;  %v4441_v58 = vadd.f32 %v10885_v39, %v4165_v56  ;;  %v12662_v37 = vld [vmem:[#allocation7_spill] sm:$0xff]  ;;  %v11190_v33 = vpop.f32.mrf.mxu0 }
 0x4f8   : > { %v11152_v21 = vadd.f32 %v10822_v52, %v12660_v50  ;;  %v4168_v25 = vadd.f32 %v10926_v42, %v3892_v55  ;;  %v4442_v52 = vadd.f32 %v10908_v10, %v4166_v0  ;;  %v12663_v39 = vld [vmem:[#allocation11_spill] sm:$0xff]  ;;  %v12664_v10 = vld [vmem:[#allocation17_spill] sm:$0xff]  ;;  %v4173_v43 = vadd.f32 %v12674_v1, %v3897_v16  ;;  %v12677_v0 = vld [vmem:[#allocation64_spill] sm:$0xff] }
 0x4f9   : > { %v4716_v18 = vadd.f32 %v10883_v48, %v4440_v26  ;;  %v4443_v59 = vadd.f32 %v10923_v6, %v4167_v61  ;;  %v4717_v53 = vadd.f32 %v10898_v47, %v4441_v58  ;;  %v11183_v9 = vadd.f32 %v12663_v39, %v12662_v37  ;;  %v12665_v42 = vld [vmem:[#allocation63_spill] sm:$0xff]  ;;  %v12668_v6 = vld [vmem:[#allocation33_spill] sm:$0xff]  ;;  %v12680_v26 = vld [vmem:[#allocation52_spill] sm:$0xff] }
 0x4fa   : > { %v4718_v30 = vadd.f32 %v12664_v10, %v4442_v52  ;;  %v11188_v48 = vadd.f32 %v12666_v31, %v12665_v42  ;;  %v11195_v27 = vadd.f32 %v12669_v4, %v12668_v6  ;;  %v4444_v47 = vadd.f32 %v12670_v46, %v4168_v25  ;;  %v12671_v45 = vld [vmem:[#allocation57_spill] sm:$0xff]  ;;  %v5030_v55 = vld [vmem:[#allocation2 + $0xe2] sm:$0xff]  ;;  %v12681_v58 = vld [vmem:[#allocation36_spill] sm:$0xff] }
 0x4fb   : > { %v11110_v57 = vpop.f32.mrf.mxu1  ;;  %v4719_v28 = vadd.f32 %v12667_v49, %v4443_v59  ;;  %v4172_v15 = vadd.f32 %v12671_v45, %v3896_v5  ;;  %v4174_v32 = vadd.f32 %v12675_v24, %v3898_v60  ;;  %v11209_v61 = vadd.f32 %v12678_v51, %v12677_v0  ;;  %v12679_v5 = vld [vmem:[#allocation39_spill] sm:$0xff]  ;;  %v12683_v16 = vld [vmem:[#allocation32_spill] sm:$0xff]  ;;  %v12686_v39 = vld [vmem:[#allocation37_spill] sm:$0xff] }
 0x4fc   : > { %v4720_v56 = vadd.f32 %v12676_v12, %v4444_v47  ;;  %v4447_v50 = vadd.f32 %v12679_v5, %v4171_v20  ;;  %v4175_v25 = vadd.f32 %v12680_v26, %v3899_v3  ;;  %v4721_v52 = vadd.f32 %v12681_v58, %v4445_v38  ;;  %v12684_v60 = vld [vmem:[#allocation43_spill] sm:$0xff]  ;;  %v12685_v37 = vld [vmem:[#allocation4_spill] sm:$0xff]  ;;  %v12689_v20 = vld [vmem:[#allocation38_spill] sm:$0xff] }
 0x4fd   : > { %v11216_v8 = vadd.f32 %v12683_v16, %v12682_v13  ;;  %v4722_v59 = vadd.f32 %v12684_v60, %v4446_v54  ;;  %v11221_v10 = vadd.f32 %v12686_v39, %v12685_v37  ;;  %v12687_v31 = vld [vmem:[#allocation40_spill] sm:$0xff]  ;;  %v12688_v6 = vld [vmem:[#allocation15_spill] sm:$0xff]  ;;  %v12690_v3 = vld [vmem:[#allocation46_spill] sm:$0xff] }
 0x4fe   : > { %8457 = vmatmul.msk.f32.gmra.mxu1 %vm2789_vm2, %v5029_v41  ;;  %v11203_v41 = vpop.f32.mrf.mxu3  ;;  %v4723_v49 = vadd.f32 %v12687_v31, %v4447_v50  ;;  %v11228_v4 = vadd.f32 %v12689_v20, %v12688_v6  ;;  %v4448_v46 = vadd.f32 %v12690_v3, %v4172_v15  ;;  %v12691_v47 = vld [vmem:[#allocation51_spill] sm:$0xff]  ;;  %v12693_v38 = vld [vmem:[#allocation8_spill] sm:$0xff]  ;;  %v12695_v24 = vld [vmem:[#allocation66_spill] sm:$0xff] }
 0x4ff   : > { %v11223_v42 = vpop.f32.mrf.mxu2  ;;  %v4176_v45 = vadd.f32 %v12691_v47, %v3900_v2  ;;  %v4450_v40 = vadd.f32 %v12693_v38, %v4174_v32  ;;  %v12694_v54 = vld [vmem:[#allocation56_spill] sm:$0xff]  ;;  %v4178_v12 = vadd.f32 %v12695_v24, %v3902_v44  ;;  %v11239_v0 = vld [vmem:[%s12264_s4] ss:$0 sm:$0xff]  ;;  %v12696_v51 = vld [vmem:[#allocation47_spill] sm:$0xff] }
 0x500   : > { %v4177_v1 = vadd.f32 %v12694_v54, %v3901_v19  ;;  %v4724_v5 = vadd.f32 %v12696_v51, %v4448_v46  ;;  %v12697_v50 = vld [vmem:[#allocation48_spill] sm:$0xff]  ;;  %v12698_v15 = vld [vmem:[#allocation65_spill] sm:$0xff]  ;;  %v12700_v32 = vld [vmem:[#allocation19_spill] sm:$0xff] }
 0x501   : > { %v11243_v26 = vadd.f32 %v12697_v50, %v4715_v63  ;;  %v4451_v2 = vadd.f32 %v12698_v15, %v4175_v25  ;;  %v12699_v58 = vld [vmem:[#allocation69_spill] sm:$0xff]  ;;  %v12702_v60 = vld [vmem:[#allocation22_spill] sm:$0xff]  ;;  %v12704_v63 = vld [vmem:[#allocation68_spill] sm:$0xff] }
 0x502   : > { %v12701_v19 = vld [vmem:[#allocation53_spill] sm:$0xff]  ;;  %v11254_v37 = vadd.f32 %v12702_v60, %v4450_v40  ;;  %v12703_v31 = vld [vmem:[#allocation54_spill] sm:$0xff] }
 0x503   : > { %v11178_v17 = vpop.f32.mrf.mxu1  ;;  %v11251_v44 = vadd.f32 %v12701_v19, %v4716_v18  ;;  %v11257_v6 = vadd.f32 %v12703_v31, %v4717_v53  ;;  %v11260_v20 = vadd.f32 %v12704_v63, %v4451_v2  ;;  %v12705_v25 = vld [vmem:[#allocation70_spill] sm:$0xff]  ;;  %v5031_v47 = vld [vmem:[#allocation2 + $0xf2] sm:$0xff]  ;;  %v12717_v31 = vld [vmem:[#allocation71_spill] sm:$0xff] }
 0x504   : > { %12661 = vst [vmem:[#allocation58_spill] sm:$0xff] %v11178_v17  ;;  %v4452_v3 = vadd.f32 %v12705_v25, %v4176_v45  ;;  %v12708_v18 = vld [vmem:[#allocation74_spill] sm:$0xff]  ;;  %v12710_v24 = vld [vmem:[#allocation73_spill] sm:$0xff]  ;;  %v12711_v45 = vld [vmem:[#allocation23_spill] sm:$0xff]  ;;  %v11293_v63 = vadd.f32 %v12717_v31, %v4721_v52 }
 0x505   : > { %v4453_v38 = vadd.f32 %v12708_v18, %v4177_v1  ;;  %v12709_v40 = vld [vmem:[#allocation78_spill] sm:$0xff]  ;;  %v11278_v50 = vadd.f32 %v12711_v45, %v4719_v28  ;;  %v12714_v1 = vld [vmem:[#allocation77_spill] sm:$0xff] }
 0x506   : > { %8458 = vmatmul.msk.f32.gmra.mxu1 %vm2789_vm2, %v5030_v55  ;;  %v12692_v55 = vld [vmem:[#allocation44_spill] sm:$0xff]  ;;  %v4454_v54 = vadd.f32 %v12709_v40, %v4178_v12  ;;  %v11275_v51 = vadd.f32 %v12710_v24, %v4452_v3  ;;  %v12715_v12 = vld [vmem:[#allocation67_spill] sm:$0xff]  ;;  %v4692_v60 = vpop.f32.mrf.mxu3  ;;  %v12718_v28 = vld [vmem:[#allocation85_spill] sm:$0xff] }
 0x507   : > { %v4449_v22 = vadd.f32 %v12692_v55, %v4173_v43  ;;  %v4179_v43 = vadd.f32 %v12699_v58, %v3903_v11  ;;  %v12706_v11 = vld [vmem:[#allocation72_spill] sm:$0xff]  ;;  %v12707_v55 = vld [vmem:[#allocation18_spill] sm:$0xff]  ;;  %v11284_v58 = vadd.f32 %v12714_v1, %v4453_v38 }
 0x508   : > { %v4180_v46 = vadd.f32 %v12706_v11, %v11142_v34  ;;  %v12712_v34 = vld [vmem:[#allocation82_spill] sm:$0xff]  ;;  %v12721_v40 = vld [vmem:[#allocation76_spill] sm:$0xff] }
 0x509   : > { %v11248_v16 = vadd.f32 %v12700_v32, %v4449_v22  ;;  %v11266_v22 = vadd.f32 %v12707_v55, %v4718_v30  ;;  %v4455_v15 = vadd.f32 %v12712_v34, %v4179_v43  ;;  %v12713_v30 = vld [vmem:[#allocation75_spill] sm:$0xff]  ;;  %v12716_v32 = vld [vmem:[#allocation81_spill] sm:$0xff] }
 0x50a   : > { %v4181_v2 = vadd.f32 %v12713_v30, %v11148_v35  ;;  %v11290_v19 = vadd.f32 %v12716_v32, %v4454_v54  ;;  %v12719_v43 = vld [vmem:[#allocation87_spill] sm:$0xff]  ;;  %v11303_v54 = vadd.f32 %v12721_v40, %v4722_v59  ;;  %v5032_v32 = vld [vmem:[#allocation2 + $0xfa] sm:$0xff] }
 0x50b   : > { %v5163_v13 = vpop.f32.mrf.mxu1  ;;  %v11296_v25 = vadd.f32 %v12718_v28, %v4455_v15  ;;  %v4456_v3 = vadd.f32 %v12719_v43, %v4180_v46  ;;  %v12720_v35 = vld [vmem:[#allocation79_spill] sm:$0xff] }
 0x50c   : > { %v5259_v39 = vadd.f32 %v5163_v13, %v4983_v14  ;;  %v11270_v14 = vpop.f32.mrf.mxu0  ;;  %v11287_v13 = vadd.f32 %v12715_v12, %v4720_v56  ;;  %v4182_v11 = vadd.f32 %v12720_v35, %v11152_v21 }
 0x50d   : > { %v11306_v52 = vadd.f32 %v11120_v36, %v4456_v3 }
 0x50e   : > { %v5295_v53 = vadd.f32 %v11239_v0, %v5259_v39  ;;  %8459 = vmatmul.msk.f32.gmra.mxu1 %vm2789_vm2, %v5031_v47  ;;  %v4419_v47 = vpop.f32.mrf.mxu2 }
 0x510   : > { %v5327_v39 = vmax.f32 %v5295_v53, 0.0  ;;  %v4457_v53 = vadd.f32 %v11135_v7, %v4181_v2  ;;  %v4458_v7 = vadd.f32 %v11223_v42, %v4182_v11  ;;  %v12723_v2 = vld [vmem:[#allocation83_spill] sm:$0xff] }
 0x511   : > { %v4183_v31 = vadd.f32 %v12723_v2, %v11156_v62  ;;  %v12725_v62 = vld [vmem:[#allocation86_spill] sm:$0xff] }
 0x512   : > { %v5391_v55 = vrot.slane %v5327_v39, 2  ;;  %v5392_v56 = vrot.slane %v5327_v39, 4  ;;  %v5393_v18 = vrot.slane %v5327_v39, 6  ;;  %v5583_v38 = vsel %vm2862_vm5, %v5327_v39, -inf  ;;  %v12722_v39 = vld [vmem:[#allocation80_spill] sm:$0xff] }
 0x513   : > { %v5584_v24 = vrot.slane %v5583_v38, 4  ;;  %v5166_v45 = vpop.f32.mrf.mxu1  ;;  %v11314_v36 = vadd.f32 %v12722_v39, %v4723_v49  ;;  %v11327_v49 = vadd.f32 %v4692_v60, %v4458_v7  ;;  %v4459_v60 = vadd.f32 %v4419_v47, %v4183_v31 }
 0x514   : > { %v5590_v46 = vsel %vm2862_vm5, %v5391_v55, -inf  ;;  %v5597_v21 = vsel %vm2862_vm5, %v5392_v56, -inf  ;;  %v5604_v34 = vsel %vm2862_vm5, %v5393_v18, -inf  ;;  %v5260_v15 = vadd.f32 %v5166_v45, %v11183_v9  ;;  %v12724_v56 = vld [vmem:[#allocation84_spill] sm:$0xff]  ;;  %v4950_v42 = vpop.f32.mrf.mxu0 }
 0x515   : > { %v5585_v30 = vmax.f32 %v5583_v38, %v5584_v24  ;;  %v5591_v1 = vrot.slane %v5590_v46, 4  ;;  %v5598_v12 = vrot.slane %v5597_v21, 4  ;;  %v5605_v59 = vrot.slane %v5604_v34, 4 }
 0x516   : > { %v5296_v28 = vadd.f32 %v11239_v0, %v5260_v15  ;;  %8460 = vmatmul.msk.f32.gmra.mxu1 %vm2789_vm2, %v5032_v32  ;;  %v11322_v55 = vadd.f32 %v11203_v41, %v4457_v53  ;;  %v11325_v18 = vadd.f32 %v12724_v56, %v4724_v5  ;;  %v4184_v38 = vadd.f32 %v12725_v62, %v11160_v23  ;;  %v4695_v15 = vpop.f32.mrf.mxu3  ;;  %v12726_v53 = vld [vmem:[#allocation45_spill] sm:$0xff]  ;;  %v4422_v32 = vpop.f32.mrf.mxu2 }
 0x517   : > { %v5586_v43 = vrot.slane %v5585_v30, 2  ;;  %v5592_v3 = vmax.f32 %v5590_v46, %v5591_v1  ;;  %v5599_v9 = vmax.f32 %v5597_v21, %v5598_v12  ;;  %v5606_v35 = vmax.f32 %v5604_v34, %v5605_v59 }
 0x518   : > { %v5328_v11 = vmax.f32 %v5296_v28, 0.0  ;;  %v11334_v5 = vadd.f32 %v12726_v53, %v11248_v16  ;;  %v11339_v28 = vadd.f32 %v4695_v15, %v4459_v60  ;;  %v11341_v56 = vadd.f32 %v4422_v32, %v4184_v38  ;;  %v5033_v16 = vld [vmem:[#allocation2 + $0x10a] sm:$0xff] }
 0x519   : > { %v5593_v40 = vrot.slane %v5592_v3, 2  ;;  %v5600_v24 = vrot.slane %v5599_v9, 2  ;;  %v5607_v45 = vrot.slane %v5606_v35, 2  ;;  %v5587_v1 = vmax.f32 %v5585_v30, %v5586_v43 }
 0x51a   : > { %v5394_v46 = vrot.slane %v5328_v11, 2  ;;  %v5395_v21 = vrot.slane %v5328_v11, 4  ;;  %v5396_v34 = vrot.slane %v5328_v11, 6  ;;  %v5611_v41 = vsel %vm2862_vm5, %v5328_v11, -inf }
 0x51b   : > { %v5594_v12 = vmax.f32 %v5592_v3, %v5593_v40  ;;  %v5169_v59 = vpop.f32.mrf.mxu1  ;;  %v5612_v39 = vrot.slane %v5611_v41, 4  ;;  %v5601_v11 = vmax.f32 %v5599_v9, %v5600_v24  ;;  %v5608_v62 = vmax.f32 %v5606_v35, %v5607_v45 }
 0x51c   : > { %v5618_v23 = vsel %vm2862_vm5, %v5394_v46, -inf  ;;  %v5625_v7 = vsel %vm2862_vm5, %v5395_v21, -inf  ;;  %v5632_v2 = vsel %vm2862_vm5, %v5396_v34, -inf  ;;  %v11346_v43 = vadd.f32 %v11190_v33, %v11254_v37  ;;  %v4953_v33 = vpop.f32.mrf.mxu0 }
 0x51d   : > { %v5613_v53 = vmax.f32 %v5611_v41, %v5612_v39  ;;  %v5619_v47 = vrot.slane %v5618_v23, 4  ;;  %v5626_v30 = vrot.slane %v5625_v7, 4  ;;  %v5633_v31 = vrot.slane %v5632_v2, 4 }
 0x51e   : > { %8461 = vmatmul.msk.f32.gmra.mxu1 %vm2789_vm2, %v5033_v16  ;;  %v11350_v3 = vadd.f32 %v11110_v57, %v11164_v29  ;;  %v5588_v40 = vrot.slane %v5587_v1, 1  ;;  %v5595_v38 = vrot.slane %v5594_v12, 1  ;;  %v11354_v45 = vadd.f32 %v11270_v14, %v11260_v20 }
 0x51f   : > { %v5614_v15 = vrot.slane %v5613_v53, 2  ;;  %v5620_v9 = vmax.f32 %v5618_v23, %v5619_v47  ;;  %v5627_v35 = vmax.f32 %v5625_v7, %v5626_v30  ;;  %v5634_v24 = vmax.f32 %v5632_v2, %v5633_v31 }
 0x520   : > { %v5602_v46 = vrot.slane %v5601_v11, 1  ;;  %v5609_v21 = vrot.slane %v5608_v62, 1  ;;  %v5261_v34 = vadd.f32 %v5169_v59, %v11188_v48  ;;  %v11358_v29 = vadd.f32 %v4950_v42, %v11275_v51 }
 0x521   : > { %v5615_v37 = vmax.f32 %v5613_v53, %v5614_v15  ;;  %v5621_v41 = vrot.slane %v5620_v9, 2  ;;  %v5628_v60 = vrot.slane %v5627_v35, 2  ;;  %v5635_v57 = vrot.slane %v5634_v24, 2  ;;  %v5034_v53 = vld [vmem:[#allocation2 + $0x112] sm:$0xff] }
 0x522   : > { %v5589_v32 = vmax.f32 %v5587_v1, %v5588_v40  ;;  %v5596_v39 = vmax.f32 %v5594_v12, %v5595_v38  ;;  %v5297_v23 = vadd.f32 %v11239_v0, %v5261_v34  ;;  %v5603_v47 = vmax.f32 %v5601_v11, %v5602_v46 }
 0x523   : > { %v5172_v7 = vpop.f32.mrf.mxu1  ;;  %v5616_v2 = vrot.slane %v5615_v37, 1  ;;  %v5622_v20 = vmax.f32 %v5620_v9, %v5621_v41  ;;  %v5629_v14 = vmax.f32 %v5627_v35, %v5628_v60  ;;  %v5636_v16 = vmax.f32 %v5634_v24, %v5635_v57 }
 0x524   : > { %v5610_v30 = vmax.f32 %v5608_v62, %v5609_v21  ;;  %v11362_v48 = vadd.f32 %v4953_v33, %v11284_v58  ;;  %v5329_v59 = vmax.f32 %v5297_v23, 0.0  ;;  %v5262_v42 = vadd.f32 %v5172_v7, %v11195_v27 }
 0x525   : > { %v5623_v31 = vrot.slane %v5622_v20, 1  ;;  %v5630_v15 = vrot.slane %v5629_v14, 1  ;;  %v5637_v51 = vrot.slane %v5636_v16, 1  ;;  %v11368_v11 = vsel %vm2789_vm2, %v5589_v32, -inf }
 0x526   : > { %8462 = vmatmul.msk.f32.gmra.mxu1 %vm2789_vm2, %v5034_v53  ;;  %v5397_v1 = vrot.slane %v5329_v59, 2  ;;  %v5398_v12 = vrot.slane %v5329_v59, 4  ;;  %v5399_v40 = vrot.slane %v5329_v59, 6  ;;  %v5639_v38 = vsel %vm2862_vm5, %v5329_v59, -inf  ;;  %v5035_v53 = vld [vmem:[#allocation2 + $0x122] sm:$0xff] }
 0x527   : > { %v11371_v58 = vsel %vm2789_vm2, %v5596_v39, -inf  ;;  %v5617_v62 = vmax.f32 %v5615_v37, %v5616_v2  ;;  %v5624_v9 = vmax.f32 %v5622_v20, %v5623_v31  ;;  %v5640_v35 = vrot.slane %v5639_v38, 4 }
 0x528   : > { %v5646_v24 = vsel %vm2862_vm5, %v5397_v1, -inf  ;;  %v5653_v27 = vsel %vm2862_vm5, %v5398_v12, -inf  ;;  %v5660_v46 = vsel %vm2862_vm5, %v5399_v40, -inf  ;;  %v11377_v21 = vsel %vm2789_vm2, %v5603_v47, -inf }
 0x529   : > { %v5631_v34 = vmax.f32 %v5629_v14, %v5630_v15  ;;  %v5638_v33 = vmax.f32 %v5636_v16, %v5637_v51  ;;  %v5647_v41 = vrot.slane %v5646_v24, 4  ;;  %v5641_v60 = vmax.f32 %v5639_v38, %v5640_v35 }
 0x52a   : > { %v5654_v57 = vrot.slane %v5653_v27, 4  ;;  %v5661_v32 = vrot.slane %v5660_v46, 4  ;;  %v5298_v39 = vadd.f32 %v11239_v0, %v5262_v42  ;;  %v11381_v23 = vsel %vm2789_vm2, %v5610_v30, -inf }
 0x52b   : > { %v5175_v37 = vpop.f32.mrf.mxu1  ;;  %v11384_v7 = vsel %vm2789_vm2, %v5617_v62, -inf  ;;  %v11387_v2 = vsel %vm2789_vm2, %v5624_v9, -inf  ;;  %v5648_v20 = vmax.f32 %v5646_v24, %v5647_v41  ;;  %v5642_v47 = vrot.slane %v5641_v60, 2 }
 0x52c   : > { %v5655_v14 = vmax.f32 %v5653_v27, %v5654_v57  ;;  %v5662_v16 = vmax.f32 %v5660_v46, %v5661_v32  ;;  %v5330_v59 = vmax.f32 %v5298_v39, 0.0  ;;  %v11390_v31 = vsel %vm2789_vm2, %v5631_v34, -inf }
 0x52d   : > { %v11393_v15 = vsel %vm2789_vm2, %v5638_v33, -inf  ;;  %v5649_v30 = vrot.slane %v5648_v20, 2  ;;  %v5263_v51 = vadd.f32 %v5175_v37, %v11209_v61  ;;  %v5643_v42 = vmax.f32 %v5641_v60, %v5642_v47 }
 0x52e   : > { %8463 = vmatmul.msk.f32.gmra.mxu1 %vm2789_vm2, %v5035_v53  ;;  %v5656_v1 = vrot.slane %v5655_v14, 2  ;;  %v5663_v12 = vrot.slane %v5662_v16, 2  ;;  %v5400_v40 = vrot.slane %v5330_v59, 2  ;;  %v5401_v62 = vrot.slane %v5330_v59, 4 }
 0x52f   : > { %v5650_v38 = vmax.f32 %v5648_v20, %v5649_v30  ;;  %v5402_v9 = vrot.slane %v5330_v59, 6  ;;  %v5667_v35 = vsel %vm2862_vm5, %v5330_v59, -inf  ;;  %v5644_v24 = vrot.slane %v5643_v42, 1 }
 0x530   : > { %v5657_v27 = vmax.f32 %v5655_v14, %v5656_v1  ;;  %v5664_v46 = vmax.f32 %v5662_v16, %v5663_v12  ;;  %v5668_v34 = vrot.slane %v5667_v35, 4  ;;  %v5674_v61 = vsel %vm2862_vm5, %v5400_v40, -inf  ;;  %v5036_v12 = vld [vmem:[#allocation2 + $0x12a] sm:$0xff]  ;;  %v11402_v40 = vpop.f32.mrf.mxu0 }
 0x531   : > { %v5651_v33 = vrot.slane %v5650_v38, 1  ;;  %v5681_v41 = vsel %vm2862_vm5, %v5401_v62, -inf  ;;  %v5688_v60 = vsel %vm2862_vm5, %v5402_v9, -inf  ;;  %v5645_v57 = vmax.f32 %v5643_v42, %v5644_v24 }
 0x532   : > { %v5658_v32 = vrot.slane %v5657_v27, 1  ;;  %v5665_v39 = vrot.slane %v5664_v46, 1  ;;  %v5669_v37 = vmax.f32 %v5667_v35, %v5668_v34  ;;  %v5675_v53 = vrot.slane %v5674_v61, 4 }
 0x533   : > { %v5178_v20 = vpop.f32.mrf.mxu1  ;;  %v5652_v47 = vmax.f32 %v5650_v38, %v5651_v33  ;;  %v5682_v30 = vrot.slane %v5681_v41, 4  ;;  %v5689_v59 = vrot.slane %v5688_v60, 4  ;;  %v6480_v16 = vsel %vm2789_vm2, %v5645_v57, -inf }
 0x534   : > { %v5659_v17 = vmax.f32 %v5657_v27, %v5658_v32  ;;  %v5666_v14 = vmax.f32 %v5664_v46, %v5665_v39  ;;  %v5670_v1 = vrot.slane %v5669_v37, 2  ;;  %v6481_v62 = vmax.f32 %v11368_v11, %v6480_v16 }
 0x535   : > { %v6483_v42 = vsel %vm2789_vm2, %v5652_v47, -inf  ;;  %v5676_v9 = vmax.f32 %v5674_v61, %v5675_v53  ;;  %v5683_v35 = vmax.f32 %v5681_v41, %v5682_v30  ;;  %v5690_v41 = vmax.f32 %v5688_v60, %v5689_v59 }
 0x536   : > { %8464 = vmatmul.msk.f32.gmra.mxu1 %vm2789_vm2, %v5036_v12  ;;  %v6484_v38 = vmax.f32 %v11371_v58, %v6483_v42  ;;  %v6486_v24 = vsel %vm2789_vm2, %v5659_v17, -inf  ;;  %v6489_v27 = vsel %vm2789_vm2, %v5666_v14, -inf  ;;  %v5671_v46 = vmax.f32 %v5669_v37, %v5670_v1 }
 0x537   : > { %v6487_v34 = vmax.f32 %v11377_v21, %v6486_v24  ;;  %v6490_v33 = vmax.f32 %v11381_v23, %v6489_v27  ;;  %v5677_v57 = vrot.slane %v5676_v9, 2  ;;  %v5684_v32 = vrot.slane %v5683_v35, 2 }
 0x538   : > { %v6736_v11 = vsel %vm6735_vm6, %v6484_v38, %v6481_v62  ;;  %6816 = vst.msk [vmem:[#allocation3 + $0x10] sm:$0x1] %vm6815_vm7, %v6484_v38  ;;  %v5672_v61 = vrot.slane %v5671_v46, 1  ;;  %v5299_v58 = vadd.f32 %v11239_v0, %v5263_v51  ;;  %v5691_v23 = vrot.slane %v5690_v41, 2  ;;  %v5037_v62 = vld [vmem:[#allocation2 + $0x13a] sm:$0xff] }
 0x539   : > { %v6738_v17 = vsel %vm6737_vm8, %v6487_v34, %v6736_v11  ;;  %v5678_v39 = vmax.f32 %v5676_v9, %v5677_v57  ;;  %v5685_v47 = vmax.f32 %v5683_v35, %v5684_v32  ;;  %v5264_v1 = vadd.f32 %v5178_v20, %v11216_v8  ;;  %v4959_v20 = vpop.f32.mrf.mxu0 }
 0x53a   : > { %v6740_v21 = vsel %vm6739_vm9, %v6490_v33, %v6738_v17  ;;  %v5673_v37 = vmax.f32 %v5671_v46, %v5672_v61  ;;  %v5331_v53 = vmax.f32 %v5299_v58, 0.0  ;;  %v5692_v12 = vmax.f32 %v5690_v41, %v5691_v23 }
 0x53b   : > { %v5181_v30 = vpop.f32.mrf.mxu1  ;;  %v5679_v14 = vrot.slane %v5678_v39, 1  ;;  %v5686_v16 = vrot.slane %v5685_v47, 1 }
 0x53c   : > { %v6492_v60 = vsel %vm2789_vm2, %v5673_v37, -inf  ;;  %v5403_v51 = vrot.slane %v5331_v53, 2  ;;  %v5404_v59 = vrot.slane %v5331_v53, 4  ;;  %v5405_v38 = vrot.slane %v5331_v53, 6 }
 0x53d   : > { %v5680_v42 = vmax.f32 %v5678_v39, %v5679_v14  ;;  %v5687_v9 = vmax.f32 %v5685_v47, %v5686_v16  ;;  %v6493_v35 = vmax.f32 %v11384_v7, %v6492_v60  ;;  %v5693_v24 = vrot.slane %v5692_v12, 1 }
 0x53e   : > { %8465 = vmatmul.msk.f32.gmra.mxu1 %vm2789_vm2, %v5037_v62  ;;  %v5695_v27 = vsel %vm2862_vm5, %v5331_v53, -inf  ;;  %v5702_v46 = vsel %vm2862_vm5, %v5403_v51, -inf  ;;  %v5709_v8 = vsel %vm2862_vm5, %v5404_v59, -inf  ;;  %v5716_v39 = vsel %vm2862_vm5, %v5405_v38, -inf  ;;  %v5038_v62 = vld [vmem:[#allocation2 + $0x142] sm:$0xff] }
 0x53f   : > { %v6495_v34 = vsel %vm2789_vm2, %v5680_v42, -inf  ;;  %v6498_v33 = vsel %vm2789_vm2, %v5687_v9, -inf  ;;  %v6742_v57 = vsel %vm6741_vm10, %v6493_v35, %v6740_v21  ;;  %v5696_v32 = vrot.slane %v5695_v27, 4 }
 0x540   : > { %v5694_v11 = vmax.f32 %v5692_v12, %v5693_v24  ;;  %v6496_v7 = vmax.f32 %v11387_v2, %v6495_v34  ;;  %v6499_v61 = vmax.f32 %v11390_v31, %v6498_v33  ;;  %v5703_v41 = vrot.slane %v5702_v46, 4 }
 0x541   : > { %v5697_v58 = vmax.f32 %v5695_v27, %v5696_v32  ;;  %v5710_v17 = vrot.slane %v5709_v8, 4  ;;  %v5300_v47 = vadd.f32 %v11239_v0, %v5264_v1  ;;  %v5717_v53 = vrot.slane %v5716_v39, 4 }
 0x542   : > { %v6501_v37 = vsel %vm2789_vm2, %v5694_v11, -inf  ;;  %v6744_v23 = vsel %vm6743_vm11, %v6496_v7, %v6742_v57  ;;  %6824 = vst.msk [vmem:[#allocation3 + $0x19] sm:$0x1] %vm6815_vm7, %v6499_v61  ;;  %v5704_v21 = vmax.f32 %v5702_v46, %v5703_v41  ;;  %v11438_v60 = vadd.f32 %v11402_v40, %v11290_v19  ;;  %v4962_v7 = vpop.f32.mrf.mxu0 }
 0x543   : > { %v5184_v14 = vpop.f32.mrf.mxu1  ;;  %v6502_v2 = vmax.f32 %v11393_v15, %v6501_v37  ;;  %v6746_v31 = vsel %vm6745_vm12, %v6499_v61, %v6744_v23  ;;  %v5698_v16 = vrot.slane %v5697_v58, 2  ;;  %v5711_v12 = vmax.f32 %v5709_v8, %v5710_v17 }
 0x544   : > { %v5705_v1 = vrot.slane %v5704_v21, 2  ;;  %v5718_v51 = vmax.f32 %v5716_v39, %v5717_v53  ;;  %v5332_v59 = vmax.f32 %v5300_v47, 0.0  ;;  %v5265_v38 = vadd.f32 %v5181_v30, %v11221_v10 }
 0x545   : > { %v6748_v42 = vsel %vm6747_vm13, %v6502_v2, %v6746_v31  ;;  %v5699_v9 = vmax.f32 %v5697_v58, %v5698_v16  ;;  %v5712_v35 = vrot.slane %v5711_v12, 2  ;;  %v11448_v23 = vadd.f32 %v4959_v20, %v11296_v25 }
 0x546   : > { %8466 = vmatmul.msk.f32.gmra.mxu1 %vm2789_vm2, %v5038_v62  ;;  %6807 = vst.msk [vmem:[#allocation3 + $0x11] sm:$0xff] %vm2789_vm2, %v6748_v42  ;;  %v5706_v15 = vmax.f32 %v5704_v21, %v5705_v1  ;;  %v5719_v24 = vrot.slane %v5718_v51, 2  ;;  %v5406_v27 = vrot.slane %v5332_v59, 2  ;;  %v5407_v46 = vrot.slane %v5332_v59, 4 }
 0x547   : > { %v5700_v19 = vrot.slane %v5699_v9, 1  ;;  %v5713_v40 = vmax.f32 %v5711_v12, %v5712_v35  ;;  %v5408_v8 = vrot.slane %v5332_v59, 6  ;;  %v5723_v34 = vsel %vm2862_vm5, %v5332_v59, -inf }
 0x548   : > { %v5707_v33 = vrot.slane %v5706_v15, 1  ;;  %v5720_v57 = vmax.f32 %v5718_v51, %v5719_v24  ;;  %v5724_v32 = vrot.slane %v5723_v34, 4  ;;  %v5730_v11 = vsel %vm2862_vm5, %v5406_v27, -inf  ;;  %v5039_v51 = vld [vmem:[#allocation2 + $0x152] sm:$0xff] }
 0x549   : > { %v5701_v10 = vmax.f32 %v5699_v9, %v5700_v19  ;;  %v5714_v30 = vrot.slane %v5713_v40, 1  ;;  %v5731_v61 = vrot.slane %v5730_v11, 4  ;;  %v5737_v41 = vsel %vm2862_vm5, %v5407_v46, -inf }
 0x54a   : > { %v5708_v58 = vmax.f32 %v5706_v15, %v5707_v33  ;;  %v5721_v17 = vrot.slane %v5720_v57, 1  ;;  %v5725_v39 = vmax.f32 %v5723_v34, %v5724_v32  ;;  %v5738_v47 = vrot.slane %v5737_v41, 4 }
 0x54b   : > { %v5187_v37 = vpop.f32.mrf.mxu1  ;;  %v5715_v21 = vmax.f32 %v5713_v40, %v5714_v30  ;;  %v5732_v53 = vmax.f32 %v5730_v11, %v5731_v61  ;;  %v5744_v2 = vsel %vm2862_vm5, %v5408_v8, -inf  ;;  %v11452_v31 = vadd.f32 %v4962_v7, %v11306_v52 }
 0x54c   : > { %v5722_v16 = vmax.f32 %v5720_v57, %v5721_v17  ;;  %v5726_v12 = vrot.slane %v5725_v39, 2  ;;  %v5739_v1 = vmax.f32 %v5737_v41, %v5738_v47  ;;  %v11455_v59 = vsel %vm2789_vm2, %v5701_v10, -inf }
 0x54d   : > { %v5733_v62 = vrot.slane %v5732_v53, 2  ;;  %v5745_v42 = vrot.slane %v5744_v2, 4  ;;  %v5301_v9 = vadd.f32 %v11239_v0, %v5265_v38  ;;  %v11460_v25 = vsel %vm2789_vm2, %v5708_v58, -inf }
 0x54e   : > { %8467 = vmatmul.msk.f32.gmra.mxu1 %vm2789_vm2, %v5039_v51  ;;  %v5727_v20 = vmax.f32 %v5725_v39, %v5726_v12  ;;  %v5740_v35 = vrot.slane %v5739_v1, 2  ;;  %v5266_v52 = vadd.f32 %v5184_v14, %v11228_v4  ;;  %v11464_v15 = vsel %vm2789_vm2, %v5715_v21, -inf }
 0x54f   : > { %v5734_v24 = vmax.f32 %v5732_v53, %v5733_v62  ;;  %v5746_v27 = vmax.f32 %v5744_v2, %v5745_v42  ;;  %v5333_v46 = vmax.f32 %v5301_v9, 0.0  ;;  %v11467_v19 = vsel %vm2789_vm2, %v5722_v16, -inf  ;;  %v5040_v53 = vld [vmem:[#allocation2 + $0x15a] sm:$0xff] }
 0x550   : > { %v5728_v40 = vrot.slane %v5727_v20, 1  ;;  %v5741_v38 = vmax.f32 %v5739_v1, %v5740_v35  ;;  %v5302_v8 = vadd.f32 %v11239_v0, %v5266_v52  ;;  %v11476_v21 = vadd.f32 %v5187_v37, %v11243_v26 }
 0x551   : > { %v5735_v34 = vrot.slane %v5734_v24, 1  ;;  %v5747_v33 = vrot.slane %v5746_v27, 2  ;;  %v5409_v57 = vrot.slane %v5333_v46, 2  ;;  %v5410_v32 = vrot.slane %v5333_v46, 4 }
 0x552   : > { %v5729_v11 = vmax.f32 %v5727_v20, %v5728_v40  ;;  %v5742_v7 = vrot.slane %v5741_v38, 1  ;;  %v5411_v4 = vrot.slane %v5333_v46, 6  ;;  %v5751_v14 = vsel %vm2862_vm5, %v5333_v46, -inf }
 0x553   : > { %v11471_v10 = vpop.f32.mrf.mxu1  ;;  %v5736_v30 = vmax.f32 %v5734_v24, %v5735_v34  ;;  %v5748_v61 = vmax.f32 %v5746_v27, %v5747_v33  ;;  %v5752_v41 = vrot.slane %v5751_v14, 4  ;;  %v5758_v58 = vsel %vm2862_vm5, %v5409_v57, -inf  ;;  %v8475_v57 = vld [vmem:[%s12265_s5 + $0x10] sm:$0xff] }
 0x554   : > { %v5743_v17 = vmax.f32 %v5741_v38, %v5742_v7  ;;  %v5759_v39 = vrot.slane %v5758_v58, 4  ;;  %v5765_v47 = vsel %vm2862_vm5, %v5410_v32, -inf  ;;  %v11479_v16 = vsel %vm2789_vm2, %v5729_v11, -inf  ;;  %6903 = vmatpush.msrb.mxu2 %v8475_v57 }
 0x555   : > { %v5749_v2 = vrot.slane %v5748_v61, 1  ;;  %v5753_v12 = vmax.f32 %v5751_v14, %v5752_v41  ;;  %v5766_v1 = vrot.slane %v5765_v47, 4  ;;  %v11483_v51 = vsel %vm2789_vm2, %v5736_v30, -inf }
 0x556   : > { %8468 = vmatmul.msk.f32.gmra.mxu1 %vm2789_vm2, %v5040_v53  ;;  %v5760_v62 = vmax.f32 %v5758_v58, %v5759_v39  ;;  %v5772_v42 = vsel %vm2862_vm5, %v5411_v4, -inf  ;;  %v5334_v9 = vmax.f32 %v5302_v8, 0.0  ;;  %v11487_v20 = vsel %vm2789_vm2, %v5743_v17, -inf  ;;  %v6851_v8 = vld [vmem:[%s12265_s5] sm:$0xff] }
 0x557   : > { %v5754_v26 = vrot.slane %v5753_v12, 2  ;;  %v5767_v37 = vmax.f32 %v5765_v47, %v5766_v1  ;;  %v5773_v35 = vrot.slane %v5772_v42, 4  ;;  %v5750_v40 = vmax.f32 %v5748_v61, %v5749_v2  ;;  %6968 = vmatpush.msrb.mxu3 %v6851_v8  ;;  %v5041_v2 = vld [vmem:[#allocation2 + $0x16a] sm:$0xff] }
 0x558   : > { %v5761_v52 = vrot.slane %v5760_v62, 2  ;;  %v5412_v24 = vrot.slane %v5334_v9, 2  ;;  %v5413_v27 = vrot.slane %v5334_v9, 4  ;;  %v5414_v46 = vrot.slane %v5334_v9, 6 }
 0x559   : > { %v5755_v38 = vmax.f32 %v5753_v12, %v5754_v26  ;;  %v5768_v34 = vrot.slane %v5767_v37, 2  ;;  %v5774_v33 = vmax.f32 %v5772_v42, %v5773_v35  ;;  %v5779_v11 = vsel %vm2862_vm5, %v5334_v9, -inf }
 0x55a   : > { %v5762_v32 = vmax.f32 %v5760_v62, %v5761_v52  ;;  %v5786_v7 = vsel %vm2862_vm5, %v5412_v24, -inf  ;;  %v5793_v4 = vsel %vm2862_vm5, %v5413_v27, -inf  ;;  %v5780_v58 = vrot.slane %v5779_v11, 4 }
 0x55b   : > { %v11498_v14 = vpop.f32.mrf.mxu1  ;;  %v5756_v30 = vrot.slane %v5755_v38, 1  ;;  %v5769_v61 = vmax.f32 %v5767_v37, %v5768_v34  ;;  %v5775_v41 = vrot.slane %v5774_v33, 2  ;;  %v5787_v39 = vrot.slane %v5786_v7, 4 }
 0x55c   : > { %v5763_v17 = vrot.slane %v5762_v32, 1  ;;  %v5794_v47 = vrot.slane %v5793_v4, 4  ;;  %v5800_v53 = vsel %vm2862_vm5, %v5414_v46, -inf  ;;  %v5781_v42 = vmax.f32 %v5779_v11, %v5780_v58  ;;  %v8554_v46 = vld [vmem:[%s12265_s5 + $0x88] sm:$0xff] }
 0x55d   : > { %v5757_v12 = vmax.f32 %v5755_v38, %v5756_v30  ;;  %v5770_v1 = vrot.slane %v5769_v61, 1  ;;  %v5776_v62 = vmax.f32 %v5774_v33, %v5775_v41  ;;  %v5788_v26 = vmax.f32 %v5786_v7, %v5787_v39  ;;  %7547 = vmatpush.msrb.mxu0 %v8554_v46  ;;  %v8553_v30 = vld [vmem:[%s12265_s5 + $0x80] sm:$0xff] }
 0x55e   : > { %8469 = vmatmul.msk.f32.gmra.mxu1 %vm2789_vm2, %v5041_v2  ;;  %v5764_v9 = vmax.f32 %v5762_v32, %v5763_v17  ;;  %v5795_v35 = vmax.f32 %v5793_v4, %v5794_v47  ;;  %v5801_v52 = vrot.slane %v5800_v53, 4  ;;  %v5782_v34 = vrot.slane %v5781_v42, 2 }
 0x55f   : > { %v5771_v24 = vmax.f32 %v5769_v61, %v5770_v1  ;;  %v5777_v37 = vrot.slane %v5776_v62, 1  ;;  %v6504_v27 = vsel %vm2789_vm2, %v5757_v12, -inf  ;;  %v5789_v57 = vrot.slane %v5788_v26, 2  ;;  %7548 = vmatpush.msrb.mxu0 %v8553_v30 }
 0x560   : > { %v6505_v38 = vmax.f32 %v11455_v59, %v6504_v27  ;;  %v6507_v33 = vsel %vm2789_vm2, %v5764_v9, -inf  ;;  %v5796_v8 = vrot.slane %v5795_v35, 2  ;;  %v5783_v4 = vmax.f32 %v5781_v42, %v5782_v34 }
 0x561   : > { %v5778_v32 = vmax.f32 %v5776_v62, %v5777_v37  ;;  %v6508_v11 = vmax.f32 %v11460_v25, %v6507_v33  ;;  %v6510_v7 = vsel %vm2789_vm2, %v5771_v24, -inf  ;;  %v5790_v41 = vmax.f32 %v5788_v26, %v5789_v57 }
 0x562   : > { %v6511_v61 = vmax.f32 %v11464_v15, %v6510_v7  ;;  %v5797_v58 = vmax.f32 %v5795_v35, %v5796_v8  ;;  %v5802_v59 = vmax.f32 %v5800_v53, %v5801_v52  ;;  %v5784_v25 = vrot.slane %v5783_v4, 1  ;;  %v5042_v53 = vld [vmem:[#allocation2 + $0x172] sm:$0xff] }
 0x563   : > { %v6513_v17 = vsel %vm2789_vm2, %v5778_v32, -inf  ;;  %v6749_v39 = vsel %vm6735_vm6, %v6508_v11, %v6505_v38  ;;  %6817 = vst.msk [vmem:[#allocation3 + $0x20] sm:$0x1] %vm6815_vm7, %v6508_v11  ;;  %v5303_v47 = vadd.f32 %v11239_v0, %v11476_v21  ;;  %v5791_v1 = vrot.slane %v5790_v41, 1  ;;  %v11521_v62 = vpop.f32.mrf.mxu1 }
 0x564   : > { %v6514_v2 = vmax.f32 %v11467_v19, %v6513_v17  ;;  %v6750_v12 = vsel %vm6737_vm8, %v6511_v61, %v6749_v39  ;;  %v5798_v15 = vrot.slane %v5797_v58, 1  ;;  %v6524_v42 = vsel %vm2789_vm2, %v5750_v40, -inf }
 0x565   : > { %v5785_v9 = vmax.f32 %v5783_v4, %v5784_v25  ;;  %v5803_v26 = vrot.slane %v5802_v59, 2  ;;  %v5335_v35 = vmax.f32 %v5303_v47, 0.0  ;;  %v5792_v24 = vmax.f32 %v5790_v41, %v5791_v1  ;;  %v5043_v25 = vld [vmem:[#allocation2 + $0x182] sm:$0xff] }
 0x566   : > { %8470 = vmatmul.msk.f32.gmra.mxu1 %vm2789_vm2, %v5042_v53  ;;  %v6751_v52 = vsel %vm6739_vm9, %v6514_v2, %v6750_v12  ;;  %v5799_v21 = vmax.f32 %v5797_v58, %v5798_v15  ;;  %v5268_v19 = vadd.f32 %v11471_v10, %v11251_v44 }
 0x567   : > { %v5804_v37 = vmax.f32 %v5802_v59, %v5803_v26  ;;  %v6516_v27 = vsel %vm2789_vm2, %v5785_v9, -inf  ;;  %v5415_v34 = vrot.slane %v5335_v35, 2  ;;  %v5416_v46 = vrot.slane %v5335_v35, 4 }
 0x568   : > { %v6517_v38 = vmax.f32 %v11479_v16, %v6516_v27  ;;  %v6519_v40 = vsel %vm2789_vm2, %v5792_v24, -inf  ;;  %v6522_v33 = vsel %vm2789_vm2, %v5799_v21, -inf  ;;  %v5417_v57 = vrot.slane %v5335_v35, 6  ;;  %v4965_v16 = vpop.f32.mrf.mxu0 }
 0x569   : > { %v5805_v8 = vrot.slane %v5804_v37, 1  ;;  %v6520_v32 = vmax.f32 %v11483_v51, %v6519_v40  ;;  %v6523_v11 = vmax.f32 %v11487_v20, %v6522_v33  ;;  %v5807_v7 = vsel %vm2862_vm5, %v5335_v35, -inf }
 0x56a   : > { %v6752_v44 = vsel %vm6741_vm10, %v6517_v38, %v6751_v52  ;;  %v5808_v10 = vrot.slane %v5807_v7, 4  ;;  %v5814_v4 = vsel %vm2862_vm5, %v5415_v34, -inf  ;;  %v5821_v30 = vsel %vm2862_vm5, %v5416_v46, -inf }
 0x56b   : > { %v5806_v61 = vmax.f32 %v5804_v37, %v5805_v8  ;;  %v6753_v41 = vsel %vm6743_vm11, %v6520_v32, %v6752_v44  ;;  %6825 = vst.msk [vmem:[#allocation3 + $0x29] sm:$0x1] %vm6815_vm7, %v6523_v11  ;;  %v5815_v58 = vrot.slane %v5814_v4, 4  ;;  %v5822_v59 = vrot.slane %v5821_v30, 4  ;;  %v5199_v35 = vpop.f32.mrf.mxu1 }
 0x56c   : > { %v6754_v51 = vsel %vm6745_vm12, %v6523_v11, %v6753_v41  ;;  %v5809_v20 = vmax.f32 %v5807_v7, %v5808_v10  ;;  %v5828_v17 = vsel %vm2862_vm5, %v5417_v57, -inf  ;;  %v5304_v39 = vadd.f32 %v11239_v0, %v5268_v19 }
 0x56d   : > { %v6525_v47 = vsel %vm2789_vm2, %v5806_v61, -inf  ;;  %v5816_v2 = vmax.f32 %v5814_v4, %v5815_v58  ;;  %v5823_v12 = vmax.f32 %v5821_v30, %v5822_v59  ;;  %v5829_v1 = vrot.slane %v5828_v17, 4  ;;  %v5044_v30 = vld [vmem:[#allocation2 + $0x18a] sm:$0xff] }
 0x56e   : > { %8471 = vmatmul.msk.f32.gmra.mxu1 %vm2789_vm2, %v5043_v25  ;;  %v11546_v15 = vadd.f32 %v4965_v16, %v11322_v55  ;;  %v6526_v53 = vmax.f32 %v6524_v42, %v6525_v47  ;;  %v5810_v9 = vrot.slane %v5809_v20, 2  ;;  %v5336_v26 = vmax.f32 %v5304_v39, 0.0 }
 0x56f   : > { %v5817_v52 = vrot.slane %v5816_v2, 2  ;;  %v5824_v24 = vrot.slane %v5823_v12, 2  ;;  %v5830_v21 = vmax.f32 %v5828_v17, %v5829_v1  ;;  %v5269_v0 = vadd.f32 %v11498_v14, %v11257_v6 }
 0x570   : > { %v6755_v19 = vsel %vm6747_vm13, %v6526_v53, %v6754_v51  ;;  %v5811_v37 = vmax.f32 %v5809_v20, %v5810_v9  ;;  %v5418_v27 = vrot.slane %v5336_v26, 2  ;;  %v5419_v34 = vrot.slane %v5336_v26, 4  ;;  %v11569_v9 = vld [vmem:[%s12264_s4] ss:$0 sm:$0xff] }
 0x571   : > { %6808 = vst.msk [vmem:[#allocation3 + $0x21] sm:$0xff] %vm2789_vm2, %v6755_v19  ;;  %v5818_v46 = vmax.f32 %v5816_v2, %v5817_v52  ;;  %v5825_v55 = vmax.f32 %v5823_v12, %v5824_v24  ;;  %v5831_v38 = vrot.slane %v5830_v21, 2  ;;  %v5420_v42 = vrot.slane %v5336_v26, 6 }
 0x572   : > { %v5812_v40 = vrot.slane %v5811_v37, 1  ;;  %v5835_v33 = vsel %vm2862_vm5, %v5336_v26, -inf  ;;  %v5842_v57 = vsel %vm2862_vm5, %v5418_v27, -inf  ;;  %v5849_v8 = vsel %vm2862_vm5, %v5419_v34, -inf }
 0x573   : > { %v5819_v32 = vrot.slane %v5818_v46, 1  ;;  %v5826_v6 = vrot.slane %v5825_v55, 1  ;;  %v5832_v14 = vmax.f32 %v5830_v21, %v5831_v38  ;;  %v5836_v11 = vrot.slane %v5835_v33, 4  ;;  %v5202_v19 = vpop.f32.mrf.mxu1 }
 0x574   : > { %v5813_v7 = vmax.f32 %v5811_v37, %v5812_v40  ;;  %v5843_v44 = vrot.slane %v5842_v57, 4  ;;  %v5850_v10 = vrot.slane %v5849_v8, 4  ;;  %v5856_v4 = vsel %vm2862_vm5, %v5420_v42, -inf }
 0x575   : > { %v5820_v16 = vmax.f32 %v5818_v46, %v5819_v32  ;;  %v5827_v61 = vmax.f32 %v5825_v55, %v5826_v6  ;;  %v5833_v41 = vrot.slane %v5832_v14, 1  ;;  %v5837_v58 = vmax.f32 %v5835_v33, %v5836_v11 }
 0x576   : > { %8472 = vmatmul.msk.f32.gmra.mxu1 %vm2789_vm2, %v5044_v30  ;;  %v11558_v59 = vsel %vm2789_vm2, %v5813_v7, -inf  ;;  %v5844_v51 = vmax.f32 %v5842_v57, %v5843_v44  ;;  %v5851_v20 = vmax.f32 %v5849_v8, %v5850_v10  ;;  %v5857_v17 = vrot.slane %v5856_v4, 4 }
 0x577   : > { %v5834_v39 = vmax.f32 %v5832_v14, %v5833_v41  ;;  %v11561_v25 = vsel %vm2789_vm2, %v5820_v16, -inf  ;;  %v11564_v47 = vsel %vm2789_vm2, %v5827_v61, -inf  ;;  %v5838_v2 = vrot.slane %v5837_v58, 2 }
 0x578   : > { %v5845_v12 = vrot.slane %v5844_v51, 2  ;;  %v5852_v1 = vrot.slane %v5851_v20, 2  ;;  %v5858_v53 = vmax.f32 %v5856_v4, %v5857_v17  ;;  %v5305_v26 = vadd.f32 %v11569_v9, %v5269_v0  ;;  %v7498_v52 = vld [vmem:[#allocation3 + $0x22] sm:$0xff] }
 0x579   : > { %v11572_v24 = vld [vmem:[#allocation3 + $0x20] sm:$0xff]  ;;  %v6834_v21 = vld [vmem:[#allocation3 + $0x28] sm:$0x3]  ;;  %v11575_v37 = vsel %vm2789_vm2, %v5834_v39, -inf  ;;  %v5839_v27 = vmax.f32 %v5837_v58, %v5838_v2  ;;  %v5270_v34 = vadd.f32 %v11521_v62, %v11266_v22  ;;  %8555 = vmatmul.msk.f32.vlgmr.msrb.gmra.mxu0 %vm2789_vm2, %v7498_v52  ;;  %v5271_v46 = vadd.f32 %v5199_v35, %v11278_v50  ;;  %v5045_v35 = vld [vmem:[#allocation2 + $0x19a] sm:$0xff] }
 0x57a   : > { %6835 = vst.msk [vmem:[#allocation3] sm:$0xff] %vm2789_vm2, %v11572_v24  ;;  %v5846_v0 = vmax.f32 %v5844_v51, %v5845_v12  ;;  %v5853_v55 = vmax.f32 %v5851_v20, %v5852_v1  ;;  %v5859_v38 = vrot.slane %v5858_v53, 2  ;;  %v5337_v42 = vmax.f32 %v5305_v26, 0.0 }
 0x57b   : > { %6836 = vst.msk [vmem:[#allocation3 + $0x8] sm:$0x3] %vm2862_vm5, %v6834_v21  ;;  %v5840_v40 = vrot.slane %v5839_v27, 1  ;;  %v5306_v33 = vadd.f32 %v11569_v9, %v5270_v34  ;;  %v5307_v57 = vadd.f32 %v11569_v9, %v5271_v46  ;;  %v5272_v22 = vadd.f32 %v5202_v19, %v11287_v13 }
 0x57c   : > { %v5847_v62 = vrot.slane %v5846_v0, 1  ;;  %v5854_v8 = vrot.slane %v5853_v55, 1  ;;  %v5860_v32 = vmax.f32 %v5858_v53, %v5859_v38  ;;  %v5421_v50 = vrot.slane %v5337_v42, 2 }
 0x57d   : > { %v5841_v6 = vmax.f32 %v5839_v27, %v5840_v40  ;;  %v5422_v14 = vrot.slane %v5337_v42, 4  ;;  %v5423_v11 = vrot.slane %v5337_v42, 6  ;;  %v5863_v7 = vsel %vm2862_vm5, %v5337_v42, -inf }
 0x57e   : > { %8473 = vmatmul.msk.f32.gmra.mxu1 %vm2789_vm2, %v5045_v35  ;;  %v5848_v44 = vmax.f32 %v5846_v0, %v5847_v62  ;;  %v5855_v10 = vmax.f32 %v5853_v55, %v5854_v8  ;;  %v5861_v4 = vrot.slane %v5860_v32, 1  ;;  %v5864_v30 = vrot.slane %v5863_v7, 4  ;;  %v5046_v62 = vld [vmem:[#allocation2 + $0x1a2] sm:$0xff] }
 0x57f   : > { %v11590_v16 = vsel %vm2789_vm2, %v5841_v6, -inf  ;;  %v5870_v13 = vsel %vm2862_vm5, %v5421_v50, -inf  ;;  %v5877_v61 = vsel %vm2862_vm5, %v5422_v14, -inf  ;;  %v5884_v41 = vsel %vm2862_vm5, %v5423_v11, -inf }
 0x580   : > { %v5862_v58 = vmax.f32 %v5860_v32, %v5861_v4  ;;  %v11596_v51 = vsel %vm2789_vm2, %v5848_v44, -inf  ;;  %v11599_v20 = vsel %vm2789_vm2, %v5855_v10, -inf  ;;  %v5865_v17 = vmax.f32 %v5863_v7, %v5864_v30 }
 0x581   : > { %v6843_v39 = vld [vmem:[#allocation3] sm:$0xff]  ;;  %v5871_v2 = vrot.slane %v5870_v13, 4  ;;  %v5878_v12 = vrot.slane %v5877_v61, 4  ;;  %v5885_v1 = vrot.slane %v5884_v41, 4  ;;  %v5338_v53 = vmax.f32 %v5306_v33, 0.0 }
 0x582   : > { %v6853_v26 = vld [vmem:[#allocation3 + $0x1] sm:$0xff]  ;;  %8485 = vmatmul.msk.f32.vlgmr.msrb.gmra.mxu3 %vm2789_vm2, %v6843_v39  ;;  %v11603_v52 = vsel %vm2789_vm2, %v5862_v58, -inf  ;;  %v5866_v21 = vrot.slane %v5865_v17, 2  ;;  %v11605_v19 = vmax.f32 %v5307_v57, 0.0  ;;  %v11609_v27 = vadd.f32 %v11569_v9, %v5272_v22 }
 0x583   : > { %8477 = vmatmul.msk.f32.vlgmr.msrb.gmra.mxu2 %vm2789_vm2, %v6853_v26  ;;  %v5872_v34 = vmax.f32 %v5870_v13, %v5871_v2  ;;  %v5879_v46 = vmax.f32 %v5877_v61, %v5878_v12  ;;  %v5886_v0 = vmax.f32 %v5884_v41, %v5885_v1  ;;  %v5424_v55 = vrot.slane %v5338_v53, 2  ;;  %v6844_v41 = vld [vmem:[#allocation3 + $0x10] sm:$0xff] }
 0x584   : > { %v5867_v38 = vmax.f32 %v5865_v17, %v5866_v21  ;;  %v5425_v42 = vrot.slane %v5338_v53, 4  ;;  %v5426_v40 = vrot.slane %v5338_v53, 6  ;;  %v5891_v33 = vsel %vm2862_vm5, %v5338_v53, -inf  ;;  %v6854_v12 = vld [vmem:[#allocation3 + $0x11] sm:$0xff] }
 0x585   : > { %v5873_v8 = vrot.slane %v5872_v34, 2  ;;  %v5880_v32 = vrot.slane %v5879_v46, 2  ;;  %v5887_v50 = vrot.slane %v5886_v0, 2  ;;  %v5892_v57 = vrot.slane %v5891_v33, 4 }
 0x586   : > { %8474 = vmatmul.msk.f32.gmra.mxu1 %vm2789_vm2, %v5046_v62  ;;  %v5868_v35 = vrot.slane %v5867_v38, 1  ;;  %v5898_v22 = vsel %vm2862_vm5, %v5424_v55, -inf  ;;  %v5905_v6 = vsel %vm2862_vm5, %v5425_v42, -inf  ;;  %v5912_v14 = vsel %vm2862_vm5, %v5426_v40, -inf }
 0x587   : > { %v5874_v11 = vmax.f32 %v5872_v34, %v5873_v8  ;;  %v5881_v7 = vmax.f32 %v5879_v46, %v5880_v32  ;;  %v5888_v44 = vmax.f32 %v5886_v0, %v5887_v50  ;;  %v5893_v10 = vmax.f32 %v5891_v33, %v5892_v57 }
 0x588   : > { %v5869_v4 = vmax.f32 %v5867_v38, %v5868_v35  ;;  %v5899_v30 = vrot.slane %v5898_v22, 4  ;;  %v5906_v13 = vrot.slane %v5905_v6, 4  ;;  %v5913_v61 = vrot.slane %v5912_v14, 4  ;;  %v5205_v38 = vpop.f32.mrf.mxu1 }
 0x589   : > { %v5875_v58 = vrot.slane %v5874_v11, 1  ;;  %v5882_v17 = vrot.slane %v5881_v7, 1  ;;  %v5889_v39 = vrot.slane %v5888_v44, 1  ;;  %v5894_v2 = vrot.slane %v5893_v10, 2 }
 0x58a   : > { %8486 = vmatmul.msk.f32.gmra.mxu3 %vm2789_vm2, %v6844_v41  ;;  %v6528_v1 = vsel %vm2789_vm2, %v5869_v4, -inf  ;;  %v5900_v53 = vmax.f32 %v5898_v22, %v5899_v30  ;;  %v5907_v26 = vmax.f32 %v5905_v6, %v5906_v13  ;;  %v5914_v21 = vmax.f32 %v5912_v14, %v5913_v61  ;;  %v6855_v41 = vld [vmem:[#allocation3 + $0x21] sm:$0xff] }
 0x58b   : > { %8478 = vmatmul.msk.f32.gmra.mxu2 %vm2789_vm2, %v6854_v12  ;;  %v5876_v34 = vmax.f32 %v5874_v11, %v5875_v58  ;;  %v5883_v46 = vmax.f32 %v5881_v7, %v5882_v17  ;;  %v5890_v0 = vmax.f32 %v5888_v44, %v5889_v39  ;;  %v6529_v55 = vmax.f32 %v11558_v59, %v6528_v1 }
 0x58c   : > { %v5895_v42 = vmax.f32 %v5893_v10, %v5894_v2  ;;  %v5901_v40 = vrot.slane %v5900_v53, 2  ;;  %v5908_v33 = vrot.slane %v5907_v26, 2  ;;  %v5915_v62 = vrot.slane %v5914_v21, 2 }
 0x58d   : > { %v6531_v8 = vsel %vm2789_vm2, %v5876_v34, -inf  ;;  %v6534_v32 = vsel %vm2789_vm2, %v5883_v46, -inf  ;;  %v6537_v50 = vsel %vm2789_vm2, %v5890_v0, -inf  ;;  %v5427_v57 = vrot.slane %v11605_v19, 2 }
 0x58e   : > { %v6532_v35 = vmax.f32 %v11561_v25, %v6531_v8  ;;  %v6535_v22 = vmax.f32 %v11564_v47, %v6534_v32  ;;  %v6538_v6 = vmax.f32 %v11575_v37, %v6537_v50  ;;  %v5896_v59 = vrot.slane %v5895_v42, 1 }
 0x58f   : > { %v5902_v14 = vmax.f32 %v5900_v53, %v5901_v40  ;;  %v5909_v11 = vmax.f32 %v5907_v26, %v5908_v33  ;;  %v5916_v7 = vmax.f32 %v5914_v21, %v5915_v62  ;;  %v5428_v44 = vrot.slane %v11605_v19, 4 }
 0x590   : > { %v6756_v10 = vsel %vm6735_vm6, %v6532_v35, %v6529_v55  ;;  %6818 = vst.msk [vmem:[#allocation3 + $0x30] sm:$0x1] %vm6815_vm7, %v6532_v35  ;;  %v5897_v4 = vmax.f32 %v5895_v42, %v5896_v59  ;;  %v5429_v30 = vrot.slane %v11605_v19, 6  ;;  %v5919_v25 = vsel %vm2862_vm5, %v11605_v19, -inf  ;;  %v5208_v40 = vpop.f32.mrf.mxu1 }
 0x591   : > { %v6757_v47 = vsel %vm6737_vm8, %v6535_v22, %v6756_v10  ;;  %v5903_v13 = vrot.slane %v5902_v14, 1  ;;  %v5910_v37 = vrot.slane %v5909_v11, 1  ;;  %v5917_v61 = vrot.slane %v5916_v7, 1 }
 0x592   : > { %8487 = vmatmul.msk.f32.gmra.mxu3 %vm2789_vm2, %v11572_v24  ;;  %v6758_v58 = vsel %vm6739_vm9, %v6538_v6, %v6757_v47  ;;  %v6540_v17 = vsel %vm2789_vm2, %v5897_v4, -inf  ;;  %v5920_v39 = vrot.slane %v5919_v25, 4  ;;  %v5926_v2 = vsel %vm2862_vm5, %v5427_v57, -inf }
 0x593   : > { %8479 = vmatmul.msk.f32.gmra.mxu2 %vm2789_vm2, %v6855_v41  ;;  %v5904_v12 = vmax.f32 %v5902_v14, %v5903_v13  ;;  %v5911_v19 = vmax.f32 %v5909_v11, %v5910_v37  ;;  %v5918_v1 = vmax.f32 %v5916_v7, %v5917_v61  ;;  %v6541_v53 = vmax.f32 %v11590_v16, %v6540_v17 }
 0x594   : > { %v5921_v26 = vmax.f32 %v5919_v25, %v5920_v39  ;;  %v5927_v21 = vrot.slane %v5926_v2, 4  ;;  %v5933_v34 = vsel %vm2862_vm5, %v5428_v44, -inf  ;;  %v5940_v24 = vsel %vm2862_vm5, %v5429_v30, -inf }
 0x595   : > { %v6543_v46 = vsel %vm2789_vm2, %v5904_v12, -inf  ;;  %v6546_v0 = vsel %vm2789_vm2, %v5911_v19, -inf  ;;  %v6549_v55 = vsel %vm2789_vm2, %v5918_v1, -inf  ;;  %v6759_v42 = vsel %vm6741_vm10, %v6541_v53, %v6758_v58 }
 0x596   : > { %v6544_v33 = vmax.f32 %v11596_v51, %v6543_v46  ;;  %v6547_v62 = vmax.f32 %v11599_v20, %v6546_v0  ;;  %v6550_v16 = vmax.f32 %v11603_v52, %v6549_v55  ;;  %v5922_v8 = vrot.slane %v5921_v26, 2 }
 0x597   : > { %v5928_v32 = vmax.f32 %v5926_v2, %v5927_v21  ;;  %v5934_v50 = vrot.slane %v5933_v34, 4  ;;  %v5941_v57 = vrot.slane %v5940_v24, 4  ;;  %v5340_v35 = vmax.f32 %v11609_v27, 0.0 }
 0x598   : > { %v6760_v22 = vsel %vm6743_vm11, %v6544_v33, %v6759_v42  ;;  %6826 = vst.msk [vmem:[#allocation3 + $0x39] sm:$0x1] %vm6815_vm7, %v6547_v62  ;;  %v5923_v6 = vmax.f32 %v5921_v26, %v5922_v8  ;;  %v5273_v59 = vadd.f32 %v5205_v38, %v11293_v63  ;;  %v5274_v14 = vadd.f32 %v5208_v40, %v11303_v54  ;;  %v5211_v21 = vpop.f32.mrf.mxu1 }
 0x599   : > { %v6761_v51 = vsel %vm6745_vm12, %v6547_v62, %v6760_v22  ;;  %v5929_v20 = vrot.slane %v5928_v32, 2  ;;  %v5935_v11 = vmax.f32 %v5933_v34, %v5934_v50  ;;  %v5942_v52 = vmax.f32 %v5940_v24, %v5941_v57 }
 0x59a   : > { %v6762_v7 = vsel %vm6747_vm13, %v6550_v16, %v6761_v51  ;;  %v5924_v44 = vrot.slane %v5923_v6, 1  ;;  %v5430_v10 = vrot.slane %v5340_v35, 2  ;;  %v5431_v4 = vrot.slane %v5340_v35, 4 }
 0x59b   : > { %6809 = vst.msk [vmem:[#allocation3 + $0x31] sm:$0xff] %vm2789_vm2, %v6762_v7  ;;  %v5930_v27 = vmax.f32 %v5928_v32, %v5929_v20  ;;  %v5936_v30 = vrot.slane %v5935_v11, 2  ;;  %v5943_v25 = vrot.slane %v5942_v52, 2  ;;  %v5432_v47 = vrot.slane %v5340_v35, 6 }
 0x59c   : > { %v5925_v13 = vmax.f32 %v5923_v6, %v5924_v44  ;;  %v5947_v63 = vsel %vm2862_vm5, %v5340_v35, -inf  ;;  %v5954_v54 = vsel %vm2862_vm5, %v5430_v10, -inf  ;;  %v5961_v38 = vsel %vm2862_vm5, %v5431_v4, -inf }
 0x59d   : > { %v5931_v37 = vrot.slane %v5930_v27, 1  ;;  %v5937_v61 = vmax.f32 %v5935_v11, %v5936_v30  ;;  %v5944_v41 = vmax.f32 %v5942_v52, %v5943_v25  ;;  %v5948_v58 = vrot.slane %v5947_v63, 4 }
 0x59e   : > { %v11662_v17 = vsel %vm2789_vm2, %v5925_v13, -inf  ;;  %v5955_v39 = vrot.slane %v5954_v54, 4  ;;  %v5962_v2 = vrot.slane %v5961_v38, 4  ;;  %v5968_v12 = vsel %vm2862_vm5, %v5432_v47, -inf }
 0x59f   : > { %v5932_v19 = vmax.f32 %v5930_v27, %v5931_v37  ;;  %v5938_v1 = vrot.slane %v5937_v61, 1  ;;  %v5945_v53 = vrot.slane %v5944_v41, 1  ;;  %v5949_v26 = vmax.f32 %v5947_v63, %v5948_v58 }
 0x5a0   : > { %v5956_v34 = vmax.f32 %v5954_v54, %v5955_v39  ;;  %v5963_v24 = vmax.f32 %v5961_v38, %v5962_v2  ;;  %v5969_v46 = vrot.slane %v5968_v12, 4  ;;  %v5309_v0 = vadd.f32 %v11569_v9, %v5273_v59 }
 0x5a1   : > { %v5939_v55 = vmax.f32 %v5937_v61, %v5938_v1  ;;  %v5946_v42 = vmax.f32 %v5944_v41, %v5945_v53  ;;  %v11667_v40 = vsel %vm2789_vm2, %v5932_v19, -inf  ;;  %v5950_v33 = vrot.slane %v5949_v26, 2  ;;  %v5214_v1 = vpop.f32.mrf.mxu1 }
 0x5a2   : > { %v5957_v62 = vrot.slane %v5956_v34, 2  ;;  %v5964_v16 = vrot.slane %v5963_v24, 2  ;;  %v5970_v8 = vmax.f32 %v5968_v12, %v5969_v46  ;;  %v5341_v32 = vmax.f32 %v5309_v0, 0.0  ;;  %v6856_v50 = vld [vmem:[#allocation3 + $0x31] sm:$0xff] }
 0x5a3   : > { %v6846_v57 = vld [vmem:[#allocation3 + $0x30] sm:$0xff]  ;;  %v11670_v22 = vsel %vm2789_vm2, %v5939_v55, -inf  ;;  %v11673_v6 = vsel %vm2789_vm2, %v5946_v42, -inf  ;;  %v5951_v59 = vmax.f32 %v5949_v26, %v5950_v33  ;;  %v5310_v51 = vadd.f32 %v11569_v9, %v5274_v14  ;;  %8480 = vmatmul.msk.f32.gmra.mxu2 %vm2789_vm2, %v6856_v50 }
 0x5a4   : > { %v7499_v35 = vld [vmem:[#allocation3 + $0x32] sm:$0xff]  ;;  %8488 = vmatmul.msk.f32.gmra.mxu3 %vm2789_vm2, %v6846_v57  ;;  %v5958_v20 = vmax.f32 %v5956_v34, %v5957_v62  ;;  %v5965_v11 = vmax.f32 %v5963_v24, %v5964_v16  ;;  %v5971_v52 = vrot.slane %v5970_v8, 2  ;;  %v5433_v7 = vrot.slane %v5341_v32, 2 }
 0x5a5   : > { %8556 = vmatmul.msk.f32.gmra.mxu0 %vm2789_vm2, %v7499_v35  ;;  %v5952_v44 = vrot.slane %v5951_v59, 1  ;;  %v5434_v10 = vrot.slane %v5341_v32, 4  ;;  %v5435_v4 = vrot.slane %v5341_v32, 6  ;;  %v5975_v27 = vsel %vm2862_vm5, %v5341_v32, -inf }
 0x5a6   : > { %v5959_v30 = vrot.slane %v5958_v20, 1  ;;  %v5966_v25 = vrot.slane %v5965_v11, 1  ;;  %v5972_v47 = vmax.f32 %v5970_v8, %v5971_v52  ;;  %v5976_v13 = vrot.slane %v5975_v27, 4 }
 0x5a7   : > { %v5953_v14 = vmax.f32 %v5951_v59, %v5952_v44  ;;  %v5982_v63 = vsel %vm2862_vm5, %v5433_v7, -inf  ;;  %v5989_v54 = vsel %vm2862_vm5, %v5434_v10, -inf  ;;  %v5996_v38 = vsel %vm2862_vm5, %v5435_v4, -inf }
 0x5a8   : > { %v5960_v37 = vmax.f32 %v5958_v20, %v5959_v30  ;;  %v5967_v61 = vmax.f32 %v5965_v11, %v5966_v25  ;;  %v5973_v41 = vrot.slane %v5972_v47, 1  ;;  %v5977_v58 = vmax.f32 %v5975_v27, %v5976_v13 }
 0x5a9   : > { %v11684_v39 = vsel %vm2789_vm2, %v5953_v14, -inf  ;;  %v5983_v2 = vrot.slane %v5982_v63, 4  ;;  %v5990_v12 = vrot.slane %v5989_v54, 4  ;;  %v5997_v19 = vrot.slane %v5996_v38, 4 }
 0x5aa   : > { %v5974_v53 = vmax.f32 %v5972_v47, %v5973_v41  ;;  %v11687_v26 = vsel %vm2789_vm2, %v5960_v37, -inf  ;;  %v11690_v34 = vsel %vm2789_vm2, %v5967_v61, -inf  ;;  %v5978_v24 = vrot.slane %v5977_v58, 2 }
 0x5ab   : > { %v5984_v46 = vmax.f32 %v5982_v63, %v5983_v2  ;;  %v5991_v0 = vmax.f32 %v5989_v54, %v5990_v12  ;;  %v5998_v55 = vmax.f32 %v5996_v38, %v5997_v19  ;;  %v5342_v42 = vmax.f32 %v5310_v51, 0.0 }
 0x5ac   : > { %v11693_v33 = vsel %vm2789_vm2, %v5974_v53, -inf  ;;  %v5979_v62 = vmax.f32 %v5977_v58, %v5978_v24  ;;  %v5275_v16 = vadd.f32 %v5211_v21, %v11314_v36  ;;  %v5276_v8 = vadd.f32 %v5214_v1, %v11325_v18 }
 0x5ad   : > { %v5985_v32 = vrot.slane %v5984_v46, 2  ;;  %v5992_v50 = vrot.slane %v5991_v0, 2  ;;  %v5999_v57 = vrot.slane %v5998_v55, 2  ;;  %v5436_v35 = vrot.slane %v5342_v42, 2 }
 0x5ae   : > { %v5980_v59 = vrot.slane %v5979_v62, 1  ;;  %v5437_v20 = vrot.slane %v5342_v42, 4  ;;  %v5438_v11 = vrot.slane %v5342_v42, 6  ;;  %v6003_v52 = vsel %vm2862_vm5, %v5342_v42, -inf }
 0x5af   : > { %v5986_v7 = vmax.f32 %v5984_v46, %v5985_v32  ;;  %v5993_v44 = vmax.f32 %v5991_v0, %v5992_v50  ;;  %v6000_v51 = vmax.f32 %v5998_v55, %v5999_v57  ;;  %v6004_v10 = vrot.slane %v6003_v52, 4  ;;  %v5217_v0 = vpop.f32.mrf.mxu1 }
 0x5b0   : > { %v5981_v4 = vmax.f32 %v5979_v62, %v5980_v59  ;;  %v6010_v27 = vsel %vm2862_vm5, %v5436_v35, -inf  ;;  %v6017_v36 = vsel %vm2862_vm5, %v5437_v20, -inf  ;;  %v6024_v18 = vsel %vm2862_vm5, %v5438_v11, -inf }
 0x5b1   : > { %v5987_v21 = vrot.slane %v5986_v7, 1  ;;  %v5994_v30 = vrot.slane %v5993_v44, 1  ;;  %v6001_v25 = vrot.slane %v6000_v51, 1  ;;  %v6005_v47 = vmax.f32 %v6003_v52, %v6004_v10 }
 0x5b2   : > { %v6552_v13 = vsel %vm2789_vm2, %v5981_v4, -inf  ;;  %v6011_v14 = vrot.slane %v6010_v27, 4  ;;  %v6018_v63 = vrot.slane %v6017_v36, 4  ;;  %v6025_v54 = vrot.slane %v6024_v18, 4 }
 0x5b3   : > { %v5988_v38 = vmax.f32 %v5986_v7, %v5987_v21  ;;  %v5995_v37 = vmax.f32 %v5993_v44, %v5994_v30  ;;  %v6002_v61 = vmax.f32 %v6000_v51, %v6001_v25  ;;  %v6553_v41 = vmax.f32 %v11662_v17, %v6552_v13 }
 0x5b4   : > { %v6006_v58 = vrot.slane %v6005_v47, 2  ;;  %v6012_v2 = vmax.f32 %v6010_v27, %v6011_v14  ;;  %v6019_v12 = vmax.f32 %v6017_v36, %v6018_v63  ;;  %v6026_v19 = vmax.f32 %v6024_v18, %v6025_v54 }
 0x5b5   : > { %v6555_v1 = vsel %vm2789_vm2, %v5988_v38, -inf  ;;  %v6558_v53 = vsel %vm2789_vm2, %v5995_v37, -inf  ;;  %v6561_v24 = vsel %vm2789_vm2, %v6002_v61, -inf  ;;  %v5311_v46 = vadd.f32 %v11569_v9, %v5275_v16 }
 0x5b6   : > { %v6556_v55 = vmax.f32 %v11667_v40, %v6555_v1  ;;  %v6559_v42 = vmax.f32 %v11670_v22, %v6558_v53  ;;  %v6562_v62 = vmax.f32 %v11673_v6, %v6561_v24  ;;  %v6007_v17 = vmax.f32 %v6005_v47, %v6006_v58 }
 0x5b7   : > { %v6013_v32 = vrot.slane %v6012_v2, 2  ;;  %v6020_v50 = vrot.slane %v6019_v12, 2  ;;  %v6027_v57 = vrot.slane %v6026_v19, 2  ;;  %v5343_v35 = vmax.f32 %v5311_v46, 0.0 }
 0x5b8   : > { %v6763_v59 = vsel %vm6735_vm6, %v6556_v55, %v6553_v41  ;;  %6819 = vst.msk [vmem:[#allocation3 + $0x40] sm:$0x1] %vm6815_vm7, %v6556_v55  ;;  %v6008_v20 = vrot.slane %v6007_v17, 1  ;;  %v5312_v11 = vadd.f32 %v11569_v9, %v5276_v8  ;;  %v5277_v16 = vadd.f32 %v5217_v0, %v11334_v5 }
 0x5b9   : > { %v6764_v40 = vsel %vm6737_vm8, %v6559_v42, %v6763_v59  ;;  %v6014_v52 = vmax.f32 %v6012_v2, %v6013_v32  ;;  %v6021_v22 = vmax.f32 %v6019_v12, %v6020_v50  ;;  %v6028_v7 = vmax.f32 %v6026_v19, %v6027_v57  ;;  %v5220_v12 = vpop.f32.mrf.mxu1 }
 0x5ba   : > { %v6765_v6 = vsel %vm6739_vm9, %v6562_v62, %v6764_v40  ;;  %v6009_v44 = vmax.f32 %v6007_v17, %v6008_v20  ;;  %v5439_v51 = vrot.slane %v5343_v35, 2  ;;  %v5440_v10 = vrot.slane %v5343_v35, 4 }
 0x5bb   : > { %v6015_v4 = vrot.slane %v6014_v52, 1  ;;  %v6022_v27 = vrot.slane %v6021_v22, 1  ;;  %v6029_v36 = vrot.slane %v6028_v7, 1  ;;  %v5441_v18 = vrot.slane %v5343_v35, 6 }
 0x5bc   : > { %v6564_v21 = vsel %vm2789_vm2, %v6009_v44, -inf  ;;  %v6031_v8 = vsel %vm2862_vm5, %v5343_v35, -inf  ;;  %v6038_v5 = vsel %vm2862_vm5, %v5439_v51, -inf  ;;  %v6045_v30 = vsel %vm2862_vm5, %v5440_v10, -inf }
 0x5bd   : > { %v6016_v25 = vmax.f32 %v6014_v52, %v6015_v4  ;;  %v6023_v47 = vmax.f32 %v6021_v22, %v6022_v27  ;;  %v6030_v13 = vmax.f32 %v6028_v7, %v6029_v36  ;;  %v6565_v14 = vmax.f32 %v11684_v39, %v6564_v21 }
 0x5be   : > { %v6032_v63 = vrot.slane %v6031_v8, 4  ;;  %v6039_v54 = vrot.slane %v6038_v5, 4  ;;  %v6046_v38 = vrot.slane %v6045_v30, 4  ;;  %v6052_v37 = vsel %vm2862_vm5, %v5441_v18, -inf }
 0x5bf   : > { %v6567_v61 = vsel %vm2789_vm2, %v6016_v25, -inf  ;;  %v6570_v41 = vsel %vm2789_vm2, %v6023_v47, -inf  ;;  %v6573_v58 = vsel %vm2789_vm2, %v6030_v13, -inf  ;;  %v6766_v2 = vsel %vm6741_vm10, %v6565_v14, %v6765_v6 }
 0x5c0   : > { %v6568_v19 = vmax.f32 %v11687_v26, %v6567_v61  ;;  %v6571_v1 = vmax.f32 %v11690_v34, %v6570_v41  ;;  %v6574_v39 = vmax.f32 %v11693_v33, %v6573_v58  ;;  %v6033_v53 = vmax.f32 %v6031_v8, %v6032_v63 }
 0x5c1   : > { %v6040_v24 = vmax.f32 %v6038_v5, %v6039_v54  ;;  %v6047_v46 = vmax.f32 %v6045_v30, %v6046_v38  ;;  %v6053_v0 = vrot.slane %v6052_v37, 4  ;;  %v5344_v55 = vmax.f32 %v5312_v11, 0.0  ;;  %v5223_v47 = vpop.f32.mrf.mxu1 }
 0x5c2   : > { %v6767_v42 = vsel %vm6743_vm11, %v6568_v19, %v6766_v2  ;;  %6827 = vst.msk [vmem:[#allocation3 + $0x49] sm:$0x1] %vm6815_vm7, %v6571_v1  ;;  %v6034_v62 = vrot.slane %v6033_v53, 2  ;;  %v5313_v17 = vadd.f32 %v11569_v9, %v5277_v16  ;;  %v5278_v32 = vadd.f32 %v5220_v12, %v11346_v43 }
 0x5c3   : > { %v6768_v26 = vsel %vm6745_vm12, %v6571_v1, %v6767_v42  ;;  %v6041_v50 = vrot.slane %v6040_v24, 2  ;;  %v6048_v34 = vrot.slane %v6047_v46, 2  ;;  %v6054_v57 = vmax.f32 %v6052_v37, %v6053_v0 }
 0x5c4   : > { %v6769_v33 = vsel %vm6747_vm13, %v6574_v39, %v6768_v26  ;;  %v6035_v35 = vmax.f32 %v6033_v53, %v6034_v62  ;;  %v5442_v59 = vrot.slane %v5344_v55, 2  ;;  %v5443_v20 = vrot.slane %v5344_v55, 4 }
 0x5c5   : > { %6810 = vst.msk [vmem:[#allocation3 + $0x41] sm:$0xff] %vm2789_vm2, %v6769_v33  ;;  %v6042_v11 = vmax.f32 %v6040_v24, %v6041_v50  ;;  %v6049_v40 = vmax.f32 %v6047_v46, %v6048_v34  ;;  %v6055_v52 = vrot.slane %v6054_v57, 2  ;;  %v5444_v22 = vrot.slane %v5344_v55, 6 }
 0x5c6   : > { %v6036_v7 = vrot.slane %v6035_v35, 1  ;;  %v6059_v16 = vsel %vm2862_vm5, %v5344_v55, -inf  ;;  %v6066_v43 = vsel %vm2862_vm5, %v5442_v59, -inf  ;;  %v6073_v6 = vsel %vm2862_vm5, %v5443_v20, -inf }
 0x5c7   : > { %v6043_v44 = vrot.slane %v6042_v11, 1  ;;  %v6050_v51 = vrot.slane %v6049_v40, 1  ;;  %v6056_v10 = vmax.f32 %v6054_v57, %v6055_v52  ;;  %v6060_v4 = vrot.slane %v6059_v16, 4 }
 0x5c8   : > { %v6037_v27 = vmax.f32 %v6035_v35, %v6036_v7  ;;  %v6067_v36 = vrot.slane %v6066_v43, 4  ;;  %v6074_v18 = vrot.slane %v6073_v6, 4  ;;  %v6080_v21 = vsel %vm2862_vm5, %v5444_v22, -inf }
 0x5c9   : > { %v6044_v8 = vmax.f32 %v6042_v11, %v6043_v44  ;;  %v6051_v5 = vmax.f32 %v6049_v40, %v6050_v51  ;;  %v6057_v30 = vrot.slane %v6056_v10, 1  ;;  %v6061_v25 = vmax.f32 %v6059_v16, %v6060_v4  ;;  %v5226_v4 = vpop.f32.mrf.mxu1 }
 0x5ca   : > { %v11741_v13 = vsel %vm2789_vm2, %v6037_v27, -inf  ;;  %v6068_v14 = vmax.f32 %v6066_v43, %v6067_v36  ;;  %v6075_v63 = vmax.f32 %v6073_v6, %v6074_v18  ;;  %v6081_v54 = vrot.slane %v6080_v21, 4 }
 0x5cb   : > { %v6058_v38 = vmax.f32 %v6056_v10, %v6057_v30  ;;  %v11744_v37 = vsel %vm2789_vm2, %v6044_v8, -inf  ;;  %v11747_v61 = vsel %vm2789_vm2, %v6051_v5, -inf  ;;  %v6062_v41 = vrot.slane %v6061_v25, 2 }
 0x5cc   : > { %v6069_v58 = vrot.slane %v6068_v14, 2  ;;  %v6076_v2 = vrot.slane %v6075_v63, 2  ;;  %v6082_v12 = vmax.f32 %v6080_v21, %v6081_v54  ;;  %v5345_v19 = vmax.f32 %v5313_v17, 0.0  ;;  %v6857_v1 = vld [vmem:[#allocation3 + $0x41] sm:$0xff] }
 0x5cd   : > { %v6847_v39 = vld [vmem:[#allocation3 + $0x40] sm:$0xff]  ;;  %v11750_v24 = vsel %vm2789_vm2, %v6058_v38, -inf  ;;  %v6063_v46 = vmax.f32 %v6061_v25, %v6062_v41  ;;  %v5314_v0 = vadd.f32 %v11569_v9, %v5278_v32  ;;  %8481 = vmatmul.msk.f32.gmra.mxu2 %vm2789_vm2, %v6857_v1  ;;  %v5279_v55 = vadd.f32 %v5223_v47, %v11354_v45 }
 0x5ce   : > { %v7500_v53 = vld [vmem:[#allocation3 + $0x42] sm:$0xff]  ;;  %8489 = vmatmul.msk.f32.gmra.mxu3 %vm2789_vm2, %v6847_v39  ;;  %v6070_v42 = vmax.f32 %v6068_v14, %v6069_v58  ;;  %v6077_v62 = vmax.f32 %v6075_v63, %v6076_v2  ;;  %v6083_v26 = vrot.slane %v6082_v12, 2  ;;  %v5445_v50 = vrot.slane %v5345_v19, 2 }
 0x5cf   : > { %8557 = vmatmul.msk.f32.gmra.mxu0 %vm2789_vm2, %v7500_v53  ;;  %v6064_v17 = vrot.slane %v6063_v46, 1  ;;  %v5446_v34 = vrot.slane %v5345_v19, 4  ;;  %v5447_v57 = vrot.slane %v5345_v19, 6  ;;  %v6087_v33 = vsel %vm2862_vm5, %v5345_v19, -inf }
 0x5d0   : > { %v6071_v35 = vrot.slane %v6070_v42, 1  ;;  %v6078_v59 = vrot.slane %v6077_v62, 1  ;;  %v6084_v32 = vmax.f32 %v6082_v12, %v6083_v26  ;;  %v6088_v20 = vrot.slane %v6087_v33, 4 }
 0x5d1   : > { %v6065_v11 = vmax.f32 %v6063_v46, %v6064_v17  ;;  %v6094_v40 = vsel %vm2862_vm5, %v5445_v50, -inf  ;;  %v6101_v45 = vsel %vm2862_vm5, %v5446_v34, -inf  ;;  %v6108_v52 = vsel %vm2862_vm5, %v5447_v57, -inf }
 0x5d2   : > { %v6072_v22 = vmax.f32 %v6070_v42, %v6071_v35  ;;  %v6079_v7 = vmax.f32 %v6077_v62, %v6078_v59  ;;  %v6085_v16 = vrot.slane %v6084_v32, 1  ;;  %v6089_v43 = vmax.f32 %v6087_v33, %v6088_v20 }
 0x5d3   : > { %v11762_v6 = vsel %vm2789_vm2, %v6065_v11, -inf  ;;  %v6095_v44 = vrot.slane %v6094_v40, 4  ;;  %v6102_v51 = vrot.slane %v6101_v45, 4  ;;  %v6109_v10 = vrot.slane %v6108_v52, 4 }
 0x5d4   : > { %v6086_v27 = vmax.f32 %v6084_v32, %v6085_v16  ;;  %v11765_v36 = vsel %vm2789_vm2, %v6072_v22, -inf  ;;  %v11768_v18 = vsel %vm2789_vm2, %v6079_v7, -inf  ;;  %v6090_v21 = vrot.slane %v6089_v43, 2 }
 0x5d5   : > { %v6096_v8 = vmax.f32 %v6094_v40, %v6095_v44  ;;  %v6103_v5 = vmax.f32 %v6101_v45, %v6102_v51  ;;  %v6110_v30 = vmax.f32 %v6108_v52, %v6109_v10  ;;  %v5346_v25 = vmax.f32 %v5314_v0, 0.0 }
 0x5d6   : > { %v11771_v47 = vsel %vm2789_vm2, %v6086_v27, -inf  ;;  %v6091_v14 = vmax.f32 %v6089_v43, %v6090_v21  ;;  %v5315_v63 = vadd.f32 %v11569_v9, %v5279_v55  ;;  %v11775_v54 = vadd.f32 %v5226_v4, %v11358_v29  ;;  %v5229_v4 = vpop.f32.mrf.mxu1 }
 0x5d7   : > { %v6097_v38 = vrot.slane %v6096_v8, 2  ;;  %v6104_v41 = vrot.slane %v6103_v5, 2  ;;  %v6111_v58 = vrot.slane %v6110_v30, 2  ;;  %v5448_v2 = vrot.slane %v5346_v25, 2 }
 0x5d8   : > { %v6092_v12 = vrot.slane %v6091_v14, 1  ;;  %v5449_v19 = vrot.slane %v5346_v25, 4  ;;  %v5450_v1 = vrot.slane %v5346_v25, 6  ;;  %v6115_v39 = vsel %vm2862_vm5, %v5346_v25, -inf }
 0x5d9   : > { %v6098_v53 = vmax.f32 %v6096_v8, %v6097_v38  ;;  %v6105_v46 = vmax.f32 %v6103_v5, %v6104_v41  ;;  %v6112_v0 = vmax.f32 %v6110_v30, %v6111_v58  ;;  %v6116_v42 = vrot.slane %v6115_v39, 4 }
 0x5da   : > { %v6093_v62 = vmax.f32 %v6091_v14, %v6092_v12  ;;  %v6122_v26 = vsel %vm2862_vm5, %v5448_v2, -inf  ;;  %v6129_v55 = vsel %vm2862_vm5, %v5449_v19, -inf  ;;  %v6136_v29 = vsel %vm2862_vm5, %v5450_v1, -inf }
 0x5db   : > { %v6099_v50 = vrot.slane %v6098_v53, 1  ;;  %v6106_v17 = vrot.slane %v6105_v46, 1  ;;  %v6113_v34 = vrot.slane %v6112_v0, 1  ;;  %v6117_v57 = vmax.f32 %v6115_v39, %v6116_v42 }
 0x5dc   : > { %v6576_v33 = vsel %vm2789_vm2, %v6093_v62, -inf  ;;  %v6123_v35 = vrot.slane %v6122_v26, 4  ;;  %v6130_v59 = vrot.slane %v6129_v55, 4  ;;  %v6137_v32 = vrot.slane %v6136_v29, 4 }
 0x5dd   : > { %v6100_v20 = vmax.f32 %v6098_v53, %v6099_v50  ;;  %v6107_v11 = vmax.f32 %v6105_v46, %v6106_v17  ;;  %v6114_v40 = vmax.f32 %v6112_v0, %v6113_v34  ;;  %v6577_v45 = vmax.f32 %v11741_v13, %v6576_v33 }
 0x5de   : > { %v6118_v52 = vrot.slane %v6117_v57, 2  ;;  %v6124_v22 = vmax.f32 %v6122_v26, %v6123_v35  ;;  %v6131_v7 = vmax.f32 %v6129_v55, %v6130_v59  ;;  %v6138_v16 = vmax.f32 %v6136_v29, %v6137_v32 }
 0x5df   : > { %v6579_v43 = vsel %vm2789_vm2, %v6100_v20, -inf  ;;  %v6582_v44 = vsel %vm2789_vm2, %v6107_v11, -inf  ;;  %v6585_v51 = vsel %vm2789_vm2, %v6114_v40, -inf  ;;  %v5347_v10 = vmax.f32 %v5315_v63, 0.0 }
 0x5e0   : > { %v6580_v27 = vmax.f32 %v11744_v37, %v6579_v43  ;;  %v6583_v21 = vmax.f32 %v11747_v61, %v6582_v44  ;;  %v6586_v8 = vmax.f32 %v11750_v24, %v6585_v51  ;;  %v6119_v5 = vmax.f32 %v6117_v57, %v6118_v52  ;;  %v5232_v52 = vpop.f32.mrf.mxu1 }
 0x5e1   : > { %v6125_v13 = vrot.slane %v6124_v22, 2  ;;  %v6132_v30 = vrot.slane %v6131_v7, 2  ;;  %v6139_v25 = vrot.slane %v6138_v16, 2  ;;  %v5451_v14 = vrot.slane %v5347_v10, 2 }
 0x5e2   : > { %v6770_v38 = vsel %vm6735_vm6, %v6580_v27, %v6577_v45  ;;  %6820 = vst.msk [vmem:[#allocation3 + $0x50] sm:$0x1] %vm6815_vm7, %v6580_v27  ;;  %v6120_v41 = vrot.slane %v6119_v5, 1  ;;  %v5452_v58 = vrot.slane %v5347_v10, 4  ;;  %v5453_v2 = vrot.slane %v5347_v10, 6 }
 0x5e3   : > { %v6771_v63 = vsel %vm6737_vm8, %v6583_v21, %v6770_v38  ;;  %v6126_v12 = vmax.f32 %v6124_v22, %v6125_v13  ;;  %v6133_v37 = vmax.f32 %v6131_v7, %v6132_v30  ;;  %v6140_v19 = vmax.f32 %v6138_v16, %v6139_v25 }
 0x5e4   : > { %v6772_v61 = vsel %vm6739_vm9, %v6586_v8, %v6771_v63  ;;  %v6121_v24 = vmax.f32 %v6119_v5, %v6120_v41  ;;  %v6143_v1 = vsel %vm2862_vm5, %v5347_v10, -inf  ;;  %v6150_v39 = vsel %vm2862_vm5, %v5451_v14, -inf }
 0x5e5   : > { %v6127_v53 = vrot.slane %v6126_v12, 1  ;;  %v6134_v46 = vrot.slane %v6133_v37, 1  ;;  %v6141_v0 = vrot.slane %v6140_v19, 1  ;;  %v6144_v42 = vrot.slane %v6143_v1, 4 }
 0x5e6   : > { %v6588_v62 = vsel %vm2789_vm2, %v6121_v24, -inf  ;;  %v6151_v26 = vrot.slane %v6150_v39, 4  ;;  %v6157_v55 = vsel %vm2862_vm5, %v5452_v58, -inf  ;;  %v6164_v29 = vsel %vm2862_vm5, %v5453_v2, -inf }
 0x5e7   : > { %v6128_v50 = vmax.f32 %v6126_v12, %v6127_v53  ;;  %v6135_v17 = vmax.f32 %v6133_v37, %v6134_v46  ;;  %v6142_v34 = vmax.f32 %v6140_v19, %v6141_v0  ;;  %v6589_v57 = vmax.f32 %v11762_v6, %v6588_v62 }
 0x5e8   : > { %v6145_v33 = vmax.f32 %v6143_v1, %v6144_v42  ;;  %v6152_v35 = vmax.f32 %v6150_v39, %v6151_v26  ;;  %v6158_v59 = vrot.slane %v6157_v55, 4  ;;  %v6165_v32 = vrot.slane %v6164_v29, 4 }
 0x5e9   : > { %v6591_v20 = vsel %vm2789_vm2, %v6128_v50, -inf  ;;  %v6594_v11 = vsel %vm2789_vm2, %v6135_v17, -inf  ;;  %v6597_v40 = vsel %vm2789_vm2, %v6142_v34, -inf  ;;  %v6773_v45 = vsel %vm6741_vm10, %v6589_v57, %v6772_v61  ;;  %v11834_v17 = vpop.f32.mrf.mxu1 }
 0x5ea   : > { %v6592_v22 = vmax.f32 %v11765_v36, %v6591_v20  ;;  %v6595_v7 = vmax.f32 %v11768_v18, %v6594_v11  ;;  %v6598_v16 = vmax.f32 %v11771_v47, %v6597_v40  ;;  %v6146_v6 = vrot.slane %v6145_v33, 2 }
 0x5eb   : > { %v6153_v43 = vrot.slane %v6152_v35, 2  ;;  %v6159_v44 = vmax.f32 %v6157_v55, %v6158_v59  ;;  %v6166_v51 = vmax.f32 %v6164_v29, %v6165_v32  ;;  %v5316_v10 = vadd.f32 %v11569_v9, %v11775_v54  ;;  %v11817_v9 = vld [vmem:[%s12264_s4] ss:$0 sm:$0xff] }
 0x5ec   : > { %v6774_v27 = vsel %vm6743_vm11, %v6592_v22, %v6773_v45  ;;  %6828 = vst.msk [vmem:[#allocation3 + $0x59] sm:$0x1] %vm6815_vm7, %v6595_v7  ;;  %v6147_v21 = vmax.f32 %v6145_v33, %v6146_v6  ;;  %v5281_v8 = vadd.f32 %v5229_v4, %v11362_v48  ;;  %v5282_v36 = vadd.f32 %v5232_v52, %v11438_v60 }
 0x5ed   : > { %v6775_v18 = vsel %vm6745_vm12, %v6595_v7, %v6774_v27  ;;  %v6154_v5 = vmax.f32 %v6152_v35, %v6153_v43  ;;  %v6160_v47 = vrot.slane %v6159_v44, 2  ;;  %v6167_v13 = vrot.slane %v6166_v51, 2 }
 0x5ee   : > { %v6776_v30 = vsel %vm6747_vm13, %v6598_v16, %v6775_v18  ;;  %v6148_v25 = vrot.slane %v6147_v21, 1  ;;  %v5348_v14 = vmax.f32 %v5316_v10, 0.0  ;;  %v5317_v54 = vadd.f32 %v11817_v9, %v5281_v8 }
 0x5ef   : > { %6811 = vst.msk [vmem:[#allocation3 + $0x51] sm:$0xff] %vm2789_vm2, %v6776_v30  ;;  %v6155_v48 = vrot.slane %v6154_v5, 1  ;;  %v6161_v60 = vmax.f32 %v6159_v44, %v6160_v47  ;;  %v6168_v4 = vmax.f32 %v6166_v51, %v6167_v13  ;;  %v11822_v38 = vadd.f32 %v11817_v9, %v5282_v36 }
 0x5f0   : > { %v6149_v41 = vmax.f32 %v6147_v21, %v6148_v25  ;;  %v5454_v58 = vrot.slane %v5348_v14, 2  ;;  %v5455_v2 = vrot.slane %v5348_v14, 4  ;;  %v5456_v63 = vrot.slane %v5348_v14, 6 }
 0x5f1   : > { %v6156_v12 = vmax.f32 %v6154_v5, %v6155_v48  ;;  %v6162_v37 = vrot.slane %v6161_v60, 1  ;;  %v6169_v19 = vrot.slane %v6168_v4, 1  ;;  %v6171_v61 = vsel %vm2862_vm5, %v5348_v14, -inf }
 0x5f2   : > { %v11826_v24 = vsel %vm2789_vm2, %v6149_v41, -inf  ;;  %v6172_v1 = vrot.slane %v6171_v61, 4  ;;  %v6178_v39 = vsel %vm2862_vm5, %v5454_v58, -inf  ;;  %v6185_v53 = vsel %vm2862_vm5, %v5455_v2, -inf }
 0x5f3   : > { %v6163_v46 = vmax.f32 %v6161_v60, %v6162_v37  ;;  %v6170_v0 = vmax.f32 %v6168_v4, %v6169_v19  ;;  %v11831_v42 = vsel %vm2789_vm2, %v6156_v12, -inf  ;;  %v6179_v62 = vrot.slane %v6178_v39, 4 }
 0x5f4   : > { %v6173_v26 = vmax.f32 %v6171_v61, %v6172_v1  ;;  %v6186_v55 = vrot.slane %v6185_v53, 4  ;;  %v6192_v29 = vsel %vm2862_vm5, %v5456_v63, -inf  ;;  %v5349_v50 = vmax.f32 %v5317_v54, 0.0 }
 0x5f5   : > { %v11837_v34 = vsel %vm2789_vm2, %v6163_v46, -inf  ;;  %v11840_v57 = vsel %vm2789_vm2, %v6170_v0, -inf  ;;  %v6180_v33 = vmax.f32 %v6178_v39, %v6179_v62  ;;  %v6193_v35 = vrot.slane %v6192_v29, 4  ;;  %v5238_v39 = vpop.f32.mrf.mxu1 }
 0x5f6   : > { %v6174_v59 = vrot.slane %v6173_v26, 2  ;;  %v6187_v32 = vmax.f32 %v6185_v53, %v6186_v55  ;;  %v5457_v20 = vrot.slane %v5349_v50, 2  ;;  %v5458_v11 = vrot.slane %v5349_v50, 4  ;;  %v6858_v40 = vld [vmem:[#allocation3 + $0x51] sm:$0xff]  ;;  %v8504_v55 = vld [vmem:[%s12265_s5 + $0x38] sm:$0xff] }
 0x5f7   : > { %v6848_v45 = vld [vmem:[#allocation3 + $0x50] sm:$0xff]  ;;  %v6181_v22 = vrot.slane %v6180_v33, 2  ;;  %v6194_v7 = vmax.f32 %v6192_v29, %v6193_v35  ;;  %v5459_v16 = vrot.slane %v5349_v50, 6  ;;  %v6199_v6 = vsel %vm2862_vm5, %v5349_v50, -inf  ;;  %8482 = vmatmul.msk.f32.gmra.mxu2 %vm2789_vm2, %v6858_v40  ;;  %7127 = vmatpush.msra.mxu3 %v8504_v55 }
 0x5f8   : > { %v7501_v52 = vld [vmem:[#allocation3 + $0x52] sm:$0xff]  ;;  %8490 = vmatmul.msk.f32.gmra.mxu3 %vm2789_vm2, %v6848_v45  ;;  %v6175_v43 = vmax.f32 %v6173_v26, %v6174_v59  ;;  %v6188_v44 = vrot.slane %v6187_v32, 2  ;;  %v6200_v51 = vrot.slane %v6199_v6, 4  ;;  %v6206_v10 = vsel %vm2862_vm5, %v5457_v20, -inf }
 0x5f9   : > { %8558 = vmatmul.msk.f32.gmra.mxu0 %vm2789_vm2, %v7501_v52  ;;  %v6182_v27 = vmax.f32 %v6180_v33, %v6181_v22  ;;  %v6195_v21 = vrot.slane %v6194_v7, 2  ;;  %v6207_v8 = vrot.slane %v6206_v10, 4  ;;  %v6213_v36 = vsel %vm2862_vm5, %v5458_v11, -inf  ;;  %v8494_v26 = vld [vmem:[%s12265_s5 + $0x28] sm:$0xff] }
 0x5fa   : > { %v6176_v18 = vrot.slane %v6175_v43, 1  ;;  %v6189_v5 = vmax.f32 %v6187_v32, %v6188_v44  ;;  %v6201_v47 = vmax.f32 %v6199_v6, %v6200_v51  ;;  %v6214_v13 = vrot.slane %v6213_v36, 4  ;;  %7043 = vmatpush.msra.mxu2 %v8494_v26 }
 0x5fb   : > { %v6183_v30 = vrot.slane %v6182_v27, 1  ;;  %v6196_v25 = vmax.f32 %v6194_v7, %v6195_v21  ;;  %v6208_v14 = vmax.f32 %v6206_v10, %v6207_v8  ;;  %v6220_v54 = vsel %vm2862_vm5, %v5459_v16, -inf }
 0x5fc   : > { %v6177_v48 = vmax.f32 %v6175_v43, %v6176_v18  ;;  %v6190_v60 = vrot.slane %v6189_v5, 1  ;;  %v6202_v4 = vrot.slane %v6201_v47, 2  ;;  %v6215_v41 = vmax.f32 %v6213_v36, %v6214_v13 }
 0x5fd   : > { %v6184_v58 = vmax.f32 %v6182_v27, %v6183_v30  ;;  %v6197_v2 = vrot.slane %v6196_v25, 1  ;;  %v6209_v63 = vrot.slane %v6208_v14, 2  ;;  %v6221_v12 = vrot.slane %v6220_v54, 4 }
 0x5fe   : > { %v6191_v37 = vmax.f32 %v6189_v5, %v6190_v60  ;;  %v11850_v19 = vsel %vm2789_vm2, %v6177_v48, -inf  ;;  %v6203_v61 = vmax.f32 %v6201_v47, %v6202_v4  ;;  %v6216_v1 = vrot.slane %v6215_v41, 2 }
 0x5ff   : > { %v6198_v53 = vmax.f32 %v6196_v25, %v6197_v2  ;;  %v11853_v46 = vsel %vm2789_vm2, %v6184_v58, -inf  ;;  %v6210_v0 = vmax.f32 %v6208_v14, %v6209_v63  ;;  %v6222_v62 = vmax.f32 %v6220_v54, %v6221_v12 }
 0x600   : > { %v11862_v29 = vsel %vm2789_vm2, %v6191_v37, -inf  ;;  %v6204_v50 = vrot.slane %v6203_v61, 1  ;;  %v6217_v33 = vmax.f32 %v6215_v41, %v6216_v1  ;;  %v5350_v35 = vmax.f32 %v11822_v38, 0.0  ;;  %v11871_v38 = vpop.f32.mrf.mxu0 }
 0x601   : > { %v11866_v59 = vsel %vm2789_vm2, %v6198_v53, -inf  ;;  %v6211_v32 = vrot.slane %v6210_v0, 1  ;;  %v6223_v20 = vrot.slane %v6222_v62, 2  ;;  %v5283_v11 = vadd.f32 %v11834_v17, %v11448_v23 }
 0x602   : > { %v6205_v40 = vmax.f32 %v6203_v61, %v6204_v50  ;;  %v6218_v45 = vrot.slane %v6217_v33, 1  ;;  %v5460_v52 = vrot.slane %v5350_v35, 2  ;;  %v5461_v22 = vrot.slane %v5350_v35, 4 }
 0x603   : > { %v6212_v7 = vmax.f32 %v6210_v0, %v6211_v32  ;;  %v6224_v16 = vmax.f32 %v6222_v62, %v6223_v20  ;;  %v5462_v6 = vrot.slane %v5350_v35, 6  ;;  %v6227_v43 = vsel %vm2862_vm5, %v5350_v35, -inf }
 0x604   : > { %v6219_v44 = vmax.f32 %v6217_v33, %v6218_v45  ;;  %v6600_v51 = vsel %vm2789_vm2, %v6205_v40, -inf  ;;  %v6228_v10 = vrot.slane %v6227_v43, 4  ;;  %v6234_v27 = vsel %vm2862_vm5, %v5460_v52, -inf }
 0x605   : > { %v6225_v21 = vrot.slane %v6224_v16, 1  ;;  %v6601_v23 = vmax.f32 %v11826_v24, %v6600_v51  ;;  %v6603_v17 = vsel %vm2789_vm2, %v6212_v7, -inf  ;;  %v6235_v8 = vrot.slane %v6234_v27, 4 }
 0x606   : > { %v6604_v36 = vmax.f32 %v11831_v42, %v6603_v17  ;;  %v6606_v18 = vsel %vm2789_vm2, %v6219_v44, -inf  ;;  %v6229_v5 = vmax.f32 %v6227_v43, %v6228_v10  ;;  %v6241_v47 = vsel %vm2862_vm5, %v5461_v22, -inf  ;;  %v5241_v42 = vpop.f32.mrf.mxu1 }
 0x607   : > { %v6226_v13 = vmax.f32 %v6224_v16, %v6225_v21  ;;  %v6607_v30 = vmax.f32 %v11837_v34, %v6606_v18  ;;  %v6236_v25 = vmax.f32 %v6234_v27, %v6235_v8  ;;  %v6242_v14 = vrot.slane %v6241_v47, 4 }
 0x608   : > { %v6777_v54 = vsel %vm6735_vm6, %v6604_v36, %v6601_v23  ;;  %6821 = vst.msk [vmem:[#allocation3 + $0x60] sm:$0x1] %vm6815_vm7, %v6604_v36  ;;  %v6230_v24 = vrot.slane %v6229_v5, 2  ;;  %v6248_v48 = vsel %vm2862_vm5, %v5462_v6, -inf  ;;  %v5319_v60 = vadd.f32 %v11817_v9, %v5283_v11  ;;  %v4971_v11 = vpop.f32.mrf.mxu0 }
 0x609   : > { %v6609_v4 = vsel %vm2789_vm2, %v6226_v13, -inf  ;;  %v6778_v41 = vsel %vm6737_vm8, %v6607_v30, %v6777_v54  ;;  %v6237_v58 = vrot.slane %v6236_v25, 2  ;;  %v6243_v2 = vmax.f32 %v6241_v47, %v6242_v14  ;;  %v4698_v13 = vpop.f32.mrf.mxu3 }
 0x60a   : > { %v6610_v34 = vmax.f32 %v11840_v57, %v6609_v4  ;;  %v6231_v63 = vmax.f32 %v6229_v5, %v6230_v24  ;;  %v6249_v12 = vrot.slane %v6248_v48, 4  ;;  %v5351_v37 = vmax.f32 %v5319_v60, 0.0 }
 0x60b   : > { %v6238_v61 = vmax.f32 %v6236_v25, %v6237_v58  ;;  %v6244_v1 = vrot.slane %v6243_v2, 2  ;;  %v5284_v53 = vadd.f32 %v5238_v39, %v11452_v31  ;;  %v5285_v0 = vadd.f32 %v5241_v42, %v11546_v15  ;;  %v4425_v58 = vpop.f32.mrf.mxu2 }
 0x60c   : > { %v6779_v62 = vsel %vm6739_vm9, %v6610_v34, %v6778_v41  ;;  %v6232_v26 = vrot.slane %v6231_v63, 1  ;;  %v6250_v55 = vmax.f32 %v6248_v48, %v6249_v12  ;;  %v5463_v50 = vrot.slane %v5351_v37, 2 }
 0x60d   : > { %v6239_v33 = vrot.slane %v6238_v61, 1  ;;  %v6245_v35 = vmax.f32 %v6243_v2, %v6244_v1  ;;  %v5464_v32 = vrot.slane %v5351_v37, 4  ;;  %v5465_v20 = vrot.slane %v5351_v37, 6 }
 0x60e   : > { %v6233_v57 = vmax.f32 %v6231_v63, %v6232_v26  ;;  %v6251_v40 = vrot.slane %v6250_v55, 2  ;;  %v6255_v45 = vsel %vm2862_vm5, %v5351_v37, -inf  ;;  %v6262_v52 = vsel %vm2862_vm5, %v5463_v50, -inf }
 0x60f   : > { %v6240_v22 = vmax.f32 %v6238_v61, %v6239_v33  ;;  %v6246_v31 = vrot.slane %v6245_v35, 1  ;;  %v6256_v39 = vrot.slane %v6255_v45, 4  ;;  %v6263_v15 = vrot.slane %v6262_v52, 4 }
 0x610   : > { %v6252_v7 = vmax.f32 %v6250_v55, %v6251_v40  ;;  %v6612_v16 = vsel %vm2789_vm2, %v6233_v57, -inf  ;;  %v6269_v6 = vsel %vm2862_vm5, %v5464_v32, -inf  ;;  %v6276_v43 = vsel %vm2862_vm5, %v5465_v20, -inf  ;;  %v4974_v1 = vpop.f32.mrf.mxu0  ;;  %v5244_v55 = vpop.f32.mrf.mxu1 }
 0x611   : > { %v6247_v44 = vmax.f32 %v6245_v35, %v6246_v31  ;;  %v6613_v51 = vmax.f32 %v11850_v19, %v6612_v16  ;;  %v6615_v10 = vsel %vm2789_vm2, %v6240_v22, -inf  ;;  %v6257_v27 = vmax.f32 %v6255_v45, %v6256_v39 }
 0x612   : > { %v6253_v21 = vrot.slane %v6252_v7, 1  ;;  %v6616_v23 = vmax.f32 %v11853_v46, %v6615_v10  ;;  %v6264_v17 = vmax.f32 %v6262_v52, %v6263_v15  ;;  %v6270_v8 = vrot.slane %v6269_v6, 4 }
 0x613   : > { %v6618_v36 = vsel %vm2789_vm2, %v6247_v44, -inf  ;;  %v6780_v18 = vsel %vm6741_vm10, %v6613_v51, %v6779_v62  ;;  %v6258_v5 = vrot.slane %v6257_v27, 2  ;;  %v6277_v47 = vrot.slane %v6276_v43, 4 }
 0x614   : > { %v6254_v30 = vmax.f32 %v6252_v7, %v6253_v21  ;;  %v6619_v25 = vmax.f32 %v11862_v29, %v6618_v36  ;;  %v6781_v19 = vsel %vm6743_vm11, %v6616_v23, %v6780_v18  ;;  %v6265_v14 = vrot.slane %v6264_v17, 2 }
 0x615   : > { %v6259_v54 = vmax.f32 %v6257_v27, %v6258_v5  ;;  %v6271_v24 = vmax.f32 %v6269_v6, %v6270_v8  ;;  %v6278_v48 = vmax.f32 %v6276_v43, %v6277_v47  ;;  %v5320_v46 = vadd.f32 %v11817_v9, %v5284_v53 }
 0x616   : > { %v6621_v60 = vsel %vm2789_vm2, %v6254_v30, -inf  ;;  %v6782_v42 = vsel %vm6745_vm12, %v6619_v25, %v6781_v19  ;;  %6829 = vst.msk [vmem:[#allocation3 + $0x69] sm:$0x1] %vm6815_vm7, %v6619_v25  ;;  %v6266_v4 = vmax.f32 %v6264_v17, %v6265_v14  ;;  %v5321_v41 = vadd.f32 %v11817_v9, %v5285_v0 }
 0x617   : > { %v4736_v29 = vadd.f32 %v4698_v13, %v11341_v56  ;;  %v6622_v2 = vmax.f32 %v11866_v59, %v6621_v60  ;;  %v6272_v34 = vrot.slane %v6271_v24, 2  ;;  %v6279_v63 = vrot.slane %v6278_v48, 2 }
 0x618   : > { %v11911_v12 = vadd.f32 %v4425_v58, %v11350_v3  ;;  %v5010_v37 = vadd.f32 %v11871_v38, %v11327_v49  ;;  %v11916_v61 = vadd.f32 %v4971_v11, %v11339_v28  ;;  %v5352_v53 = vmax.f32 %v5320_v46, 0.0 }
 0x619   : > { %v6783_v0 = vsel %vm6747_vm13, %v6622_v2, %v6782_v42  ;;  %v6260_v62 = vrot.slane %v6259_v54, 1  ;;  %v6267_v26 = vrot.slane %v6266_v4, 1  ;;  %v6273_v56 = vmax.f32 %v6271_v24, %v6272_v34 }
 0x61a   : > { %6812 = vst.msk [vmem:[#allocation3 + $0x61] sm:$0xff] %vm2789_vm2, %v6783_v0  ;;  %v5466_v59 = vrot.slane %v5352_v53, 2  ;;  %v5467_v50 = vrot.slane %v5352_v53, 4  ;;  %v5468_v3 = vrot.slane %v5352_v53, 6  ;;  %v5353_v33 = vmax.f32 %v5321_v41, 0.0 }
 0x61b   : > { %v11920_v35 = vadd.f32 %v4974_v1, %v4736_v29  ;;  %v6274_v49 = vrot.slane %v6273_v56, 1  ;;  %v6280_v38 = vmax.f32 %v6278_v48, %v6279_v63  ;;  %v6283_v28 = vsel %vm2862_vm5, %v5352_v53, -inf }
 0x61c   : > { %v6284_v32 = vrot.slane %v6283_v28, 4  ;;  %v6290_v20 = vsel %vm2862_vm5, %v5466_v59, -inf  ;;  %v6297_v11 = vsel %vm2862_vm5, %v5467_v50, -inf  ;;  %v11925_v57 = vadd.f32 %v5244_v55, %v5010_v37 }
 0x61d   : > { %v6261_v40 = vmax.f32 %v6259_v54, %v6260_v62  ;;  %v6268_v45 = vmax.f32 %v6266_v4, %v6267_v26  ;;  %v6291_v52 = vrot.slane %v6290_v20, 4  ;;  %v6298_v22 = vrot.slane %v6297_v11, 4 }
 0x61e   : > { %v6285_v31 = vmax.f32 %v6283_v28, %v6284_v32  ;;  %v6304_v39 = vsel %vm2862_vm5, %v5468_v3, -inf  ;;  %v5469_v15 = vrot.slane %v5353_v33, 2  ;;  %v5470_v7 = vrot.slane %v5353_v33, 4 }
 0x61f   : > { %v6275_v16 = vmax.f32 %v6273_v56, %v6274_v49  ;;  %v6281_v6 = vrot.slane %v6280_v38, 1  ;;  %v6292_v43 = vmax.f32 %v6290_v20, %v6291_v52  ;;  %v6299_v44 = vmax.f32 %v6297_v11, %v6298_v22  ;;  %v5247_v56 = vpop.f32.mrf.mxu1  ;;  %v8503_v52 = vld [vmem:[%s12265_s5 + $0x30] sm:$0xff] }
 0x620   : > { %v6286_v51 = vrot.slane %v6285_v31, 2  ;;  %v6305_v10 = vrot.slane %v6304_v39, 4  ;;  %v5471_v27 = vrot.slane %v5353_v33, 6  ;;  %v6311_v21 = vsel %vm2862_vm5, %v5353_v33, -inf  ;;  %7128 = vmatpush.msra.mxu3 %v8503_v52 }
 0x621   : > { %v6293_v23 = vrot.slane %v6292_v43, 2  ;;  %v6300_v17 = vrot.slane %v6299_v44, 2  ;;  %v6312_v8 = vrot.slane %v6311_v21, 4  ;;  %v6318_v36 = vsel %vm2862_vm5, %v5469_v15, -inf  ;;  %v11930_v18 = vld [vmem:[#allocation3 + $0x61] sm:$0xff] }
 0x622   : > { %v11932_v5 = vld [vmem:[#allocation3 + $0x60] sm:$0xff]  ;;  %v6287_v47 = vmax.f32 %v6285_v31, %v6286_v51  ;;  %v6306_v13 = vmax.f32 %v6304_v39, %v6305_v10  ;;  %v6319_v30 = vrot.slane %v6318_v36, 4  ;;  %v6325_v25 = vsel %vm2862_vm5, %v5470_v7, -inf  ;;  %8483 = vmatmul.msk.f32.gmra.mxu2 %vm2789_vm2, %v11930_v18 }
 0x623   : > { %8491 = vmatmul.msk.f32.gmra.mxu3 %vm2789_vm2, %v11932_v5  ;;  %v11939_v19 = vld [vmem:[#allocation3 + $0x62] sm:$0xff]  ;;  %v6294_v14 = vmax.f32 %v6292_v43, %v6293_v23  ;;  %v6301_v54 = vmax.f32 %v6299_v44, %v6300_v17  ;;  %v6313_v24 = vmax.f32 %v6311_v21, %v6312_v8  ;;  %v6326_v48 = vrot.slane %v6325_v25, 4 }
 0x624   : > { %8559 = vmatmul.msk.f32.gmra.mxu0 %vm2789_vm2, %v11939_v19  ;;  %v6288_v46 = vrot.slane %v6287_v47, 1  ;;  %v6307_v60 = vrot.slane %v6306_v13, 2  ;;  %v6320_v42 = vmax.f32 %v6318_v36, %v6319_v30  ;;  %v6332_v4 = vsel %vm2862_vm5, %v5471_v27, -inf }
 0x625   : > { %v6282_v41 = vmax.f32 %v6280_v38, %v6281_v6  ;;  %v6295_v58 = vrot.slane %v6294_v14, 1  ;;  %v6314_v29 = vrot.slane %v6313_v24, 2  ;;  %v6327_v2 = vmax.f32 %v6325_v25, %v6326_v48 }
 0x626   : > { %v6623_v34 = vsel %vm2789_vm2, %v6261_v40, -inf  ;;  %v6302_v63 = vrot.slane %v6301_v54, 1  ;;  %v6321_v37 = vrot.slane %v6320_v42, 2  ;;  %v6333_v1 = vrot.slane %v6332_v4, 4 }
 0x627   : > { %v6626_v53 = vsel %vm2789_vm2, %v6268_v45, -inf  ;;  %v11946_v0 = vmax.f32 %v6306_v13, %v6307_v60  ;;  %v6315_v62 = vmax.f32 %v6313_v24, %v6314_v29  ;;  %v6328_v26 = vrot.slane %v6327_v2, 2  ;;  %v8493_v45 = vld [vmem:[%s12265_s5 + $0x20] sm:$0xff]  ;;  %v5250_v60 = vpop.f32.mrf.mxu1 }
 0x628   : > { %v6629_v55 = vsel %vm2789_vm2, %v6275_v16, -inf  ;;  %v6289_v59 = vmax.f32 %v6287_v47, %v6288_v46  ;;  %v6322_v50 = vmax.f32 %v6320_v42, %v6321_v37  ;;  %v6334_v3 = vmax.f32 %v6332_v4, %v6333_v1  ;;  %7044 = vmatpush.msra.mxu2 %v8493_v45 }
 0x629   : > { %v6632_v33 = vsel %vm2789_vm2, %v6282_v41, -inf  ;;  %v6296_v49 = vmax.f32 %v6294_v14, %v6295_v58  ;;  %v6316_v38 = vrot.slane %v6315_v62, 1  ;;  %v6329_v28 = vmax.f32 %v6327_v2, %v6328_v26 }
 0x62a   : > { %v6303_v32 = vmax.f32 %v6301_v54, %v6302_v63  ;;  %v6323_v20 = vrot.slane %v6322_v50, 1  ;;  %v6335_v11 = vrot.slane %v6334_v3, 2  ;;  %v5322_v40 = vadd.f32 %v11817_v9, %v11925_v57 }
 0x62b   : > { %v6309_v22 = vrot.slane %v11946_v0, 1  ;;  %v6317_v31 = vmax.f32 %v6315_v62, %v6316_v38  ;;  %v6330_v39 = vrot.slane %v6329_v28, 1  ;;  %v5287_v15 = vadd.f32 %v5247_v56, %v11916_v61 }
 0x62c   : > { %v11961_v7 = vsel %vm2789_vm2, %v6289_v59, -inf  ;;  %v6324_v57 = vmax.f32 %v6322_v50, %v6323_v20  ;;  %v6336_v16 = vmax.f32 %v6334_v3, %v6335_v11  ;;  %v5354_v6 = vmax.f32 %v5322_v40, 0.0 }
 0x62d   : > { %v11964_v43 = vsel %vm2789_vm2, %v6296_v49, -inf  ;;  %v6331_v44 = vmax.f32 %v6329_v28, %v6330_v39  ;;  %v6624_v51 = vsel %vm2789_vm2, %v6317_v31, -inf  ;;  %v5323_v10 = vadd.f32 %v11817_v9, %v5287_v15 }
 0x62e   : > { %v6337_v27 = vrot.slane %v6336_v16, 1  ;;  %v6625_v21 = vmax.f32 %v6623_v34, %v6624_v51  ;;  %v6627_v61 = vsel %vm2789_vm2, %v6324_v57, -inf  ;;  %v5472_v23 = vrot.slane %v5354_v6, 2 }
 0x62f   : > { %v6628_v17 = vmax.f32 %v6626_v53, %v6627_v61  ;;  %v6630_v8 = vsel %vm2789_vm2, %v6331_v44, -inf  ;;  %v5473_v36 = vrot.slane %v5354_v6, 4  ;;  %v5474_v47 = vrot.slane %v5354_v6, 6  ;;  %v4701_v61 = vpop.f32.mrf.mxu3 }
 0x630   : > { %v6338_v13 = vmax.f32 %v6336_v16, %v6337_v27  ;;  %v6631_v30 = vmax.f32 %v6629_v55, %v6630_v8  ;;  %v6339_v25 = vsel %vm2862_vm5, %v5354_v6, -inf  ;;  %v6346_v14 = vsel %vm2862_vm5, %v5472_v23, -inf }
 0x631   : > { %v6784_v54 = vsel %vm6735_vm6, %v6628_v17, %v6625_v21  ;;  %6822 = vst.msk [vmem:[#allocation3 + $0x70] sm:$0x1] %vm6815_vm7, %v6628_v17  ;;  %v6340_v24 = vrot.slane %v6339_v25, 4  ;;  %v6347_v48 = vrot.slane %v6346_v14, 4  ;;  %v6353_v46 = vsel %vm2862_vm5, %v5473_v36, -inf }
 0x632   : > { %v6633_v42 = vsel %vm2789_vm2, %v6338_v13, -inf  ;;  %v6785_v4 = vsel %vm6737_vm8, %v6631_v30, %v6784_v54  ;;  %v6354_v41 = vrot.slane %v6353_v46, 4  ;;  %v6360_v58 = vsel %vm2862_vm5, %v5474_v47, -inf }
 0x633   : > { %v6634_v29 = vmax.f32 %v6632_v33, %v6633_v42  ;;  %v6341_v2 = vmax.f32 %v6339_v25, %v6340_v24  ;;  %v6348_v34 = vmax.f32 %v6346_v14, %v6347_v48  ;;  %v6361_v63 = vrot.slane %v6360_v58, 4  ;;  %v4977_v14 = vpop.f32.mrf.mxu0 }
 0x634   : > { %v6641_v37 = vsel %vm2789_vm2, %v6303_v32, -inf  ;;  %v6355_v1 = vmax.f32 %v6353_v46, %v6354_v41  ;;  %v5355_v53 = vmax.f32 %v5323_v10, 0.0  ;;  %v5288_v62 = vadd.f32 %v5250_v60, %v11920_v35 }
 0x635   : > { %v6786_v26 = vsel %vm6739_vm9, %v6634_v29, %v6785_v4  ;;  %v6342_v56 = vrot.slane %v6341_v2, 2  ;;  %v6349_v55 = vrot.slane %v6348_v34, 2  ;;  %v6362_v59 = vmax.f32 %v6360_v58, %v6361_v63 }
 0x636   : > { %v6356_v50 = vrot.slane %v6355_v1, 2  ;;  %v5475_v3 = vrot.slane %v5355_v53, 2  ;;  %v5476_v49 = vrot.slane %v5355_v53, 4  ;;  %v5477_v38 = vrot.slane %v5355_v53, 6 }
 0x637   : > { %v6343_v28 = vmax.f32 %v6341_v2, %v6342_v56  ;;  %v6350_v33 = vmax.f32 %v6348_v34, %v6349_v55  ;;  %v6363_v20 = vrot.slane %v6362_v59, 2  ;;  %v6367_v11 = vsel %vm2862_vm5, %v5355_v53, -inf  ;;  %v5253_v2 = vpop.f32.mrf.mxu1  ;;  %v12727_v34 = vld [vmem:[#allocation62_spill] sm:$0xff] }
 0x638   : > { %v6357_v40 = vmax.f32 %v6355_v1, %v6356_v50  ;;  %v6368_v32 = vrot.slane %v6367_v11, 4  ;;  %v6374_v45 = vsel %vm2862_vm5, %v5475_v3, -inf  ;;  %v6381_v35 = vsel %vm2862_vm5, %v5476_v49, -inf  ;;  %v12729_v56 = vld [vmem:[#allocation58_spill] sm:$0xff] }
 0x639   : > { %v6344_v52 = vrot.slane %v6343_v28, 1  ;;  %v6351_v31 = vrot.slane %v6350_v33, 1  ;;  %v6364_v39 = vmax.f32 %v6362_v59, %v6363_v20  ;;  %v6375_v15 = vrot.slane %v6374_v45, 4  ;;  %v4428_v20 = vpop.f32.mrf.mxu2 }
 0x63a   : > { %v6358_v57 = vrot.slane %v6357_v40, 1  ;;  %v6369_v16 = vmax.f32 %v6367_v11, %v6368_v32  ;;  %v6382_v6 = vrot.slane %v6381_v35, 4  ;;  %v6388_v44 = vsel %vm2862_vm5, %v5477_v38, -inf  ;;  %v4704_v11 = vpop.f32.mrf.mxu3 }
 0x63b   : > { %v6310_v51 = vmax.f32 %v11946_v0, %v6309_v22  ;;  %v6345_v10 = vmax.f32 %v6343_v28, %v6344_v52  ;;  %v6352_v27 = vmax.f32 %v6350_v33, %v6351_v31  ;;  %v6365_v21 = vrot.slane %v6364_v39, 1 }
 0x63c   : > { %v6359_v23 = vmax.f32 %v6357_v40, %v6358_v57  ;;  %v6376_v17 = vmax.f32 %v6374_v45, %v6375_v15  ;;  %v6389_v8 = vrot.slane %v6388_v44, 4  ;;  %v5324_v36 = vadd.f32 %v11817_v9, %v5288_v62 }
 0x63d   : > { %v6366_v47 = vmax.f32 %v6364_v39, %v6365_v21  ;;  %v6636_v13 = vsel %vm2789_vm2, %v6345_v10, -inf  ;;  %v6639_v30 = vsel %vm2789_vm2, %v6352_v27, -inf  ;;  %v6370_v25 = vrot.slane %v6369_v16, 2 }
 0x63e   : > { %v6637_v54 = vmax.f32 %v11961_v7, %v6636_v13  ;;  %v6640_v0 = vmax.f32 %v11964_v43, %v6639_v30  ;;  %v6642_v22 = vsel %vm2789_vm2, %v6359_v23, -inf  ;;  %v6383_v24 = vmax.f32 %v6381_v35, %v6382_v6  ;;  %v12728_v7 = vld [vmem:[#allocation5_spill] sm:$0xff] }
 0x63f   : > { %v4737_v48 = vadd.f32 %v4701_v61, %v11911_v12  ;;  %v6644_v46 = vsel %vm2789_vm2, %v6310_v51, -inf  ;;  %v6643_v60 = vmax.f32 %v6641_v37, %v6642_v22  ;;  %v6645_v42 = vsel %vm2789_vm2, %v6366_v47, -inf }
 0x640   : > { %v6646_v4 = vmax.f32 %v6644_v46, %v6645_v42  ;;  %v6787_v41 = vsel %vm6741_vm10, %v6637_v54, %v6786_v26  ;;  %v6377_v58 = vrot.slane %v6376_v17, 2  ;;  %v6390_v29 = vmax.f32 %v6388_v44, %v6389_v8  ;;  %v4980_v44 = vpop.f32.mrf.mxu0 }
 0x641   : > { %v3910_v63 = vadd.f32 %v12728_v7, %v12727_v34  ;;  %v5013_v43 = vadd.f32 %v4977_v14, %v4737_v48  ;;  %v6788_v1 = vsel %vm6743_vm11, %v6640_v0, %v6787_v41  ;;  %6830 = vst.msk [vmem:[#allocation3 + $0x79] sm:$0x1] %vm6815_vm7, %v6643_v60  ;;  %v5356_v12 = vmax.f32 %v5324_v36, 0.0  ;;  %v8514_v34 = vld [vmem:[%s12265_s5 + $0x48] sm:$0xff]  ;;  %v8524_v7 = vld [vmem:[%s12265_s5 + $0x58] sm:$0xff] }
 0x642   : > { %v6789_v53 = vsel %vm6745_vm12, %v6643_v60, %v6788_v1  ;;  %v6371_v37 = vmax.f32 %v6369_v16, %v6370_v25  ;;  %v6384_v62 = vrot.slane %v6383_v24, 2  ;;  %v6378_v3 = vmax.f32 %v6376_v17, %v6377_v58  ;;  %7211 = vmatpush.msrb.mxu2 %v8514_v34  ;;  %7295 = vmatpush.msrb.mxu3 %v8524_v7  ;;  %v12061_v34 = vld [vmem:[#allocation3 + $0x12] sm:$0xff]  ;;  %v12063_v7 = vld [vmem:[#allocation3 + $0x20] sm:$0xff] }
 0x643   : > { %v4186_v55 = vadd.f32 %v12729_v56, %v3910_v63  ;;  %v6790_v26 = vsel %vm6747_vm13, %v6646_v4, %v6789_v53  ;;  %v5478_v59 = vrot.slane %v5356_v12, 2  ;;  %v5289_v50 = vadd.f32 %v5253_v2, %v5013_v43  ;;  %v5256_v4 = vpop.f32.mrf.mxu1 }
 0x644   : > { %6813 = vst.msk [vmem:[#allocation3 + $0x71] sm:$0xff] %vm2789_vm2, %v6790_v26  ;;  %v6391_v49 = vrot.slane %v6390_v29, 2  ;;  %v5479_v38 = vrot.slane %v5356_v12, 4  ;;  %v5480_v28 = vrot.slane %v5356_v12, 6  ;;  %v6395_v33 = vsel %vm2862_vm5, %v5356_v12, -inf }
 0x645   : > { %v6372_v40 = vrot.slane %v6371_v37, 1  ;;  %v6385_v32 = vmax.f32 %v6383_v24, %v6384_v62  ;;  %v6396_v45 = vrot.slane %v6395_v33, 4  ;;  %v6402_v35 = vsel %vm2862_vm5, %v5478_v59, -inf }
 0x646   : > { %v4462_v52 = vadd.f32 %v4428_v20, %v4186_v55  ;;  %v6409_v31 = vsel %vm2862_vm5, %v5479_v38, -inf  ;;  %v5325_v39 = vadd.f32 %v11817_v9, %v5289_v50  ;;  %v6379_v15 = vrot.slane %v6378_v3, 1 }
 0x647   : > { %v6392_v57 = vmax.f32 %v6390_v29, %v6391_v49  ;;  %v6416_v16 = vsel %vm2862_vm5, %v5480_v28, -inf  ;;  %v6403_v51 = vrot.slane %v6402_v35, 4  ;;  %v6373_v27 = vmax.f32 %v6371_v37, %v6372_v40 }
 0x648   : > { %v4738_v6 = vadd.f32 %v4704_v11, %v4462_v52  ;;  %v5357_v10 = vmax.f32 %v5325_v39, 0.0  ;;  %v6386_v21 = vrot.slane %v6385_v32, 1  ;;  %v6397_v61 = vmax.f32 %v6395_v33, %v6396_v45  ;;  %v6994_v45 = vld [vmem:[#allocation3 + $0x2] sm:$0xff] }
 0x649   : > { %v6410_v23 = vrot.slane %v6409_v31, 4  ;;  %v6417_v17 = vrot.slane %v6416_v16, 4  ;;  %v6380_v14 = vmax.f32 %v6378_v3, %v6379_v15  ;;  %v6393_v54 = vrot.slane %v6392_v57, 1 }
 0x64a   : > { %v5481_v8 = vrot.slane %v5357_v10, 2  ;;  %v5482_v36 = vrot.slane %v5357_v10, 4  ;;  %v5483_v47 = vrot.slane %v5357_v10, 6  ;;  %v5014_v25 = vadd.f32 %v4980_v44, %v4738_v6 }
 0x64b   : > { %v12011_v13 = vld [vmem:[#allocation3 + $0x71] sm:$0xff]  ;;  %v6423_v0 = vsel %vm2862_vm5, %v5357_v10, -inf  ;;  %v6404_v48 = vmax.f32 %v6402_v35, %v6403_v51  ;;  %v12030_v41 = vsel %vm2789_vm2, %v6373_v27, -inf  ;;  %v6398_v58 = vrot.slane %v6397_v61, 2 }
 0x64c   : > { %v12013_v30 = vld [vmem:[#allocation3 + $0x70] sm:$0xff]  ;;  %8484 = vmatmul.msk.f32.gmra.mxu2 %vm2789_vm2, %v12011_v13  ;;  %v6839_v24 = vld [vmem:[#allocation3 + $0x78] sm:$0x3]  ;;  %v6424_v46 = vrot.slane %v6423_v0, 4  ;;  %v6430_v60 = vsel %vm2862_vm5, %v5481_v8, -inf  ;;  %v6437_v42 = vsel %vm2862_vm5, %v5482_v36, -inf  ;;  %v6411_v29 = vmax.f32 %v6409_v31, %v6410_v23 }
 0x64d   : > { %8492 = vmatmul.msk.f32.gmra.mxu3 %vm2789_vm2, %v12013_v30  ;;  %v12020_v22 = vld [vmem:[#allocation3 + $0x72] sm:$0xff]  ;;  %6841 = vst.msk [vmem:[#allocation3 + $0x90] sm:$0xff] %vm2789_vm2, %v12013_v30  ;;  %v6431_v2 = vrot.slane %v6430_v60, 4  ;;  %v6418_v63 = vmax.f32 %v6416_v16, %v6417_v17  ;;  %v6438_v1 = vrot.slane %v6437_v42, 4  ;;  %v6444_v12 = vsel %vm2862_vm5, %v5483_v47, -inf }
 0x64e   : > { %8560 = vmatmul.msk.f32.gmra.mxu0 %vm2789_vm2, %v12020_v22  ;;  %6842 = vst.msk [vmem:[#allocation3 + $0x98] sm:$0x3] %vm2862_vm5, %v6839_v24  ;;  %v6425_v43 = vmax.f32 %v6423_v0, %v6424_v46  ;;  %v6387_v53 = vmax.f32 %v6385_v32, %v6386_v21  ;;  %v6394_v37 = vmax.f32 %v6392_v57, %v6393_v54  ;;  %v6405_v55 = vrot.slane %v6404_v48, 2  ;;  %v7078_v35 = vld [vmem:[#allocation3 + $0x10] sm:$0xff] }
 0x64f   : > { %v6432_v62 = vmax.f32 %v6430_v60, %v6431_v2  ;;  %v5290_v56 = vadd.f32 %v5256_v4, %v5014_v25  ;;  %v6439_v59 = vmax.f32 %v6437_v42, %v6438_v1  ;;  %v6445_v50 = vrot.slane %v6444_v12, 4  ;;  %v8513_v21 = vld [vmem:[%s12265_s5 + $0x40] sm:$0xff] }
 0x650   : > { %v6426_v26 = vrot.slane %v6425_v43, 2  ;;  %v6650_v3 = vsel %vm2789_vm2, %v6380_v14, -inf  ;;  %v12040_v49 = vmax.f32 %v6397_v61, %v6398_v58  ;;  %v6412_v38 = vrot.slane %v6411_v29, 2  ;;  %7212 = vmatpush.msrb.mxu2 %v8513_v21 }
 0x651   : > { %v6433_v28 = vrot.slane %v6432_v62, 2  ;;  %v6419_v33 = vrot.slane %v6418_v63, 2  ;;  %v6440_v11 = vrot.slane %v6439_v59, 2  ;;  %v6446_v40 = vmax.f32 %v6444_v12, %v6445_v50  ;;  %v8523_v50 = vld [vmem:[%s12265_s5 + $0x50] sm:$0xff] }
 0x652   : > { %v6427_v20 = vmax.f32 %v6425_v43, %v6426_v26  ;;  %v6653_v32 = vsel %vm2789_vm2, %v6387_v53, -inf  ;;  %v6656_v52 = vsel %vm2789_vm2, %v6394_v37, -inf  ;;  %v5326_v39 = vadd.f32 %v11817_v9, %v5290_v56  ;;  %7296 = vmatpush.msrb.mxu3 %v8523_v50  ;;  %v7162_v50 = vld [vmem:[#allocation3 + $0x11] sm:$0xff] }
 0x653   : > { %v6434_v31 = vmax.f32 %v6432_v62, %v6433_v28  ;;  %v6406_v15 = vmax.f32 %v6404_v48, %v6405_v55  ;;  %v6441_v16 = vmax.f32 %v6439_v59, %v6440_v11  ;;  %v6447_v6 = vrot.slane %v6446_v40, 2 }
 0x654   : > { %8495 = vmatmul.msk.f32.vlgmr.msra.gmra.mxu2 %vm2789_vm2, %v6994_v45  ;;  %v6428_v57 = vrot.slane %v6427_v20, 1  ;;  %v6400_v44 = vrot.slane %v12040_v49, 1  ;;  %v12048_v51 = vmax.f32 %v6411_v29, %v6412_v38  ;;  %v5358_v27 = vmax.f32 %v5326_v39, 0.0 }
 0x655   : > { %8505 = vmatmul.msk.f32.vlgmr.msra.gmra.mxu3 %vm2789_vm2, %v7078_v35  ;;  %v6435_v10 = vrot.slane %v6434_v31, 1  ;;  %v12053_v61 = vmax.f32 %v6418_v63, %v6419_v33  ;;  %v6442_v23 = vrot.slane %v6441_v16, 1  ;;  %v6448_v17 = vmax.f32 %v6446_v40, %v6447_v6 }
 0x656   : > { %v6429_v9 = vmax.f32 %v6427_v20, %v6428_v57  ;;  %v5484_v36 = vrot.slane %v5358_v27, 2  ;;  %v5485_v47 = vrot.slane %v5358_v27, 4  ;;  %v5486_v25 = vrot.slane %v5358_v27, 6 }
 0x657   : > { %v6436_v8 = vmax.f32 %v6434_v31, %v6435_v10  ;;  %v6443_v14 = vmax.f32 %v6441_v16, %v6442_v23  ;;  %v6449_v54 = vrot.slane %v6448_v17, 1  ;;  %v6451_v24 = vsel %vm2862_vm5, %v5358_v27, -inf  ;;  %v12082_v10 = vld [vmem:[#allocation3 + $0x22] sm:$0xff]  ;;  %v12084_v27 = vld [vmem:[#allocation3 + $0x30] sm:$0xff] }
 0x658   : > { %v6648_v0 = vsel %vm2789_vm2, %v6429_v9, -inf  ;;  %v6452_v60 = vrot.slane %v6451_v24, 4  ;;  %v6458_v42 = vsel %vm2862_vm5, %v5484_v36, -inf  ;;  %v6465_v1 = vsel %vm2862_vm5, %v5485_v47, -inf }
 0x659   : > { %v6649_v48 = vmax.f32 %v12030_v41, %v6648_v0  ;;  %v6651_v46 = vsel %vm2789_vm2, %v6436_v8, -inf  ;;  %v6450_v4 = vmax.f32 %v6448_v17, %v6449_v54  ;;  %v6654_v29 = vsel %vm2789_vm2, %v6443_v14, -inf }
 0x65a   : > { %v6652_v58 = vmax.f32 %v6650_v3, %v6651_v46  ;;  %v6459_v2 = vrot.slane %v6458_v42, 4  ;;  %v6655_v63 = vmax.f32 %v6653_v32, %v6654_v29  ;;  %v6453_v43 = vmax.f32 %v6451_v24, %v6452_v60  ;;  %v6997_v29 = vld [vmem:[#allocation3 + $0x32] sm:$0xff] }
 0x65b   : > { %v6472_v41 = vsel %vm2862_vm5, %v5486_v25, -inf  ;;  %v6657_v12 = vsel %vm2789_vm2, %v6450_v4, -inf  ;;  %v6466_v62 = vrot.slane %v6465_v1, 4  ;;  %v6407_v3 = vrot.slane %v6406_v15, 1 }
 0x65c   : > { %8496 = vmatmul.msk.f32.gmra.mxu2 %vm2789_vm2, %v12061_v34  ;;  %v6791_v53 = vsel %vm6735_vm6, %v6652_v58, %v6649_v48  ;;  %6823 = vst.msk [vmem:[#allocation3 + $0x80] sm:$0x1] %vm6815_vm7, %v6652_v58  ;;  %v6460_v37 = vmax.f32 %v6458_v42, %v6459_v2  ;;  %v6658_v56 = vmax.f32 %v6656_v52, %v6657_v12  ;;  %v6454_v26 = vrot.slane %v6453_v43, 2  ;;  %v12102_v2 = vld [vmem:[#allocation3 + $0x40] sm:$0xff]  ;;  %v8534_v12 = vld [vmem:[%s12265_s5 + $0x68] sm:$0xff] }
 0x65d   : > { %8506 = vmatmul.msk.f32.gmra.mxu3 %vm2789_vm2, %v12063_v7  ;;  %v6792_v55 = vsel %vm6737_vm8, %v6655_v63, %v6791_v53  ;;  %v6473_v59 = vrot.slane %v6472_v41, 4  ;;  %v6467_v28 = vmax.f32 %v6465_v1, %v6466_v62  ;;  %v6414_v40 = vrot.slane %v12048_v51, 1  ;;  %v6998_v1 = vld [vmem:[#allocation3 + $0x42] sm:$0xff]  ;;  %7379 = vmatpush.msra.mxu2 %v8534_v12  ;;  %v8606_v62 = vld [vmem:[#allocation3 + $0x52] sm:$0xff] }
 0x65e   : > { %v6461_v38 = vrot.slane %v6460_v37, 2  ;;  %v6793_v33 = vsel %vm6739_vm9, %v6658_v56, %v6792_v55  ;;  %v6455_v20 = vmax.f32 %v6453_v43, %v6454_v26  ;;  %v6401_v32 = vmax.f32 %v12040_v49, %v6400_v44  ;;  %v8544_v53 = vld [vmem:[%s12265_s5 + $0x78] sm:$0xff]  ;;  %v7505_v56 = vld [vmem:[#allocation3 + $0x92] sm:$0xff]  ;;  %v6905_v26 = vpop.f32.mrf.mxu2 }
 0x65f   : > { %v6474_v11 = vmax.f32 %v6472_v41, %v6473_v59  ;;  %v6468_v35 = vrot.slane %v6467_v28, 2  ;;  %v6421_v52 = vrot.slane %v12053_v61, 1  ;;  %v6408_v57 = vmax.f32 %v6406_v15, %v6407_v3  ;;  %v8605_v41 = vld [vmem:[#allocation3 + $0x50] sm:$0xff]  ;;  %7463 = vmatpush.msra.mxu3 %v8544_v53  ;;  %v6970_v59 = vpop.f32.mrf.mxu3 }
 0x660   : > { %v6462_v45 = vmax.f32 %v6460_v37, %v6461_v38  ;;  %v6456_v31 = vrot.slane %v6455_v20, 1  ;;  %v6415_v49 = vmax.f32 %v12048_v51, %v6414_v40  ;;  %v6659_v17 = vsel %vm2789_vm2, %v6401_v32, -inf  ;;  %v8533_v3 = vld [vmem:[%s12265_s5 + $0x60] sm:$0xff]  ;;  %v8543_v38 = vld [vmem:[%s12265_s5 + $0x70] sm:$0xff] }
 0x661   : > { %v6475_v39 = vrot.slane %v6474_v11, 2  ;;  %v6469_v6 = vmax.f32 %v6467_v28, %v6468_v35  ;;  %v6422_v15 = vmax.f32 %v12053_v61, %v6421_v52  ;;  %v6662_v47 = vsel %vm2789_vm2, %v6408_v57, -inf  ;;  %7380 = vmatpush.msra.mxu2 %v8533_v3  ;;  %7464 = vmatpush.msra.mxu3 %v8543_v38  ;;  %v8607_v52 = vld [vmem:[#allocation3 + $0x51] sm:$0xff] }
 0x662   : > { %v6463_v16 = vrot.slane %v6462_v45, 1  ;;  %v6457_v21 = vmax.f32 %v6455_v20, %v6456_v31  ;;  %v6665_v48 = vsel %vm2789_vm2, %v6415_v49, -inf  ;;  %v7163_v20 = vld [vmem:[#allocation3 + $0x21] sm:$0xff] }
 0x663   : > { %v6476_v9 = vmax.f32 %v6474_v11, %v6475_v39  ;;  %v6470_v23 = vrot.slane %v6469_v6, 1  ;;  %v6668_v61 = vsel %vm2789_vm2, %v6422_v15, -inf  ;;  %v7164_v11 = vld [vmem:[#allocation3 + $0x31] sm:$0xff] }
 0x664   : > { %8497 = vmatmul.msk.f32.gmra.mxu2 %vm2789_vm2, %v12082_v10  ;;  %v6464_v44 = vmax.f32 %v6462_v45, %v6463_v16  ;;  %v6660_v36 = vsel %vm2789_vm2, %v6457_v21, -inf  ;;  %v7165_v45 = vld [vmem:[#allocation3 + $0x41] sm:$0xff] }
 0x665   : > { %8507 = vmatmul.msk.f32.gmra.mxu3 %vm2789_vm2, %v12084_v27  ;;  %v6477_v8 = vrot.slane %v6476_v9, 1  ;;  %v6471_v25 = vmax.f32 %v6469_v6, %v6470_v23  ;;  %v6661_v14 = vmax.f32 %v6659_v17, %v6660_v36 }
 0x666   : > { %v6663_v54 = vsel %vm2789_vm2, %v6464_v44, -inf  ;;  %v6908_v28 = vpop.f32.mrf.mxu2 }
 0x667   : > { %v6478_v0 = vmax.f32 %v6476_v9, %v6477_v8  ;;  %v6664_v24 = vmax.f32 %v6662_v47, %v6663_v54  ;;  %v6666_v51 = vsel %vm2789_vm2, %v6471_v25, -inf  ;;  %v6794_v46 = vsel %vm6741_vm10, %v6661_v14, %v6793_v33  ;;  %v6973_v33 = vpop.f32.mrf.mxu3 }
 0x668   : > { %v6667_v60 = vmax.f32 %v6665_v48, %v6666_v51  ;;  %v6974_v8 = vadd.f32 %v6973_v33, %v6908_v28  ;;  %v7417_v51 = vld [vmem:[#allocation3 + $0x51] sm:$0xff] }
 0x669   : > { %v6669_v42 = vsel %vm2789_vm2, %v6478_v0, -inf  ;;  %v6795_v4 = vsel %vm6743_vm11, %v6664_v24, %v6794_v46 }
 0x66a   : > { %v6670_v58 = vmax.f32 %v6668_v61, %v6669_v42  ;;  %v6796_v63 = vsel %vm6745_vm12, %v6667_v60, %v6795_v4  ;;  %6831 = vst.msk [vmem:[#allocation3 + $0x89] sm:$0x1] %vm6815_vm7, %v6667_v60 }
 0x66c   : > { %8498 = vmatmul.msk.f32.gmra.mxu2 %vm2789_vm2, %v6997_v29  ;;  %v6797_v43 = vsel %vm6747_vm13, %v6670_v58, %v6796_v63 }
 0x66d   : > { %8508 = vmatmul.msk.f32.gmra.mxu3 %vm2789_vm2, %v12102_v2  ;;  %6814 = vst.msk [vmem:[#allocation3 + $0x81] sm:$0xff] %vm2789_vm2, %v6797_v43 }
 0x66f   : > { %v6976_v40 = vpop.f32.mrf.mxu3 }
 0x674   : > { %8499 = vmatmul.msk.f32.gmra.mxu2 %vm2789_vm2, %v6998_v1  ;;  %v7504_v37 = vld [vmem:[#allocation3 + $0x82] sm:$0xff] }
 0x675   : > { %8509 = vmatmul.msk.f32.gmra.mxu3 %vm2789_vm2, %v8605_v41  ;;  %8561 = vmatmul.msk.f32.gmra.mxu0 %vm2789_vm2, %v7504_v37  ;;  %v12128_v55 = vld [vmem:[#allocation3 + $0x80] sm:$0xff] }
 0x676   : > { %v7169_v21 = vld [vmem:[#allocation3 + $0x81] sm:$0xff] }
 0x677   : > { %v6979_v32 = vpop.f32.mrf.mxu3 }
 0x67c   : > { %8500 = vmatmul.msk.f32.gmra.mxu2 %vm2789_vm2, %v8606_v62 }
 0x67d   : > { %8510 = vmatmul.msk.f32.gmra.mxu3 %vm2789_vm2, %v11932_v5  ;;  %8562 = vmatmul.msk.f32.gmra.mxu0 %vm2789_vm2, %v7505_v56 }
 0x67f   : > { %v6982_v39 = vpop.f32.mrf.mxu3 }
 0x684   : > { %8501 = vmatmul.msk.f32.gmra.mxu2 %vm2789_vm2, %v11939_v19 }
 0x685   : > { %8511 = vmatmul.msk.f32.gmra.mxu3 %vm2789_vm2, %v12013_v30 }
 0x687   : > { %v6985_v16 = vpop.f32.mrf.mxu3 }
 0x68c   : > { %8502 = vmatmul.msk.f32.gmra.mxu2 %vm2789_vm2, %v12020_v22 }
 0x68d   : > { %8512 = vmatmul.msk.f32.gmra.mxu3 %vm2789_vm2, %v12128_v55 }
 0x694   : > { %8515 = vmatmul.msk.f32.vlgmr.msrb.gmra.mxu2 %vm2789_vm2, %v7162_v50 }
 0x695   : > { %8525 = vmatmul.msk.f32.vlgmr.msrb.gmra.mxu3 %vm2789_vm2, %v12061_v34  ;;  %v6911_v34 = vpop.f32.mrf.mxu2 }
 0x69c   : > { %8516 = vmatmul.msk.f32.gmra.mxu2 %vm2789_vm2, %v7163_v20 }
 0x69d   : > { %8526 = vmatmul.msk.f32.gmra.mxu3 %vm2789_vm2, %v12082_v10  ;;  %v6914_v35 = vpop.f32.mrf.mxu2 }
 0x69e   : > { %v6980_v46 = vadd.f32 %v6979_v32, %v6914_v35 }
 0x6a4   : > { %8517 = vmatmul.msk.f32.gmra.mxu2 %vm2789_vm2, %v7164_v11 }
 0x6a5   : > { %8527 = vmatmul.msk.f32.gmra.mxu3 %vm2789_vm2, %v6997_v29  ;;  %v6917_v31 = vpop.f32.mrf.mxu2 }
 0x6a6   : > { %v6988_v10 = vpop.f32.mrf.mxu3  ;;  %v6983_v58 = vadd.f32 %v6982_v39, %v6917_v31 }
 0x6ac   : > { %8518 = vmatmul.msk.f32.gmra.mxu2 %vm2789_vm2, %v7165_v45 }
 0x6ad   : > { %8528 = vmatmul.msk.f32.gmra.mxu3 %vm2789_vm2, %v6998_v1  ;;  %v6920_v57 = vpop.f32.mrf.mxu2 }
 0x6ae   : > { %v6986_v1 = vadd.f32 %v6985_v16, %v6920_v57 }
 0x6b4   : > { %8519 = vmatmul.msk.f32.gmra.mxu2 %vm2789_vm2, %v8607_v52 }
 0x6b5   : > { %8529 = vmatmul.msk.f32.gmra.mxu3 %vm2789_vm2, %v8606_v62  ;;  %v6923_v6 = vpop.f32.mrf.mxu2 }
 0x6bc   : > { %8520 = vmatmul.msk.f32.gmra.mxu2 %vm2789_vm2, %v11930_v18 }
 0x6bd   : > { %8530 = vmatmul.msk.f32.gmra.mxu3 %vm2789_vm2, %v11939_v19  ;;  %v6971_v19 = vadd.f32 %v6970_v59, %v6905_v26  ;;  %v7421_v59 = vld [vmem:[#allocation3 + $0x91] sm:$0xff] }
 0x6c4   : > { %8521 = vmatmul.msk.f32.gmra.mxu2 %vm2789_vm2, %v12011_v13 }
 0x6c5   : > { %8531 = vmatmul.msk.f32.gmra.mxu3 %vm2789_vm2, %v12020_v22 }
 0x6cc   : > { %8522 = vmatmul.msk.f32.gmra.mxu2 %vm2789_vm2, %v7169_v21 }
 0x6cd   : > { %8532 = vmatmul.msk.f32.gmra.mxu3 %vm2789_vm2, %v7504_v37 }
 0x6cf   : > { %v6926_v9 = vpop.f32.mrf.mxu2 }
 0x6d0   : > { %v6991_v49 = vpop.f32.mrf.mxu3 }
 0x6d1   : > { %v6992_v44 = vadd.f32 %v6991_v49, %v6926_v9 }
 0x6d4   : > { %8535 = vmatmul.msk.f32.vlgmr.msra.gmra.mxu2 %vm2789_vm2, %v12063_v7  ;;  %v6977_v7 = vadd.f32 %v6976_v40, %v6911_v34 }
 0x6d5   : > { %8545 = vmatmul.msk.f32.vlgmr.msra.gmra.mxu3 %vm2789_vm2, %v7163_v20 }
 0x6d7   : > { %v7046_v23 = vpop.f32.mrf.mxu2 }
 0x6d8   : > { %v7130_v15 = vpop.f32.mrf.mxu3  ;;  %v7070_v17 = vadd.f32 %v7046_v23, %v6971_v19  ;;  %v7550_v19 = vpop.f32.mrf.mxu0 }
 0x6da   : > { %v12165_v22 = vadd.f32 %v7130_v15, %v7070_v17  ;;  %v12215_v17 = vld [vmem:[%s12266_s6] ss:$0 sm:$0xff] }
 0x6dc   : > { %8536 = vmatmul.msk.f32.gmra.mxu2 %vm2789_vm2, %v12084_v27  ;;  %v7333_v27 = vld [vmem:[#allocation3 + $0x50] sm:$0xff] }
 0x6dd   : > { %8546 = vmatmul.msk.f32.gmra.mxu3 %vm2789_vm2, %v7164_v11 }
 0x6df   : > { %v7049_v36 = vpop.f32.mrf.mxu2 }
 0x6e0   : > { %v7133_v47 = vpop.f32.mrf.mxu3  ;;  %v7071_v25 = vadd.f32 %v7049_v36, %v6974_v8 }
 0x6e2   : > { %v12170_v14 = vadd.f32 %v7133_v47, %v7071_v25 }
 0x6e4   : > { %8537 = vmatmul.msk.f32.gmra.mxu2 %vm2789_vm2, %v12102_v2 }
 0x6e5   : > { %8547 = vmatmul.msk.f32.gmra.mxu3 %vm2789_vm2, %v7165_v45 }
 0x6e7   : > { %v7052_v54 = vpop.f32.mrf.mxu2 }
 0x6e8   : > { %v7136_v0 = vpop.f32.mrf.mxu3  ;;  %v7072_v24 = vadd.f32 %v7052_v54, %v6977_v7  ;;  %v7553_v54 = vpop.f32.mrf.mxu0 }
 0x6ea   : > { %v12175_v48 = vadd.f32 %v7136_v0, %v7072_v24 }
 0x6ec   : > { %8538 = vmatmul.msk.f32.gmra.mxu2 %vm2789_vm2, %v7333_v27 }
 0x6ed   : > { %8548 = vmatmul.msk.f32.gmra.mxu3 %vm2789_vm2, %v7417_v51 }
 0x6ef   : > { %v7055_v61 = vpop.f32.mrf.mxu2 }
 0x6f0   : > { %v7139_v60 = vpop.f32.mrf.mxu3  ;;  %v7073_v42 = vadd.f32 %v7055_v61, %v6980_v46 }
 0x6f2   : > { %v12179_v4 = vadd.f32 %v7139_v60, %v7073_v42 }
 0x6f4   : > { %8539 = vmatmul.msk.f32.gmra.mxu2 %vm2789_vm2, %v11932_v5 }
 0x6f5   : > { %8549 = vmatmul.msk.f32.gmra.mxu3 %vm2789_vm2, %v11930_v18  ;;  %v6989_v18 = vadd.f32 %v6988_v10, %v6923_v6 }
 0x6f7   : > { %v7058_v29 = vpop.f32.mrf.mxu2 }
 0x6f8   : > { %v7142_v2 = vpop.f32.mrf.mxu3  ;;  %v7074_v63 = vadd.f32 %v7058_v29, %v6983_v58  ;;  %v7556_v29 = vpop.f32.mrf.mxu0 }
 0x6fa   : > { %v12185_v43 = vadd.f32 %v7142_v2, %v7074_v63 }
 0x6fc   : > { %8540 = vmatmul.msk.f32.gmra.mxu2 %vm2789_vm2, %v12013_v30  ;;  %v7337_v30 = vld [vmem:[#allocation3 + $0x90] sm:$0xff] }
 0x6fd   : > { %8550 = vmatmul.msk.f32.gmra.mxu3 %vm2789_vm2, %v12011_v13 }
 0x6ff   : > { %v7061_v41 = vpop.f32.mrf.mxu2 }
 0x700   : > { %v7145_v12 = vpop.f32.mrf.mxu3  ;;  %v7075_v53 = vadd.f32 %v7061_v41, %v6986_v1 }
 0x702   : > { %v12191_v5 = vadd.f32 %v7145_v12, %v7075_v53 }
 0x704   : > { %8541 = vmatmul.msk.f32.gmra.mxu2 %vm2789_vm2, %v12128_v55 }
 0x705   : > { %8551 = vmatmul.msk.f32.gmra.mxu3 %vm2789_vm2, %v7169_v21 }
 0x707   : > { %v7064_v37 = vpop.f32.mrf.mxu2 }
 0x708   : > { %v7148_v62 = vpop.f32.mrf.mxu3  ;;  %v7076_v56 = vadd.f32 %v7064_v37, %v6989_v18 }
 0x70a   : > { %v12196_v26 = vadd.f32 %v7148_v62, %v7076_v56  ;;  %v7559_v62 = vpop.f32.mrf.mxu0 }
 0x70c   : > { %8542 = vmatmul.msk.f32.gmra.mxu2 %vm2789_vm2, %v7337_v30 }
 0x70d   : > { %8552 = vmatmul.msk.f32.gmra.mxu3 %vm2789_vm2, %v7421_v59 }
 0x70f   : > { %v7067_v13 = vpop.f32.mrf.mxu2 }
 0x710   : > { %v7151_v50 = vpop.f32.mrf.mxu3  ;;  %v7077_v3 = vadd.f32 %v7067_v13, %v6992_v44 }
 0x712   : > { %v12200_v38 = vadd.f32 %v7151_v50, %v7077_v3 }
 0x717   : > { %v7214_v55 = vpop.f32.mrf.mxu2 }
 0x718   : > { %v7298_v28 = vpop.f32.mrf.mxu3  ;;  %v7238_v10 = vadd.f32 %v7214_v55, %v12165_v22 }
 0x71a   : > { %v7322_v21 = vadd.f32 %v7298_v28, %v7238_v10 }
 0x71f   : > { %v7217_v33 = vpop.f32.mrf.mxu2 }
 0x720   : > { %v7301_v20 = vpop.f32.mrf.mxu3  ;;  %v7239_v23 = vadd.f32 %v7217_v33, %v12170_v14  ;;  %v7562_v33 = vpop.f32.mrf.mxu0 }
 0x722   : > { %v7323_v36 = vadd.f32 %v7301_v20, %v7239_v23 }
 0x727   : > { %v7220_v11 = vpop.f32.mrf.mxu2 }
 0x728   : > { %v7304_v34 = vpop.f32.mrf.mxu3  ;;  %v7240_v0 = vadd.f32 %v7220_v11, %v12175_v48 }
 0x72a   : > { %v7324_v51 = vadd.f32 %v7304_v34, %v7240_v0 }
 0x72f   : > { %v7223_v40 = vpop.f32.mrf.mxu2 }
 0x730   : > { %v7307_v45 = vpop.f32.mrf.mxu3  ;;  %v7241_v2 = vadd.f32 %v7223_v40, %v12179_v4 }
 0x732   : > { %v7325_v48 = vadd.f32 %v7307_v45, %v7241_v2 }
 0x737   : > { %v7226_v35 = vpop.f32.mrf.mxu2 }
 0x738   : > { %v7310_v32 = vpop.f32.mrf.mxu3  ;;  %v7242_v56 = vadd.f32 %v7226_v35, %v12185_v43 }
 0x73a   : > { %v7326_v4 = vadd.f32 %v7310_v32, %v7242_v56 }
 0x73f   : > { %v7229_v52 = vpop.f32.mrf.mxu2 }
 0x740   : > { %v7313_v31 = vpop.f32.mrf.mxu3  ;;  %v7243_v20 = vadd.f32 %v7229_v52, %v12191_v5 }
 0x742   : > { %v7327_v43 = vadd.f32 %v7313_v31, %v7243_v20 }
 0x747   : > { %v12202_v39 = vpop.f32.mrf.mxu2 }
 0x748   : > { %v12204_v57 = vpop.f32.mrf.mxu3 }
 0x74f   : > { %v12206_v16 = vpop.f32.mrf.mxu2 }
 0x750   : > { %v12208_v6 = vpop.f32.mrf.mxu3 }
 0x757   : > { %v7382_v9 = vpop.f32.mrf.mxu2 }
 0x758   : > { %v7466_v49 = vpop.f32.mrf.mxu3  ;;  %v7406_v44 = vadd.f32 %v7382_v9, %v7322_v21  ;;  %v7565_v21 = vpop.f32.mrf.mxu0  ;;  %v7244_v9 = vadd.f32 %v12202_v39, %v12196_v26 }
 0x75a   : > { %v7490_v15 = vadd.f32 %v7466_v49, %v7406_v44  ;;  %v7328_v52 = vadd.f32 %v12204_v57, %v7244_v9 }
 0x75c   : > { %v7574_v8 = vadd.f32 %v7550_v19, %v7490_v15 }
 0x75e   : > { %v7586_v47 = vadd.f32 %v12215_v17, %v7574_v8 }
 0x75f   : > { %v7385_v22 = vpop.f32.mrf.mxu2 }
 0x760   : > { %v7469_v25 = vpop.f32.mrf.mxu3  ;;  %v7594_v14 = vmax.f32 %v7586_v47, 0.0  ;;  %v7407_v7 = vadd.f32 %v7385_v22, %v7323_v36  ;;  %v7568_v8 = vpop.f32.mrf.mxu0  ;;  %v7245_v36 = vadd.f32 %v12206_v16, %v12200_v38 }
 0x762   : > { %7603 = vst.msk [vmem:[%s12222_s30] sm:$0xff] %vm7602_vm14, %v7594_v14  ;;  %v7491_v24 = vadd.f32 %v7469_v25, %v7407_v7  ;;  %v7329_v47 = vadd.f32 %v12208_v6, %v7245_v36 }
 0x764   : > { %v7575_v27 = vadd.f32 %v7553_v54, %v7491_v24 }
 0x766   : > { %v7587_v46 = vadd.f32 %v12215_v17, %v7575_v27 }
 0x767   : > { %v7388_v61 = vpop.f32.mrf.mxu2 }
 0x768   : > { %v7472_v60 = vpop.f32.mrf.mxu3  ;;  %v7595_v42 = vmax.f32 %v7587_v46, 0.0  ;;  %v7408_v58 = vadd.f32 %v7388_v61, %v7324_v51  ;;  %v7571_v0 = vpop.f32.mrf.mxu0 }
 0x76a   : > { %7604 = vst.msk [vmem:[%s12222_s30 + $0x8] sm:$0xff] %vm7602_vm14, %v7595_v42  ;;  %v7492_v63 = vadd.f32 %v7472_v60, %v7408_v58 }
 0x76c   : > { %v7576_v1 = vadd.f32 %v7556_v29, %v7492_v63 }
 0x76e   : > { %v7588_v41 = vadd.f32 %v12215_v17, %v7576_v1 }
 0x76f   : > { %v7391_v12 = vpop.f32.mrf.mxu2 }
 0x770   : > { %v7475_v53 = vpop.f32.mrf.mxu3  ;;  %v7596_v18 = vmax.f32 %v7588_v41, 0.0  ;;  %v7409_v37 = vadd.f32 %v7391_v12, %v7325_v48 }
 0x772   : > { %7605 = vst.msk [vmem:[%s12222_s30 + $0x10] sm:$0xff] %vm7602_vm14, %v7596_v18  ;;  %v7493_v30 = vadd.f32 %v7475_v53, %v7409_v37 }
 0x774   : > { %v7577_v59 = vadd.f32 %v7559_v62, %v7493_v30 }
 0x776   : > { %v7589_v13 = vadd.f32 %v12215_v17, %v7577_v59 }
 0x777   : > { %v7394_v50 = vpop.f32.mrf.mxu2 }
 0x778   : > { %v7478_v3 = vpop.f32.mrf.mxu3  ;;  %v7597_v55 = vmax.f32 %v7589_v13, 0.0  ;;  %v7410_v28 = vadd.f32 %v7394_v50, %v7326_v4 }
 0x77a   : > { %7606 = vst.msk [vmem:[%s12222_s30 + $0x18] sm:$0xff] %vm7602_vm14, %v7597_v55  ;;  %v7494_v11 = vadd.f32 %v7478_v3, %v7410_v28 }
 0x77c   : > { %v7578_v34 = vadd.f32 %v7562_v33, %v7494_v11 }
 0x77e   : > { %v7590_v40 = vadd.f32 %v12215_v17, %v7578_v34 }
 0x77f   : > { %v7397_v45 = vpop.f32.mrf.mxu2 }
 0x780   : > { %v7481_v35 = vpop.f32.mrf.mxu3  ;;  %v7598_v32 = vmax.f32 %v7590_v40, 0.0  ;;  %v7411_v10 = vadd.f32 %v7397_v45, %v7327_v43 }
 0x782   : > { %7607 = vst.msk [vmem:[%s12222_s30 + $0x20] sm:$0xff] %vm7602_vm14, %v7598_v32  ;;  %v7495_v49 = vadd.f32 %v7481_v35, %v7411_v10 }
 0x784   : > { %v7579_v5 = vadd.f32 %v7565_v21, %v7495_v49 }
 0x786   : > { %v7591_v44 = vadd.f32 %v12215_v17, %v7579_v5 }
 0x787   : > { %v7400_v31 = vpop.f32.mrf.mxu2 }
 0x788   : > { %v7484_v19 = vpop.f32.mrf.mxu3  ;;  %v7599_v23 = vmax.f32 %v7591_v44, 0.0  ;;  %v7412_v15 = vadd.f32 %v7400_v31, %v7328_v52 }
 0x78a   : > { %7608 = vst.msk [vmem:[%s12222_s30 + $0x28] sm:$0xff] %vm7602_vm14, %v7599_v23  ;;  %v7496_v26 = vadd.f32 %v7484_v19, %v7412_v15 }
 0x78c   : > { %v7580_v39 = vadd.f32 %v7568_v8, %v7496_v26 }
 0x78e   : > { %v7592_v57 = vadd.f32 %v12215_v17, %v7580_v39 }
 0x78f   : > { %v7403_v22 = vpop.f32.mrf.mxu2 }
 0x790   : > { %v7600_v25 = vmax.f32 %v7592_v57, 0.0  ;;  %v7413_v14 = vadd.f32 %v7403_v22, %v7329_v47  ;;  %v7487_v7 = vpop.f32.mrf.mxu3 }
 0x792   : > { %7609 = vst.msk [vmem:[%s12222_s30 + $0x30] sm:$0xff] %vm7602_vm14, %v7600_v25  ;;  %v7497_v54 = vadd.f32 %v7487_v7, %v7413_v14 }
 0x794   : > { %v7581_v24 = vadd.f32 %v7571_v0, %v7497_v54 }
 0x796   : > { %v7593_v38 = vadd.f32 %v12215_v17, %v7581_v24 }
 0x798   : > { %v7601_v16 = vmax.f32 %v7593_v38, 0.0 }
 0x79a   : > { %7610 = vst.msk [vmem:[%s12222_s30 + $0x38] sm:$0xff] %vm7602_vm14, %v7601_v16 }
 0x79b PF: > { %s17_s24 = sadd.s32 1, %s8614_s24  }
 0x79c   : > { %p14_p4 = scmp.ge.s32.totalorder %s17_s24, 4  }
 0x79e   :  { %16 = sbr.rel (!%p14_p4) target bundleno = 1 (0x1), region = 112 }

</bundles_post_ra>
